<compile_context>
chip_gen: v7x
topology: tpu7x:2x2x1
jax: 0.10.0
libtpu: 0.0.40
codegen_flags: <defaults>
</compile_context>

<pallas_src>
import functools

import jax
import jax.numpy as jnp
from jax.experimental import pallas as pl
from jax.experimental.pallas import tpu as pltpu


# ------------------------------ canvas helpers (XLA side) --------------------

def _round_up(v, m):
    return (v + m - 1) // m * m


def _canvas_len(H, W):
    # padded (H+2)x(W+2) image + slack for halo rolls, lane-aligned to 128
    return _round_up((H + 4) * (W + 2), 128)


def _to_canvas(img, Ws, N):
    """(B, C, h, w) -> (B, C, N): element (y, x) at lane (y+1)*Ws + (x+1), rest zero."""
    B, C, h, w = img.shape
    x = jnp.pad(img, ((0, 0), (0, 0), (1, 0), (1, Ws - 1 - w)))
    x = x.reshape(B, C, (h + 1) * Ws)
    return jnp.pad(x, ((0, 0), (0, 0), (0, N - (h + 1) * Ws)))


def _canvas_to_padded(canv, H, W):
    """(B, C, N) canonical canvas -> (B, C, H+2, W+2) zero-padded image."""
    B, C, _ = canv.shape
    Ws = W + 2
    return canv[:, :, :(H + 2) * Ws].reshape(B, C, H + 2, Ws)


def _build_mask(H, W):
    """(1, N) f32 mask: 1 at valid lanes (r+1)*Ws + (c+1), 0 elsewhere."""
    Ws, N = W + 2, _canvas_len(H, W)
    m = jnp.zeros((H + 2, Ws), jnp.float32).at[1:H + 1, 1:W + 1].set(1.0)
    return jnp.pad(m.reshape(1, (H + 2) * Ws), ((0, 0), (0, N - (H + 2) * Ws)))


def _build_conv1_slab(x):
    """7x7/s2/p3 stem conv: 49-tap im2col slab (built once, in XLA, on the input)."""
    B, C, H, W = x.shape
    Ho, Wo = H // 2, W // 2
    Ws, N = Wo + 2, _canvas_len(Ho, Wo)
    xp = jnp.pad(x, ((0, 0), (0, 0), (3, 3), (3, 3)))
    taps = []
    for i in range(7):
        for j in range(7):
            t = xp[:, :, i:i + 2 * Ho:2, j:j + 2 * Wo:2]        # (B, C, Ho, Wo)
            taps.append(_to_canvas(t, Ws, N))
    return jnp.concatenate(taps, axis=1).astype(jnp.bfloat16), Ho, Wo, N


def _build_pool_phases(canv, H, W):
    """2x2 phase split of the padded stem output for the fused 3x3/s2 maxpool."""
    Ho, Wo = H // 2, W // 2
    Ws, N = Wo + 2, _canvas_len(Ho, Wo)
    yp = _canvas_to_padded(canv, H, W)
    phs = []
    for a in range(2):
        for b in range(2):
            p = yp[:, :, a:a + 2 * (Ho + 1):2, b:b + 2 * (Wo + 1):2]
            phs.append(_to_canvas(p, Ws, N))
    return jnp.stack(phs, axis=1), Ho, Wo, N                    # (B, 4, C, N)


def _build_s2_slabs(canv, H, W):
    """Stage entry: 3x3/s2/p1 conv slab (K = 9*Cin) + 1x1/s2 downsample slab."""
    Ho, Wo = H // 2, W // 2
    Ws, N = Wo + 2, _canvas_len(Ho, Wo)
    xp = _canvas_to_padded(canv, H, W)
    taps = []
    for i in range(3):
        for j in range(3):
            t = xp[:, :, i:i + 2 * Ho:2, j:j + 2 * Wo:2]
            taps.append(_to_canvas(t, Ws, N))
    return jnp.concatenate(taps, axis=1), taps[4], Ho, Wo, N    # slab, ds(=tap(1,1))


# ------------------------------ Pallas kernels -------------------------------
# pltpu.roll follows jnp.roll semantics (out[i] = x[i - shift]); to read the
# canvas at lane offset +st we roll by shift = (-st) % N.  All shifts are
# static; rolls run on the XLU alongside the MXU matmuls.

def _shift(x, st, N):
    return pltpu.roll(x, (-st) % N, 1) if st else x


def _conv3x3_s1(xv, w, b, mask, Ws, N, relu, residual=None):
    """3x3/s1/p1 conv + folded-BN bias (+residual) (+ReLU) on a masked canvas.

    Builds a (9*Cin, N) K-concatenated slab from 8 static lane-rolls and does
    a single bf16 MXU matmul with f32 accumulation.
    """
    taps = []
    for i in range(3):
        for j in range(3):
            taps.append(_shift(xv, (i - 1) * Ws + (j - 1), N))
    slab = jnp.concatenate(taps, axis=0).astype(jnp.bfloat16)
    y = jnp.dot(w, slab, preferred_element_type=jnp.float32) + b
    if residual is not None:
        y = y + residual
    if relu:
        y = jnp.maximum(y, 0.0)
    return y * mask          # re-zero border/tail lanes (they act as zero padding)


def _conv1_kernel(slab_ref, w_ref, b_ref, m_ref, o_ref):
    # stem 7x7/s2 conv (pre-built slab) + folded BN + ReLU, lane-dense output
    y = jnp.dot(w_ref[...], slab_ref[0], preferred_element_type=jnp.float32)
    y = jnp.maximum(y + b_ref[...], 0.0) * m_ref[...]
    o_ref[0] = y.astype(o_ref.dtype)


def _pool_layer1_kernel(ph_ref, w_ref, b_ref, m_ref, o_ref, *, H, W, N):
    # fused: 3x3/s2 maxpool + the whole layer1 (2 BasicBlocks, stride 1)
    Ws = W + 2
    mask = m_ref[...]
    phs = [ph_ref[0, k].astype(jnp.float32) for k in range(4)]
    cur = None
    for i in range(3):
        for j in range(3):
            t = _shift(phs[(i % 2) * 2 + (j % 2)], (i // 2) * Ws + (j // 2), N)
            cur = t if cur is None else jnp.maximum(cur, t)
    x = cur * mask                                   # post-ReLU input: 0-pad == -inf-pad
    for blk in range(2):
        y = _conv3x3_s1(x, w_ref[2 * blk], b_ref[2 * blk], mask, Ws, N, relu=True)
        x = _conv3x3_s1(y, w_ref[2 * blk + 1], b_ref[2 * blk + 1], mask, Ws, N,
                        relu=True, residual=x)
    o_ref[0] = x.astype(o_ref.dtype)


def _stage_kernel(*refs, H, W, N, with_head, temp, inv_area):
    # fused stage: block1 (3x3/s2 conv via pre-built slab + 1x1/s2 downsample)
    # + block2, all activations kept in-kernel; optionally the avgpool+distance head.
    if with_head:
        (slab_ref, ds_ref, w1_ref, b1_ref, wd_ref, bd_ref,
         wi_ref, bi_ref, m_ref, cen_ref, c2_ref, thr_ref, o_ref) = refs
    else:
        (slab_ref, ds_ref, w1_ref, b1_ref, wd_ref, bd_ref,
         wi_ref, bi_ref, m_ref, o_ref) = refs
    Ws = W + 2
    mask = m_ref[...]

    # block 1
    y1 = jnp.dot(w1_ref[...], slab_ref[0], preferred_element_type=jnp.float32) + b1_ref[...]
    y1 = jnp.maximum(y1, 0.0) * mask
    idn = (jnp.dot(wd_ref[...], ds_ref[0], preferred_element_type=jnp.float32)
           + bd_ref[...]) * mask
    x = _conv3x3_s1(y1, wi_ref[0], bi_ref[0], mask, Ws, N, relu=True, residual=idn)
    # block 2
    y2 = _conv3x3_s1(x, wi_ref[1], bi_ref[1], mask, Ws, N, relu=True)
    x = _conv3x3_s1(y2, wi_ref[2], bi_ref[2], mask, Ws, N, relu=True, residual=x)

    if with_head:
        # global avg-pool + squared-distance-to-centers + threshold/temperature
        f_col = jnp.sum(x, axis=1, keepdims=True) * inv_area                 # (C, 1)
        f2 = jnp.sum(f_col * f_col, axis=0, keepdims=True)                   # (1, 1)
        px = jnp.dot(cen_ref[...], x, preferred_element_type=jnp.float32)    # (cls, N)
        fc = jnp.sum(px, axis=1, keepdims=True) * inv_area                   # (cls, 1)
        dist = f2 - 2.0 * fc + c2_ref[...]
        o_ref[0] = -(dist - thr_ref[...]) * temp
    else:
        o_ref[0] = x.astype(o_ref.dtype)


# --------------------------------- call wrappers ------------------------------

_PAR = pltpu.CompilerParams(dimension_semantics=("parallel",))


def _call_conv1(slab, w, b, mask, N):
    B, Cout = slab.shape[0], w.shape[0]
    return pl.pallas_call(
        _conv1_kernel,
        out_shape=jax.ShapeDtypeStruct((B, Cout, N), jnp.bfloat16),
        grid=(B,),
        in_specs=[
            pl.BlockSpec((1,) + slab.shape[1:], lambda i: (i, 0, 0)),
            pl.BlockSpec(w.shape, lambda i: (0, 0)),
            pl.BlockSpec(b.shape, lambda i: (0, 0)),
            pl.BlockSpec(mask.shape, lambda i: (0, 0)),
        ],
        out_specs=pl.BlockSpec((1, Cout, N), lambda i: (i, 0, 0)),
        compiler_params=_PAR,
    )(slab, w, b, mask)


def _call_pool_layer1(phases, wts, bias, mask, H, W, N):
    B, C = phases.shape[0], wts.shape[1]
    kern = functools.partial(_pool_layer1_kernel, H=H, W=W, N=N)
    return pl.pallas_call(
        kern,
        out_shape=jax.ShapeDtypeStruct((B, C, N), jnp.bfloat16),
        grid=(B,),
        in_specs=[
            pl.BlockSpec((1,) + phases.shape[1:], lambda i: (i, 0, 0, 0)),
            pl.BlockSpec(wts.shape, lambda i: (0, 0, 0)),
            pl.BlockSpec(bias.shape, lambda i: (0, 0, 0)),
            pl.BlockSpec(mask.shape, lambda i: (0, 0)),
        ],
        out_specs=pl.BlockSpec((1, C, N), lambda i: (i, 0, 0)),
        compiler_params=_PAR,
    )(phases, wts, bias, mask)


def _call_stage(slab, ds, sp, mask, H, W, N, head=None, temp=1.0):
    B = slab.shape[0]
    C = sp['w_s2'].shape[0]
    with_head = head is not None
    kern = functools.partial(_stage_kernel, H=H, W=W, N=N, with_head=with_head,
                             temp=float(temp), inv_area=1.0 / float(H * W))
    args = [slab, ds, sp['w_s2'], sp['b_s2'], sp['w_ds'], sp['b_ds'],
            sp['w_in'], sp['b_in'], mask]
    in_specs = [
        pl.BlockSpec((1,) + slab.shape[1:], lambda i: (i, 0, 0)),
        pl.BlockSpec((1,) + ds.shape[1:], lambda i: (i, 0, 0)),
        pl.BlockSpec(sp['w_s2'].shape, lambda i: (0, 0)),
        pl.BlockSpec(sp['b_s2'].shape, lambda i: (0, 0)),
        pl.BlockSpec(sp['w_ds'].shape, lambda i: (0, 0)),
        pl.BlockSpec(sp['b_ds'].shape, lambda i: (0, 0)),
        pl.BlockSpec(sp['w_in'].shape, lambda i: (0, 0, 0)),
        pl.BlockSpec(sp['b_in'].shape, lambda i: (0, 0, 0)),
        pl.BlockSpec(mask.shape, lambda i: (0, 0)),
    ]
    if with_head:
        cen, c2, thr = head
        args += [cen, c2, thr]
        in_specs += [pl.BlockSpec(cen.shape, lambda i: (0, 0)),
                     pl.BlockSpec(c2.shape, lambda i: (0, 0)),
                     pl.BlockSpec(thr.shape, lambda i: (0, 0))]
        cls = cen.shape[0]
        out_shape = jax.ShapeDtypeStruct((B, cls, 1), jnp.float32)
        out_spec = pl.BlockSpec((1, cls, 1), lambda i: (i, 0, 0))
    else:
        out_shape = jax.ShapeDtypeStruct((B, C, N), jnp.bfloat16)
        out_spec = pl.BlockSpec((1, C, N), lambda i: (i, 0, 0))
    return pl.pallas_call(
        kern, out_shape=out_shape, grid=(B,),
        in_specs=in_specs, out_specs=out_spec,
        compiler_params=_PAR,
    )(*args)


# ---------------------------- params (pre-folded) -----------------------------

def _fold_conv_bn(key, cout, cin, kh, kw, eps=1e-5):
    """Random conv weight + eval-mode BN folded into a (Cout, kh*kw*Cin) bf16
    matrix (tap-major, channel-minor) and a (Cout, 1) f32 bias."""
    kw_, kg, kb, km, kv = jax.random.split(key, 5)
    w = jax.random.normal(kw_, (cout, cin, kh, kw), jnp.float32) / jnp.sqrt(float(cin * kh * kw))
    gamma = jax.random.uniform(kg, (cout,), jnp.float32, 0.5, 1.5)
    beta = 0.1 * jax.random.normal(kb, (cout,), jnp.float32)
    mean = 0.1 * jax.random.normal(km, (cout,), jnp.float32)
    var = jax.random.uniform(kv, (cout,), jnp.float32, 0.5, 1.5)
    scale = gamma / jnp.sqrt(var + eps)
    wf = w * scale[:, None, None, None]
    bias = (beta - mean * scale).reshape(cout, 1)
    w2d = jnp.transpose(wf, (0, 2, 3, 1)).reshape(cout, kh * kw * cin).astype(jnp.bfloat16)
    return w2d, bias


def init_params(key, in_ch=3, widths=(8, 16, 32, 64), classnum=16):
    keys = iter(jax.random.split(key, 40))
    p = {'conv1': _fold_conv_bn(next(keys), widths[0], in_ch, 7, 7)}
    # layer1: 2 BasicBlocks, stride 1, width widths[0]
    l1w, l1b = [], []
    for _ in range(4):
        w2d, b = _fold_conv_bn(next(keys), widths[0], widths[0], 3, 3)
        l1w.append(w2d); l1b.append(b)
    p['layer1_w'] = jnp.stack(l1w)
    p['layer1_b'] = jnp.stack(l1b)
    # layers 2-4: stride-2 entry block (+1x1 downsample) + one stride-1 block
    stages, cin = [], widths[0]
    for c in widths[1:]:
        s = {}
        s['w_s2'], s['b_s2'] = _fold_conv_bn(next(keys), c, cin, 3, 3)
        s['w_ds'], s['b_ds'] = _fold_conv_bn(next(keys), c, cin, 1, 1)
        wi, bi = [], []
        for _ in range(3):
            w2d, b = _fold_conv_bn(next(keys), c, c, 3, 3)
            wi.append(w2d); bi.append(b)
        s['w_in'] = jnp.stack(wi)
        s['b_in'] = jnp.stack(bi)
        stages.append(s)
        cin = c
    p['stages'] = stages
    # nn.Parameter(torch.rand(classnum, fc.in_features)); |c|^2 precomputed.
    centers = jax.random.uniform(next(keys), (classnum, widths[-1]), jnp.float32)
    p['centers'] = centers
    p['c2'] = jnp.sum(centers * centers, axis=1, keepdims=True)
    # thres_type == 'multi': ones per class
    p['thres'] = jnp.ones((classnum, 1), jnp.float32)
    return p


# ---------------------------------- forward -----------------------------------

def custom_resnet_forward(x, params, logit_temperature):
    x = x.astype(jnp.float32)                              # NCHW input
    # --- stem: 7x7/s2 conv + folded BN + ReLU (1 call) ---
    slab1, H, W, N = _build_conv1_slab(x)
    w1, b1 = params['conv1']
    xc = _call_conv1(slab1, w1, b1, _build_mask(H, W), N)
    # --- 3x3/s2 maxpool + layer1, fused (1 call) ---
    phases, H, W, N = _build_pool_phases(xc, H, W)
    xc = _call_pool_layer1(phases, params['layer1_w'], params['layer1_b'],
                           _build_mask(H, W), H, W, N)
    # --- layer2 / layer3 / layer4(+head): one fused kernel per stage ---
    n_stage = len(params['stages'])
    for si, sp in enumerate(params['stages']):
        slab, ds, Ho, Wo, No = _build_s2_slabs(xc, H, W)
        mask = _build_mask(Ho, Wo)
        if si == n_stage - 1:
            head = (params['centers'], params['c2'], params['thres'])
            logits = _call_stage(slab, ds, sp, mask, Ho, Wo, No,
                                 head=head, temp=logit_temperature)
            return logits[:, :, 0]
        xc = _call_stage(slab, ds, sp, mask, Ho, Wo, No)
        H, W = Ho, Wo


# ------------------------------------ main -------------------------------------

if __name__ == "__main__":
    key = jax.random.PRNGKey(0)
    kx, kp = jax.random.split(key)
    # batch=2, 3 input channels, 64x64 spatial (Tiny-ImageNet-ish), NCHW
    x = jax.random.normal(kx, (2, 3, 64, 64), jnp.float32)
    params = init_params(kp, classnum=16)

    fwd = jax.jit(functools.partial(custom_resnet_forward, logit_temperature=0.5))
    logits = jax.block_until_ready(fwd(x, params))

    assert logits.shape == (2, 16) and logits.dtype == jnp.float32
    assert bool(jnp.all(jnp.isfinite(logits)))
    print("KERNEL_OK")
</pallas_src>

<mosaic_0001>
module attributes {stable_mosaic.version = 11 : i64} {
  func.func @_conv1_kernel(%arg0: i32, %arg1: memref<1x147x1280xbf16, #tpu.memory_space<vmem>>, %arg2: memref<8x147xbf16, #tpu.memory_space<vmem>>, %arg3: memref<8x1xf32, #tpu.memory_space<vmem>>, %arg4: memref<1x1280xf32, #tpu.memory_space<vmem>>, %arg5: memref<1x8x1280xbf16, #tpu.memory_space<vmem>>) attributes {dimension_semantics = [#tpu.dimension_semantics<parallel>], iteration_bounds = array<i64: 2>, scalar_prefetch = 0 : i64, scratch_operands = 0 : i64, tpu.core_type = #tpu.core_type<tc>, window_params = [{transform_indices = @transform_0, window_bounds = array<i64: 1, 147, 1280>}, {pipeline_mode = #tpu.pipeline_mode<synchronous>, transform_indices = @transform_1, window_bounds = array<i64: 8, 147>}, {pipeline_mode = #tpu.pipeline_mode<synchronous>, transform_indices = @transform_2, window_bounds = array<i64: 8, 1>}, {pipeline_mode = #tpu.pipeline_mode<synchronous>, transform_indices = @transform_3, window_bounds = array<i64: 1, 1280>}, {transform_indices = @transform_4, window_bounds = array<i64: 1, 8, 1280>}]} {
    %c0 = arith.constant 0 : index
    %c0_0 = arith.constant 0 : index
    %0 = vector.load %arg2[%c0, %c0_0] : memref<8x147xbf16, #tpu.memory_space<vmem>>, vector<8x147xbf16>
    %c0_1 = arith.constant 0 : index
    %c0_2 = arith.constant 0 : index
    %c0_3 = arith.constant 0 : index
    %1 = vector.load %arg1[%c0_1, %c0_2, %c0_3] : memref<1x147x1280xbf16, #tpu.memory_space<vmem>>, vector<1x147x1280xbf16>
    %2 = vector.shape_cast %1 : vector<1x147x1280xbf16> to vector<147x1280xbf16>
    %cst = arith.constant dense<0.000000e+00> : vector<8x1280xf32>
    %3 = tpu.matmul %0, %2, %cst {dimension_numbers = #tpu.dot_dimension_numbers<[1], [0], [0], [1], [0, 0, 1, 1], [], []>} : vector<8x147xbf16>, vector<147x1280xbf16>, vector<8x1280xf32> -> vector<8x1280xf32>
    %c0_4 = arith.constant 0 : index
    %c0_5 = arith.constant 0 : index
    %4 = vector.load %arg3[%c0_4, %c0_5] : memref<8x1xf32, #tpu.memory_space<vmem>>, vector<8x1xf32>
    %5 = vector.broadcast %4 : vector<8x1xf32> to vector<8x1280xf32>
    %6 = arith.addf %3, %5 : vector<8x1280xf32>
    %cst_6 = arith.constant 0.000000e+00 : f32
    %7 = vector.broadcast %cst_6 : f32 to vector<8x1280xf32>
    %8 = arith.maximumf %6, %7 : vector<8x1280xf32>
    %c0_7 = arith.constant 0 : index
    %c0_8 = arith.constant 0 : index
    %9 = vector.load %arg4[%c0_7, %c0_8] : memref<1x1280xf32, #tpu.memory_space<vmem>>, vector<1x1280xf32>
    %10 = vector.broadcast %9 : vector<1x1280xf32> to vector<8x1280xf32>
    %11 = arith.mulf %8, %10 : vector<8x1280xf32>
    %12 = arith.truncf %11 : vector<8x1280xf32> to vector<8x1280xbf16>
    %c0_9 = arith.constant 0 : index
    %c0_10 = arith.constant 0 : index
    %c0_11 = arith.constant 0 : index
    %13 = vector.load %arg5[%c0_9, %c0_10, %c0_11] : memref<1x8x1280xbf16, #tpu.memory_space<vmem>>, vector<1x8x1280xbf16>
    %14 = vector.shape_cast %13 : vector<1x8x1280xbf16> to vector<8x1280xbf16>
    %15 = vector.shape_cast %12 : vector<8x1280xbf16> to vector<1x8x1280xbf16>
    tpu.vector_store %arg5[%c0_9, %c0_10, %c0_11], %15 {strides = array<i32>} : memref<1x8x1280xbf16, #tpu.memory_space<vmem>>, vector<1x8x1280xbf16>,
    return
  }
  func.func @transform_0(%arg0: i32) -> (i32, i32, i32) {
    %c0_i32 = arith.constant 0 : i32
    %c0_i32_0 = arith.constant 0 : i32
    %c0_i32_1 = arith.constant 0 : i32
    return %arg0, %c0_i32, %c0_i32_0 : i32, i32, i32
  }
  func.func @transform_1(%arg0: i32) -> (i32, i32) {
    %c0_i32 = arith.constant 0 : i32
    %c0_i32_0 = arith.constant 0 : i32
    %c0_i32_1 = arith.constant 0 : i32
    return %c0_i32, %c0_i32_0 : i32, i32
  }
  func.func @transform_2(%arg0: i32) -> (i32, i32) {
    %c0_i32 = arith.constant 0 : i32
    %c0_i32_0 = arith.constant 0 : i32
    %c0_i32_1 = arith.constant 0 : i32
    return %c0_i32, %c0_i32_0 : i32, i32
  }
  func.func @transform_3(%arg0: i32) -> (i32, i32) {
    %c0_i32 = arith.constant 0 : i32
    %c0_i32_0 = arith.constant 0 : i32
    %c0_i32_1 = arith.constant 0 : i32
    return %c0_i32, %c0_i32_0 : i32, i32
  }
  func.func @transform_4(%arg0: i32) -> (i32, i32, i32) {
    %c0_i32 = arith.constant 0 : i32
    %c0_i32_0 = arith.constant 0 : i32
    %c0_i32_1 = arith.constant 0 : i32
    return %arg0, %c0_i32, %c0_i32_0 : i32, i32, i32
  }
}

module attributes {stable_mosaic.version = 11 : i64} {
  func.func @_pool_layer1_kernel(%arg0: i32, %arg1: memref<1x4x8x384xbf16, #tpu.memory_space<vmem>>, %arg2: memref<4x8x72xbf16, #tpu.memory_space<vmem>>, %arg3: memref<4x8x1xf32, #tpu.memory_space<vmem>>, %arg4: memref<1x384xf32, #tpu.memory_space<vmem>>, %arg5: memref<1x8x384xbf16, #tpu.memory_space<vmem>>) attributes {dimension_semantics = [#tpu.dimension_semantics<parallel>], iteration_bounds = array<i64: 2>, scalar_prefetch = 0 : i64, scratch_operands = 0 : i64, tpu.core_type = #tpu.core_type<tc>, window_params = [{transform_indices = @transform_0, window_bounds = array<i64: 1, 4, 8, 384>}, {pipeline_mode = #tpu.pipeline_mode<synchronous>, transform_indices = @transform_1, window_bounds = array<i64: 4, 8, 72>}, {pipeline_mode = #tpu.pipeline_mode<synchronous>, transform_indices = @transform_2, window_bounds = array<i64: 4, 8, 1>}, {pipeline_mode = #tpu.pipeline_mode<synchronous>, transform_indices = @transform_3, window_bounds = array<i64: 1, 384>}, {transform_indices = @transform_4, window_bounds = array<i64: 1, 8, 384>}]} {
    %c0 = arith.constant 0 : index
    %c0_0 = arith.constant 0 : index
    %0 = vector.load %arg4[%c0, %c0_0] : memref<1x384xf32, #tpu.memory_space<vmem>>, vector<1x384xf32>
    %c0_1 = arith.constant 0 : index
    %c0_2 = arith.constant 0 : index
    %c0_3 = arith.constant 0 : index
    %c0_4 = arith.constant 0 : index
    %1 = vector.load %arg1[%c0_1, %c0_2, %c0_3, %c0_4] : memref<1x4x8x384xbf16, #tpu.memory_space<vmem>>, vector<1x1x8x384xbf16>
    %2 = vector.shape_cast %1 : vector<1x1x8x384xbf16> to vector<8x384xbf16>
    %3 = arith.extf %2 : vector<8x384xbf16> to vector<8x384xf32>
    %c0_5 = arith.constant 0 : index
    %c1 = arith.constant 1 : index
    %c0_6 = arith.constant 0 : index
    %c0_7 = arith.constant 0 : index
    %4 = vector.load %arg1[%c0_5, %c1, %c0_6, %c0_7] : memref<1x4x8x384xbf16, #tpu.memory_space<vmem>>, vector<1x1x8x384xbf16>
    %5 = vector.shape_cast %4 : vector<1x1x8x384xbf16> to vector<8x384xbf16>
    %6 = arith.extf %5 : vector<8x384xbf16> to vector<8x384xf32>
    %c0_8 = arith.constant 0 : index
    %c2 = arith.constant 2 : index
    %c0_9 = arith.constant 0 : index
    %c0_10 = arith.constant 0 : index
    %7 = vector.load %arg1[%c0_8, %c2, %c0_9, %c0_10] : memref<1x4x8x384xbf16, #tpu.memory_space<vmem>>, vector<1x1x8x384xbf16>
    %8 = vector.shape_cast %7 : vector<1x1x8x384xbf16> to vector<8x384xbf16>
    %9 = arith.extf %8 : vector<8x384xbf16> to vector<8x384xf32>
    %c0_11 = arith.constant 0 : index
    %c3 = arith.constant 3 : index
    %c0_12 = arith.constant 0 : index
    %c0_13 = arith.constant 0 : index
    %10 = vector.load %arg1[%c0_11, %c3, %c0_12, %c0_13] : memref<1x4x8x384xbf16, #tpu.memory_space<vmem>>, vector<1x1x8x384xbf16>
    %11 = vector.shape_cast %10 : vector<1x1x8x384xbf16> to vector<8x384xbf16>
    %12 = arith.extf %11 : vector<8x384xbf16> to vector<8x384xf32>
    %13 = arith.maximumf %3, %6 : vector<8x384xf32>
    %c383_i32 = arith.constant 383 : i32
    %14 = tpu.dynamic_rotate %3 by %c383_i32 dim 1 : vector<8x384xf32>, i32 -> vector<8x384xf32>
    %15 = arith.maximumf %13, %14 : vector<8x384xf32>
    %16 = arith.maximumf %15, %9 : vector<8x384xf32>
    %17 = arith.maximumf %16, %12 : vector<8x384xf32>
    %c383_i32_14 = arith.constant 383 : i32
    %18 = tpu.dynamic_rotate %9 by %c383_i32_14 dim 1 : vector<8x384xf32>, i32 -> vector<8x384xf32>
    %19 = arith.maximumf %17, %18 : vector<8x384xf32>
    %c366_i32 = arith.constant 366 : i32
    %20 = tpu.dynamic_rotate %3 by %c366_i32 dim 1 : vector<8x384xf32>, i32 -> vector<8x384xf32>
    %21 = arith.maximumf %19, %20 : vector<8x384xf32>
    %c366_i32_15 = arith.constant 366 : i32
    %22 = tpu.dynamic_rotate %6 by %c366_i32_15 dim 1 : vector<8x384xf32>, i32 -> vector<8x384xf32>
    %23 = arith.maximumf %21, %22 : vector<8x384xf32>
    %c365_i32 = arith.constant 365 : i32
    %24 = tpu.dynamic_rotate %3 by %c365_i32 dim 1 : vector<8x384xf32>, i32 -> vector<8x384xf32>
    %25 = arith.maximumf %23, %24 : vector<8x384xf32>
    %26 = vector.broadcast %0 : vector<1x384xf32> to vector<8x384xf32>
    %27 = arith.mulf %25, %26 : vector<8x384xf32>
    %c0_16 = arith.constant 0 : index
    %c0_17 = arith.constant 0 : index
    %c0_18 = arith.constant 0 : index
    %28 = vector.load %arg2[%c0_16, %c0_17, %c0_18] : memref<4x8x72xbf16, #tpu.memory_space<vmem>>, vector<1x8x72xbf16>
    %29 = vector.shape_cast %28 : vector<1x8x72xbf16> to vector<8x72xbf16>
    %c0_19 = arith.constant 0 : index
    %c0_20 = arith.constant 0 : index
    %c0_21 = arith.constant 0 : index
    %30 = vector.load %arg3[%c0_19, %c0_20, %c0_21] : memref<4x8x1xf32, #tpu.memory_space<vmem>>, vector<1x8x1xf32>
    %31 = vector.shape_cast %30 : vector<1x8x1xf32> to vector<8x1xf32>
    %c19_i32 = arith.constant 19 : i32
    %32 = tpu.dynamic_rotate %27 by %c19_i32 dim 1 : vector<8x384xf32>, i32 -> vector<8x384xf32>
    %c18_i32 = arith.constant 18 : i32
    %33 = tpu.dynamic_rotate %27 by %c18_i32 dim 1 : vector<8x384xf32>, i32 -> vector<8x384xf32>
    %c17_i32 = arith.constant 17 : i32
    %34 = tpu.dynamic_rotate %27 by %c17_i32 dim 1 : vector<8x384xf32>, i32 -> vector<8x384xf32>
    %c1_i32 = arith.constant 1 : i32
    %35 = tpu.dynamic_rotate %27 by %c1_i32 dim 1 : vector<8x384xf32>, i32 -> vector<8x384xf32>
    %c383_i32_22 = arith.constant 383 : i32
    %36 = tpu.dynamic_rotate %27 by %c383_i32_22 dim 1 : vector<8x384xf32>, i32 -> vector<8x384xf32>
    %c367_i32 = arith.constant 367 : i32
    %37 = tpu.dynamic_rotate %27 by %c367_i32 dim 1 : vector<8x384xf32>, i32 -> vector<8x384xf32>
    %c366_i32_23 = arith.constant 366 : i32
    %38 = tpu.dynamic_rotate %27 by %c366_i32_23 dim 1 : vector<8x384xf32>, i32 -> vector<8x384xf32>
    %c365_i32_24 = arith.constant 365 : i32
    %39 = tpu.dynamic_rotate %27 by %c365_i32_24 dim 1 : vector<8x384xf32>, i32 -> vector<8x384xf32>
    %40 = tpu.concatenate %32, %33, %34, %35, %27, %36, %37, %38, %39 in 0 : vector<8x384xf32>, vector<8x384xf32>, vector<8x384xf32>, vector<8x384xf32>, vector<8x384xf32>, vector<8x384xf32>, vector<8x384xf32>, vector<8x384xf32>, vector<8x384xf32> -> vector<72x384xf32>
    %41 = arith.truncf %40 : vector<72x384xf32> to vector<72x384xbf16>
    %cst = arith.constant dense<0.000000e+00> : vector<8x384xf32>
    %42 = tpu.matmul %29, %41, %cst {dimension_numbers = #tpu.dot_dimension_numbers<[1], [0], [0], [1], [0, 0, 1, 1], [], []>} : vector<8x72xbf16>, vector<72x384xbf16>, vector<8x384xf32> -> vector<8x384xf32>
    %43 = vector.broadcast %31 : vector<8x1xf32> to vector<8x384xf32>
    %44 = arith.addf %42, %43 : vector<8x384xf32>
    %cst_25 = arith.constant 0.000000e+00 : f32
    %45 = vector.broadcast %cst_25 : f32 to vector<8x384xf32>
    %46 = arith.maximumf %44, %45 : vector<8x384xf32>
    %47 = vector.broadcast %0 : vector<1x384xf32> to vector<8x384xf32>
    %48 = arith.mulf %46, %47 : vector<8x384xf32>
    %c1_26 = arith.constant 1 : index
    %c0_27 = arith.constant 0 : index
    %c0_28 = arith.constant 0 : index
    %49 = vector.load %arg2[%c1_26, %c0_27, %c0_28] : memref<4x8x72xbf16, #tpu.memory_space<vmem>>, vector<1x8x72xbf16>
    %50 = vector.shape_cast %49 : vector<1x8x72xbf16> to vector<8x72xbf16>
    %c1_29 = arith.constant 1 : index
    %c0_30 = arith.constant 0 : index
    %c0_31 = arith.constant 0 : index
    %51 = vector.load %arg3[%c1_29, %c0_30, %c0_31] : memref<4x8x1xf32, #tpu.memory_space<vmem>>, vector<1x8x1xf32>
    %52 = vector.shape_cast %51 : vector<1x8x1xf32> to vector<8x1xf32>
    %c19_i32_32 = arith.constant 19 : i32
    %53 = tpu.dynamic_rotate %48 by %c19_i32_32 dim 1 : vector<8x384xf32>, i32 -> vector<8x384xf32>
    %c18_i32_33 = arith.constant 18 : i32
    %54 = tpu.dynamic_rotate %48 by %c18_i32_33 dim 1 : vector<8x384xf32>, i32 -> vector<8x384xf32>
    %c17_i32_34 = arith.constant 17 : i32
    %55 = tpu.dynamic_rotate %48 by %c17_i32_34 dim 1 : vector<8x384xf32>, i32 -> vector<8x384xf32>
    %c1_i32_35 = arith.constant 1 : i32
    %56 = tpu.dynamic_rotate %48 by %c1_i32_35 dim 1 : vector<8x384xf32>, i32 -> vector<8x384xf32>
    %c383_i32_36 = arith.constant 383 : i32
    %57 = tpu.dynamic_rotate %48 by %c383_i32_36 dim 1 : vector<8x384xf32>, i32 -> vector<8x384xf32>
    %c367_i32_37 = arith.constant 367 : i32
    %58 = tpu.dynamic_rotate %48 by %c367_i32_37 dim 1 : vector<8x384xf32>, i32 -> vector<8x384xf32>
    %c366_i32_38 = arith.constant 366 : i32
    %59 = tpu.dynamic_rotate %48 by %c366_i32_38 dim 1 : vector<8x384xf32>, i32 -> vector<8x384xf32>
    %c365_i32_39 = arith.constant 365 : i32
    %60 = tpu.dynamic_rotate %48 by %c365_i32_39 dim 1 : vector<8x384xf32>, i32 -> vector<8x384xf32>
    %61 = tpu.concatenate %53, %54, %55, %56, %48, %57, %58, %59, %60 in 0 : vector<8x384xf32>, vector<8x384xf32>, vector<8x384xf32>, vector<8x384xf32>, vector<8x384xf32>, vector<8x384xf32>, vector<8x384xf32>, vector<8x384xf32>, vector<8x384xf32> -> vector<72x384xf32>
    %62 = arith.truncf %61 : vector<72x384xf32> to vector<72x384xbf16>
    %cst_40 = arith.constant dense<0.000000e+00> : vector<8x384xf32>
    %63 = tpu.matmul %50, %62, %cst_40 {dimension_numbers = #tpu.dot_dimension_numbers<[1], [0], [0], [1], [0, 0, 1, 1], [], []>} : vector<8x72xbf16>, vector<72x384xbf16>, vector<8x384xf32> -> vector<8x384xf32>
    %64 = vector.broadcast %52 : vector<8x1xf32> to vector<8x384xf32>
    %65 = arith.addf %63, %64 : vector<8x384xf32>
    %66 = arith.addf %65, %27 : vector<8x384xf32>
    %cst_41 = arith.constant 0.000000e+00 : f32
    %67 = vector.broadcast %cst_41 : f32 to vector<8x384xf32>
    %68 = arith.maximumf %66, %67 : vector<8x384xf32>
    %69 = vector.broadcast %0 : vector<1x384xf32> to vector<8x384xf32>
    %70 = arith.mulf %68, %69 : vector<8x384xf32>
    %c2_42 = arith.constant 2 : index
    %c0_43 = arith.constant 0 : index
    %c0_44 = arith.constant 0 : index
    %71 = vector.load %arg2[%c2_42, %c0_43, %c0_44] : memref<4x8x72xbf16, #tpu.memory_space<vmem>>, vector<1x8x72xbf16>
    %72 = vector.shape_cast %71 : vector<1x8x72xbf16> to vector<8x72xbf16>
    %c2_45 = arith.constant 2 : index
    %c0_46 = arith.constant 0 : index
    %c0_47 = arith.constant 0 : index
    %73 = vector.load %arg3[%c2_45, %c0_46, %c0_47] : memref<4x8x1xf32, #tpu.memory_space<vmem>>, vector<1x8x1xf32>
    %74 = vector.shape_cast %73 : vector<1x8x1xf32> to vector<8x1xf32>
    %c19_i32_48 = arith.constant 19 : i32
    %75 = tpu.dynamic_rotate %70 by %c19_i32_48 dim 1 : vector<8x384xf32>, i32 -> vector<8x384xf32>
    %c18_i32_49 = arith.constant 18 : i32
    %76 = tpu.dynamic_rotate %70 by %c18_i32_49 dim 1 : vector<8x384xf32>, i32 -> vector<8x384xf32>
    %c17_i32_50 = arith.constant 17 : i32
    %77 = tpu.dynamic_rotate %70 by %c17_i32_50 dim 1 : vector<8x384xf32>, i32 -> vector<8x384xf32>
    %c1_i32_51 = arith.constant 1 : i32
    %78 = tpu.dynamic_rotate %70 by %c1_i32_51 dim 1 : vector<8x384xf32>, i32 -> vector<8x384xf32>
    %c383_i32_52 = arith.constant 383 : i32
    %79 = tpu.dynamic_rotate %70 by %c383_i32_52 dim 1 : vector<8x384xf32>, i32 -> vector<8x384xf32>
    %c367_i32_53 = arith.constant 367 : i32
    %80 = tpu.dynamic_rotate %70 by %c367_i32_53 dim 1 : vector<8x384xf32>, i32 -> vector<8x384xf32>
    %c366_i32_54 = arith.constant 366 : i32
    %81 = tpu.dynamic_rotate %70 by %c366_i32_54 dim 1 : vector<8x384xf32>, i32 -> vector<8x384xf32>
    %c365_i32_55 = arith.constant 365 : i32
    %82 = tpu.dynamic_rotate %70 by %c365_i32_55 dim 1 : vector<8x384xf32>, i32 -> vector<8x384xf32>
    %83 = tpu.concatenate %75, %76, %77, %78, %70, %79, %80, %81, %82 in 0 : vector<8x384xf32>, vector<8x384xf32>, vector<8x384xf32>, vector<8x384xf32>, vector<8x384xf32>, vector<8x384xf32>, vector<8x384xf32>, vector<8x384xf32>, vector<8x384xf32> -> vector<72x384xf32>
    %84 = arith.truncf %83 : vector<72x384xf32> to vector<72x384xbf16>
    %cst_56 = arith.constant dense<0.000000e+00> : vector<8x384xf32>
    %85 = tpu.matmul %72, %84, %cst_56 {dimension_numbers = #tpu.dot_dimension_numbers<[1], [0], [0], [1], [0, 0, 1, 1], [], []>} : vector<8x72xbf16>, vector<72x384xbf16>, vector<8x384xf32> -> vector<8x384xf32>
    %86 = vector.broadcast %74 : vector<8x1xf32> to vector<8x384xf32>
    %87 = arith.addf %85, %86 : vector<8x384xf32>
    %cst_57 = arith.constant 0.000000e+00 : f32
    %88 = vector.broadcast %cst_57 : f32 to vector<8x384xf32>
    %89 = arith.maximumf %87, %88 : vector<8x384xf32>
    %90 = vector.broadcast %0 : vector<1x384xf32> to vector<8x384xf32>
    %91 = arith.mulf %89, %90 : vector<8x384xf32>
    %c3_58 = arith.constant 3 : index
    %c0_59 = arith.constant 0 : index
    %c0_60 = arith.constant 0 : index
    %92 = vector.load %arg2[%c3_58, %c0_59, %c0_60] : memref<4x8x72xbf16, #tpu.memory_space<vmem>>, vector<1x8x72xbf16>
    %93 = vector.shape_cast %92 : vector<1x8x72xbf16> to vector<8x72xbf16>
    %c3_61 = arith.constant 3 : index
    %c0_62 = arith.constant 0 : index
    %c0_63 = arith.constant 0 : index
    %94 = vector.load %arg3[%c3_61, %c0_62, %c0_63] : memref<4x8x1xf32, #tpu.memory_space<vmem>>, vector<1x8x1xf32>
    %95 = vector.shape_cast %94 : vector<1x8x1xf32> to vector<8x1xf32>
    %c19_i32_64 = arith.constant 19 : i32
    %96 = tpu.dynamic_rotate %91 by %c19_i32_64 dim 1 : vector<8x384xf32>, i32 -> vector<8x384xf32>
    %c18_i32_65 = arith.constant 18 : i32
    %97 = tpu.dynamic_rotate %91 by %c18_i32_65 dim 1 : vector<8x384xf32>, i32 -> vector<8x384xf32>
    %c17_i32_66 = arith.constant 17 : i32
    %98 = tpu.dynamic_rotate %91 by %c17_i32_66 dim 1 : vector<8x384xf32>, i32 -> vector<8x384xf32>
    %c1_i32_67 = arith.constant 1 : i32
    %99 = tpu.dynamic_rotate %91 by %c1_i32_67 dim 1 : vector<8x384xf32>, i32 -> vector<8x384xf32>
    %c383_i32_68 = arith.constant 383 : i32
    %100 = tpu.dynamic_rotate %91 by %c383_i32_68 dim 1 : vector<8x384xf32>, i32 -> vector<8x384xf32>
    %c367_i32_69 = arith.constant 367 : i32
    %101 = tpu.dynamic_rotate %91 by %c367_i32_69 dim 1 : vector<8x384xf32>, i32 -> vector<8x384xf32>
    %c366_i32_70 = arith.constant 366 : i32
    %102 = tpu.dynamic_rotate %91 by %c366_i32_70 dim 1 : vector<8x384xf32>, i32 -> vector<8x384xf32>
    %c365_i32_71 = arith.constant 365 : i32
    %103 = tpu.dynamic_rotate %91 by %c365_i32_71 dim 1 : vector<8x384xf32>, i32 -> vector<8x384xf32>
    %104 = tpu.concatenate %96, %97, %98, %99, %91, %100, %101, %102, %103 in 0 : vector<8x384xf32>, vector<8x384xf32>, vector<8x384xf32>, vector<8x384xf32>, vector<8x384xf32>, vector<8x384xf32>, vector<8x384xf32>, vector<8x384xf32>, vector<8x384xf32> -> vector<72x384xf32>
    %105 = arith.truncf %104 : vector<72x384xf32> to vector<72x384xbf16>
    %cst_72 = arith.constant dense<0.000000e+00> : vector<8x384xf32>
    %106 = tpu.matmul %93, %105, %cst_72 {dimension_numbers = #tpu.dot_dimension_numbers<[1], [0], [0], [1], [0, 0, 1, 1], [], []>} : vector<8x72xbf16>, vector<72x384xbf16>, vector<8x384xf32> -> vector<8x384xf32>
    %107 = vector.broadcast %95 : vector<8x1xf32> to vector<8x384xf32>
    %108 = arith.addf %106, %107 : vector<8x384xf32>
    %109 = arith.addf %108, %70 : vector<8x384xf32>
    %cst_73 = arith.constant 0.000000e+00 : f32
    %110 = vector.broadcast %cst_73 : f32 to vector<8x384xf32>
    %111 = arith.maximumf %109, %110 : vector<8x384xf32>
    %112 = vector.broadcast %0 : vector<1x384xf32> to vector<8x384xf32>
    %113 = arith.mulf %111, %112 : vector<8x384xf32>
    %114 = arith.truncf %113 : vector<8x384xf32> to vector<8x384xbf16>
    %c0_74 = arith.constant 0 : index
    %c0_75 = arith.constant 0 : index
    %c0_76 = arith.constant 0 : index
    %115 = vector.load %arg5[%c0_74, %c0_75, %c0_76] : memref<1x8x384xbf16, #tpu.memory_space<vmem>>, vector<1x8x384xbf16>
    %116 = vector.shape_cast %115 : vector<1x8x384xbf16> to vector<8x384xbf16>
    %117 = vector.shape_cast %114 : vector<8x384xbf16> to vector<1x8x384xbf16>
    tpu.vector_store %arg5[%c0_74, %c0_75, %c0_76], %117 {strides = array<i32>} : memref<1x8x384xbf16, #tpu.memory_space<vmem>>, vector<1x8x384xbf16>,
    return
  }
  func.func @transform_0(%arg0: i32) -> (i32, i32, i32, i32) {
    %c0_i32 = arith.constant 0 : i32
    %c0_i32_0 = arith.constant 0 : i32
    %c0_i32_1 = arith.constant 0 : i32
    %c0_i32_2 = arith.constant 0 : i32
    return %arg0, %c0_i32, %c0_i32_0, %c0_i32_1 : i32, i32, i32, i32
  }
  func.func @transform_1(%arg0: i32) -> (i32, i32, i32) {
    %c0_i32 = arith.constant 0 : i32
    %c0_i32_0 = arith.constant 0 : i32
    %c0_i32_1 = arith.constant 0 : i32
    %c0_i32_2 = arith.constant 0 : i32
    return %c0_i32, %c0_i32_0, %c0_i32_1 : i32, i32, i32
  }
  func.func @transform_2(%arg0: i32) -> (i32, i32, i32) {
    %c0_i32 = arith.constant 0 : i32
    %c0_i32_0 = arith.constant 0 : i32
    %c0_i32_1 = arith.constant 0 : i32
    %c0_i32_2 = arith.constant 0 : i32
    return %c0_i32, %c0_i32_0, %c0_i32_1 : i32, i32, i32
  }
  func.func @transform_3(%arg0: i32) -> (i32, i32) {
    %c0_i32 = arith.constant 0 : i32
    %c0_i32_0 = arith.constant 0 : i32
    %c0_i32_1 = arith.constant 0 : i32
    return %c0_i32, %c0_i32_0 : i32, i32
  }
  func.func @transform_4(%arg0: i32) -> (i32, i32, i32) {
    %c0_i32 = arith.constant 0 : i32
    %c0_i32_0 = arith.constant 0 : i32
    %c0_i32_1 = arith.constant 0 : i32
    return %arg0, %c0_i32, %c0_i32_0 : i32, i32, i32
  }
}

module attributes {stable_mosaic.version = 11 : i64} {
  func.func @_stage_kernel(%arg0: i32, %arg1: memref<1x72x128xbf16, #tpu.memory_space<vmem>>, %arg2: memref<1x8x128xbf16, #tpu.memory_space<vmem>>, %arg3: memref<16x72xbf16, #tpu.memory_space<vmem>>, %arg4: memref<16x1xf32, #tpu.memory_space<vmem>>, %arg5: memref<16x8xbf16, #tpu.memory_space<vmem>>, %arg6: memref<16x1xf32, #tpu.memory_space<vmem>>, %arg7: memref<3x16x144xbf16, #tpu.memory_space<vmem>>, %arg8: memref<3x16x1xf32, #tpu.memory_space<vmem>>, %arg9: memref<1x128xf32, #tpu.memory_space<vmem>>, %arg10: memref<1x16x128xbf16, #tpu.memory_space<vmem>>) attributes {dimension_semantics = [#tpu.dimension_semantics<parallel>], iteration_bounds = array<i64: 2>, scalar_prefetch = 0 : i64, scratch_operands = 0 : i64, tpu.core_type = #tpu.core_type<tc>, window_params = [{transform_indices = @transform_0, window_bounds = array<i64: 1, 72, 128>}, {transform_indices = @transform_1, window_bounds = array<i64: 1, 8, 128>}, {pipeline_mode = #tpu.pipeline_mode<synchronous>, transform_indices = @transform_2, window_bounds = array<i64: 16, 72>}, {pipeline_mode = #tpu.pipeline_mode<synchronous>, transform_indices = @transform_3, window_bounds = array<i64: 16, 1>}, {pipeline_mode = #tpu.pipeline_mode<synchronous>, transform_indices = @transform_4, window_bounds = array<i64: 16, 8>}, {pipeline_mode = #tpu.pipeline_mode<synchronous>, transform_indices = @transform_5, window_bounds = array<i64: 16, 1>}, {pipeline_mode = #tpu.pipeline_mode<synchronous>, transform_indices = @transform_6, window_bounds = array<i64: 3, 16, 144>}, {pipeline_mode = #tpu.pipeline_mode<synchronous>, transform_indices = @transform_7, window_bounds = array<i64: 3, 16, 1>}, {pipeline_mode = #tpu.pipeline_mode<synchronous>, transform_indices = @transform_8, window_bounds = array<i64: 1, 128>}, {transform_indices = @transform_9, window_bounds = array<i64: 1, 16, 128>}]} {
    %c0 = arith.constant 0 : index
    %c0_0 = arith.constant 0 : index
    %0 = vector.load %arg9[%c0, %c0_0] : memref<1x128xf32, #tpu.memory_space<vmem>>, vector<1x128xf32>
    %c0_1 = arith.constant 0 : index
    %c0_2 = arith.constant 0 : index
    %1 = vector.load %arg3[%c0_1, %c0_2] : memref<16x72xbf16, #tpu.memory_space<vmem>>, vector<16x72xbf16>
    %c0_3 = arith.constant 0 : index
    %c0_4 = arith.constant 0 : index
    %c0_5 = arith.constant 0 : index
    %2 = vector.load %arg1[%c0_3, %c0_4, %c0_5] : memref<1x72x128xbf16, #tpu.memory_space<vmem>>, vector<1x72x128xbf16>
    %3 = vector.shape_cast %2 : vector<1x72x128xbf16> to vector<72x128xbf16>
    %cst = arith.constant dense<0.000000e+00> : vector<16x128xf32>
    %4 = tpu.matmul %1, %3, %cst {dimension_numbers = #tpu.dot_dimension_numbers<[1], [0], [0], [1], [0, 0, 1, 1], [], []>} : vector<16x72xbf16>, vector<72x128xbf16>, vector<16x128xf32> -> vector<16x128xf32>
    %c0_6 = arith.constant 0 : index
    %c0_7 = arith.constant 0 : index
    %5 = vector.load %arg4[%c0_6, %c0_7] : memref<16x1xf32, #tpu.memory_space<vmem>>, vector<16x1xf32>
    %6 = vector.broadcast %5 : vector<16x1xf32> to vector<16x128xf32>
    %7 = arith.addf %4, %6 : vector<16x128xf32>
    %cst_8 = arith.constant 0.000000e+00 : f32
    %8 = vector.broadcast %cst_8 : f32 to vector<16x128xf32>
    %9 = arith.maximumf %7, %8 : vector<16x128xf32>
    %10 = vector.broadcast %0 : vector<1x128xf32> to vector<16x128xf32>
    %11 = arith.mulf %9, %10 : vector<16x128xf32>
    %c0_9 = arith.constant 0 : index
    %c0_10 = arith.constant 0 : index
    %12 = vector.load %arg5[%c0_9, %c0_10] : memref<16x8xbf16, #tpu.memory_space<vmem>>, vector<16x8xbf16>
    %c0_11 = arith.constant 0 : index
    %c0_12 = arith.constant 0 : index
    %c0_13 = arith.constant 0 : index
    %13 = vector.load %arg2[%c0_11, %c0_12, %c0_13] : memref<1x8x128xbf16, #tpu.memory_space<vmem>>, vector<1x8x128xbf16>
    %14 = vector.shape_cast %13 : vector<1x8x128xbf16> to vector<8x128xbf16>
    %cst_14 = arith.constant dense<0.000000e+00> : vector<16x128xf32>
    %15 = tpu.matmul %12, %14, %cst_14 {dimension_numbers = #tpu.dot_dimension_numbers<[1], [0], [0], [1], [0, 0, 1, 1], [], []>} : vector<16x8xbf16>, vector<8x128xbf16>, vector<16x128xf32> -> vector<16x128xf32>
    %c0_15 = arith.constant 0 : index
    %c0_16 = arith.constant 0 : index
    %16 = vector.load %arg6[%c0_15, %c0_16] : memref<16x1xf32, #tpu.memory_space<vmem>>, vector<16x1xf32>
    %17 = vector.broadcast %16 : vector<16x1xf32> to vector<16x128xf32>
    %18 = arith.addf %15, %17 : vector<16x128xf32>
    %19 = vector.broadcast %0 : vector<1x128xf32> to vector<16x128xf32>
    %20 = arith.mulf %18, %19 : vector<16x128xf32>
    %c0_17 = arith.constant 0 : index
    %c0_18 = arith.constant 0 : index
    %c0_19 = arith.constant 0 : index
    %21 = vector.load %arg7[%c0_17, %c0_18, %c0_19] : memref<3x16x144xbf16, #tpu.memory_space<vmem>>, vector<1x16x144xbf16>
    %22 = vector.shape_cast %21 : vector<1x16x144xbf16> to vector<16x144xbf16>
    %c0_20 = arith.constant 0 : index
    %c0_21 = arith.constant 0 : index
    %c0_22 = arith.constant 0 : index
    %23 = vector.load %arg8[%c0_20, %c0_21, %c0_22] : memref<3x16x1xf32, #tpu.memory_space<vmem>>, vector<1x16x1xf32>
    %24 = vector.shape_cast %23 : vector<1x16x1xf32> to vector<16x1xf32>
    %c11_i32 = arith.constant 11 : i32
    %25 = tpu.dynamic_rotate %11 by %c11_i32 dim 1 : vector<16x128xf32>, i32 -> vector<16x128xf32>
    %c10_i32 = arith.constant 10 : i32
    %26 = tpu.dynamic_rotate %11 by %c10_i32 dim 1 : vector<16x128xf32>, i32 -> vector<16x128xf32>
    %c9_i32 = arith.constant 9 : i32
    %27 = tpu.dynamic_rotate %11 by %c9_i32 dim 1 : vector<16x128xf32>, i32 -> vector<16x128xf32>
    %c1_i32 = arith.constant 1 : i32
    %28 = tpu.dynamic_rotate %11 by %c1_i32 dim 1 : vector<16x128xf32>, i32 -> vector<16x128xf32>
    %c127_i32 = arith.constant 127 : i32
    %29 = tpu.dynamic_rotate %11 by %c127_i32 dim 1 : vector<16x128xf32>, i32 -> vector<16x128xf32>
    %c119_i32 = arith.constant 119 : i32
    %30 = tpu.dynamic_rotate %11 by %c119_i32 dim 1 : vector<16x128xf32>, i32 -> vector<16x128xf32>
    %c118_i32 = arith.constant 118 : i32
    %31 = tpu.dynamic_rotate %11 by %c118_i32 dim 1 : vector<16x128xf32>, i32 -> vector<16x128xf32>
    %c117_i32 = arith.constant 117 : i32
    %32 = tpu.dynamic_rotate %11 by %c117_i32 dim 1 : vector<16x128xf32>, i32 -> vector<16x128xf32>
    %33 = tpu.concatenate %25, %26, %27, %28, %11, %29, %30, %31, %32 in 0 : vector<16x128xf32>, vector<16x128xf32>, vector<16x128xf32>, vector<16x128xf32>, vector<16x128xf32>, vector<16x128xf32>, vector<16x128xf32>, vector<16x128xf32>, vector<16x128xf32> -> vector<144x128xf32>
    %34 = arith.truncf %33 : vector<144x128xf32> to vector<144x128xbf16>
    %cst_23 = arith.constant dense<0.000000e+00> : vector<16x128xf32>
    %35 = tpu.matmul %22, %34, %cst_23 {dimension_numbers = #tpu.dot_dimension_numbers<[1], [0], [0], [1], [0, 0, 1, 1], [], []>} : vector<16x144xbf16>, vector<144x128xbf16>, vector<16x128xf32> -> vector<16x128xf32>
    %36 = vector.broadcast %24 : vector<16x1xf32> to vector<16x128xf32>
    %37 = arith.addf %35, %36 : vector<16x128xf32>
    %38 = arith.addf %37, %20 : vector<16x128xf32>
    %cst_24 = arith.constant 0.000000e+00 : f32
    %39 = vector.broadcast %cst_24 : f32 to vector<16x128xf32>
    %40 = arith.maximumf %38, %39 : vector<16x128xf32>
    %41 = vector.broadcast %0 : vector<1x128xf32> to vector<16x128xf32>
    %42 = arith.mulf %40, %41 : vector<16x128xf32>
    %c1 = arith.constant 1 : index
    %c0_25 = arith.constant 0 : index
    %c0_26 = arith.constant 0 : index
    %43 = vector.load %arg7[%c1, %c0_25, %c0_26] : memref<3x16x144xbf16, #tpu.memory_space<vmem>>, vector<1x16x144xbf16>
    %44 = vector.shape_cast %43 : vector<1x16x144xbf16> to vector<16x144xbf16>
    %c1_27 = arith.constant 1 : index
    %c0_28 = arith.constant 0 : index
    %c0_29 = arith.constant 0 : index
    %45 = vector.load %arg8[%c1_27, %c0_28, %c0_29] : memref<3x16x1xf32, #tpu.memory_space<vmem>>, vector<1x16x1xf32>
    %46 = vector.shape_cast %45 : vector<1x16x1xf32> to vector<16x1xf32>
    %c11_i32_30 = arith.constant 11 : i32
    %47 = tpu.dynamic_rotate %42 by %c11_i32_30 dim 1 : vector<16x128xf32>, i32 -> vector<16x128xf32>
    %c10_i32_31 = arith.constant 10 : i32
    %48 = tpu.dynamic_rotate %42 by %c10_i32_31 dim 1 : vector<16x128xf32>, i32 -> vector<16x128xf32>
    %c9_i32_32 = arith.constant 9 : i32
    %49 = tpu.dynamic_rotate %42 by %c9_i32_32 dim 1 : vector<16x128xf32>, i32 -> vector<16x128xf32>
    %c1_i32_33 = arith.constant 1 : i32
    %50 = tpu.dynamic_rotate %42 by %c1_i32_33 dim 1 : vector<16x128xf32>, i32 -> vector<16x128xf32>
    %c127_i32_34 = arith.constant 127 : i32
    %51 = tpu.dynamic_rotate %42 by %c127_i32_34 dim 1 : vector<16x128xf32>, i32 -> vector<16x128xf32>
    %c119_i32_35 = arith.constant 119 : i32
    %52 = tpu.dynamic_rotate %42 by %c119_i32_35 dim 1 : vector<16x128xf32>, i32 -> vector<16x128xf32>
    %c118_i32_36 = arith.constant 118 : i32
    %53 = tpu.dynamic_rotate %42 by %c118_i32_36 dim 1 : vector<16x128xf32>, i32 -> vector<16x128xf32>
    %c117_i32_37 = arith.constant 117 : i32
    %54 = tpu.dynamic_rotate %42 by %c117_i32_37 dim 1 : vector<16x128xf32>, i32 -> vector<16x128xf32>
    %55 = tpu.concatenate %47, %48, %49, %50, %42, %51, %52, %53, %54 in 0 : vector<16x128xf32>, vector<16x128xf32>, vector<16x128xf32>, vector<16x128xf32>, vector<16x128xf32>, vector<16x128xf32>, vector<16x128xf32>, vector<16x128xf32>, vector<16x128xf32> -> vector<144x128xf32>
    %56 = arith.truncf %55 : vector<144x128xf32> to vector<144x128xbf16>
    %cst_38 = arith.constant dense<0.000000e+00> : vector<16x128xf32>
    %57 = tpu.matmul %44, %56, %cst_38 {dimension_numbers = #tpu.dot_dimension_numbers<[1], [0], [0], [1], [0, 0, 1, 1], [], []>} : vector<16x144xbf16>, vector<144x128xbf16>, vector<16x128xf32> -> vector<16x128xf32>
    %58 = vector.broadcast %46 : vector<16x1xf32> to vector<16x128xf32>
    %59 = arith.addf %57, %58 : vector<16x128xf32>
    %cst_39 = arith.constant 0.000000e+00 : f32
    %60 = vector.broadcast %cst_39 : f32 to vector<16x128xf32>
    %61 = arith.maximumf %59, %60 : vector<16x128xf32>
    %62 = vector.broadcast %0 : vector<1x128xf32> to vector<16x128xf32>
    %63 = arith.mulf %61, %62 : vector<16x128xf32>
    %c2 = arith.constant 2 : index
    %c0_40 = arith.constant 0 : index
    %c0_41 = arith.constant 0 : index
    %64 = vector.load %arg7[%c2, %c0_40, %c0_41] : memref<3x16x144xbf16, #tpu.memory_space<vmem>>, vector<1x16x144xbf16>
    %65 = vector.shape_cast %64 : vector<1x16x144xbf16> to vector<16x144xbf16>
    %c2_42 = arith.constant 2 : index
    %c0_43 = arith.constant 0 : index
    %c0_44 = arith.constant 0 : index
    %66 = vector.load %arg8[%c2_42, %c0_43, %c0_44] : memref<3x16x1xf32, #tpu.memory_space<vmem>>, vector<1x16x1xf32>
    %67 = vector.shape_cast %66 : vector<1x16x1xf32> to vector<16x1xf32>
    %c11_i32_45 = arith.constant 11 : i32
    %68 = tpu.dynamic_rotate %63 by %c11_i32_45 dim 1 : vector<16x128xf32>, i32 -> vector<16x128xf32>
    %c10_i32_46 = arith.constant 10 : i32
    %69 = tpu.dynamic_rotate %63 by %c10_i32_46 dim 1 : vector<16x128xf32>, i32 -> vector<16x128xf32>
    %c9_i32_47 = arith.constant 9 : i32
    %70 = tpu.dynamic_rotate %63 by %c9_i32_47 dim 1 : vector<16x128xf32>, i32 -> vector<16x128xf32>
    %c1_i32_48 = arith.constant 1 : i32
    %71 = tpu.dynamic_rotate %63 by %c1_i32_48 dim 1 : vector<16x128xf32>, i32 -> vector<16x128xf32>
    %c127_i32_49 = arith.constant 127 : i32
    %72 = tpu.dynamic_rotate %63 by %c127_i32_49 dim 1 : vector<16x128xf32>, i32 -> vector<16x128xf32>
    %c119_i32_50 = arith.constant 119 : i32
    %73 = tpu.dynamic_rotate %63 by %c119_i32_50 dim 1 : vector<16x128xf32>, i32 -> vector<16x128xf32>
    %c118_i32_51 = arith.constant 118 : i32
    %74 = tpu.dynamic_rotate %63 by %c118_i32_51 dim 1 : vector<16x128xf32>, i32 -> vector<16x128xf32>
    %c117_i32_52 = arith.constant 117 : i32
    %75 = tpu.dynamic_rotate %63 by %c117_i32_52 dim 1 : vector<16x128xf32>, i32 -> vector<16x128xf32>
    %76 = tpu.concatenate %68, %69, %70, %71, %63, %72, %73, %74, %75 in 0 : vector<16x128xf32>, vector<16x128xf32>, vector<16x128xf32>, vector<16x128xf32>, vector<16x128xf32>, vector<16x128xf32>, vector<16x128xf32>, vector<16x128xf32>, vector<16x128xf32> -> vector<144x128xf32>
    %77 = arith.truncf %76 : vector<144x128xf32> to vector<144x128xbf16>
    %cst_53 = arith.constant dense<0.000000e+00> : vector<16x128xf32>
    %78 = tpu.matmul %65, %77, %cst_53 {dimension_numbers = #tpu.dot_dimension_numbers<[1], [0], [0], [1], [0, 0, 1, 1], [], []>} : vector<16x144xbf16>, vector<144x128xbf16>, vector<16x128xf32> -> vector<16x128xf32>
    %79 = vector.broadcast %67 : vector<16x1xf32> to vector<16x128xf32>
    %80 = arith.addf %78, %79 : vector<16x128xf32>
    %81 = arith.addf %80, %42 : vector<16x128xf32>
    %cst_54 = arith.constant 0.000000e+00 : f32
    %82 = vector.broadcast %cst_54 : f32 to vector<16x128xf32>
    %83 = arith.maximumf %81, %82 : vector<16x128xf32>
    %84 = vector.broadcast %0 : vector<1x128xf32> to vector<16x128xf32>
    %85 = arith.mulf %83, %84 : vector<16x128xf32>
    %86 = arith.truncf %85 : vector<16x128xf32> to vector<16x128xbf16>
    %c0_55 = arith.constant 0 : index
    %c0_56 = arith.constant 0 : index
    %c0_57 = arith.constant 0 : index
    %87 = vector.load %arg10[%c0_55, %c0_56, %c0_57] : memref<1x16x128xbf16, #tpu.memory_space<vmem>>, vector<1x16x128xbf16>
    %88 = vector.shape_cast %87 : vector<1x16x128xbf16> to vector<16x128xbf16>
    %89 = vector.shape_cast %86 : vector<16x128xbf16> to vector<1x16x128xbf16>
    tpu.vector_store %arg10[%c0_55, %c0_56, %c0_57], %89 {strides = array<i32>} : memref<1x16x128xbf16, #tpu.memory_space<vmem>>, vector<1x16x128xbf16>,
    return
  }
  func.func @transform_0(%arg0: i32) -> (i32, i32, i32) {
    %c0_i32 = arith.constant 0 : i32
    %c0_i32_0 = arith.constant 0 : i32
    %c0_i32_1 = arith.constant 0 : i32
    return %arg0, %c0_i32, %c0_i32_0 : i32, i32, i32
  }
  func.func @transform_1(%arg0: i32) -> (i32, i32, i32) {
    %c0_i32 = arith.constant 0 : i32
    %c0_i32_0 = arith.constant 0 : i32
    %c0_i32_1 = arith.constant 0 : i32
    return %arg0, %c0_i32, %c0_i32_0 : i32, i32, i32
  }
  func.func @transform_2(%arg0: i32) -> (i32, i32) {
    %c0_i32 = arith.constant 0 : i32
    %c0_i32_0 = arith.constant 0 : i32
    %c0_i32_1 = arith.constant 0 : i32
    return %c0_i32, %c0_i32_0 : i32, i32
  }
  func.func @transform_3(%arg0: i32) -> (i32, i32) {
    %c0_i32 = arith.constant 0 : i32
    %c0_i32_0 = arith.constant 0 : i32
    %c0_i32_1 = arith.constant 0 : i32
    return %c0_i32, %c0_i32_0 : i32, i32
  }
  func.func @transform_4(%arg0: i32) -> (i32, i32) {
    %c0_i32 = arith.constant 0 : i32
    %c0_i32_0 = arith.constant 0 : i32
    %c0_i32_1 = arith.constant 0 : i32
    return %c0_i32, %c0_i32_0 : i32, i32
  }
  func.func @transform_5(%arg0: i32) -> (i32, i32) {
    %c0_i32 = arith.constant 0 : i32
    %c0_i32_0 = arith.constant 0 : i32
    %c0_i32_1 = arith.constant 0 : i32
    return %c0_i32, %c0_i32_0 : i32, i32
  }
  func.func @transform_6(%arg0: i32) -> (i32, i32, i32) {
    %c0_i32 = arith.constant 0 : i32
    %c0_i32_0 = arith.constant 0 : i32
    %c0_i32_1 = arith.constant 0 : i32
    %c0_i32_2 = arith.constant 0 : i32
    return %c0_i32, %c0_i32_0, %c0_i32_1 : i32, i32, i32
  }
  func.func @transform_7(%arg0: i32) -> (i32, i32, i32) {
    %c0_i32 = arith.constant 0 : i32
    %c0_i32_0 = arith.constant 0 : i32
    %c0_i32_1 = arith.constant 0 : i32
    %c0_i32_2 = arith.constant 0 : i32
    return %c0_i32, %c0_i32_0, %c0_i32_1 : i32, i32, i32
  }
  func.func @transform_8(%arg0: i32) -> (i32, i32) {
    %c0_i32 = arith.constant 0 : i32
    %c0_i32_0 = arith.constant 0 : i32
    %c0_i32_1 = arith.constant 0 : i32
    return %c0_i32, %c0_i32_0 : i32, i32
  }
  func.func @transform_9(%arg0: i32) -> (i32, i32, i32) {
    %c0_i32 = arith.constant 0 : i32
    %c0_i32_0 = arith.constant 0 : i32
    %c0_i32_1 = arith.constant 0 : i32
    return %arg0, %c0_i32, %c0_i32_0 : i32, i32, i32
  }
}

module attributes {stable_mosaic.version = 11 : i64} {
  func.func @_stage_kernel(%arg0: i32, %arg1: memref<1x144x128xbf16, #tpu.memory_space<vmem>>, %arg2: memref<1x16x128xbf16, #tpu.memory_space<vmem>>, %arg3: memref<32x144xbf16, #tpu.memory_space<vmem>>, %arg4: memref<32x1xf32, #tpu.memory_space<vmem>>, %arg5: memref<32x16xbf16, #tpu.memory_space<vmem>>, %arg6: memref<32x1xf32, #tpu.memory_space<vmem>>, %arg7: memref<3x32x288xbf16, #tpu.memory_space<vmem>>, %arg8: memref<3x32x1xf32, #tpu.memory_space<vmem>>, %arg9: memref<1x128xf32, #tpu.memory_space<vmem>>, %arg10: memref<1x32x128xbf16, #tpu.memory_space<vmem>>) attributes {dimension_semantics = [#tpu.dimension_semantics<parallel>], iteration_bounds = array<i64: 2>, scalar_prefetch = 0 : i64, scratch_operands = 0 : i64, tpu.core_type = #tpu.core_type<tc>, window_params = [{transform_indices = @transform_0, window_bounds = array<i64: 1, 144, 128>}, {transform_indices = @transform_1, window_bounds = array<i64: 1, 16, 128>}, {pipeline_mode = #tpu.pipeline_mode<synchronous>, transform_indices = @transform_2, window_bounds = array<i64: 32, 144>}, {pipeline_mode = #tpu.pipeline_mode<synchronous>, transform_indices = @transform_3, window_bounds = array<i64: 32, 1>}, {pipeline_mode = #tpu.pipeline_mode<synchronous>, transform_indices = @transform_4, window_bounds = array<i64: 32, 16>}, {pipeline_mode = #tpu.pipeline_mode<synchronous>, transform_indices = @transform_5, window_bounds = array<i64: 32, 1>}, {pipeline_mode = #tpu.pipeline_mode<synchronous>, transform_indices = @transform_6, window_bounds = array<i64: 3, 32, 288>}, {pipeline_mode = #tpu.pipeline_mode<synchronous>, transform_indices = @transform_7, window_bounds = array<i64: 3, 32, 1>}, {pipeline_mode = #tpu.pipeline_mode<synchronous>, transform_indices = @transform_8, window_bounds = array<i64: 1, 128>}, {transform_indices = @transform_9, window_bounds = array<i64: 1, 32, 128>}]} {
    %c0 = arith.constant 0 : index
    %c0_0 = arith.constant 0 : index
    %0 = vector.load %arg9[%c0, %c0_0] : memref<1x128xf32, #tpu.memory_space<vmem>>, vector<1x128xf32>
    %c0_1 = arith.constant 0 : index
    %c0_2 = arith.constant 0 : index
    %1 = vector.load %arg3[%c0_1, %c0_2] : memref<32x144xbf16, #tpu.memory_space<vmem>>, vector<32x144xbf16>
    %c0_3 = arith.constant 0 : index
    %c0_4 = arith.constant 0 : index
    %c0_5 = arith.constant 0 : index
    %2 = vector.load %arg1[%c0_3, %c0_4, %c0_5] : memref<1x144x128xbf16, #tpu.memory_space<vmem>>, vector<1x144x128xbf16>
    %3 = vector.shape_cast %2 : vector<1x144x128xbf16> to vector<144x128xbf16>
    %cst = arith.constant dense<0.000000e+00> : vector<32x128xf32>
    %4 = tpu.matmul %1, %3, %cst {dimension_numbers = #tpu.dot_dimension_numbers<[1], [0], [0], [1], [0, 0, 1, 1], [], []>} : vector<32x144xbf16>, vector<144x128xbf16>, vector<32x128xf32> -> vector<32x128xf32>
    %c0_6 = arith.constant 0 : index
    %c0_7 = arith.constant 0 : index
    %5 = vector.load %arg4[%c0_6, %c0_7] : memref<32x1xf32, #tpu.memory_space<vmem>>, vector<32x1xf32>
    %6 = vector.broadcast %5 : vector<32x1xf32> to vector<32x128xf32>
    %7 = arith.addf %4, %6 : vector<32x128xf32>
    %cst_8 = arith.constant 0.000000e+00 : f32
    %8 = vector.broadcast %cst_8 : f32 to vector<32x128xf32>
    %9 = arith.maximumf %7, %8 : vector<32x128xf32>
    %10 = vector.broadcast %0 : vector<1x128xf32> to vector<32x128xf32>
    %11 = arith.mulf %9, %10 : vector<32x128xf32>
    %c0_9 = arith.constant 0 : index
    %c0_10 = arith.constant 0 : index
    %12 = vector.load %arg5[%c0_9, %c0_10] : memref<32x16xbf16, #tpu.memory_space<vmem>>, vector<32x16xbf16>
    %c0_11 = arith.constant 0 : index
    %c0_12 = arith.constant 0 : index
    %c0_13 = arith.constant 0 : index
    %13 = vector.load %arg2[%c0_11, %c0_12, %c0_13] : memref<1x16x128xbf16, #tpu.memory_space<vmem>>, vector<1x16x128xbf16>
    %14 = vector.shape_cast %13 : vector<1x16x128xbf16> to vector<16x128xbf16>
    %cst_14 = arith.constant dense<0.000000e+00> : vector<32x128xf32>
    %15 = tpu.matmul %12, %14, %cst_14 {dimension_numbers = #tpu.dot_dimension_numbers<[1], [0], [0], [1], [0, 0, 1, 1], [], []>} : vector<32x16xbf16>, vector<16x128xbf16>, vector<32x128xf32> -> vector<32x128xf32>
    %c0_15 = arith.constant 0 : index
    %c0_16 = arith.constant 0 : index
    %16 = vector.load %arg6[%c0_15, %c0_16] : memref<32x1xf32, #tpu.memory_space<vmem>>, vector<32x1xf32>
    %17 = vector.broadcast %16 : vector<32x1xf32> to vector<32x128xf32>
    %18 = arith.addf %15, %17 : vector<32x128xf32>
    %19 = vector.broadcast %0 : vector<1x128xf32> to vector<32x128xf32>
    %20 = arith.mulf %18, %19 : vector<32x128xf32>
    %c0_17 = arith.constant 0 : index
    %c0_18 = arith.constant 0 : index
    %c0_19 = arith.constant 0 : index
    %21 = vector.load %arg7[%c0_17, %c0_18, %c0_19] : memref<3x32x288xbf16, #tpu.memory_space<vmem>>, vector<1x32x288xbf16>
    %22 = vector.shape_cast %21 : vector<1x32x288xbf16> to vector<32x288xbf16>
    %c0_20 = arith.constant 0 : index
    %c0_21 = arith.constant 0 : index
    %c0_22 = arith.constant 0 : index
    %23 = vector.load %arg8[%c0_20, %c0_21, %c0_22] : memref<3x32x1xf32, #tpu.memory_space<vmem>>, vector<1x32x1xf32>
    %24 = vector.shape_cast %23 : vector<1x32x1xf32> to vector<32x1xf32>
    %c7_i32 = arith.constant 7 : i32
    %25 = tpu.dynamic_rotate %11 by %c7_i32 dim 1 : vector<32x128xf32>, i32 -> vector<32x128xf32>
    %c6_i32 = arith.constant 6 : i32
    %26 = tpu.dynamic_rotate %11 by %c6_i32 dim 1 : vector<32x128xf32>, i32 -> vector<32x128xf32>
    %c5_i32 = arith.constant 5 : i32
    %27 = tpu.dynamic_rotate %11 by %c5_i32 dim 1 : vector<32x128xf32>, i32 -> vector<32x128xf32>
    %c1_i32 = arith.constant 1 : i32
    %28 = tpu.dynamic_rotate %11 by %c1_i32 dim 1 : vector<32x128xf32>, i32 -> vector<32x128xf32>
    %c127_i32 = arith.constant 127 : i32
    %29 = tpu.dynamic_rotate %11 by %c127_i32 dim 1 : vector<32x128xf32>, i32 -> vector<32x128xf32>
    %c123_i32 = arith.constant 123 : i32
    %30 = tpu.dynamic_rotate %11 by %c123_i32 dim 1 : vector<32x128xf32>, i32 -> vector<32x128xf32>
    %c122_i32 = arith.constant 122 : i32
    %31 = tpu.dynamic_rotate %11 by %c122_i32 dim 1 : vector<32x128xf32>, i32 -> vector<32x128xf32>
    %c121_i32 = arith.constant 121 : i32
    %32 = tpu.dynamic_rotate %11 by %c121_i32 dim 1 : vector<32x128xf32>, i32 -> vector<32x128xf32>
    %33 = tpu.concatenate %25, %26, %27, %28, %11, %29, %30, %31, %32 in 0 : vector<32x128xf32>, vector<32x128xf32>, vector<32x128xf32>, vector<32x128xf32>, vector<32x128xf32>, vector<32x128xf32>, vector<32x128xf32>, vector<32x128xf32>, vector<32x128xf32> -> vector<288x128xf32>
    %34 = arith.truncf %33 : vector<288x128xf32> to vector<288x128xbf16>
    %cst_23 = arith.constant dense<0.000000e+00> : vector<32x128xf32>
    %35 = tpu.matmul %22, %34, %cst_23 {dimension_numbers = #tpu.dot_dimension_numbers<[1], [0], [0], [1], [0, 0, 1, 1], [], []>} : vector<32x288xbf16>, vector<288x128xbf16>, vector<32x128xf32> -> vector<32x128xf32>
    %36 = vector.broadcast %24 : vector<32x1xf32> to vector<32x128xf32>
    %37 = arith.addf %35, %36 : vector<32x128xf32>
    %38 = arith.addf %37, %20 : vector<32x128xf32>
    %cst_24 = arith.constant 0.000000e+00 : f32
    %39 = vector.broadcast %cst_24 : f32 to vector<32x128xf32>
    %40 = arith.maximumf %38, %39 : vector<32x128xf32>
    %41 = vector.broadcast %0 : vector<1x128xf32> to vector<32x128xf32>
    %42 = arith.mulf %40, %41 : vector<32x128xf32>
    %c1 = arith.constant 1 : index
    %c0_25 = arith.constant 0 : index
    %c0_26 = arith.constant 0 : index
    %43 = vector.load %arg7[%c1, %c0_25, %c0_26] : memref<3x32x288xbf16, #tpu.memory_space<vmem>>, vector<1x32x288xbf16>
    %44 = vector.shape_cast %43 : vector<1x32x288xbf16> to vector<32x288xbf16>
    %c1_27 = arith.constant 1 : index
    %c0_28 = arith.constant 0 : index
    %c0_29 = arith.constant 0 : index
    %45 = vector.load %arg8[%c1_27, %c0_28, %c0_29] : memref<3x32x1xf32, #tpu.memory_space<vmem>>, vector<1x32x1xf32>
    %46 = vector.shape_cast %45 : vector<1x32x1xf32> to vector<32x1xf32>
    %c7_i32_30 = arith.constant 7 : i32
    %47 = tpu.dynamic_rotate %42 by %c7_i32_30 dim 1 : vector<32x128xf32>, i32 -> vector<32x128xf32>
    %c6_i32_31 = arith.constant 6 : i32
    %48 = tpu.dynamic_rotate %42 by %c6_i32_31 dim 1 : vector<32x128xf32>, i32 -> vector<32x128xf32>
    %c5_i32_32 = arith.constant 5 : i32
    %49 = tpu.dynamic_rotate %42 by %c5_i32_32 dim 1 : vector<32x128xf32>, i32 -> vector<32x128xf32>
    %c1_i32_33 = arith.constant 1 : i32
    %50 = tpu.dynamic_rotate %42 by %c1_i32_33 dim 1 : vector<32x128xf32>, i32 -> vector<32x128xf32>
    %c127_i32_34 = arith.constant 127 : i32
    %51 = tpu.dynamic_rotate %42 by %c127_i32_34 dim 1 : vector<32x128xf32>, i32 -> vector<32x128xf32>
    %c123_i32_35 = arith.constant 123 : i32
    %52 = tpu.dynamic_rotate %42 by %c123_i32_35 dim 1 : vector<32x128xf32>, i32 -> vector<32x128xf32>
    %c122_i32_36 = arith.constant 122 : i32
    %53 = tpu.dynamic_rotate %42 by %c122_i32_36 dim 1 : vector<32x128xf32>, i32 -> vector<32x128xf32>
    %c121_i32_37 = arith.constant 121 : i32
    %54 = tpu.dynamic_rotate %42 by %c121_i32_37 dim 1 : vector<32x128xf32>, i32 -> vector<32x128xf32>
    %55 = tpu.concatenate %47, %48, %49, %50, %42, %51, %52, %53, %54 in 0 : vector<32x128xf32>, vector<32x128xf32>, vector<32x128xf32>, vector<32x128xf32>, vector<32x128xf32>, vector<32x128xf32>, vector<32x128xf32>, vector<32x128xf32>, vector<32x128xf32> -> vector<288x128xf32>
    %56 = arith.truncf %55 : vector<288x128xf32> to vector<288x128xbf16>
    %cst_38 = arith.constant dense<0.000000e+00> : vector<32x128xf32>
    %57 = tpu.matmul %44, %56, %cst_38 {dimension_numbers = #tpu.dot_dimension_numbers<[1], [0], [0], [1], [0, 0, 1, 1], [], []>} : vector<32x288xbf16>, vector<288x128xbf16>, vector<32x128xf32> -> vector<32x128xf32>
    %58 = vector.broadcast %46 : vector<32x1xf32> to vector<32x128xf32>
    %59 = arith.addf %57, %58 : vector<32x128xf32>
    %cst_39 = arith.constant 0.000000e+00 : f32
    %60 = vector.broadcast %cst_39 : f32 to vector<32x128xf32>
    %61 = arith.maximumf %59, %60 : vector<32x128xf32>
    %62 = vector.broadcast %0 : vector<1x128xf32> to vector<32x128xf32>
    %63 = arith.mulf %61, %62 : vector<32x128xf32>
    %c2 = arith.constant 2 : index
    %c0_40 = arith.constant 0 : index
    %c0_41 = arith.constant 0 : index
    %64 = vector.load %arg7[%c2, %c0_40, %c0_41] : memref<3x32x288xbf16, #tpu.memory_space<vmem>>, vector<1x32x288xbf16>
    %65 = vector.shape_cast %64 : vector<1x32x288xbf16> to vector<32x288xbf16>
    %c2_42 = arith.constant 2 : index
    %c0_43 = arith.constant 0 : index
    %c0_44 = arith.constant 0 : index
    %66 = vector.load %arg8[%c2_42, %c0_43, %c0_44] : memref<3x32x1xf32, #tpu.memory_space<vmem>>, vector<1x32x1xf32>
    %67 = vector.shape_cast %66 : vector<1x32x1xf32> to vector<32x1xf32>
    %c7_i32_45 = arith.constant 7 : i32
    %68 = tpu.dynamic_rotate %63 by %c7_i32_45 dim 1 : vector<32x128xf32>, i32 -> vector<32x128xf32>
    %c6_i32_46 = arith.constant 6 : i32
    %69 = tpu.dynamic_rotate %63 by %c6_i32_46 dim 1 : vector<32x128xf32>, i32 -> vector<32x128xf32>
    %c5_i32_47 = arith.constant 5 : i32
    %70 = tpu.dynamic_rotate %63 by %c5_i32_47 dim 1 : vector<32x128xf32>, i32 -> vector<32x128xf32>
    %c1_i32_48 = arith.constant 1 : i32
    %71 = tpu.dynamic_rotate %63 by %c1_i32_48 dim 1 : vector<32x128xf32>, i32 -> vector<32x128xf32>
    %c127_i32_49 = arith.constant 127 : i32
    %72 = tpu.dynamic_rotate %63 by %c127_i32_49 dim 1 : vector<32x128xf32>, i32 -> vector<32x128xf32>
    %c123_i32_50 = arith.constant 123 : i32
    %73 = tpu.dynamic_rotate %63 by %c123_i32_50 dim 1 : vector<32x128xf32>, i32 -> vector<32x128xf32>
    %c122_i32_51 = arith.constant 122 : i32
    %74 = tpu.dynamic_rotate %63 by %c122_i32_51 dim 1 : vector<32x128xf32>, i32 -> vector<32x128xf32>
    %c121_i32_52 = arith.constant 121 : i32
    %75 = tpu.dynamic_rotate %63 by %c121_i32_52 dim 1 : vector<32x128xf32>, i32 -> vector<32x128xf32>
    %76 = tpu.concatenate %68, %69, %70, %71, %63, %72, %73, %74, %75 in 0 : vector<32x128xf32>, vector<32x128xf32>, vector<32x128xf32>, vector<32x128xf32>, vector<32x128xf32>, vector<32x128xf32>, vector<32x128xf32>, vector<32x128xf32>, vector<32x128xf32> -> vector<288x128xf32>
    %77 = arith.truncf %76 : vector<288x128xf32> to vector<288x128xbf16>
    %cst_53 = arith.constant dense<0.000000e+00> : vector<32x128xf32>
    %78 = tpu.matmul %65, %77, %cst_53 {dimension_numbers = #tpu.dot_dimension_numbers<[1], [0], [0], [1], [0, 0, 1, 1], [], []>} : vector<32x288xbf16>, vector<288x128xbf16>, vector<32x128xf32> -> vector<32x128xf32>
    %79 = vector.broadcast %67 : vector<32x1xf32> to vector<32x128xf32>
    %80 = arith.addf %78, %79 : vector<32x128xf32>
    %81 = arith.addf %80, %42 : vector<32x128xf32>
    %cst_54 = arith.constant 0.000000e+00 : f32
    %82 = vector.broadcast %cst_54 : f32 to vector<32x128xf32>
    %83 = arith.maximumf %81, %82 : vector<32x128xf32>
    %84 = vector.broadcast %0 : vector<1x128xf32> to vector<32x128xf32>
    %85 = arith.mulf %83, %84 : vector<32x128xf32>
    %86 = arith.truncf %85 : vector<32x128xf32> to vector<32x128xbf16>
    %c0_55 = arith.constant 0 : index
    %c0_56 = arith.constant 0 : index
    %c0_57 = arith.constant 0 : index
    %87 = vector.load %arg10[%c0_55, %c0_56, %c0_57] : memref<1x32x128xbf16, #tpu.memory_space<vmem>>, vector<1x32x128xbf16>
    %88 = vector.shape_cast %87 : vector<1x32x128xbf16> to vector<32x128xbf16>
    %89 = vector.shape_cast %86 : vector<32x128xbf16> to vector<1x32x128xbf16>
    tpu.vector_store %arg10[%c0_55, %c0_56, %c0_57], %89 {strides = array<i32>} : memref<1x32x128xbf16, #tpu.memory_space<vmem>>, vector<1x32x128xbf16>,
    return
  }
  func.func @transform_0(%arg0: i32) -> (i32, i32, i32) {
    %c0_i32 = arith.constant 0 : i32
    %c0_i32_0 = arith.constant 0 : i32
    %c0_i32_1 = arith.constant 0 : i32
    return %arg0, %c0_i32, %c0_i32_0 : i32, i32, i32
  }
  func.func @transform_1(%arg0: i32) -> (i32, i32, i32) {
    %c0_i32 = arith.constant 0 : i32
    %c0_i32_0 = arith.constant 0 : i32
    %c0_i32_1 = arith.constant 0 : i32
    return %arg0, %c0_i32, %c0_i32_0 : i32, i32, i32
  }
  func.func @transform_2(%arg0: i32) -> (i32, i32) {
    %c0_i32 = arith.constant 0 : i32
    %c0_i32_0 = arith.constant 0 : i32
    %c0_i32_1 = arith.constant 0 : i32
    return %c0_i32, %c0_i32_0 : i32, i32
  }
  func.func @transform_3(%arg0: i32) -> (i32, i32) {
    %c0_i32 = arith.constant 0 : i32
    %c0_i32_0 = arith.constant 0 : i32
    %c0_i32_1 = arith.constant 0 : i32
    return %c0_i32, %c0_i32_0 : i32, i32
  }
  func.func @transform_4(%arg0: i32) -> (i32, i32) {
    %c0_i32 = arith.constant 0 : i32
    %c0_i32_0 = arith.constant 0 : i32
    %c0_i32_1 = arith.constant 0 : i32
    return %c0_i32, %c0_i32_0 : i32, i32
  }
  func.func @transform_5(%arg0: i32) -> (i32, i32) {
    %c0_i32 = arith.constant 0 : i32
    %c0_i32_0 = arith.constant 0 : i32
    %c0_i32_1 = arith.constant 0 : i32
    return %c0_i32, %c0_i32_0 : i32, i32
  }
  func.func @transform_6(%arg0: i32) -> (i32, i32, i32) {
    %c0_i32 = arith.constant 0 : i32
    %c0_i32_0 = arith.constant 0 : i32
    %c0_i32_1 = arith.constant 0 : i32
    %c0_i32_2 = arith.constant 0 : i32
    return %c0_i32, %c0_i32_0, %c0_i32_1 : i32, i32, i32
  }
  func.func @transform_7(%arg0: i32) -> (i32, i32, i32) {
    %c0_i32 = arith.constant 0 : i32
    %c0_i32_0 = arith.constant 0 : i32
    %c0_i32_1 = arith.constant 0 : i32
    %c0_i32_2 = arith.constant 0 : i32
    return %c0_i32, %c0_i32_0, %c0_i32_1 : i32, i32, i32
  }
  func.func @transform_8(%arg0: i32) -> (i32, i32) {
    %c0_i32 = arith.constant 0 : i32
    %c0_i32_0 = arith.constant 0 : i32
    %c0_i32_1 = arith.constant 0 : i32
    return %c0_i32, %c0_i32_0 : i32, i32
  }
  func.func @transform_9(%arg0: i32) -> (i32, i32, i32) {
    %c0_i32 = arith.constant 0 : i32
    %c0_i32_0 = arith.constant 0 : i32
    %c0_i32_1 = arith.constant 0 : i32
    return %arg0, %c0_i32, %c0_i32_0 : i32, i32, i32
  }
}

module attributes {stable_mosaic.version = 11 : i64} {
  func.func @_stage_kernel(%arg0: i32, %arg1: memref<1x288x128xbf16, #tpu.memory_space<vmem>>, %arg2: memref<1x32x128xbf16, #tpu.memory_space<vmem>>, %arg3: memref<64x288xbf16, #tpu.memory_space<vmem>>, %arg4: memref<64x1xf32, #tpu.memory_space<vmem>>, %arg5: memref<64x32xbf16, #tpu.memory_space<vmem>>, %arg6: memref<64x1xf32, #tpu.memory_space<vmem>>, %arg7: memref<3x64x576xbf16, #tpu.memory_space<vmem>>, %arg8: memref<3x64x1xf32, #tpu.memory_space<vmem>>, %arg9: memref<1x128xf32, #tpu.memory_space<vmem>>, %arg10: memref<16x64xf32, #tpu.memory_space<vmem>>, %arg11: memref<16x1xf32, #tpu.memory_space<vmem>>, %arg12: memref<16x1xf32, #tpu.memory_space<vmem>>, %arg13: memref<1x16x1xf32, #tpu.memory_space<vmem>>) attributes {dimension_semantics = [#tpu.dimension_semantics<parallel>], iteration_bounds = array<i64: 2>, scalar_prefetch = 0 : i64, scratch_operands = 0 : i64, tpu.core_type = #tpu.core_type<tc>, window_params = [{transform_indices = @transform_0, window_bounds = array<i64: 1, 288, 128>}, {transform_indices = @transform_1, window_bounds = array<i64: 1, 32, 128>}, {pipeline_mode = #tpu.pipeline_mode<synchronous>, transform_indices = @transform_2, window_bounds = array<i64: 64, 288>}, {pipeline_mode = #tpu.pipeline_mode<synchronous>, transform_indices = @transform_3, window_bounds = array<i64: 64, 1>}, {pipeline_mode = #tpu.pipeline_mode<synchronous>, transform_indices = @transform_4, window_bounds = array<i64: 64, 32>}, {pipeline_mode = #tpu.pipeline_mode<synchronous>, transform_indices = @transform_5, window_bounds = array<i64: 64, 1>}, {pipeline_mode = #tpu.pipeline_mode<synchronous>, transform_indices = @transform_6, window_bounds = array<i64: 3, 64, 576>}, {pipeline_mode = #tpu.pipeline_mode<synchronous>, transform_indices = @transform_7, window_bounds = array<i64: 3, 64, 1>}, {pipeline_mode = #tpu.pipeline_mode<synchronous>, transform_indices = @transform_8, window_bounds = array<i64: 1, 128>}, {pipeline_mode = #tpu.pipeline_mode<synchronous>, transform_indices = @transform_9, window_bounds = array<i64: 16, 64>}, {pipeline_mode = #tpu.pipeline_mode<synchronous>, transform_indices = @transform_10, window_bounds = array<i64: 16, 1>}, {pipeline_mode = #tpu.pipeline_mode<synchronous>, transform_indices = @transform_11, window_bounds = array<i64: 16, 1>}, {transform_indices = @transform_12, window_bounds = array<i64: 1, 16, 1>}]} {
    %c0 = arith.constant 0 : index
    %c0_0 = arith.constant 0 : index
    %0 = vector.load %arg9[%c0, %c0_0] : memref<1x128xf32, #tpu.memory_space<vmem>>, vector<1x128xf32>
    %c0_1 = arith.constant 0 : index
    %c0_2 = arith.constant 0 : index
    %1 = vector.load %arg3[%c0_1, %c0_2] : memref<64x288xbf16, #tpu.memory_space<vmem>>, vector<64x288xbf16>
    %c0_3 = arith.constant 0 : index
    %c0_4 = arith.constant 0 : index
    %c0_5 = arith.constant 0 : index
    %2 = vector.load %arg1[%c0_3, %c0_4, %c0_5] : memref<1x288x128xbf16, #tpu.memory_space<vmem>>, vector<1x288x128xbf16>
    %3 = vector.shape_cast %2 : vector<1x288x128xbf16> to vector<288x128xbf16>
    %cst = arith.constant dense<0.000000e+00> : vector<64x128xf32>
    %4 = tpu.matmul %1, %3, %cst {dimension_numbers = #tpu.dot_dimension_numbers<[1], [0], [0], [1], [0, 0, 1, 1], [], []>} : vector<64x288xbf16>, vector<288x128xbf16>, vector<64x128xf32> -> vector<64x128xf32>
    %c0_6 = arith.constant 0 : index
    %c0_7 = arith.constant 0 : index
    %5 = vector.load %arg4[%c0_6, %c0_7] : memref<64x1xf32, #tpu.memory_space<vmem>>, vector<64x1xf32>
    %6 = vector.broadcast %5 : vector<64x1xf32> to vector<64x128xf32>
    %7 = arith.addf %4, %6 : vector<64x128xf32>
    %cst_8 = arith.constant 0.000000e+00 : f32
    %8 = vector.broadcast %cst_8 : f32 to vector<64x128xf32>
    %9 = arith.maximumf %7, %8 : vector<64x128xf32>
    %10 = vector.broadcast %0 : vector<1x128xf32> to vector<64x128xf32>
    %11 = arith.mulf %9, %10 : vector<64x128xf32>
    %c0_9 = arith.constant 0 : index
    %c0_10 = arith.constant 0 : index
    %12 = vector.load %arg5[%c0_9, %c0_10] : memref<64x32xbf16, #tpu.memory_space<vmem>>, vector<64x32xbf16>
    %c0_11 = arith.constant 0 : index
    %c0_12 = arith.constant 0 : index
    %c0_13 = arith.constant 0 : index
    %13 = vector.load %arg2[%c0_11, %c0_12, %c0_13] : memref<1x32x128xbf16, #tpu.memory_space<vmem>>, vector<1x32x128xbf16>
    %14 = vector.shape_cast %13 : vector<1x32x128xbf16> to vector<32x128xbf16>
    %cst_14 = arith.constant dense<0.000000e+00> : vector<64x128xf32>
    %15 = tpu.matmul %12, %14, %cst_14 {dimension_numbers = #tpu.dot_dimension_numbers<[1], [0], [0], [1], [0, 0, 1, 1], [], []>} : vector<64x32xbf16>, vector<32x128xbf16>, vector<64x128xf32> -> vector<64x128xf32>
    %c0_15 = arith.constant 0 : index
    %c0_16 = arith.constant 0 : index
    %16 = vector.load %arg6[%c0_15, %c0_16] : memref<64x1xf32, #tpu.memory_space<vmem>>, vector<64x1xf32>
    %17 = vector.broadcast %16 : vector<64x1xf32> to vector<64x128xf32>
    %18 = arith.addf %15, %17 : vector<64x128xf32>
    %19 = vector.broadcast %0 : vector<1x128xf32> to vector<64x128xf32>
    %20 = arith.mulf %18, %19 : vector<64x128xf32>
    %c0_17 = arith.constant 0 : index
    %c0_18 = arith.constant 0 : index
    %c0_19 = arith.constant 0 : index
    %21 = vector.load %arg7[%c0_17, %c0_18, %c0_19] : memref<3x64x576xbf16, #tpu.memory_space<vmem>>, vector<1x64x576xbf16>
    %22 = vector.shape_cast %21 : vector<1x64x576xbf16> to vector<64x576xbf16>
    %c0_20 = arith.constant 0 : index
    %c0_21 = arith.constant 0 : index
    %c0_22 = arith.constant 0 : index
    %23 = vector.load %arg8[%c0_20, %c0_21, %c0_22] : memref<3x64x1xf32, #tpu.memory_space<vmem>>, vector<1x64x1xf32>
    %24 = vector.shape_cast %23 : vector<1x64x1xf32> to vector<64x1xf32>
    %c5_i32 = arith.constant 5 : i32
    %25 = tpu.dynamic_rotate %11 by %c5_i32 dim 1 : vector<64x128xf32>, i32 -> vector<64x128xf32>
    %c4_i32 = arith.constant 4 : i32
    %26 = tpu.dynamic_rotate %11 by %c4_i32 dim 1 : vector<64x128xf32>, i32 -> vector<64x128xf32>
    %c3_i32 = arith.constant 3 : i32
    %27 = tpu.dynamic_rotate %11 by %c3_i32 dim 1 : vector<64x128xf32>, i32 -> vector<64x128xf32>
    %c1_i32 = arith.constant 1 : i32
    %28 = tpu.dynamic_rotate %11 by %c1_i32 dim 1 : vector<64x128xf32>, i32 -> vector<64x128xf32>
    %c127_i32 = arith.constant 127 : i32
    %29 = tpu.dynamic_rotate %11 by %c127_i32 dim 1 : vector<64x128xf32>, i32 -> vector<64x128xf32>
    %c125_i32 = arith.constant 125 : i32
    %30 = tpu.dynamic_rotate %11 by %c125_i32 dim 1 : vector<64x128xf32>, i32 -> vector<64x128xf32>
    %c124_i32 = arith.constant 124 : i32
    %31 = tpu.dynamic_rotate %11 by %c124_i32 dim 1 : vector<64x128xf32>, i32 -> vector<64x128xf32>
    %c123_i32 = arith.constant 123 : i32
    %32 = tpu.dynamic_rotate %11 by %c123_i32 dim 1 : vector<64x128xf32>, i32 -> vector<64x128xf32>
    %33 = tpu.concatenate %25, %26, %27, %28, %11, %29, %30, %31, %32 in 0 : vector<64x128xf32>, vector<64x128xf32>, vector<64x128xf32>, vector<64x128xf32>, vector<64x128xf32>, vector<64x128xf32>, vector<64x128xf32>, vector<64x128xf32>, vector<64x128xf32> -> vector<576x128xf32>
    %34 = arith.truncf %33 : vector<576x128xf32> to vector<576x128xbf16>
    %cst_23 = arith.constant dense<0.000000e+00> : vector<64x128xf32>
    %35 = tpu.matmul %22, %34, %cst_23 {dimension_numbers = #tpu.dot_dimension_numbers<[1], [0], [0], [1], [0, 0, 1, 1], [], []>} : vector<64x576xbf16>, vector<576x128xbf16>, vector<64x128xf32> -> vector<64x128xf32>
    %36 = vector.broadcast %24 : vector<64x1xf32> to vector<64x128xf32>
    %37 = arith.addf %35, %36 : vector<64x128xf32>
    %38 = arith.addf %37, %20 : vector<64x128xf32>
    %cst_24 = arith.constant 0.000000e+00 : f32
    %39 = vector.broadcast %cst_24 : f32 to vector<64x128xf32>
    %40 = arith.maximumf %38, %39 : vector<64x128xf32>
    %41 = vector.broadcast %0 : vector<1x128xf32> to vector<64x128xf32>
    %42 = arith.mulf %40, %41 : vector<64x128xf32>
    %c1 = arith.constant 1 : index
    %c0_25 = arith.constant 0 : index
    %c0_26 = arith.constant 0 : index
    %43 = vector.load %arg7[%c1, %c0_25, %c0_26] : memref<3x64x576xbf16, #tpu.memory_space<vmem>>, vector<1x64x576xbf16>
    %44 = vector.shape_cast %43 : vector<1x64x576xbf16> to vector<64x576xbf16>
    %c1_27 = arith.constant 1 : index
    %c0_28 = arith.constant 0 : index
    %c0_29 = arith.constant 0 : index
    %45 = vector.load %arg8[%c1_27, %c0_28, %c0_29] : memref<3x64x1xf32, #tpu.memory_space<vmem>>, vector<1x64x1xf32>
    %46 = vector.shape_cast %45 : vector<1x64x1xf32> to vector<64x1xf32>
    %c5_i32_30 = arith.constant 5 : i32
    %47 = tpu.dynamic_rotate %42 by %c5_i32_30 dim 1 : vector<64x128xf32>, i32 -> vector<64x128xf32>
    %c4_i32_31 = arith.constant 4 : i32
    %48 = tpu.dynamic_rotate %42 by %c4_i32_31 dim 1 : vector<64x128xf32>, i32 -> vector<64x128xf32>
    %c3_i32_32 = arith.constant 3 : i32
    %49 = tpu.dynamic_rotate %42 by %c3_i32_32 dim 1 : vector<64x128xf32>, i32 -> vector<64x128xf32>
    %c1_i32_33 = arith.constant 1 : i32
    %50 = tpu.dynamic_rotate %42 by %c1_i32_33 dim 1 : vector<64x128xf32>, i32 -> vector<64x128xf32>
    %c127_i32_34 = arith.constant 127 : i32
    %51 = tpu.dynamic_rotate %42 by %c127_i32_34 dim 1 : vector<64x128xf32>, i32 -> vector<64x128xf32>
    %c125_i32_35 = arith.constant 125 : i32
    %52 = tpu.dynamic_rotate %42 by %c125_i32_35 dim 1 : vector<64x128xf32>, i32 -> vector<64x128xf32>
    %c124_i32_36 = arith.constant 124 : i32
    %53 = tpu.dynamic_rotate %42 by %c124_i32_36 dim 1 : vector<64x128xf32>, i32 -> vector<64x128xf32>
    %c123_i32_37 = arith.constant 123 : i32
    %54 = tpu.dynamic_rotate %42 by %c123_i32_37 dim 1 : vector<64x128xf32>, i32 -> vector<64x128xf32>
    %55 = tpu.concatenate %47, %48, %49, %50, %42, %51, %52, %53, %54 in 0 : vector<64x128xf32>, vector<64x128xf32>, vector<64x128xf32>, vector<64x128xf32>, vector<64x128xf32>, vector<64x128xf32>, vector<64x128xf32>, vector<64x128xf32>, vector<64x128xf32> -> vector<576x128xf32>
    %56 = arith.truncf %55 : vector<576x128xf32> to vector<576x128xbf16>
    %cst_38 = arith.constant dense<0.000000e+00> : vector<64x128xf32>
    %57 = tpu.matmul %44, %56, %cst_38 {dimension_numbers = #tpu.dot_dimension_numbers<[1], [0], [0], [1], [0, 0, 1, 1], [], []>} : vector<64x576xbf16>, vector<576x128xbf16>, vector<64x128xf32> -> vector<64x128xf32>
    %58 = vector.broadcast %46 : vector<64x1xf32> to vector<64x128xf32>
    %59 = arith.addf %57, %58 : vector<64x128xf32>
    %cst_39 = arith.constant 0.000000e+00 : f32
    %60 = vector.broadcast %cst_39 : f32 to vector<64x128xf32>
    %61 = arith.maximumf %59, %60 : vector<64x128xf32>
    %62 = vector.broadcast %0 : vector<1x128xf32> to vector<64x128xf32>
    %63 = arith.mulf %61, %62 : vector<64x128xf32>
    %c2 = arith.constant 2 : index
    %c0_40 = arith.constant 0 : index
    %c0_41 = arith.constant 0 : index
    %64 = vector.load %arg7[%c2, %c0_40, %c0_41] : memref<3x64x576xbf16, #tpu.memory_space<vmem>>, vector<1x64x576xbf16>
    %65 = vector.shape_cast %64 : vector<1x64x576xbf16> to vector<64x576xbf16>
    %c2_42 = arith.constant 2 : index
    %c0_43 = arith.constant 0 : index
    %c0_44 = arith.constant 0 : index
    %66 = vector.load %arg8[%c2_42, %c0_43, %c0_44] : memref<3x64x1xf32, #tpu.memory_space<vmem>>, vector<1x64x1xf32>
    %67 = vector.shape_cast %66 : vector<1x64x1xf32> to vector<64x1xf32>
    %c5_i32_45 = arith.constant 5 : i32
    %68 = tpu.dynamic_rotate %63 by %c5_i32_45 dim 1 : vector<64x128xf32>, i32 -> vector<64x128xf32>
    %c4_i32_46 = arith.constant 4 : i32
    %69 = tpu.dynamic_rotate %63 by %c4_i32_46 dim 1 : vector<64x128xf32>, i32 -> vector<64x128xf32>
    %c3_i32_47 = arith.constant 3 : i32
    %70 = tpu.dynamic_rotate %63 by %c3_i32_47 dim 1 : vector<64x128xf32>, i32 -> vector<64x128xf32>
    %c1_i32_48 = arith.constant 1 : i32
    %71 = tpu.dynamic_rotate %63 by %c1_i32_48 dim 1 : vector<64x128xf32>, i32 -> vector<64x128xf32>
    %c127_i32_49 = arith.constant 127 : i32
    %72 = tpu.dynamic_rotate %63 by %c127_i32_49 dim 1 : vector<64x128xf32>, i32 -> vector<64x128xf32>
    %c125_i32_50 = arith.constant 125 : i32
    %73 = tpu.dynamic_rotate %63 by %c125_i32_50 dim 1 : vector<64x128xf32>, i32 -> vector<64x128xf32>
    %c124_i32_51 = arith.constant 124 : i32
    %74 = tpu.dynamic_rotate %63 by %c124_i32_51 dim 1 : vector<64x128xf32>, i32 -> vector<64x128xf32>
    %c123_i32_52 = arith.constant 123 : i32
    %75 = tpu.dynamic_rotate %63 by %c123_i32_52 dim 1 : vector<64x128xf32>, i32 -> vector<64x128xf32>
    %76 = tpu.concatenate %68, %69, %70, %71, %63, %72, %73, %74, %75 in 0 : vector<64x128xf32>, vector<64x128xf32>, vector<64x128xf32>, vector<64x128xf32>, vector<64x128xf32>, vector<64x128xf32>, vector<64x128xf32>, vector<64x128xf32>, vector<64x128xf32> -> vector<576x128xf32>
    %77 = arith.truncf %76 : vector<576x128xf32> to vector<576x128xbf16>
    %cst_53 = arith.constant dense<0.000000e+00> : vector<64x128xf32>
    %78 = tpu.matmul %65, %77, %cst_53 {dimension_numbers = #tpu.dot_dimension_numbers<[1], [0], [0], [1], [0, 0, 1, 1], [], []>} : vector<64x576xbf16>, vector<576x128xbf16>, vector<64x128xf32> -> vector<64x128xf32>
    %79 = vector.broadcast %67 : vector<64x1xf32> to vector<64x128xf32>
    %80 = arith.addf %78, %79 : vector<64x128xf32>
    %81 = arith.addf %80, %42 : vector<64x128xf32>
    %cst_54 = arith.constant 0.000000e+00 : f32
    %82 = vector.broadcast %cst_54 : f32 to vector<64x128xf32>
    %83 = arith.maximumf %81, %82 : vector<64x128xf32>
    %84 = vector.broadcast %0 : vector<1x128xf32> to vector<64x128xf32>
    %85 = arith.mulf %83, %84 : vector<64x128xf32>
    %cst_55 = arith.constant dense<0.000000e+00> : vector<64xf32>
    %86 = vector.multi_reduction <add>, %85, %cst_55 [1] : vector<64x128xf32> to vector<64xf32>
    %87 = vector.shape_cast %86 : vector<64xf32> to vector<64x1xf32>
    %cst_56 = arith.constant 2.500000e-01 : f32
    %88 = vector.broadcast %cst_56 : f32 to vector<64x1xf32>
    %89 = arith.mulf %87, %88 : vector<64x1xf32>
    %90 = arith.mulf %89, %89 : vector<64x1xf32>
    %cst_57 = arith.constant dense<0.000000e+00> : vector<1xf32>
    %91 = vector.multi_reduction <add>, %90, %cst_57 [0] : vector<64x1xf32> to vector<1xf32>
    %92 = vector.shape_cast %91 : vector<1xf32> to vector<1x1xf32>
    %c0_58 = arith.constant 0 : index
    %c0_59 = arith.constant 0 : index
    %93 = vector.load %arg10[%c0_58, %c0_59] : memref<16x64xf32, #tpu.memory_space<vmem>>, vector<16x64xf32>
    %cst_60 = arith.constant dense<0.000000e+00> : vector<16x128xf32>
    %94 = tpu.matmul %93, %85, %cst_60 {dimension_numbers = #tpu.dot_dimension_numbers<[1], [0], [0], [1], [0, 0, 1, 1], [], []>} : vector<16x64xf32>, vector<64x128xf32>, vector<16x128xf32> -> vector<16x128xf32>
    %cst_61 = arith.constant dense<0.000000e+00> : vector<16xf32>
    %95 = vector.multi_reduction <add>, %94, %cst_61 [1] : vector<16x128xf32> to vector<16xf32>
    %96 = vector.shape_cast %95 : vector<16xf32> to vector<16x1xf32>
    %cst_62 = arith.constant 2.500000e-01 : f32
    %97 = vector.broadcast %cst_62 : f32 to vector<16x1xf32>
    %98 = arith.mulf %96, %97 : vector<16x1xf32>
    %cst_63 = arith.constant 2.000000e+00 : f32
    %99 = vector.broadcast %cst_63 : f32 to vector<16x1xf32>
    %100 = arith.mulf %99, %98 : vector<16x1xf32>
    %101 = vector.broadcast %92 : vector<1x1xf32> to vector<16x1xf32>
    %102 = arith.subf %101, %100 : vector<16x1xf32>
    %c0_64 = arith.constant 0 : index
    %c0_65 = arith.constant 0 : index
    %103 = vector.load %arg11[%c0_64, %c0_65] : memref<16x1xf32, #tpu.memory_space<vmem>>, vector<16x1xf32>
    %104 = arith.addf %102, %103 : vector<16x1xf32>
    %c0_66 = arith.constant 0 : index
    %c0_67 = arith.constant 0 : index
    %105 = vector.load %arg12[%c0_66, %c0_67] : memref<16x1xf32, #tpu.memory_space<vmem>>, vector<16x1xf32>
    %106 = arith.subf %104, %105 : vector<16x1xf32>
    %cst_68 = arith.constant 0.000000e+00 : f32
    %107 = vector.broadcast %cst_68 : f32 to vector<16x1xf32>
    %108 = arith.subf %107, %106 : vector<16x1xf32>
    %cst_69 = arith.constant 5.000000e-01 : f32
    %109 = vector.broadcast %cst_69 : f32 to vector<16x1xf32>
    %110 = arith.mulf %108, %109 : vector<16x1xf32>
    %c0_70 = arith.constant 0 : index
    %c0_71 = arith.constant 0 : index
    %c0_72 = arith.constant 0 : index
    %111 = vector.load %arg13[%c0_70, %c0_71, %c0_72] : memref<1x16x1xf32, #tpu.memory_space<vmem>>, vector<1x16x1xf32>
    %112 = vector.shape_cast %111 : vector<1x16x1xf32> to vector<16x1xf32>
    %113 = vector.shape_cast %110 : vector<16x1xf32> to vector<1x16x1xf32>
    tpu.vector_store %arg13[%c0_70, %c0_71, %c0_72], %113 {strides = array<i32>} : memref<1x16x1xf32, #tpu.memory_space<vmem>>, vector<1x16x1xf32>,
    return
  }
  func.func @transform_0(%arg0: i32) -> (i32, i32, i32) {
    %c0_i32 = arith.constant 0 : i32
    %c0_i32_0 = arith.constant 0 : i32
    %c0_i32_1 = arith.constant 0 : i32
    return %arg0, %c0_i32, %c0_i32_0 : i32, i32, i32
  }
  func.func @transform_1(%arg0: i32) -> (i32, i32, i32) {
    %c0_i32 = arith.constant 0 : i32
    %c0_i32_0 = arith.constant 0 : i32
    %c0_i32_1 = arith.constant 0 : i32
    return %arg0, %c0_i32, %c0_i32_0 : i32, i32, i32
  }
  func.func @transform_2(%arg0: i32) -> (i32, i32) {
    %c0_i32 = arith.constant 0 : i32
    %c0_i32_0 = arith.constant 0 : i32
    %c0_i32_1 = arith.constant 0 : i32
    return %c0_i32, %c0_i32_0 : i32, i32
  }
  func.func @transform_3(%arg0: i32) -> (i32, i32) {
    %c0_i32 = arith.constant 0 : i32
    %c0_i32_0 = arith.constant 0 : i32
    %c0_i32_1 = arith.constant 0 : i32
    return %c0_i32, %c0_i32_0 : i32, i32
  }
  func.func @transform_4(%arg0: i32) -> (i32, i32) {
    %c0_i32 = arith.constant 0 : i32
    %c0_i32_0 = arith.constant 0 : i32
    %c0_i32_1 = arith.constant 0 : i32
    return %c0_i32, %c0_i32_0 : i32, i32
  }
  func.func @transform_5(%arg0: i32) -> (i32, i32) {
    %c0_i32 = arith.constant 0 : i32
    %c0_i32_0 = arith.constant 0 : i32
    %c0_i32_1 = arith.constant 0 : i32
    return %c0_i32, %c0_i32_0 : i32, i32
  }
  func.func @transform_6(%arg0: i32) -> (i32, i32, i32) {
    %c0_i32 = arith.constant 0 : i32
    %c0_i32_0 = arith.constant 0 : i32
    %c0_i32_1 = arith.constant 0 : i32
    %c0_i32_2 = arith.constant 0 : i32
    return %c0_i32, %c0_i32_0, %c0_i32_1 : i32, i32, i32
  }
  func.func @transform_7(%arg0: i32) -> (i32, i32, i32) {
    %c0_i32 = arith.constant 0 : i32
    %c0_i32_0 = arith.constant 0 : i32
    %c0_i32_1 = arith.constant 0 : i32
    %c0_i32_2 = arith.constant 0 : i32
    return %c0_i32, %c0_i32_0, %c0_i32_1 : i32, i32, i32
  }
  func.func @transform_8(%arg0: i32) -> (i32, i32) {
    %c0_i32 = arith.constant 0 : i32
    %c0_i32_0 = arith.constant 0 : i32
    %c0_i32_1 = arith.constant 0 : i32
    return %c0_i32, %c0_i32_0 : i32, i32
  }
  func.func @transform_9(%arg0: i32) -> (i32, i32) {
    %c0_i32 = arith.constant 0 : i32
    %c0_i32_0 = arith.constant 0 : i32
    %c0_i32_1 = arith.constant 0 : i32
    return %c0_i32, %c0_i32_0 : i32, i32
  }
  func.func @transform_10(%arg0: i32) -> (i32, i32) {
    %c0_i32 = arith.constant 0 : i32
    %c0_i32_0 = arith.constant 0 : i32
    %c0_i32_1 = arith.constant 0 : i32
    return %c0_i32, %c0_i32_0 : i32, i32
  }
  func.func @transform_11(%arg0: i32) -> (i32, i32) {
    %c0_i32 = arith.constant 0 : i32
    %c0_i32_0 = arith.constant 0 : i32
    %c0_i32_1 = arith.constant 0 : i32
    return %c0_i32, %c0_i32_0 : i32, i32
  }
  func.func @transform_12(%arg0: i32) -> (i32, i32, i32) {
    %c0_i32 = arith.constant 0 : i32
    %c0_i32_0 = arith.constant 0 : i32
    %c0_i32_1 = arith.constant 0 : i32
    return %arg0, %c0_i32, %c0_i32_0 : i32, i32, i32
  }
}

</mosaic_0001>

<bundles_post_ra>
// kernel: custom_resnet_forward.5
= control target key start
LH: loop header
LB: loop body
LE: loop exit
PB: predicated region body
PF: predicated region fallthrough
CT: control target
= control target key end

     0   :  { %s1520_s15 = smov 0   ;;  %s1730_s0 = inlined_call_operand.vmem [shape: bf16[2,147,1280], index: 0, kind: input, shape index: {}]   ;;  %s1731_s1 = inlined_call_operand.vmem [shape: bf16[8,147], index: 1, kind: input, shape index: {}]   ;;  %s1732_s2 = inlined_call_operand.vmem [shape: f32[8,1], index: 2, kind: input, shape index: {}]   ;;  %s1733_s3 = inlined_call_operand.vmem [shape: f32[1,1280], index: 3, kind: input, shape index: {}]   ;;  %s1734_s4 = inlined_call_operand.vmem [shape: bf16[2,8,1280], index: 4, kind: output, shape index: {}]  }
   0x1 LB: > { %s1199_s16 = sadd.s32 4294967295, %s1491_s15   ;;  %p1203_p0 = scmp.ge.s32.totalorder %s1491_s15, 1  ;;  %s1491_s15 = sphi %s1520_s15, %s14_s15  }
   0x2   : > { %p162_p1 = scmp.lt.s32.totalorder %s1491_s15, 3 }
   0x4   : > { %p163_p2 = pnand %p1203_p0, %p162_p1 }
   0x5   : > { %p188_p3 = scmp.lt.s32.totalorder (!%p163_p2), %s1199_s16, 1  ;;  %v1531_v0 = vld [vmem:[%s1731_s1] sm:$0xff] (!%p163_p2)  ;;  %vm782_vm0 = vcmask (!%p163_p2), 154624   ;;  %v1493_v3 = vmov (!%p163_p2), 0   ;;  %vm786_vm1 = vcmask (!%p163_p2), 1040384   ;;  %vm787_vm2 = vcmask (!%p163_p2), 1041408  }
   0x6   : > { %166 = sbr.rel (%p163_p2) target bundleno = 360 (0x168), region = 36  ;;  %v1535_v1 = vcombine.high (!%p163_p2), %v1531_v0, %v1531_v0  ;;  %v295_v2 = vld [vmem:[%s1732_s2] sm:$0xff] (!%p163_p2)  ;;  %1337 = vset.pattern.permute.xlu0 (!%p163_p2), %v1493_v3  ;;  %v1494_v30 = vmov (!%p163_p2), 65535   ;;  %v1593_v46 = vcombine.low (!%p163_p2), %v1531_v0, %v1531_v0 }
   0x7   : > { %298 = vperm.xlu0 (!%p163_p2), %1337, %v295_v2   ;;  %v788_v31 = vsel (!%p163_p2), %vm786_vm1, 4294967295, %v1494_v30 }
   0x8   : > { %1308 = vmatprep.mubr.msk.bf16.mxu0 (!%p163_p2), %vm782_vm0, %v1535_v1  ;;  %1309 = vmatprep.mubr.msk.bf16.mxu1 (!%p163_p2), %vm782_vm0, %v1535_v1  ;;  %v1580_v35 = vsel (!%p163_p2), %vm787_vm2, %v788_v31, 0 }
   0xd   : > { %s1736_s16 = smov (!%p188_p3, %s1199_s16), 1 }
   0xe   : > { %s1325_s21 = smul.u32 760, %s1736_s16 }
   0xf   : > { %s1326_s27 = smul.u32 40, %s1736_s16 }
  0x10   : > { %s1550_s24 = scalar_lea.vmem %s1730_s0, %s1325_s21 }
  0x11   : > { %v1338_v4 = vld [vmem:[%s1550_s24 + $0x4] ss:$40 sps:$4 sm:$0xff]   ;;  %v1340_v5 = vld [vmem:[%s1550_s24] ss:$40 sps:$4 sm:$0xff]   ;;  %v1341_v6 = vld [vmem:[%s1550_s24 + $0x54] ss:$40 sps:$4 sm:$0xff]   ;;  %s1699_s30 = scalar_lea.vmem %s1734_s4, %s1326_s27 }
  0x12   : > { %820 = vmatprep.subr.bf16.mxu0 %v1338_v4  ;;  %v1343_v7 = vld [vmem:[%s1550_s24 + $0x50] ss:$40 sps:$4 sm:$0xff]   ;;  %v1344_v8 = vld [vmem:[%s1550_s24 + $0xa4] ss:$40 sps:$4 sm:$0xff]   ;;  %v1346_v9 = vld [vmem:[%s1550_s24 + $0xa0] ss:$40 sps:$4 sm:$0xff]  }
  0x13   : > { %821 = vmatpush1.bf16.msra.mxu0 %v1340_v5  ;;  %v1347_v10 = vld [vmem:[%s1550_s24 + $0xf4] ss:$40 sps:$4 sm:$0xff]   ;;  %v1349_v11 = vld [vmem:[%s1550_s24 + $0xf0] ss:$40 sps:$4 sm:$0xff]   ;;  %v1350_v12 = vld [vmem:[%s1550_s24 + $0x144] ss:$40 sps:$4 sm:$0xff]  }
  0x14   : > { %822 = vmatprep.subr.bf16.mxu0 %v1341_v6  ;;  %v1367_v13 = vld [vmem:[%s1550_s24 + $0xc] ss:$40 sps:$4 sm:$0xff]   ;;  %v1369_v14 = vld [vmem:[%s1550_s24 + $0x8] ss:$40 sps:$4 sm:$0xff]   ;;  %v1375_v17 = vld [vmem:[%s1550_s24 + $0x5c] ss:$40 sps:$4 sm:$0xff]  }
  0x15   : > { %v1352_v15 = vld [vmem:[%s1550_s24 + $0x140] ss:$40 sps:$4 sm:$0xff]   ;;  %v1353_v16 = vld [vmem:[%s1550_s24 + $0x194] ss:$40 sps:$4 sm:$0xff]   ;;  %861 = vmatprep.subr.bf16.mxu1 %v1367_v13  ;;  %v1355_v19 = vld [vmem:[%s1550_s24 + $0x190] ss:$40 sps:$4 sm:$0xff]  }
  0x16   : > { %862 = vmatpush1.bf16.msra.mxu1 %v1369_v14  ;;  %v1377_v18 = vld [vmem:[%s1550_s24 + $0x58] ss:$40 sps:$4 sm:$0xff]   ;;  %v1381_v20 = vld [vmem:[%s1550_s24 + $0xac] ss:$40 sps:$4 sm:$0xff]   ;;  %v1383_v22 = vld [vmem:[%s1550_s24 + $0xa8] ss:$40 sps:$4 sm:$0xff]  }
  0x17   : > { %823 = vmatpush1.bf16.msra.mxu0 %v1343_v7  ;;  %863 = vmatprep.subr.bf16.mxu1 %v1375_v17  ;;  %v1356_v21 = vld [vmem:[%s1550_s24 + $0x1e4] ss:$40 sps:$4 sm:$0xff]   ;;  %v1358_v24 = vld [vmem:[%s1550_s24 + $0x1e0] ss:$40 sps:$4 sm:$0xff]   ;;  %v1359_v25 = vld [vmem:[%s1550_s24 + $0x234] ss:$40 sps:$4 sm:$0xff]  }
  0x18   : > { %824 = vmatprep.subr.bf16.mxu0 %v1344_v8  ;;  %v1387_v23 = vld [vmem:[%s1550_s24 + $0xfc] ss:$40 sps:$4 sm:$0xff]   ;;  %v1389_v26 = vld [vmem:[%s1550_s24 + $0xf8] ss:$40 sps:$4 sm:$0xff]   ;;  %v290_v27 = vld [vmem:[%s1550_s24 + $0x2d0] sm:$0x33] }
  0x19   : > { %v1393_v28 = vld [vmem:[%s1550_s24 + $0x14c] ss:$40 sps:$4 sm:$0xff]   ;;  %v1361_v29 = vld [vmem:[%s1550_s24 + $0x230] ss:$40 sps:$4 sm:$0xff]   ;;  %v1299_v33 = vcombine.high %v290_v27, %v290_v27  ;;  %v1399_v36 = vld [vmem:[%s1550_s24 + $0x19c] ss:$40 sps:$4 sm:$0xff]   ;;  %v1298_v38 = vcombine.low %v290_v27, %v290_v27 }
  0x1a   : > { %864 = vmatpush1.bf16.msra.mxu1 %v1377_v18  ;;  %v1362_v32 = vld [vmem:[%s1550_s24 + $0x284] ss:$40 sps:$4 sm:$0xff]   ;;  %v1395_v34 = vld [vmem:[%s1550_s24 + $0x148] ss:$40 sps:$4 sm:$0xff]   ;;  %v1401_v40 = vld [vmem:[%s1550_s24 + $0x198] ss:$40 sps:$4 sm:$0xff]  }
  0x1b   : > { %825 = vmatpush1.bf16.msra.mxu0 %v1346_v9  ;;  %865 = vmatprep.subr.bf16.mxu1 %v1381_v20  ;;  %v1364_v37 = vld [vmem:[%s1550_s24 + $0x280] ss:$40 sps:$4 sm:$0xff]   ;;  %v794_v39 = vand.u32 %v1299_v33, %v1580_v35  ;;  %v1405_v41 = vld [vmem:[%s1550_s24 + $0x1ec] ss:$40 sps:$4 sm:$0xff]   ;;  %v791_v42 = vand.u32 %v1298_v38, %v1580_v35  ;;  %v1411_v45 = vld [vmem:[%s1550_s24 + $0x23c] ss:$40 sps:$4 sm:$0xff]  }
  0x1c   : > { %826 = vmatprep.subr.bf16.mxu0 %v1347_v10  ;;  %v1374_v43 = vld [vmem:[%s1550_s24 + $0x14] ss:$40 sps:$4 sm:$0xff]   ;;  %v1407_v44 = vld [vmem:[%s1550_s24 + $0x1e8] ss:$40 sps:$4 sm:$0xff]   ;;  %v1380_v49 = vld [vmem:[%s1550_s24 + $0x64] ss:$40 sps:$4 sm:$0xff]  }
  0x1d   : > { %v291_v47 = vld [vmem:[%s1550_s24 + $0x2d8] sm:$0x33]  ;;  %v1417_v51 = vld [vmem:[%s1550_s24 + $0x28c] ss:$40 sps:$4 sm:$0xff]   ;;  %v1378_v53 = vld [vmem:[%s1550_s24 + $0x60] ss:$40 sps:$4 sm:$0xff]  }
  0x1e   : > { %866 = vmatpush1.bf16.msra.mxu1 %v1383_v22  ;;  %v1372_v48 = vld [vmem:[%s1550_s24 + $0x10] ss:$40 sps:$4 sm:$0xff]   ;;  %v1301_v52 = vcombine.high %v291_v47, %v291_v47  ;;  %v1386_v54 = vld [vmem:[%s1550_s24 + $0xb4] ss:$40 sps:$4 sm:$0xff]   ;;  %v1300_v56 = vcombine.low %v291_v47, %v291_v47  ;;  %v1392_v59 = vld [vmem:[%s1550_s24 + $0x104] ss:$40 sps:$4 sm:$0xff]  }
  0x1f   : > { %827 = vmatpush1.bf16.msra.mxu0 %v1349_v11  ;;  %867 = vmatprep.subr.bf16.mxu1 %v1387_v23  ;;  %v1413_v50 = vld [vmem:[%s1550_s24 + $0x238] ss:$40 sps:$4 sm:$0xff]   ;;  %v1419_v55 = vld [vmem:[%s1550_s24 + $0x288] ss:$40 sps:$4 sm:$0xff]   ;;  %v1429_v61 = vld [vmem:[%s1550_s24 + $0x1c] ss:$40 sps:$4 sm:$0xff]  }
  0x20   : > { %828 = vmatprep.subr.bf16.mxu0 %v1350_v12  ;;  %v800_v57 = vand.u32 %v1301_v52, %v1580_v35  ;;  %v1384_v58 = vld [vmem:[%s1550_s24 + $0xb0] ss:$40 sps:$4 sm:$0xff]   ;;  %v797_v60 = vand.u32 %v1300_v56, %v1580_v35  ;;  %v1390_v62 = vld [vmem:[%s1550_s24 + $0x100] ss:$40 sps:$4 sm:$0xff]   ;;  %v1398_v63 = vld [vmem:[%s1550_s24 + $0x154] ss:$40 sps:$4 sm:$0xff]  }
  0x21   : > { %v1427_v0 = vld [vmem:[%s1550_s24 + $0x18] ss:$40 sps:$4 sm:$0xff]   ;;  %v1435_v2 = vld [vmem:[%s1550_s24 + $0x6c] ss:$40 sps:$4 sm:$0xff]   ;;  %v1433_v5 = vld [vmem:[%s1550_s24 + $0x68] ss:$40 sps:$4 sm:$0xff]  }
  0x22   : > { %868 = vmatpush1.bf16.msra.mxu1 %v1389_v26  ;;  %v1396_v3 = vld [vmem:[%s1550_s24 + $0x150] ss:$40 sps:$4 sm:$0xff]   ;;  %v1404_v4 = vld [vmem:[%s1550_s24 + $0x1a4] ss:$40 sps:$4 sm:$0xff]   ;;  %v1402_v7 = vld [vmem:[%s1550_s24 + $0x1a0] ss:$40 sps:$4 sm:$0xff]  }
  0x23   : > { %829 = vmatpush1.bf16.msra.mxu0 %v1352_v15  ;;  %869 = vmatprep.subr.bf16.mxu1 %v1393_v28  ;;  %v1441_v6 = vld [vmem:[%s1550_s24 + $0xbc] ss:$40 sps:$4 sm:$0xff]   ;;  %v1439_v9 = vld [vmem:[%s1550_s24 + $0xb8] ss:$40 sps:$4 sm:$0xff]   ;;  %v1447_v10 = vld [vmem:[%s1550_s24 + $0x10c] ss:$40 sps:$4 sm:$0xff]  }
  0x24   : > { %830 = vmatprep.subr.bf16.mxu0 %v1353_v16  ;;  %v1410_v8 = vld [vmem:[%s1550_s24 + $0x1f4] ss:$40 sps:$4 sm:$0xff]   ;;  %v1408_v14 = vld [vmem:[%s1550_s24 + $0x1f0] ss:$40 sps:$4 sm:$0xff]   ;;  %v1416_v15 = vld [vmem:[%s1550_s24 + $0x244] ss:$40 sps:$4 sm:$0xff]  }
  0x25   : > { %v294_v11 = vld [vmem:[%s1550_s24 + $0x2f0] sm:$0x33]  ;;  %v292_v18 = vld [vmem:[%s1550_s24 + $0x2e0] sm:$0x33] }
  0x26   : > { %870 = vmatpush1.bf16.msra.mxu1 %v1395_v34  ;;  %v1306_v12 = vcombine.low %v294_v11, %v294_v11  ;;  %v1307_v13 = vcombine.high %v294_v11, %v294_v11  ;;  %v1445_v16 = vld [vmem:[%s1550_s24 + $0x108] ss:$40 sps:$4 sm:$0xff]   ;;  %v1422_v22 = vld [vmem:[%s1550_s24 + $0x294] ss:$40 sps:$4 sm:$0xff]   ;;  %v1303_v23 = vcombine.high %v292_v18, %v292_v18  ;;  %v1302_v27 = vcombine.low %v292_v18, %v292_v18  ;;  %v1463_v33 = vld [vmem:[%s1550_s24 + $0x1f8] ss:$40 sps:$4 sm:$0xff]  }
  0x27   : > { %831 = vmatpush1.bf16.msra.mxu0 %v1355_v19  ;;  %871 = vmatprep.subr.bf16.mxu1 %v1399_v36  ;;  %v1453_v19 = vld [vmem:[%s1550_s24 + $0x15c] ss:$40 sps:$4 sm:$0xff]   ;;  %v1420_v26 = vld [vmem:[%s1550_s24 + $0x290] ss:$40 sps:$4 sm:$0xff]   ;;  %v1471_v34 = vld [vmem:[%s1550_s24 + $0x24c] ss:$40 sps:$4 sm:$0xff]  }
  0x28   : > { %832 = vmatprep.subr.bf16.mxu0 %v1356_v21  ;;  %v1631_v17 = vand.u32 %v1307_v13, %v1580_v35  ;;  %v1636_v20 = vand.u32 %v1306_v12, %v1580_v35  ;;  %v1414_v21 = vld [vmem:[%s1550_s24 + $0x240] ss:$40 sps:$4 sm:$0xff]   ;;  %v806_v28 = vand.u32 %v1303_v23, %v1580_v35  ;;  %v1465_v30 = vld [vmem:[%s1550_s24 + $0x1fc] ss:$40 sps:$4 sm:$0xff]   ;;  %v803_v31 = vand.u32 %v1302_v27, %v1580_v35 }
  0x29   : > { %v293_v36 = vld [vmem:[%s1550_s24 + $0x2e8] sm:$0x33]  ;;  %v1438_v38 = vld [vmem:[%s1550_s24 + $0x74] ss:$40 sps:$4 sm:$0xff]  }
  0x2a   : > { %872 = vmatpush1.bf16.msra.mxu1 %v1401_v40  ;;  %v1477_v40 = vld [vmem:[%s1550_s24 + $0x29c] ss:$40 sps:$4 sm:$0xff]   ;;  %v1454_v52 = vld [vmem:[%s1550_s24 + $0x160] ss:$40 sps:$4 sm:$0xff]  }
  0x2b   : > { %833 = vmatpush1.bf16.msra.mxu0 %v1358_v24  ;;  %873 = vmatprep.subr.bf16.mxu1 %v1405_v41  ;;  %v1451_v24 = vld [vmem:[%s1550_s24 + $0x158] ss:$40 sps:$4 sm:$0xff]   ;;  %v1305_v41 = vcombine.high %v293_v36, %v293_v36  ;;  %v1474_v56 = vld [vmem:[%s1550_s24 + $0x254] ss:$40 sps:$4 sm:$0xff]  }
  0x2c   : > { %834 = vmatprep.subr.bf16.mxu0 %v1359_v25  ;;  %v1459_v25 = vld [vmem:[%s1550_s24 + $0x1ac] ss:$40 sps:$4 sm:$0xff]  }
  0x2d   : > { %v812_v47 = vand.u32 %v1305_v41, %v1580_v35 }
  0x2e   : > { %874 = vmatpush1.bf16.msra.mxu1 %v1407_v44  ;;  %v1475_v44 = vld [vmem:[%s1550_s24 + $0x298] ss:$40 sps:$4 sm:$0xff]  }
  0x2f   : > { %835 = vmatpush1.bf16.msra.mxu0 %v1361_v29  ;;  %875 = vmatprep.subr.bf16.mxu1 %v1411_v45  ;;  %v1457_v29 = vld [vmem:[%s1550_s24 + $0x1a8] ss:$40 sps:$4 sm:$0xff]   ;;  %v1304_v45 = vcombine.low %v293_v36, %v293_v36 }
  0x30   : > { %836 = vmatprep.subr.bf16.mxu0 %v1362_v32  ;;  %v1432_v32 = vld [vmem:[%s1550_s24 + $0x24] ss:$40 sps:$4 sm:$0xff]  }
  0x32   : > { %876 = vmatpush1.bf16.msra.mxu1 %v1413_v50  ;;  %v1448_v50 = vld [vmem:[%s1550_s24 + $0x110] ss:$40 sps:$4 sm:$0xff]  }
  0x33   : > { %837 = vmatpush1.bf16.msra.mxu0 %v1364_v37  ;;  %877 = vmatprep.subr.bf16.mxu1 %v1417_v51  ;;  %v1430_v37 = vld [vmem:[%s1550_s24 + $0x20] ss:$40 sps:$4 sm:$0xff]   ;;  %v1456_v51 = vld [vmem:[%s1550_s24 + $0x164] ss:$40 sps:$4 sm:$0xff]  }
  0x34   : > { %838 = vmatprep.subr.bf16.mxu0 %v794_v39  ;;  %v1469_v39 = vld [vmem:[%s1550_s24 + $0x248] ss:$40 sps:$4 sm:$0xff]  }
  0x36   : > { %878 = vmatpush1.bf16.msra.mxu1 %v1419_v55  ;;  %v1466_v55 = vld [vmem:[%s1550_s24 + $0x200] ss:$40 sps:$4 sm:$0xff]  }
  0x37   : > { %839 = vmatpush1.bf16.msra.mxu0 %v791_v42  ;;  %879 = vmatprep.subr.bf16.mxu1 %v800_v57  ;;  %v1436_v42 = vld [vmem:[%s1550_s24 + $0x70] ss:$40 sps:$4 sm:$0xff]  }
  0x38   : > { %902 = vmatprep.subr.bf16.mxu0 %v1374_v43  ;;  %v1444_v43 = vld [vmem:[%s1550_s24 + $0xc4] ss:$40 sps:$4 sm:$0xff]   ;;  %v1472_v57 = vld [vmem:[%s1550_s24 + $0x250] ss:$40 sps:$4 sm:$0xff]  }
  0x3a   : > { %853 = vmatmul.mubr.bf16.vlgmr.msra.gmra.mrb[0].mxu0 %v1593_v46  ;;  %880 = vmatpush1.bf16.msra.mxu1 %v797_v60  ;;  %v1039_v60 = vlaneseq }
  0x3b   : > { %903 = vmatpush1.bf16.msra.mxu0 %v1372_v48  ;;  %1310 = vmatprep.mubr.msk.bf16.mxu0 %vm782_vm0, %v1535_v1  ;;  %v1442_v48 = vld [vmem:[%s1550_s24 + $0xc0] ss:$40 sps:$4 sm:$0xff]  }
  0x3c   : > { %904 = vmatprep.subr.bf16.mxu0 %v1380_v49  ;;  %943 = vmatprep.subr.bf16.mxu1 %v1429_v61  ;;  %v1450_v49 = vld [vmem:[%s1550_s24 + $0x114] ss:$40 sps:$4 sm:$0xff]   ;;  %v1680_v61 = vshrl.u32 %v1039_v60, 7  ;;  %v1036_v60 = vld [vmem:[%s1733_s3 + $0x8] sm:$0x3] }
  0x3d   : > { %894 = vmatmul.mubr.bf16.vlgmr.msra.gmra.mrb[0].mxu1 %v1593_v46 }
  0x3e   : > { %944 = vmatpush1.bf16.msra.mxu1 %v1427_v0  ;;  %1311 = vmatprep.mubr.msk.bf16.mxu1 %vm782_vm0, %v1535_v1  ;;  %v1035_v0 = vld [vmem:[%s1733_s3] sm:$0xff] }
  0x3f   : > { %905 = vmatpush1.bf16.msra.mxu0 %v1378_v53  ;;  %945 = vmatprep.subr.bf16.mxu1 %v1435_v2  ;;  %v1462_v53 = vld [vmem:[%s1550_s24 + $0x1b4] ss:$40 sps:$4 sm:$0xff]   ;;  %v1045_v2 = vsub.s32 1, %v1680_v61 }
  0x40   : > { %906 = vmatprep.subr.bf16.mxu0 %v1386_v54  ;;  %v1460_v54 = vld [vmem:[%s1550_s24 + $0x1b0] ss:$40 sps:$4 sm:$0xff]  }
  0x42   : > { %946 = vmatpush1.bf16.msra.mxu1 %v1433_v5 }
  0x43   : > { %907 = vmatpush1.bf16.msra.mxu0 %v1384_v58  ;;  %947 = vmatprep.subr.bf16.mxu1 %v1441_v6  ;;  %v1480_v58 = vld [vmem:[%s1550_s24 + $0x2a4] ss:$40 sps:$4 sm:$0xff]  }
  0x44   : > { %908 = vmatprep.subr.bf16.mxu0 %v1392_v59  ;;  %v1478_v59 = vld [vmem:[%s1550_s24 + $0x2a0] ss:$40 sps:$4 sm:$0xff]  }
  0x46   : > { %948 = vmatpush1.bf16.msra.mxu1 %v1439_v9 }
  0x47   : > { %909 = vmatpush1.bf16.msra.mxu0 %v1390_v62  ;;  %949 = vmatprep.subr.bf16.mxu1 %v1447_v10  ;;  %v1041_v62 = vsub.s32 0, %v1680_v61 }
  0x48   : > { %910 = vmatprep.subr.bf16.mxu0 %v1398_v63 }
  0x4a   : > { %950 = vmatpush1.bf16.msra.mxu1 %v1445_v16  ;;  %v1053_v16 = vsub.s32 3, %v1680_v61 }
  0x4b   : > { %911 = vmatpush1.bf16.msra.mxu0 %v1396_v3  ;;  %951 = vmatprep.subr.bf16.mxu1 %v1453_v19 }
  0x4c   : > { %912 = vmatprep.subr.bf16.mxu0 %v1404_v4 }
  0x4e   : > { %952 = vmatpush1.bf16.msra.mxu1 %v1451_v24 }
  0x4f   : > { %913 = vmatpush1.bf16.msra.mxu0 %v1402_v7  ;;  %953 = vmatprep.subr.bf16.mxu1 %v1459_v25  ;;  %v1046_v7 = vrot.slane %v1035_v0, %v1045_v2 }
  0x50   : > { %914 = vmatprep.subr.bf16.mxu0 %v1410_v8 }
  0x52   : > { %954 = vmatpush1.bf16.msra.mxu1 %v1457_v29 }
  0x53   : > { %915 = vmatpush1.bf16.msra.mxu0 %v1408_v14  ;;  %955 = vmatprep.subr.bf16.mxu1 %v1465_v30  ;;  %v1057_v30 = vsub.s32 4, %v1680_v61 }
  0x54   : > { %916 = vmatprep.subr.bf16.mxu0 %v1416_v15  ;;  %v1049_v15 = vsub.s32 2, %v1680_v61 }
  0x56   : > { %956 = vmatpush1.bf16.msra.mxu1 %v1463_v33  ;;  %v1050_v19 = vrot.slane %v1035_v0, %v1049_v15 }
  0x57   : > { %917 = vmatpush1.bf16.msra.mxu0 %v1414_v21  ;;  %957 = vmatprep.subr.bf16.mxu1 %v1471_v34  ;;  %v1058_v34 = vrot.slane %v1035_v0, %v1057_v30 }
  0x58   : > { %918 = vmatprep.subr.bf16.mxu0 %v1422_v22  ;;  %v1054_v22 = vrot.slane %v1035_v0, %v1053_v16 }
  0x5a   : > { %958 = vmatpush1.bf16.msra.mxu1 %v1469_v39 }
  0x5b   : > { %919 = vmatpush1.bf16.msra.mxu0 %v1420_v26  ;;  %959 = vmatprep.subr.bf16.mxu1 %v1477_v40 }
  0x5c   : > { %920 = vmatprep.subr.bf16.mxu0 %v806_v28 }
  0x5e   : > { %960 = vmatpush1.bf16.msra.mxu1 %v1475_v44 }
  0x5f   : > { %921 = vmatpush1.bf16.msra.mxu0 %v803_v31  ;;  %961 = vmatprep.subr.bf16.mxu1 %v812_v47  ;;  %v1061_v31 = vsub.s32 5, %v1680_v61  ;;  %v1065_v47 = vsub.s32 6, %v1680_v61 }
  0x60   : > { %984 = vmatprep.subr.bf16.mxu0 %v1432_v32 }
  0x62   : > { %935 = vmatmul.mubr.bf16.vlgmr.msra.gmra.mrb[4].mxu0 %v1593_v46 }
  0x63   : > { %985 = vmatpush1.bf16.msra.mxu0 %v1430_v37  ;;  %1312 = vmatprep.mubr.msk.bf16.mxu0 %vm782_vm0, %v1535_v1  ;;  %v809_v1 = vand.u32 %v1304_v45, %v1580_v35  ;;  %v1468_v35 = vld [vmem:[%s1550_s24 + $0x204] ss:$40 sps:$4 sm:$0xff]  }
  0x64   : > { %986 = vmatprep.subr.bf16.mxu0 %v1438_v38  ;;  %v1062_v38 = vrot.slane %v1035_v0, %v1061_v31 }
  0x65   : > { %962 = vmatpush1.bf16.msra.mxu1 %v809_v1 }
  0x67   : > { %987 = vmatpush1.bf16.msra.mxu0 %v1436_v42 }
  0x68   : > { %988 = vmatprep.subr.bf16.mxu0 %v1444_v43  ;;  %976 = vmatmul.mubr.bf16.vlgmr.msra.gmra.mrb[4].mxu1 %v1593_v46 }
  0x6b   : > { %989 = vmatpush1.bf16.msra.mxu0 %v1442_v48  ;;  %v1069_v48 = vsub.s32 7, %v1680_v61 }
  0x6c   : > { %990 = vmatprep.subr.bf16.mxu0 %v1450_v49 }
  0x6f   : > { %991 = vmatpush1.bf16.msra.mxu0 %v1448_v50  ;;  %v1066_v50 = vrot.slane %v1035_v0, %v1065_v47 }
  0x70   : > { %992 = vmatprep.subr.bf16.mxu0 %v1456_v51 }
  0x73   : > { %993 = vmatpush1.bf16.msra.mxu0 %v1454_v52 }
  0x74   : > { %994 = vmatprep.subr.bf16.mxu0 %v1462_v53  ;;  %v1070_v53 = vrot.slane %v1035_v0, %v1069_v48 }
  0x77   : > { %995 = vmatpush1.bf16.msra.mxu0 %v1460_v54 }
  0x78   : > { %996 = vmatprep.subr.bf16.mxu0 %v1468_v35 }
  0x7b   : > { %997 = vmatpush1.bf16.msra.mxu0 %v1466_v55 }
  0x7c   : > { %998 = vmatprep.subr.bf16.mxu0 %v1474_v56 }
  0x7f   : > { %999 = vmatpush1.bf16.msra.mxu0 %v1472_v57 }
  0x80   : > { %1000 = vmatprep.subr.bf16.mxu0 %v1480_v58 }
  0x83   : > { %1001 = vmatpush1.bf16.msra.mxu0 %v1478_v59 }
  0x84   : > { %1002 = vmatprep.subr.bf16.mxu0 %v1631_v17 }
  0x86   : > { %v1683_v63 = vpop.permute.xlu0 %298 }
  0x87   : > { %1003 = vmatpush1.bf16.msra.mxu0 %v1636_v20 }
  0x8a   : > { %1017 = vmatmul.mubr.bf16.vlgmr.msra.gmra.mrb[8].mxu0 %v1593_v46  ;;  %v1042_v46 = vrot.slane %v1035_v0, %v1041_v62 }
 0x10d   : > { %v854_v3 = vpop.f32.mrb[0].mxu0 }
 0x10e   : > { %v855_v4 = vadd.f32 %v854_v3, %v1683_v63  ;;  %v856_v5 = vpop.f32.mrb[1].mxu0 }
 0x10f   : > { %v857_v6 = vadd.f32 %v856_v5, %v1683_v63  ;;  %v858_v8 = vpop.f32.mrb[2].mxu0  ;;  %v1074_v5 = vrot.slane %v1036_v60, %v1041_v62 }
 0x110   : > { %v1025_v9 = vmax.f32 %v855_v4, 0.0  ;;  %v859_v10 = vpop.f32.mrb[3].mxu0  ;;  %v895_v17 = vpop.f32.mrb[0].mxu1 }
 0x111   : > { %v1026_v11 = vmax.f32 %v857_v6, 0.0  ;;  %v896_v18 = vadd.f32 %v895_v17, %v1683_v63  ;;  %v897_v20 = vpop.f32.mrb[1].mxu1  ;;  %v1078_v6 = vrot.slane %v1036_v60, %v1045_v2 }
 0x112   : > { %v1089_v12 = vmul.f32 %v1042_v46, %v1025_v9  ;;  %v898_v21 = vadd.f32 %v897_v20, %v1683_v63  ;;  %v899_v23 = vpop.f32.mrb[2].mxu1 }
 0x113   : > { %v1090_v13 = vmul.f32 %v1046_v7, %v1026_v11  ;;  %v1027_v24 = vmax.f32 %v896_v18, 0.0  ;;  %v900_v25 = vpop.f32.mrb[3].mxu1 }
 0x114   : > { %v1028_v26 = vmax.f32 %v898_v21, 0.0 }
 0x115   : > { %v1320_v14 = vpack.c.bf16 %v1090_v13, %v1089_v12  ;;  %v1091_v27 = vmul.f32 %v1050_v19, %v1027_v24 }
 0x116   : > { %v1092_v28 = vmul.f32 %v1054_v22, %v1028_v26 }
 0x117   : > { %1139 = vst [vmem:[%s1699_s30] sm:$0xff] %v1320_v14 }
 0x118   : > { %v1321_v29 = vpack.c.bf16 %v1092_v28, %v1091_v27 }
 0x11a   : > { %1140 = vst [vmem:[%s1699_s30 + $0x8] sm:$0xff] %v1321_v29 }
 0x135   : > { %v936_v32 = vpop.f32.mrb[4].mxu0 }
 0x136   : > { %v937_v33 = vadd.f32 %v936_v32, %v1683_v63  ;;  %v938_v36 = vpop.f32.mrb[5].mxu0 }
 0x137   : > { %v939_v37 = vadd.f32 %v938_v36, %v1683_v63  ;;  %v940_v39 = vpop.f32.mrb[6].mxu0 }
 0x138   : > { %v1029_v40 = vmax.f32 %v937_v33, 0.0  ;;  %v941_v41 = vpop.f32.mrb[7].mxu0 }
 0x139   : > { %v1030_v42 = vmax.f32 %v939_v37, 0.0 }
 0x13a   : > { %v1093_v43 = vmul.f32 %v1058_v34, %v1029_v40 }
 0x13b   : > { %v1094_v44 = vmul.f32 %v1062_v38, %v1030_v42  ;;  %v977_v49 = vpop.f32.mrb[4].mxu1 }
 0x13c   : > { %v978_v1 = vadd.f32 %v977_v49, %v1683_v63  ;;  %v979_v51 = vpop.f32.mrb[5].mxu1 }
 0x13d   : > { %v1322_v45 = vpack.c.bf16 %v1094_v44, %v1093_v43  ;;  %v980_v52 = vadd.f32 %v979_v51, %v1683_v63  ;;  %v981_v54 = vpop.f32.mrb[6].mxu1 }
 0x13e   : > { %v1031_v35 = vmax.f32 %v978_v1, 0.0  ;;  %v982_v55 = vpop.f32.mrb[7].mxu1 }
 0x13f   : > { %1141 = vst [vmem:[%s1699_s30 + $0x10] sm:$0xff] %v1322_v45  ;;  %v1032_v56 = vmax.f32 %v980_v52, 0.0 }
 0x140   : > { %v1095_v57 = vmul.f32 %v1066_v50, %v1031_v35 }
 0x141   : > { %v1096_v58 = vmul.f32 %v1070_v53, %v1032_v56 }
 0x143   : > { %v1323_v59 = vpack.c.bf16 %v1096_v58, %v1095_v57 }
 0x145   : > { %1142 = vst [vmem:[%s1699_s30 + $0x18] sm:$0xff] %v1323_v59 }
 0x15d   : > { %v1018_v3 = vpop.f32.mrb[8].mxu0 }
 0x15e   : > { %v1019_v4 = vadd.f32 %v1018_v3, %v1683_v63  ;;  %v1020_v0 = vpop.f32.mrb[9].mxu0 }
 0x15f   : > { %v1021_v46 = vadd.f32 %v1020_v0, %v1683_v63  ;;  %v1022_v7 = vpop.f32.mrb[10].mxu0 }
 0x160   : > { %v1033_v8 = vmax.f32 %v1019_v4, 0.0  ;;  %v1023_v9 = vpop.f32.mrb[11].mxu0 }
 0x161   : > { %v1034_v10 = vmax.f32 %v1021_v46, 0.0 }
 0x162   : > { %v1097_v11 = vmul.f32 %v1074_v5, %v1033_v8 }
 0x163   : > { %v1098_v12 = vmul.f32 %v1078_v6, %v1034_v10 }
 0x165   : > { %v1324_v13 = vpack.c.bf16 %v1098_v12, %v1097_v11 }
 0x167   : > { %1143 = vst [vmem:[%s1699_s30 + $0x20] sm:$0xff] %v1324_v13 }
 0x168 PF: > { %s14_s15 = sadd.s32 1, %s1491_s15  }
 0x169   : > { %p11_p4 = scmp.ge.s32.totalorder %s14_s15, 4  }
 0x16b   :  { %13 = sbr.rel (!%p11_p4) target bundleno = 1 (0x1), region = 66 }

// kernel: custom_resnet_forward.6
= control target key start
LH: loop header
LB: loop body
LE: loop exit
PB: predicated region body
PF: predicated region fallthrough
CT: control target
= control target key end

     0   :  { %s1556_s15 = smov 0   ;;  %s2105_s0 = inlined_call_operand.vmem [shape: bf16[2,4,8,384], index: 0, kind: input, shape index: {}]   ;;  %s2106_s1 = inlined_call_operand.vmem [shape: bf16[4,8,72], index: 1, kind: input, shape index: {}]   ;;  %s2107_s2 = inlined_call_operand.vmem [shape: f32[4,8,1], index: 2, kind: input, shape index: {}]   ;;  %s2108_s3 = inlined_call_operand.vmem [shape: f32[1,384], index: 3, kind: input, shape index: {}]   ;;  %s2109_s4 = inlined_call_operand.vmem [shape: bf16[2,8,384], index: 4, kind: output, shape index: {}]  }
   0x1 LB: > { %s1177_s16 = sadd.s32 4294967295, %s1518_s15   ;;  %p1181_p0 = scmp.ge.s32.totalorder %s1518_s15, 1  ;;  %s1518_s15 = sphi %s1556_s15, %s14_s15  }
   0x2   : > { %p162_p1 = scmp.lt.s32.totalorder %s1518_s15, 3 }
   0x4   : > { %p163_p2 = pnand %p1181_p0, %p162_p1 }
   0x5   : > { %p188_p3 = scmp.lt.s32.totalorder (!%p163_p2), %s1177_s16, 1  ;;  %s1520_s21 = smov (!%p163_p2), 127   ;;  %v232_v22 = vlaneseq (!%p163_p2)  ;;  %vm1530_vm3 = vmmov (!%p163_p2), 0   ;;  %vm419_vm9 = vcmask (!%p163_p2), 1043456   ;;  %vm415_vm10 = vcmask (!%p163_p2), 588800  }
   0x6   : > { %166 = sbr.rel (%p163_p2) target bundleno = 1655 (0x677), region = 36  ;;  %s1521_s22 = smov (!%p163_p2), 110  }
   0x7   : > { %s1522_s23 = smov (!%p163_p2), 109   ;;  %v1600_v23 = vand.u32 (!%p163_p2), 127, %v232_v22  ;;  %v299_v43 = vshrl.u32 (!%p163_p2), %v232_v22, 7  ;;  %s1524_s26 = smov (!%p163_p2), 18  }
   0x8   : > { %s1525_s27 = smov (!%p163_p2), 19   ;;  %s1526_s28 = smov (!%p163_p2), 1  }
   0x9   : > { %vm234_vm0 = vcmp.lt.s32.totalorder (!%p163_p2), %v1600_v23, 127  ;;  %vm265_vm1 = vcmp.lt.s32.totalorder (!%p163_p2), %v1600_v23, 110  ;;  %vm290_vm2 = vcmp.lt.s32.totalorder (!%p163_p2), %v1600_v23, 109  ;;  %v300_v60 = vsub.s32 (!%p163_p2), 0, %v299_v43  ;;  %s1527_s29 = smov (!%p163_p2), 17   ;;  %s1528_s30 = smov (!%p163_p2), 111  }
   0xa   : > { %vm334_vm4 = vcmp.lt.s32.totalorder (!%p163_p2), %v1600_v23, 18  ;;  %vm324_vm5 = vcmp.lt.s32.totalorder (!%p163_p2), %v1600_v23, 19  ;;  %vm354_vm6 = vcmp.lt.s32.totalorder (!%p163_p2), %v1600_v23, 1  ;;  %vm344_vm7 = vcmp.lt.s32.totalorder (!%p163_p2), %v1600_v23, 17 }
   0xb   : > { %vm373_vm8 = vcmp.lt.s32.totalorder (!%p163_p2), %v1600_v23, 111 }
   0xd   : > { %s2111_s16 = smov (!%p188_p3, %s1177_s16), 1 }
   0xe   : > { %s1294_s17 = smul.u32 48, %s2111_s16 }
  0x10   : > { %s1570_s20 = scalar_lea.vmem %s2105_s0, %s1294_s17 }
  0x11   : > { %v200_v0 = vld [vmem:[%s1570_s20] sm:$0xff]  ;;  %v1574_v1 = vld [vmem:[%s1570_s20 + $0x18] sm:$0xff]  ;;  %v1184_v7 = vld [vmem:[%s1570_s20 + $0xc] sm:$0xff] }
  0x12   : > { %v1577_v2 = vld [vmem:[%s1570_s20 + $0x8] ss:$24 sps:$4 sm:$0xff]   ;;  %v202_v3 = vunpack.c.l.bf16 %v200_v0  ;;  %v203_v4 = vunpack.c.h.bf16 %v200_v0  ;;  %v215_v5 = vunpack.c.h.bf16 %v1574_v1  ;;  %v1583_v8 = vld [vmem:[%s1570_s20 + $0x14] ss:$24 sps:$4 sm:$0xff]   ;;  %v214_v9 = vunpack.c.l.bf16 %v1574_v1 }
  0x13   : > { %v216_v6 = vunpack.c.h.bf16 %v1577_v2  ;;  %v204_v10 = vunpack.c.l.bf16 %v1577_v2  ;;  %v208_v11 = vunpack.c.l.bf16 %v1184_v7  ;;  %v209_v12 = vunpack.c.h.bf16 %v1184_v7  ;;  %v1188_v28 = vld [vmem:[%s1570_s20 + $0x24] sm:$0xff] }
  0x14   : > { %v1315_v13 = vpack.i.bf16 %v203_v4, %v202_v3  ;;  %v210_v15 = vunpack.c.l.bf16 %v1583_v8  ;;  %v220_v32 = vunpack.c.l.bf16 %v1188_v28  ;;  %v222_v40 = vunpack.c.h.bf16 %v1583_v8  ;;  %v199_v8 = vld [vmem:[%s2108_s3] sm:$0x7] }
  0x15   : > { %v1325_v14 = vpack.i.bf16 %v216_v6, %v215_v5  ;;  %v223_v16 = vmax.f32 %v202_v3, %v208_v11  ;;  %v224_v17 = vmax.f32 %v203_v4, %v209_v12  ;;  %v1320_v18 = vpack.i.bf16 %v214_v9, %v204_v10 }
  0x16   : > { %1316 = vrot.lane.b32.xlu0 %v1315_v13, %s1520_s21  ;;  %v225_v19 = vmax.f32 %v204_v10, %v210_v15  ;;  %v1335_v20 = vpack.i.bf16 %v208_v11, %v204_v10  ;;  %v1340_v21 = vpack.i.bf16 %v210_v15, %v209_v12  ;;  %v221_v44 = vunpack.c.h.bf16 %v1188_v28 }
  0x17   : > { %1326 = vrot.lane.b32.xlu1 %v1325_v14, %s1520_s21 }
  0x1a   : > { %1321 = vrot.lane.b32.xlu0 %v1320_v18, %s1520_s21  ;;  %v1638_v18 = vrot.slane %v199_v8, %v300_v60 }
  0x1b   : > { %1331 = vrot.lane.b32.xlu1 %v1315_v13, %s1521_s22 }
  0x1e   : > { %1336 = vrot.lane.b32.xlu0 %v1335_v20, %s1521_s22 }
  0x1f   : > { %1341 = vrot.lane.b32.xlu1 %v1340_v21, %s1521_s22 }
  0x22   : > { %1346 = vrot.lane.b32.xlu0 %v1315_v13, %s1522_s23 }
  0x23   : > { %288 = vrot.lane.b32.xlu1 %v204_v10, %s1522_s23 }
  0x88   : > { %v1317_v24 = vpop.permute.xlu0 %1316 }
  0x89   : > { %v1327_v25 = vpop.permute.xlu1 %1326  ;;  %v1319_v26 = vunpack.i.h.bf16 %v1317_v24  ;;  %v1318_v27 = vunpack.i.l.bf16 %v1317_v24 }
  0x8a   : > { %v1328_v31 = vunpack.i.l.bf16 %v1327_v25  ;;  %v1329_v45 = vunpack.i.h.bf16 %v1327_v25  ;;  %v1523_v25 = vmov 0.0  }
  0x8b   : > { %v236_v29 = vsel %vm234_vm0, %v1318_v27, %v1319_v26  ;;  %1238 = vmatprep.subr.bf16.mxu1 %v1523_v25  ;;  %1248 = vmatprep.mubr.msk.bf16.mxu1 %vm1530_vm3, %v1523_v25 }
  0x8c   : > { %v238_v30 = vmax.f32 %v223_v16, %v236_v29  ;;  %v1322_v33 = vpop.permute.xlu0 %1321  ;;  %v253_v61 = vsel %vm234_vm0, %v1328_v31, %v1329_v45 }
  0x8d   : > { %v1332_v34 = vpop.permute.xlu1 %1331  ;;  %v1324_v35 = vunpack.i.h.bf16 %v1322_v33  ;;  %v1323_v36 = vunpack.i.l.bf16 %v1322_v33 }
  0x8e   : > { %v1334_v37 = vunpack.i.h.bf16 %v1332_v34  ;;  %v1333_v38 = vunpack.i.l.bf16 %v1332_v34  ;;  %v241_v39 = vmax.f32 %v238_v30, %v214_v9  ;;  %v304_v9 = vsub.s32 1, %v299_v43 }
  0x8f   : > { %v235_v41 = vsel %vm234_vm0, %v1319_v26, %v1323_v36  ;;  %v237_v42 = vsel %vm234_vm0, %v1323_v36, %v1318_v27  ;;  %v254_v51 = vsel %vm234_vm0, %v1324_v35, %v1328_v31  ;;  %v255_v1 = vsel %vm234_vm0, %v1329_v45, %v1324_v35 }
  0x90   : > { %v239_v46 = vmax.f32 %v224_v17, %v235_v41  ;;  %v240_v47 = vmax.f32 %v225_v19, %v237_v42  ;;  %v244_v48 = vmax.f32 %v241_v39, %v220_v32  ;;  %v1337_v49 = vpop.permute.xlu0 %1336  ;;  %v267_v52 = vsel %vm265_vm1, %v1333_v38, %v1334_v37 }
  0x91   : > { %v1342_v50 = vpop.permute.xlu1 %1341  ;;  %v1339_v53 = vunpack.i.h.bf16 %v1337_v49  ;;  %v1338_v58 = vunpack.i.l.bf16 %v1337_v49  ;;  %v1642_v21 = vrot.slane %v199_v8, %v304_v9  ;;  %v308_v26 = vsub.s32 2, %v299_v43 }
  0x92   : > { %v1343_v54 = vunpack.i.l.bf16 %v1342_v50  ;;  %v242_v55 = vmax.f32 %v239_v46, %v215_v5  ;;  %v243_v56 = vmax.f32 %v240_v47, %v216_v6  ;;  %v256_v57 = vmax.f32 %v244_v48, %v254_v51 }
  0x93   : > { %v1344_v2 = vunpack.i.h.bf16 %v1342_v50  ;;  %v266_v12 = vsel %vm265_vm1, %v1334_v37, %v1338_v58  ;;  %v268_v13 = vsel %vm265_vm1, %v1338_v58, %v1333_v38  ;;  %v1655_v32 = vrot.slane %v199_v8, %v308_v26  ;;  %v317_v38 = vld [vmem:[%s2107_s2] sm:$0xff] }
  0x94   : > { %v279_v59 = vsel %vm265_vm1, %v1339_v53, %v1343_v54  ;;  %v246_v62 = vmax.f32 %v243_v56, %v222_v40  ;;  %v269_v63 = vmax.f32 %v256_v57, %v267_v52  ;;  %v1347_v0 = vpop.permute.xlu0 %1346  ;;  %v245_v3 = vmax.f32 %v242_v55, %v221_v44 }
  0x95   : > { %v1349_v4 = vunpack.i.h.bf16 %v1347_v0  ;;  %v1348_v5 = vunpack.i.l.bf16 %v1347_v0  ;;  %v289_v10 = vpop.permute.xlu1 %288  ;;  %v278_v15 = vsel %vm265_vm1, %v1343_v54, %v1344_v2  ;;  %v280_v24 = vsel %vm265_vm1, %v1344_v2, %v1339_v53 }
  0x96   : > { %v258_v6 = vmax.f32 %v246_v62, %v255_v1  ;;  %v281_v7 = vmax.f32 %v269_v63, %v279_v59  ;;  %v257_v11 = vmax.f32 %v245_v3, %v253_v61  ;;  %v1529_v37 = vmov 0  }
  0x97   : > { %v292_v14 = vsel %vm290_vm2, %v1348_v5, %v1349_v4  ;;  %v291_v19 = vsel %vm290_vm2, %v1349_v4, %v289_v10  ;;  %v293_v29 = vsel %vm290_vm2, %v289_v10, %v1348_v5  ;;  %461 = vmatprep.mubr.bf16.mxu0 %v1529_v37  ;;  %1390 = vset.pattern.permute.xlu0 %v1529_v37 }
  0x98   : > { %v270_v16 = vmax.f32 %v257_v11, %v266_v12  ;;  %v271_v17 = vmax.f32 %v258_v6, %v268_v13  ;;  %v294_v20 = vmax.f32 %v281_v7, %v292_v14  ;;  %1471 = vset.pattern.permute.xlu1 %v1529_v37 }
  0x9a   : > { %v282_v22 = vmax.f32 %v270_v16, %v278_v15  ;;  %v283_v27 = vmax.f32 %v271_v17, %v280_v24  ;;  %v1650_v30 = vmul.f32 %v1638_v18, %v294_v20 }
  0x9c   : > { %v295_v28 = vmax.f32 %v282_v22, %v291_v19  ;;  %v296_v33 = vmax.f32 %v283_v27, %v293_v29 }
  0x9e   : > { %v1653_v31 = vmul.f32 %v1642_v21, %v295_v28  ;;  %v1662_v35 = vmul.f32 %v1655_v32, %v296_v33 }
  0xa0   : > { %v1355_v34 = vpack.i.bf16 %v1653_v31, %v1650_v30  ;;  %v1370_v36 = vpack.i.bf16 %v1662_v35, %v1653_v31 }
  0xa2   : > { %1356 = vrot.lane.b32.xlu1 %v1355_v34, %s1524_s26  ;;  %1351 = vrot.lane.b32.xlu0 %v1355_v34, %s1525_s27 }
  0xa6   : > { %332 = vrot.lane.b32.xlu1 %v1662_v35, %s1524_s26  ;;  %322 = vrot.lane.b32.xlu0 %v1662_v35, %s1525_s27 }
  0xaa   : > { %1366 = vrot.lane.b32.xlu1 %v1355_v34, %s1526_s28  ;;  %1361 = vrot.lane.b32.xlu0 %v1355_v34, %s1527_s29 }
  0xae   : > { %352 = vrot.lane.b32.xlu1 %v1662_v35, %s1526_s28  ;;  %342 = vrot.lane.b32.xlu0 %v1662_v35, %s1527_s29 }
  0xb2   : > { %358 = vrot.lane.b32.xlu1 %v1650_v30, %s1520_s21  ;;  %1371 = vrot.lane.b32.xlu0 %v1370_v36, %s1520_s21 }
  0xb6   : > { %1381 = vrot.lane.b32.xlu1 %v1370_v36, %s1521_s22  ;;  %1376 = vrot.lane.b32.xlu0 %v1370_v36, %s1528_s30 }
  0xba   : > { %377 = vrot.lane.b32.xlu1 %v1650_v30, %s1521_s22  ;;  %367 = vrot.lane.b32.xlu0 %v1650_v30, %s1528_s30 }
  0xbe   : > { %390 = vrot.lane.b32.xlu1 %v1662_v35, %s1522_s23  ;;  %1386 = vrot.lane.b32.xlu0 %v1355_v34, %s1522_s23 }
  0xc2   : > { %412 = vperm.xlu0 %1390, %v317_v38  }
 0x114   : > { %v1357_v39 = vpop.permute.xlu1 %1356  ;;  %v1352_v40 = vpop.permute.xlu0 %1351 }
 0x115   : > { %v1359_v41 = vunpack.i.h.bf16 %v1357_v39  ;;  %v1358_v42 = vunpack.i.l.bf16 %v1357_v39  ;;  %v1354_v43 = vunpack.i.h.bf16 %v1352_v40  ;;  %v1353_v44 = vunpack.i.l.bf16 %v1352_v40 }
 0x117   : > { %v326_v45 = vsel %vm324_vm5, %v1353_v44, %v1354_v43  ;;  %v336_v46 = vsel %vm334_vm4, %v1358_v42, %v1359_v41 }
 0x118   : > { %v333_v47 = vpop.permute.xlu1 %332  ;;  %v323_v48 = vpop.permute.xlu0 %322  ;;  %v396_v49 = vpack.c.bf16 %v336_v46, %v326_v45 }
 0x119   : > { %v335_v50 = vsel %vm334_vm4, %v1359_v41, %v333_v47  ;;  %v337_v51 = vsel %vm334_vm4, %v333_v47, %v1358_v42  ;;  %v325_v52 = vsel %vm324_vm5, %v1354_v43, %v323_v48  ;;  %v327_v53 = vsel %vm324_vm5, %v323_v48, %v1353_v44 }
 0x11a   : > { %429 = vmatprep.subr.bf16.mxu0 %v396_v49  ;;  %v395_v54 = vpack.c.bf16 %v337_v51, %v327_v53  ;;  %v397_v55 = vpack.c.bf16 %v335_v50, %v325_v52 }
 0x11c   : > { %v1367_v56 = vpop.permute.xlu1 %1366  ;;  %v1362_v57 = vpop.permute.xlu0 %1361  ;;  %430 = vmatpush1.bf16.msra.mxu0 %v395_v54  ;;  %1239 = vmatpush3.bf16.msra.mxu1 %v397_v55 }
 0x11d   : > { %v1369_v58 = vunpack.i.h.bf16 %v1367_v56  ;;  %v1368_v59 = vunpack.i.l.bf16 %v1367_v56  ;;  %v1364_v60 = vunpack.i.h.bf16 %v1362_v57  ;;  %v1363_v61 = vunpack.i.l.bf16 %v1362_v57  ;;  %1240 = vmatprep.subr.bf16.mxu1 %v1523_v25  ;;  %v316_v57 = vld [vmem:[%s2106_s1] sm:$0xf] }
 0x11f   : > { %v346_v62 = vsel %vm344_vm7, %v1363_v61, %v1364_v60  ;;  %v356_v63 = vsel %vm354_vm6, %v1368_v59, %v1369_v58 }
 0x120   : > { %v353_v0 = vpop.permute.xlu1 %352  ;;  %v343_v3 = vpop.permute.xlu0 %342  ;;  %v399_v1 = vpack.c.bf16 %v356_v63, %v346_v62 }
 0x121   : > { %v355_v2 = vsel %vm354_vm6, %v1369_v58, %v353_v0  ;;  %v357_v4 = vsel %vm354_vm6, %v353_v0, %v1368_v59  ;;  %v345_v5 = vsel %vm344_vm7, %v1364_v60, %v343_v3  ;;  %v347_v6 = vsel %vm344_vm7, %v343_v3, %v1363_v61 }
 0x122   : > { %v398_v7 = vpack.c.bf16 %v357_v4, %v347_v6  ;;  %v400_v8 = vpack.c.bf16 %v355_v2, %v345_v5  ;;  %431 = vmatprep.subr.bf16.mxu0 %v399_v1 }
 0x124   : > { %v359_v9 = vpop.permute.xlu1 %358  ;;  %v1372_v10 = vpop.permute.xlu0 %1371  ;;  %432 = vmatpush1.bf16.msra.mxu0 %v398_v7  ;;  %1241 = vmatpush3.bf16.msra.mxu1 %v400_v8 }
 0x125   : > { %v1374_v11 = vunpack.i.h.bf16 %v1372_v10  ;;  %v1373_v12 = vunpack.i.l.bf16 %v1372_v10  ;;  %1242 = vmatprep.subr.bf16.mxu1 %v1523_v25 }
 0x127   : > { %v364_v13 = vsel %vm234_vm0, %v1373_v12, %v1374_v11  ;;  %v366_v14 = vsel %vm234_vm0, %v1374_v11, %v359_v9  ;;  %v365_v15 = vsel %vm234_vm0, %v359_v9, %v1373_v12 }
 0x128   : > { %v1382_v16 = vpop.permute.xlu1 %1381  ;;  %v1377_v17 = vpop.permute.xlu0 %1376  ;;  %v402_v19 = vpack.c.bf16 %v364_v13, %v1653_v31  ;;  %v403_v20 = vpack.c.bf16 %v366_v14, %v1662_v35  ;;  %v401_v22 = vpack.c.bf16 %v365_v15, %v1650_v30  ;;  %v1194_v14 = vld [vmem:[%s2107_s2 + $0x8] sm:$0xff] }
 0x129   : > { %v1384_v24 = vunpack.i.h.bf16 %v1382_v16  ;;  %v1383_v26 = vunpack.i.l.bf16 %v1382_v16  ;;  %v1379_v27 = vunpack.i.h.bf16 %v1377_v17  ;;  %v1378_v28 = vunpack.i.l.bf16 %v1377_v17 }
 0x12a   : > { %433 = vmatprep.subr.bf16.mxu0 %v402_v19  ;;  %1243 = vmatpush3.bf16.msra.mxu1 %v403_v20 }
 0x12b   : > { %434 = vmatpush1.bf16.msra.mxu0 %v401_v22  ;;  %v374_v29 = vsel %vm373_vm8, %v1378_v28, %v1379_v27  ;;  %v383_v33 = vsel %vm265_vm1, %v1383_v26, %v1384_v24  ;;  %1244 = vmatprep.subr.bf16.mxu1 %v1523_v25 }
 0x12c   : > { %v378_v34 = vpop.permute.xlu1 %377  ;;  %v368_v36 = vpop.permute.xlu0 %367  ;;  %v405_v38 = vpack.c.bf16 %v383_v33, %v374_v29 }
 0x12d   : > { %v384_v39 = vsel %vm265_vm1, %v378_v34, %v1383_v26  ;;  %v385_v40 = vsel %vm265_vm1, %v1384_v24, %v378_v34  ;;  %v375_v41 = vsel %vm373_vm8, %v368_v36, %v1378_v28  ;;  %v376_v42 = vsel %vm373_vm8, %v1379_v27, %v368_v36 }
 0x12e   : > { %v404_v43 = vpack.c.bf16 %v384_v39, %v375_v41  ;;  %v406_v44 = vpack.c.bf16 %v385_v40, %v376_v42  ;;  %435 = vmatprep.subr.bf16.mxu0 %v405_v38 }
 0x130   : > { %v1387_v45 = vpop.permute.xlu0 %1386  ;;  %436 = vmatpush1.bf16.msra.mxu0 %v404_v43  ;;  %1245 = vmatpush3.bf16.msra.mxu1 %v406_v44  ;;  %v391_v48 = vpop.permute.xlu1 %390 }
 0x131   : > { %v1389_v46 = vunpack.i.h.bf16 %v1387_v45  ;;  %v1388_v47 = vunpack.i.l.bf16 %v1387_v45  ;;  %1246 = vmatprep.subr.bf16.mxu1 %v1523_v25 }
 0x133   : > { %v392_v49 = vsel %vm290_vm2, %v1389_v46, %v391_v48  ;;  %v393_v50 = vsel %vm290_vm2, %v1388_v47, %v1389_v46  ;;  %v394_v51 = vsel %vm290_vm2, %v391_v48, %v1388_v47 }
 0x134   : > { %v408_v52 = vpack.c.bf16 %v392_v49, %v392_v49  ;;  %v407_v53 = vpack.c.bf16 %v393_v50, %v393_v50  ;;  %v409_v54 = vpack.c.bf16 %v394_v51, %v394_v51 }
 0x136   : > { %1190 = vmatprep.subr.msk.bf16.mxu0 %vm419_vm9, %v408_v52  ;;  %v421_v55 = vsel %vm419_vm9, %v407_v53, 0  ;;  %v427_v56 = vsel %vm419_vm9, %v409_v54, 0 }
 0x137   : > { %438 = vmatpush1.bf16.msra.mxu0 %v421_v55  ;;  %1247 = vmatpush3.bf16.msra.mxu1 %v427_v56 }
 0x138   : > { %1252 = vmatprep.subr.bf16.mxu1 %v1523_v25 }
 0x13a   : > { %1191 = vmatmul.mubr.msk.bf16.vlgmr.msra.gmra.mrb[0].mxu0 %vm415_vm10, %v316_v57  ;;  %1249 = vmatmul.mubr.msk.bf16.vlgmr.msra.gmra.mrb[0].mxu1 %vm415_vm10, %v316_v57 }
 0x13b   : > { %1262 = vmatprep.mubr.msk.bf16.mxu1 %vm1530_vm3, %v1523_v25  ;;  %656 = vmatprep.mubr.bf16.mxu0 %v1529_v37 }
 0x141   : > { %v413_v58 = vpop.permute.xlu0 %412 }
 0x20d   : > { %v463_v59 = vpop.f32.mrb[0].mxu0  ;;  %v504_v60 = vpop.f32.mrb[0].mxu1 }
 0x20e   : > { %v505_v61 = vadd.f32 %v504_v60, %v413_v58  ;;  %v465_v62 = vpop.f32.mrb[1].mxu0  ;;  %v1250_v63 = vpop.f32.mrb[1].mxu1  ;;  %v464_v5 = vadd.f32 %v463_v59, %v413_v58 }
 0x20f   : > { %v507_v0 = vpop.f32.mrb[2].mxu1  ;;  %v467_v3 = vpop.f32.mrb[2].mxu0  ;;  %v466_v7 = vadd.f32 %v465_v62, %v413_v58 }
 0x210   : > { %v512_v1 = vmax.f32 %v505_v61, 0.0  ;;  %v1251_v2 = vpop.f32.mrb[3].mxu1  ;;  %v468_v4 = vpop.f32.mrb[3].mxu0  ;;  %v510_v8 = vmax.f32 %v464_v5, 0.0 }
 0x211   : > { %v511_v9 = vmax.f32 %v466_v7, 0.0 }
 0x212   : > { %v1769_v6 = vmul.f32 %v512_v1, %v1655_v32  ;;  %v1780_v10 = vmul.f32 %v510_v8, %v1638_v18 }
 0x213   : > { %v1783_v11 = vmul.f32 %v511_v9, %v1642_v21 }
 0x214   : > { %533 = vrot.lane.b32.xlu1 %v1769_v6, %s1524_s26  ;;  %524 = vrot.lane.b32.xlu0 %v1769_v6, %s1525_s27 }
 0x215   : > { %v1401_v12 = vpack.i.bf16 %v1783_v11, %v1780_v10  ;;  %v1411_v13 = vpack.i.bf16 %v1769_v6, %v1783_v11 }
 0x218   : > { %551 = vrot.lane.b32.xlu1 %v1769_v6, %s1526_s28  ;;  %542 = vrot.lane.b32.xlu0 %v1769_v6, %s1527_s29 }
 0x21c   : > { %565 = vrot.lane.b32.xlu0 %v1780_v10, %s1528_s30  ;;  %556 = vrot.lane.b32.xlu1 %v1780_v10, %s1520_s21 }
 0x220   : > { %1402 = vrot.lane.b32.xlu0 %v1401_v12, %s1527_s29  ;;  %1392 = vrot.lane.b32.xlu1 %v1401_v12, %s1525_s27 }
 0x224   : > { %1412 = vrot.lane.b32.xlu0 %v1411_v13, %s1520_s21  ;;  %1397 = vrot.lane.b32.xlu1 %v1401_v12, %s1524_s26 }
 0x228   : > { %1417 = vrot.lane.b32.xlu0 %v1411_v13, %s1528_s30  ;;  %1407 = vrot.lane.b32.xlu1 %v1401_v12, %s1526_s28 }
 0x22c   : > { %1427 = vrot.lane.b32.xlu0 %v1401_v12, %s1522_s23  ;;  %574 = vrot.lane.b32.xlu1 %v1780_v10, %s1521_s22 }
 0x230   : > { %609 = vperm.xlu0 %1390, %v1194_v14   ;;  %1422 = vrot.lane.b32.xlu1 %v1411_v13, %s1521_s22 }
 0x234   : > { %587 = vrot.lane.b32.xlu1 %v1769_v6, %s1522_s23 }
 0x286   : > { %v534_v15 = vpop.permute.xlu1 %533  ;;  %v525_v16 = vpop.permute.xlu0 %524 }
 0x28a   : > { %v552_v17 = vpop.permute.xlu1 %551  ;;  %v543_v19 = vpop.permute.xlu0 %542 }
 0x28e   : > { %v1808_v20 = vpop.permute.xlu0 %565  ;;  %v557_v22 = vpop.permute.xlu1 %556 }
 0x292   : > { %v1403_v24 = vpop.permute.xlu0 %1402  ;;  %v1393_v26 = vpop.permute.xlu1 %1392 }
 0x293   : > { %v1395_v27 = vunpack.i.h.bf16 %v1393_v26  ;;  %v1405_v36 = vunpack.i.h.bf16 %v1403_v24  ;;  %v1394_v38 = vunpack.i.l.bf16 %v1393_v26  ;;  %v1404_v39 = vunpack.i.l.bf16 %v1403_v24 }
 0x295   : > { %v526_v40 = vsel %vm324_vm5, %v1395_v27, %v525_v16  ;;  %v544_v49 = vsel %vm344_vm7, %v1405_v36, %v543_v19  ;;  %v528_v50 = vsel %vm324_vm5, %v525_v16, %v1394_v38  ;;  %v527_v51 = vsel %vm324_vm5, %v1394_v38, %v1395_v27 }
 0x296   : > { %v1413_v28 = vpop.permute.xlu0 %1412  ;;  %v1398_v29 = vpop.permute.xlu1 %1397  ;;  %v545_v56 = vsel %vm344_vm7, %v1404_v39, %v1405_v36  ;;  %v546_v0 = vsel %vm344_vm7, %v543_v19, %v1404_v39 }
 0x297   : > { %v1400_v33 = vunpack.i.h.bf16 %v1398_v29  ;;  %v1399_v34 = vunpack.i.l.bf16 %v1398_v29  ;;  %v1415_v45 = vunpack.i.h.bf16 %v1413_v28  ;;  %v1414_v53 = vunpack.i.l.bf16 %v1413_v28 }
 0x299   : > { %v535_v41 = vsel %vm334_vm4, %v1400_v33, %v534_v15  ;;  %v537_v42 = vsel %vm334_vm4, %v534_v15, %v1399_v34  ;;  %v536_v52 = vsel %vm334_vm4, %v1399_v34, %v1400_v33  ;;  %v564_v62 = vsel %vm234_vm0, %v1415_v45, %v557_v22 }
 0x29a   : > { %v594_v43 = vpack.c.bf16 %v535_v41, %v526_v40  ;;  %v1408_v44 = vpop.permute.xlu1 %1407  ;;  %v1418_v46 = vpop.permute.xlu0 %1417  ;;  %v592_v54 = vpack.c.bf16 %v537_v42, %v528_v50  ;;  %v593_v59 = vpack.c.bf16 %v536_v52, %v527_v51  ;;  %v562_v5 = vsel %vm234_vm0, %v1414_v53, %v1415_v45  ;;  %v1193_v42 = vld [vmem:[%s2106_s1 + $0x4] sm:$0xf] }
 0x29b   : > { %v1410_v47 = vunpack.i.h.bf16 %v1408_v44  ;;  %v1409_v48 = vunpack.i.l.bf16 %v1408_v44  ;;  %v1420_v3 = vunpack.i.h.bf16 %v1418_v46  ;;  %v1419_v1 = vunpack.i.l.bf16 %v1418_v46 }
 0x29c   : > { %1253 = vmatpush3.bf16.msra.mxu1 %v594_v43  ;;  %624 = vmatprep.subr.bf16.mxu0 %v593_v59  ;;  %v600_v7 = vpack.c.bf16 %v564_v62, %v1769_v6  ;;  %v563_v13 = vsel %vm234_vm0, %v557_v22, %v1414_v53  ;;  %v599_v16 = vpack.c.bf16 %v562_v5, %v1783_v11 }
 0x29d   : > { %v553_v55 = vsel %vm354_vm6, %v1410_v47, %v552_v17  ;;  %1254 = vmatprep.subr.bf16.mxu1 %v1523_v25  ;;  %v555_v58 = vsel %vm354_vm6, %v552_v17, %v1409_v48  ;;  %v554_v61 = vsel %vm354_vm6, %v1409_v48, %v1410_v47  ;;  %625 = vmatpush1.bf16.msra.mxu0 %v592_v54 }
 0x29e   : > { %v597_v57 = vpack.c.bf16 %v553_v55, %v544_v49  ;;  %v575_v60 = vpop.permute.xlu1 %574  ;;  %v596_v63 = vpack.c.bf16 %v554_v61, %v545_v56  ;;  %v595_v2 = vpack.c.bf16 %v555_v58, %v546_v0  ;;  %v1428_v4 = vpop.permute.xlu0 %1427  ;;  %v573_v14 = vsel %vm373_vm8, %v1420_v3, %v1808_v20 }
 0x29f   : > { %v1430_v15 = vunpack.i.h.bf16 %v1428_v4  ;;  %v1429_v17 = vunpack.i.l.bf16 %v1428_v4  ;;  %v571_v19 = vsel %vm373_vm8, %v1419_v1, %v1420_v3  ;;  %v598_v28 = vpack.c.bf16 %v563_v13, %v1780_v10 }
 0x2a0   : > { %1255 = vmatpush3.bf16.msra.mxu1 %v597_v57  ;;  %626 = vmatprep.subr.bf16.mxu0 %v596_v63  ;;  %v572_v34 = vsel %vm373_vm8, %v1808_v20, %v1419_v1  ;;  %v1199_v63 = vld [vmem:[%s2107_s2 + $0x10] sm:$0xff] }
 0x2a1   : > { %1256 = vmatprep.subr.bf16.mxu1 %v1523_v25  ;;  %627 = vmatpush1.bf16.msra.mxu0 %v595_v2  ;;  %v590_v39 = vsel %vm290_vm2, %v1429_v17, %v1430_v15 }
 0x2a2   : > { %v1423_v8 = vpop.permute.xlu1 %1422  ;;  %628 = vmatprep.subr.bf16.mxu0 %v599_v16  ;;  %v604_v41 = vpack.c.bf16 %v590_v39, %v590_v39 }
 0x2a3   : > { %v1425_v9 = vunpack.i.h.bf16 %v1423_v8  ;;  %v1424_v12 = vunpack.i.l.bf16 %v1423_v8 }
 0x2a4   : > { %1257 = vmatpush3.bf16.msra.mxu1 %v600_v7  ;;  %v616_v20 = vsel %vm419_vm9, %v604_v41, 0 }
 0x2a5   : > { %v582_v6 = vsel %vm265_vm1, %v1425_v9, %v575_v60  ;;  %1258 = vmatprep.subr.bf16.mxu1 %v1523_v25  ;;  %v580_v22 = vsel %vm265_vm1, %v1424_v12, %v1425_v9  ;;  %v581_v26 = vsel %vm265_vm1, %v575_v60, %v1424_v12  ;;  %629 = vmatpush1.bf16.msra.mxu0 %v598_v28 }
 0x2a6   : > { %v603_v24 = vpack.c.bf16 %v582_v6, %v573_v14  ;;  %v588_v11 = vpop.permute.xlu1 %587  ;;  %v602_v27 = vpack.c.bf16 %v580_v22, %v571_v19  ;;  %v601_v38 = vpack.c.bf16 %v581_v26, %v572_v34 }
 0x2a7   : > { %v589_v29 = vsel %vm290_vm2, %v1430_v15, %v588_v11  ;;  %v591_v33 = vsel %vm290_vm2, %v588_v11, %v1429_v17 }
 0x2a8   : > { %v606_v36 = vpack.c.bf16 %v591_v33, %v591_v33  ;;  %1259 = vmatpush3.bf16.msra.mxu1 %v603_v24  ;;  %v605_v10 = vpack.c.bf16 %v589_v29, %v589_v29  ;;  %630 = vmatprep.subr.bf16.mxu0 %v602_v27 }
 0x2a9   : > { %1260 = vmatprep.subr.bf16.mxu1 %v1523_v25  ;;  %631 = vmatpush1.bf16.msra.mxu0 %v601_v38 }
 0x2aa   : > { %v622_v40 = vsel %vm419_vm9, %v606_v36, 0  ;;  %1195 = vmatprep.subr.msk.bf16.mxu0 %vm419_vm9, %v605_v10 }
 0x2ac   : > { %1261 = vmatpush3.bf16.msra.mxu1 %v622_v40 }
 0x2ad   : > { %1266 = vmatprep.subr.bf16.mxu1 %v1523_v25  ;;  %633 = vmatpush1.bf16.msra.mxu0 %v616_v20 }
 0x2af   : > { %1263 = vmatmul.mubr.msk.bf16.vlgmr.msra.gmra.mrb[4].mxu1 %vm415_vm10, %v1193_v42  ;;  %v610_v43 = vpop.permute.xlu0 %609 }
 0x2b0   : > { %1276 = vmatprep.mubr.msk.bf16.mxu1 %vm1530_vm3, %v1523_v25  ;;  %1196 = vmatmul.mubr.msk.bf16.vlgmr.msra.gmra.mrb[4].mxu0 %vm415_vm10, %v1193_v42 }
 0x2b1   : > { %854 = vmatprep.mubr.bf16.mxu0 %v1529_v37 }
 0x382   : > { %v699_v44 = vpop.f32.mrb[4].mxu1 }
 0x383   : > { %v700_v45 = vadd.f32 %v699_v44, %v610_v43  ;;  %v1264_v46 = vpop.f32.mrb[5].mxu1  ;;  %v658_v51 = vpop.f32.mrb[4].mxu0 }
 0x384   : > { %v702_v47 = vpop.f32.mrb[6].mxu1  ;;  %v659_v52 = vadd.f32 %v658_v51, %v610_v43  ;;  %v660_v53 = vpop.f32.mrb[5].mxu0 }
 0x385   : > { %v707_v48 = vadd.f32 %v700_v45, %v1662_v35  ;;  %v1265_v49 = vpop.f32.mrb[7].mxu1  ;;  %v661_v55 = vadd.f32 %v660_v53, %v610_v43  ;;  %v662_v56 = vpop.f32.mrb[6].mxu0 }
 0x386   : > { %v705_v57 = vadd.f32 %v659_v52, %v1650_v30  ;;  %v663_v58 = vpop.f32.mrb[7].mxu0 }
 0x387   : > { %v710_v50 = vmax.f32 %v707_v48, 0.0  ;;  %v706_v59 = vadd.f32 %v661_v55, %v1653_v31 }
 0x388   : > { %v708_v35 = vmax.f32 %v705_v57, 0.0 }
 0x389   : > { %v1881_v54 = vmul.f32 %v710_v50, %v1655_v32  ;;  %v709_v60 = vmax.f32 %v706_v59, 0.0 }
 0x38a   : > { %v1894_v61 = vmul.f32 %v708_v35, %v1638_v18 }
 0x38b   : > { %731 = vrot.lane.b32.xlu0 %v1881_v54, %s1524_s26  ;;  %722 = vrot.lane.b32.xlu1 %v1881_v54, %s1525_s27  ;;  %v1897_v30 = vmul.f32 %v709_v60, %v1642_v21 }
 0x38d   : > { %v1431_v31 = vpack.i.bf16 %v1897_v30, %v1894_v61  ;;  %v1451_v62 = vpack.i.bf16 %v1881_v54, %v1897_v30 }
 0x38f   : > { %749 = vrot.lane.b32.xlu0 %v1881_v54, %s1526_s28  ;;  %740 = vrot.lane.b32.xlu1 %v1881_v54, %s1527_s29 }
 0x393   : > { %763 = vrot.lane.b32.xlu1 %v1894_v61, %s1528_s30  ;;  %754 = vrot.lane.b32.xlu0 %v1894_v61, %s1520_s21 }
 0x397   : > { %1432 = vrot.lane.b32.xlu1 %v1431_v31, %s1525_s27  ;;  %1437 = vrot.lane.b32.xlu0 %v1431_v31, %s1524_s26 }
 0x39b   : > { %1442 = vrot.lane.b32.xlu1 %v1431_v31, %s1527_s29  ;;  %1447 = vrot.lane.b32.xlu0 %v1431_v31, %s1526_s28 }
 0x39f   : > { %1452 = vrot.lane.b32.xlu1 %v1451_v62, %s1520_s21  ;;  %772 = vrot.lane.b32.xlu0 %v1894_v61, %s1521_s22 }
 0x3a3   : > { %1457 = vrot.lane.b32.xlu1 %v1451_v62, %s1528_s30  ;;  %1462 = vrot.lane.b32.xlu0 %v1451_v62, %s1521_s22 }
 0x3a7   : > { %1467 = vrot.lane.b32.xlu1 %v1431_v31, %s1522_s23  ;;  %785 = vrot.lane.b32.xlu0 %v1881_v54, %s1522_s23 }
 0x3ab   : > { %807 = vperm.xlu1 %1471, %v1199_v63  }
 0x3fd   : > { %v732_v0 = vpop.permute.xlu0 %731  ;;  %v723_v3 = vpop.permute.xlu1 %722 }
 0x401   : > { %v750_v1 = vpop.permute.xlu0 %749  ;;  %v741_v2 = vpop.permute.xlu1 %740 }
 0x405   : > { %v764_v4 = vpop.permute.xlu1 %763  ;;  %v755_v5 = vpop.permute.xlu0 %754 }
 0x409   : > { %v1433_v7 = vpop.permute.xlu1 %1432  ;;  %v1438_v8 = vpop.permute.xlu0 %1437 }
 0x40a   : > { %v1435_v9 = vunpack.i.h.bf16 %v1433_v7  ;;  %v1434_v12 = vunpack.i.l.bf16 %v1433_v7  ;;  %v1440_v13 = vunpack.i.h.bf16 %v1438_v8  ;;  %v1439_v14 = vunpack.i.l.bf16 %v1438_v8 }
 0x40c   : > { %v724_v15 = vsel %vm324_vm5, %v1435_v9, %v723_v3  ;;  %v726_v16 = vsel %vm324_vm5, %v723_v3, %v1434_v12  ;;  %v733_v17 = vsel %vm334_vm4, %v1440_v13, %v732_v0  ;;  %v735_v6 = vsel %vm334_vm4, %v732_v0, %v1439_v14 }
 0x40d   : > { %v792_v19 = vpack.c.bf16 %v733_v17, %v724_v15  ;;  %v790_v22 = vpack.c.bf16 %v735_v6, %v726_v16  ;;  %v1443_v24 = vpop.permute.xlu1 %1442  ;;  %v1448_v26 = vpop.permute.xlu0 %1447  ;;  %v725_v11 = vsel %vm324_vm5, %v1434_v12, %v1435_v9  ;;  %v734_v27 = vsel %vm334_vm4, %v1439_v14, %v1440_v13 }
 0x40e   : > { %v1445_v28 = vunpack.i.h.bf16 %v1443_v24  ;;  %v1444_v29 = vunpack.i.l.bf16 %v1443_v24  ;;  %v1450_v33 = vunpack.i.h.bf16 %v1448_v26  ;;  %v1449_v34 = vunpack.i.l.bf16 %v1448_v26  ;;  %v1198_v24 = vld [vmem:[%s2106_s1 + $0x8] sm:$0xf] }
 0x40f   : > { %v791_v36 = vpack.c.bf16 %v734_v27, %v725_v11  ;;  %1267 = vmatpush3.bf16.msra.mxu1 %v792_v19 }
 0x410   : > { %v742_v38 = vsel %vm344_vm7, %v1445_v28, %v741_v2  ;;  %v744_v39 = vsel %vm344_vm7, %v741_v2, %v1444_v29  ;;  %v751_v10 = vsel %vm354_vm6, %v1450_v33, %v750_v1  ;;  %v753_v40 = vsel %vm354_vm6, %v750_v1, %v1449_v34  ;;  %1268 = vmatprep.subr.bf16.mxu1 %v1523_v25 }
 0x411   : > { %v795_v41 = vpack.c.bf16 %v751_v10, %v742_v38  ;;  %822 = vmatprep.subr.bf16.mxu0 %v791_v36  ;;  %v1453_v42 = vpop.permute.xlu1 %1452  ;;  %v773_v20 = vpop.permute.xlu0 %772  ;;  %v743_v43 = vsel %vm344_vm7, %v1444_v29, %v1445_v28  ;;  %v752_v44 = vsel %vm354_vm6, %v1449_v34, %v1450_v33  ;;  %v793_v45 = vpack.c.bf16 %v753_v40, %v744_v39 }
 0x412   : > { %823 = vmatpush1.bf16.msra.mxu0 %v790_v22  ;;  %v1455_v46 = vunpack.i.h.bf16 %v1453_v42  ;;  %v1454_v47 = vunpack.i.l.bf16 %v1453_v42  ;;  %v794_v48 = vpack.c.bf16 %v752_v44, %v743_v43 }
 0x413   : > { %1269 = vmatpush3.bf16.msra.mxu1 %v795_v41 }
 0x414   : > { %v761_v49 = vsel %vm234_vm0, %v755_v5, %v1454_v47  ;;  %v762_v50 = vsel %vm234_vm0, %v1455_v46, %v755_v5  ;;  %824 = vmatprep.subr.bf16.mxu0 %v794_v48  ;;  %1270 = vmatprep.subr.bf16.mxu1 %v1523_v25  ;;  %v760_v51 = vsel %vm234_vm0, %v1454_v47, %v1455_v46  ;;  %v1204_v47 = vld [vmem:[%s2107_s2 + $0x18] sm:$0xff] }
 0x415   : > { %v796_v52 = vpack.c.bf16 %v761_v49, %v1894_v61  ;;  %v798_v53 = vpack.c.bf16 %v762_v50, %v1881_v54  ;;  %v1458_v55 = vpop.permute.xlu1 %1457  ;;  %v1463_v56 = vpop.permute.xlu0 %1462  ;;  %v797_v57 = vpack.c.bf16 %v760_v51, %v1897_v30 }
 0x416   : > { %825 = vmatpush1.bf16.msra.mxu0 %v793_v45  ;;  %v1460_v58 = vunpack.i.h.bf16 %v1458_v55  ;;  %v1459_v59 = vunpack.i.l.bf16 %v1458_v55  ;;  %v1465_v35 = vunpack.i.h.bf16 %v1463_v56  ;;  %v1464_v60 = vunpack.i.l.bf16 %v1463_v56 }
 0x417   : > { %826 = vmatprep.subr.bf16.mxu0 %v797_v57  ;;  %1271 = vmatpush3.bf16.msra.mxu1 %v798_v53 }
 0x418   : > { %v771_v31 = vsel %vm373_vm8, %v1460_v58, %v764_v4  ;;  %v770_v62 = vsel %vm373_vm8, %v764_v4, %v1459_v59  ;;  %v780_v63 = vsel %vm265_vm1, %v1465_v35, %v773_v20  ;;  %v779_v0 = vsel %vm265_vm1, %v773_v20, %v1464_v60  ;;  %1272 = vmatprep.subr.bf16.mxu1 %v1523_v25 }
 0x419   : > { %v801_v3 = vpack.c.bf16 %v780_v63, %v771_v31  ;;  %v1468_v1 = vpop.permute.xlu1 %1467  ;;  %v769_v2 = vsel %vm373_vm8, %v1459_v59, %v1460_v58  ;;  %v778_v5 = vsel %vm265_vm1, %v1464_v60, %v1465_v35  ;;  %v799_v7 = vpack.c.bf16 %v779_v0, %v770_v62  ;;  %v786_v12 = vpop.permute.xlu0 %785 }
 0x41a   : > { %827 = vmatpush1.bf16.msra.mxu0 %v796_v52  ;;  %v1470_v8 = vunpack.i.h.bf16 %v1468_v1  ;;  %v1469_v4 = vunpack.i.l.bf16 %v1468_v1  ;;  %v800_v9 = vpack.c.bf16 %v778_v5, %v769_v2 }
 0x41b   : > { %1273 = vmatpush3.bf16.msra.mxu1 %v801_v3 }
 0x41c   : > { %v787_v13 = vsel %vm290_vm2, %v1470_v8, %v786_v12  ;;  %v789_v14 = vsel %vm290_vm2, %v786_v12, %v1469_v4  ;;  %828 = vmatprep.subr.bf16.mxu0 %v800_v9  ;;  %1274 = vmatprep.subr.bf16.mxu1 %v1523_v25  ;;  %v788_v15 = vsel %vm290_vm2, %v1469_v4, %v1470_v8 }
 0x41d   : > { %v803_v16 = vpack.c.bf16 %v787_v13, %v787_v13  ;;  %v804_v17 = vpack.c.bf16 %v789_v14, %v789_v14  ;;  %v802_v6 = vpack.c.bf16 %v788_v15, %v788_v15 }
 0x41e   : > { %829 = vmatpush1.bf16.msra.mxu0 %v799_v7 }
 0x41f   : > { %1200 = vmatprep.subr.msk.bf16.mxu0 %vm419_vm9, %v803_v16  ;;  %v814_v19 = vsel %vm419_vm9, %v802_v6, 0  ;;  %v820_v22 = vsel %vm419_vm9, %v804_v17, 0 }
 0x420   : > { %1275 = vmatpush3.bf16.msra.mxu1 %v820_v22 }
 0x421   : > { %1280 = vmatprep.subr.bf16.mxu1 %v1523_v25 }
 0x422   : > { %831 = vmatpush1.bf16.msra.mxu0 %v814_v19 }
 0x423   : > { %1277 = vmatmul.mubr.msk.bf16.vlgmr.msra.gmra.mrb[8].mxu1 %vm415_vm10, %v1198_v24 }
 0x424   : > { %1290 = vmatprep.mubr.msk.bf16.mxu1 %vm1530_vm3, %v1523_v25 }
 0x425   : > { %1201 = vmatmul.mubr.msk.bf16.vlgmr.msra.gmra.mrb[8].mxu0 %vm415_vm10, %v1198_v24 }
 0x426   : > { %1049 = vmatprep.mubr.bf16.mxu0 %v1529_v37 }
 0x42a   : > { %v808_v26 = vpop.permute.xlu1 %807 }
 0x4f6   : > { %v897_v11 = vpop.f32.mrb[8].mxu1 }
 0x4f7   : > { %v898_v27 = vadd.f32 %v897_v11, %v808_v26  ;;  %v1278_v28 = vpop.f32.mrb[9].mxu1 }
 0x4f8   : > { %v856_v29 = vpop.f32.mrb[8].mxu0  ;;  %v900_v33 = vpop.f32.mrb[10].mxu1 }
 0x4f9   : > { %v905_v34 = vmax.f32 %v898_v27, 0.0  ;;  %v858_v36 = vpop.f32.mrb[9].mxu0  ;;  %v1279_v38 = vpop.f32.mrb[11].mxu1  ;;  %v857_v10 = vadd.f32 %v856_v29, %v808_v26 }
 0x4fa   : > { %v860_v39 = vpop.f32.mrb[10].mxu0  ;;  %v859_v41 = vadd.f32 %v858_v36, %v808_v26 }
 0x4fb   : > { %v1990_v40 = vmul.f32 %v905_v34, %v1655_v32  ;;  %v861_v42 = vpop.f32.mrb[11].mxu0  ;;  %v903_v37 = vmax.f32 %v857_v10, 0.0 }
 0x4fc   : > { %v904_v20 = vmax.f32 %v859_v41, 0.0 }
 0x4fd   : > { %926 = vrot.lane.b32.xlu1 %v1990_v40, %s1524_s26  ;;  %917 = vrot.lane.b32.xlu0 %v1990_v40, %s1525_s27  ;;  %v2001_v43 = vmul.f32 %v903_v37, %v1638_v18 }
 0x4fe   : > { %v2004_v44 = vmul.f32 %v904_v20, %v1642_v21 }
 0x500   : > { %v1472_v45 = vpack.i.bf16 %v2004_v44, %v2001_v43  ;;  %v1492_v46 = vpack.i.bf16 %v1990_v40, %v2004_v44 }
 0x501   : > { %944 = vrot.lane.b32.xlu1 %v1990_v40, %s1526_s28  ;;  %935 = vrot.lane.b32.xlu0 %v1990_v40, %s1527_s29 }
 0x505   : > { %958 = vrot.lane.b32.xlu0 %v2001_v43, %s1528_s30  ;;  %949 = vrot.lane.b32.xlu1 %v2001_v43, %s1520_s21 }
 0x509   : > { %1473 = vrot.lane.b32.xlu0 %v1472_v45, %s1525_s27  ;;  %1478 = vrot.lane.b32.xlu1 %v1472_v45, %s1524_s26 }
 0x50d   : > { %1483 = vrot.lane.b32.xlu0 %v1472_v45, %s1527_s29  ;;  %1488 = vrot.lane.b32.xlu1 %v1472_v45, %s1526_s28 }
 0x511   : > { %1493 = vrot.lane.b32.xlu0 %v1492_v46, %s1520_s21  ;;  %967 = vrot.lane.b32.xlu1 %v2001_v43, %s1521_s22 }
 0x515   : > { %1498 = vrot.lane.b32.xlu0 %v1492_v46, %s1528_s30  ;;  %1503 = vrot.lane.b32.xlu1 %v1492_v46, %s1521_s22 }
 0x519   : > { %1508 = vrot.lane.b32.xlu0 %v1472_v45, %s1522_s23  ;;  %980 = vrot.lane.b32.xlu1 %v1990_v40, %s1522_s23  ;;  %s1295_s23 = smul.u32 12, %s2111_s16 }
 0x51b   : > { %s197_s26 = scalar_lea.vmem %s2109_s4, %s1295_s23 }
 0x51d   : > { %1002 = vperm.xlu0 %1390, %v1204_v47  }
 0x56f   : > { %v927_v48 = vpop.permute.xlu1 %926  ;;  %v918_v49 = vpop.permute.xlu0 %917 }
 0x573   : > { %v945_v50 = vpop.permute.xlu1 %944  ;;  %v936_v51 = vpop.permute.xlu0 %935 }
 0x577   : > { %v959_v52 = vpop.permute.xlu0 %958  ;;  %v950_v53 = vpop.permute.xlu1 %949 }
 0x57b   : > { %v1474_v55 = vpop.permute.xlu0 %1473  ;;  %v1479_v56 = vpop.permute.xlu1 %1478 }
 0x57c   : > { %v1476_v57 = vunpack.i.h.bf16 %v1474_v55  ;;  %v1475_v58 = vunpack.i.l.bf16 %v1474_v55  ;;  %v1481_v59 = vunpack.i.h.bf16 %v1479_v56  ;;  %v1480_v35 = vunpack.i.l.bf16 %v1479_v56 }
 0x57e   : > { %v919_v60 = vsel %vm324_vm5, %v1476_v57, %v918_v49  ;;  %v921_v31 = vsel %vm324_vm5, %v918_v49, %v1475_v58  ;;  %v928_v62 = vsel %vm334_vm4, %v1481_v59, %v927_v48  ;;  %v930_v63 = vsel %vm334_vm4, %v927_v48, %v1480_v35 }
 0x57f   : > { %v987_v0 = vpack.c.bf16 %v928_v62, %v919_v60  ;;  %v985_v3 = vpack.c.bf16 %v930_v63, %v921_v31  ;;  %v1484_v1 = vpop.permute.xlu0 %1483  ;;  %v1489_v2 = vpop.permute.xlu1 %1488  ;;  %v920_v5 = vsel %vm324_vm5, %v1475_v58, %v1476_v57  ;;  %v929_v7 = vsel %vm334_vm4, %v1480_v35, %v1481_v59 }
 0x580   : > { %v1486_v8 = vunpack.i.h.bf16 %v1484_v1  ;;  %v1485_v4 = vunpack.i.l.bf16 %v1484_v1  ;;  %v1491_v9 = vunpack.i.h.bf16 %v1489_v2  ;;  %v1490_v12 = vunpack.i.l.bf16 %v1489_v2 }
 0x581   : > { %v986_v13 = vpack.c.bf16 %v929_v7, %v920_v5  ;;  %1281 = vmatpush3.bf16.msra.mxu1 %v987_v0 }
 0x582   : > { %v937_v14 = vsel %vm344_vm7, %v1486_v8, %v936_v51  ;;  %v939_v15 = vsel %vm344_vm7, %v936_v51, %v1485_v4  ;;  %v946_v16 = vsel %vm354_vm6, %v1491_v9, %v945_v50  ;;  %v948_v17 = vsel %vm354_vm6, %v945_v50, %v1490_v12  ;;  %1282 = vmatprep.subr.bf16.mxu1 %v1523_v25 }
 0x583   : > { %v990_v6 = vpack.c.bf16 %v946_v16, %v937_v14  ;;  %1017 = vmatprep.subr.bf16.mxu0 %v986_v13  ;;  %v1494_v19 = vpop.permute.xlu0 %1493  ;;  %v968_v22 = vpop.permute.xlu1 %967  ;;  %v938_v24 = vsel %vm344_vm7, %v1485_v4, %v1486_v8  ;;  %v947_v26 = vsel %vm354_vm6, %v1490_v12, %v1491_v9  ;;  %v988_v11 = vpack.c.bf16 %v948_v17, %v939_v15 }
 0x584   : > { %1018 = vmatpush1.bf16.msra.mxu0 %v985_v3  ;;  %v1496_v27 = vunpack.i.h.bf16 %v1494_v19  ;;  %v1495_v28 = vunpack.i.l.bf16 %v1494_v19  ;;  %v989_v29 = vpack.c.bf16 %v947_v26, %v938_v24  ;;  %v1203_v3 = vld [vmem:[%s2106_s1 + $0xc] sm:$0xf] }
 0x585   : > { %1283 = vmatpush3.bf16.msra.mxu1 %v990_v6 }
 0x586   : > { %v956_v33 = vsel %vm234_vm0, %v950_v53, %v1495_v28  ;;  %v957_v34 = vsel %vm234_vm0, %v1496_v27, %v950_v53  ;;  %1019 = vmatprep.subr.bf16.mxu0 %v989_v29  ;;  %1284 = vmatprep.subr.bf16.mxu1 %v1523_v25  ;;  %v955_v36 = vsel %vm234_vm0, %v1495_v28, %v1496_v27 }
 0x587   : > { %v991_v38 = vpack.c.bf16 %v956_v33, %v2001_v43  ;;  %v993_v39 = vpack.c.bf16 %v957_v34, %v1990_v40  ;;  %v1499_v10 = vpop.permute.xlu0 %1498  ;;  %v1504_v41 = vpop.permute.xlu1 %1503  ;;  %v992_v42 = vpack.c.bf16 %v955_v36, %v2004_v44 }
 0x588   : > { %1020 = vmatpush1.bf16.msra.mxu0 %v988_v11  ;;  %v1501_v37 = vunpack.i.h.bf16 %v1499_v10  ;;  %v1500_v20 = vunpack.i.l.bf16 %v1499_v10  ;;  %v1506_v45 = vunpack.i.h.bf16 %v1504_v41  ;;  %v1505_v46 = vunpack.i.l.bf16 %v1504_v41 }
 0x589   : > { %1021 = vmatprep.subr.bf16.mxu0 %v992_v42  ;;  %1285 = vmatpush3.bf16.msra.mxu1 %v993_v39 }
 0x58a   : > { %v966_v47 = vsel %vm373_vm8, %v1501_v37, %v959_v52  ;;  %v965_v48 = vsel %vm373_vm8, %v959_v52, %v1500_v20  ;;  %v975_v40 = vsel %vm265_vm1, %v1506_v45, %v968_v22  ;;  %v974_v43 = vsel %vm265_vm1, %v968_v22, %v1505_v46  ;;  %1286 = vmatprep.subr.bf16.mxu1 %v1523_v25 }
 0x58b   : > { %v996_v44 = vpack.c.bf16 %v975_v40, %v966_v47  ;;  %v1509_v49 = vpop.permute.xlu0 %1508  ;;  %v964_v50 = vsel %vm373_vm8, %v1500_v20, %v1501_v37  ;;  %v973_v51 = vsel %vm265_vm1, %v1505_v46, %v1506_v45  ;;  %v994_v53 = vpack.c.bf16 %v974_v43, %v965_v48  ;;  %v981_v57 = vpop.permute.xlu1 %980 }
 0x58c   : > { %1022 = vmatpush1.bf16.msra.mxu0 %v991_v38  ;;  %v1511_v55 = vunpack.i.h.bf16 %v1509_v49  ;;  %v1510_v52 = vunpack.i.l.bf16 %v1509_v49  ;;  %v995_v56 = vpack.c.bf16 %v973_v51, %v964_v50 }
 0x58d   : > { %1287 = vmatpush3.bf16.msra.mxu1 %v996_v44 }
 0x58e   : > { %v982_v58 = vsel %vm290_vm2, %v1511_v55, %v981_v57  ;;  %v984_v59 = vsel %vm290_vm2, %v981_v57, %v1510_v52  ;;  %1023 = vmatprep.subr.bf16.mxu0 %v995_v56  ;;  %1288 = vmatprep.subr.bf16.mxu1 %v1523_v25  ;;  %v983_v35 = vsel %vm290_vm2, %v1510_v52, %v1511_v55 }
 0x58f   : > { %v998_v60 = vpack.c.bf16 %v982_v58, %v982_v58  ;;  %v999_v31 = vpack.c.bf16 %v984_v59, %v984_v59  ;;  %v997_v62 = vpack.c.bf16 %v983_v35, %v983_v35 }
 0x590   : > { %1024 = vmatpush1.bf16.msra.mxu0 %v994_v53 }
 0x591   : > { %1205 = vmatprep.subr.msk.bf16.mxu0 %vm419_vm9, %v998_v60  ;;  %v1009_v63 = vsel %vm419_vm9, %v997_v62, 0  ;;  %v1015_v0 = vsel %vm419_vm9, %v999_v31, 0 }
 0x592   : > { %1289 = vmatpush3.bf16.msra.mxu1 %v1015_v0 }
 0x594   : > { %1026 = vmatpush1.bf16.msra.mxu0 %v1009_v63 }
 0x595   : > { %1291 = vmatmul.mubr.msk.bf16.vlgmr.msra.gmra.mrb[12].mxu1 %vm415_vm10, %v1203_v3 }
 0x597   : > { %1206 = vmatmul.mubr.msk.bf16.vlgmr.msra.gmra.mrb[12].mxu0 %vm415_vm10, %v1203_v3 }
 0x59c   : > { %v1003_v23 = vpop.permute.xlu0 %1002 }
 0x668   : > { %v1092_v25 = vpop.f32.mrb[12].mxu1 }
 0x669   : > { %v1093_v1 = vadd.f32 %v1092_v25, %v1003_v23  ;;  %v1292_v2 = vpop.f32.mrb[13].mxu1 }
 0x66a   : > { %v1051_v5 = vpop.f32.mrb[12].mxu0  ;;  %v1095_v7 = vpop.f32.mrb[14].mxu1 }
 0x66b   : > { %v1052_v8 = vadd.f32 %v1051_v5, %v1003_v23  ;;  %v1100_v4 = vadd.f32 %v1093_v1, %v1881_v54  ;;  %v1053_v9 = vpop.f32.mrb[13].mxu0  ;;  %v1293_v12 = vpop.f32.mrb[15].mxu1 }
 0x66c   : > { %v1054_v13 = vadd.f32 %v1053_v9, %v1003_v23  ;;  %v1055_v14 = vpop.f32.mrb[14].mxu0 }
 0x66d   : > { %v1098_v15 = vadd.f32 %v1052_v8, %v1894_v61  ;;  %v1103_v16 = vmax.f32 %v1100_v4, 0.0  ;;  %v1056_v17 = vpop.f32.mrb[15].mxu0 }
 0x66e   : > { %v1099_v6 = vadd.f32 %v1054_v13, %v1897_v30 }
 0x66f   : > { %v1101_v19 = vmax.f32 %v1098_v15, 0.0  ;;  %v1106_v22 = vmul.f32 %v1103_v16, %v1655_v32 }
 0x670   : > { %v1102_v24 = vmax.f32 %v1099_v6, 0.0 }
 0x671   : > { %v1104_v54 = vmul.f32 %v1101_v19, %v1638_v18  ;;  %v1213_v26 = vpack.c.bf16 %v1106_v22, %v1106_v22 }
 0x672   : > { %v1105_v11 = vmul.f32 %v1102_v24, %v1642_v21 }
 0x673   : > { %1121 = vst [vmem:[%s197_s26 + $0x8] sm:$0xf] %v1213_v26 }
 0x674   : > { %v1212_v27 = vpack.c.bf16 %v1105_v11, %v1104_v54 }
 0x676   : > { %1120 = vst [vmem:[%s197_s26] sm:$0xff] %v1212_v27 }
 0x677 PF: > { %s14_s15 = sadd.s32 1, %s1518_s15  }
 0x678   : > { %p11_p4 = scmp.ge.s32.totalorder %s14_s15, 4  }
 0x67a   :  { %13 = sbr.rel (!%p11_p4) target bundleno = 1 (0x1), region = 75 }

// kernel: custom_resnet_forward.7
= control target key start
LH: loop header
LB: loop body
LE: loop exit
PB: predicated region body
PF: predicated region fallthrough
CT: control target
= control target key end

     0   :  { %s1261_s30 = smov 0   ;;  %s1430_s0 = inlined_call_operand.vmem [shape: bf16[2,72,128], index: 0, kind: input, shape index: {}]   ;;  %s1431_s1 = inlined_call_operand.vmem [shape: bf16[2,8,128], index: 1, kind: input, shape index: {}]   ;;  %s1432_s2 = inlined_call_operand.vmem [shape: bf16[16,72], index: 2, kind: input, shape index: {}]   ;;  %s1433_s3 = inlined_call_operand.vmem [shape: f32[16,1], index: 3, kind: input, shape index: {}]   ;;  %s1434_s4 = inlined_call_operand.vmem [shape: bf16[16,8], index: 4, kind: input, shape index: {}]   ;;  %s1435_s5 = inlined_call_operand.vmem [shape: f32[16,1], index: 5, kind: input, shape index: {}]   ;;  %s1436_s6 = inlined_call_operand.vmem [shape: bf16[3,16,144], index: 6, kind: input, shape index: {}]   ;;  %s1437_s7 = inlined_call_operand.vmem [shape: f32[3,16,1], index: 7, kind: input, shape index: {}]   ;;  %s1438_s8 = inlined_call_operand.vmem [shape: f32[1,128], index: 8, kind: input, shape index: {}]   ;;  %s1439_s9 = inlined_call_operand.vmem [shape: bf16[2,16,128], index: 9, kind: output, shape index: {}]  }
   0x1 LB: > { %s958_s10 = sadd.s32 4294967295, %s1198_s30   ;;  %p962_p0 = scmp.ge.s32.totalorder %s1198_s30, 1  ;;  %s1198_s30 = sphi %s1261_s30, %s19_s30  }
   0x2   : > { %p296_p1 = scmp.lt.s32.totalorder %s1198_s30, 3 }
   0x4   : > { %p297_p2 = pnand %p962_p0, %p296_p1 }
   0x5   : > { %p336_p3 = scmp.lt.s32.totalorder (!%p297_p2), %s958_s10, 1  ;;  %v1200_v0 = vmov (!%p297_p2), 0.0   ;;  %vm1201_vm0 = vmmov (!%p297_p2), 0   ;;  %v363_v1 = vld [vmem:[%s1433_s3] sm:$0xff] (!%p297_p2)  ;;  %v1202_v2 = vmov (!%p297_p2), 0   ;;  %v364_v3 = vld [vmem:[%s1433_s3 + $0x8] sm:$0xff] (!%p297_p2) }
   0x6   : > { %300 = sbr.rel (%p297_p2) target bundleno = 1392 (0x570), region = 56  ;;  %1014 = vmatprep.subr.bf16.mxu0 (!%p297_p2), %v1200_v0  ;;  %1024 = vmatprep.mubr.msk.bf16.mxu0 (!%p297_p2), %vm1201_vm0, %v1200_v0  ;;  %vm411_vm1 = vcmask (!%p297_p2), 1043456   ;;  %v1181_v11 = vld [vmem:[%s1432_s2] sm:$0xff] (!%p297_p2)   ;;  %vm407_vm2 = vcmask (!%p297_p2), 588800   ;;  %vm486_vm3 = vcmask (!%p297_p2), 64512   ;;  %s1203_s29 = smov (!%p297_p2), 9  }
   0x7   : > { %1054 = vset.pattern.permute.xlu0 (!%p297_p2), %v1202_v2  ;;  %604 = vmatprep.subr.bf16.mxu1 (!%p297_p2), %v1202_v2  ;;  %v1182_v13 = vld [vmem:[%s1434_s4] sm:$0xff] (!%p297_p2)   ;;  %s1204_s11 = smov (!%p297_p2), 11   ;;  %s1205_s12 = smov (!%p297_p2), 127   ;;  %vm600_vm4 = vcmask (!%p297_p2), 130048   ;;  %v470_v34 = vld [vmem:[%s1435_s5 + $0x8] sm:$0xff] (!%p297_p2) }
   0x8   : > { %367 = vperm.xlu0 (!%p297_p2), %1054, %v363_v1   ;;  %1095 = vset.pattern.permute.xlu1 (!%p297_p2), %v1202_v2  ;;  %v1300_v23 = vld [vmem:[%s1438_s8] ss:$0 sm:$0xff] (!%p297_p2)  ;;  %s1206_s13 = smov (!%p297_p2), 10   ;;  %s1207_s14 = smov (!%p297_p2), 118   ;;  %v1185_v33 = vld [vmem:[%s1436_s6 + $0x4] ss:$8 sps:$4 sm:$0xff] (!%p297_p2)  }
   0x9   : > { %v469_v29 = vld [vmem:[%s1435_s5] sm:$0xff] (!%p297_p2)  ;;  %s1210_s21 = smov (!%p297_p2), 117   ;;  %979 = vmatprep.mubr.msk.bf16.mxu1 (!%p297_p2), %vm600_vm4, %v1185_v33  ;;  %v539_v37 = vld [vmem:[%s1437_s7 + $0x8] sm:$0xff] (!%p297_p2) }
   0xa   : > { %v538_v32 = vld [vmem:[%s1437_s7] sm:$0xff] (!%p297_p2) }
   0xc   : > { %372 = vperm.xlu0 (!%p297_p2), %1054, %v364_v3  }
   0xd   : > { %s1441_s10 = smov (!%p336_p3, %s958_s10), 1 }
   0xe   : > { %s1034_s15 = smul.u32 36, %s1441_s10  ;;  %s964_s19 = sshll.u32 %s1441_s10, 2 }
   0xf   : > { %s344_s22 = scalar_lea.vmem %s1431_s1, %s964_s19 }
  0x10   : > { %s340_s18 = scalar_lea.vmem %s1430_s0, %s1034_s15  ;;  %v468_v10 = vld [vmem:[%s344_s22] sm:$0xf]  ;;  %s1208_s15 = smov 1  }
  0x11   : > { %v1176_v4 = vld [vmem:[%s340_s18] sm:$0xff]   ;;  %v1177_v5 = vld [vmem:[%s340_s18 + $0x8] sm:$0xff]   ;;  %v1178_v6 = vld [vmem:[%s340_s18 + $0x10] sm:$0xff]   ;;  %v491_v12 = vsel %vm411_vm1, %v468_v10, 0 }
  0x12   : > { %1015 = vmatpush3.bf16.msra.mxu0 %v1176_v4  ;;  %v1179_v7 = vld [vmem:[%s340_s18 + $0x18] sm:$0xff]   ;;  %v1180_v8 = vld [vmem:[%s340_s18 + $0x20] ss:$0 sps:$4 sm:$0xff]   ;;  %s1209_s18 = smov 119  }
  0x13   : > { %1016 = vmatprep.subr.bf16.mxu0 %v1200_v0  ;;  %v413_v9 = vsel %vm411_vm1, %v1180_v8, 0 }
  0x16   : > { %1017 = vmatpush3.bf16.msra.mxu0 %v1177_v5 }
  0x17   : > { %1018 = vmatprep.subr.bf16.mxu0 %v1200_v0 }
  0x1a   : > { %1019 = vmatpush3.bf16.msra.mxu0 %v1178_v6 }
  0x1b   : > { %1020 = vmatprep.subr.bf16.mxu0 %v1200_v0 }
  0x1e   : > { %1021 = vmatpush3.bf16.msra.mxu0 %v1179_v7  ;;  %v1183_v7 = vld [vmem:[%s1436_s6] ss:$8 sps:$4 sm:$0xff]  }
  0x1f   : > { %1022 = vmatprep.subr.bf16.mxu0 %v1200_v0 }
  0x22   : > { %1023 = vmatpush3.bf16.msra.mxu0 %v413_v9 }
  0x23   : > { %1028 = vmatprep.subr.bf16.mxu0 %v1200_v0 }
  0x25   : > { %1025 = vmatmul.mubr.msk.bf16.vlgmr.msra.gmra.mrb[0].mxu0 %vm407_vm2, %v1181_v11 }
  0x26   : > { %1029 = vmatpush3.bf16.msra.mxu0 %v491_v12  ;;  %1030 = vmatprep.mubr.msk.bf16.mxu0 %vm1201_vm0, %v1200_v0 }
  0x27   : > { %720 = vmatprep.subr.bf16.mxu0 %v1202_v2 }
  0x2d   : > { %1031 = vmatmul.mubr.msk.bf16.vlgmr.msra.gmra.mrb[4].mxu0 %vm486_vm3, %v1182_v13 }
  0x87   : > { %v368_v14 = vpop.permute.xlu0 %367 }
  0x8b   : > { %v373_v18 = vpop.permute.xlu0 %372 }
  0xf8   : > { %v449_v15 = vpop.f32.mrb[0].mxu0 }
  0xf9   : > { %v450_v16 = vadd.f32 %v449_v15, %v368_v14  ;;  %v1026_v17 = vpop.f32.mrb[1].mxu0 }
  0xfa   : > { %v452_v19 = vpop.f32.mrb[2].mxu0 }
  0xfb   : > { %v456_v20 = vmax.f32 %v450_v16, 0.0  ;;  %v453_v21 = vadd.f32 %v452_v19, %v373_v18  ;;  %v1027_v22 = vpop.f32.mrb[3].mxu0 }
  0xfd   : > { %v457_v24 = vmax.f32 %v453_v21, 0.0  ;;  %v1303_v25 = vmul.f32 %v1300_v23, %v456_v20 }
  0xff   : > { %v465_v26 = vmul.f32 %v1300_v23, %v457_v24 }
 0x100   : > { %v1317_v30 = vpop.f32.mrb[4].mxu0 }
 0x101   : > { %v1065_v27 = vpack.i.bf16 %v465_v26, %v1303_v25  ;;  %v576_v28 = vpack.c.bf16 %v465_v26, %v1303_v25  ;;  %v1032_v31 = vpop.f32.mrb[5].mxu0 }
 0x102   : > { %v530_v35 = vpop.f32.mrb[6].mxu0  ;;  %v982_v31 = vld [vmem:[%s1437_s7 + $0x10] sm:$0xff] }
 0x103   : > { %1066 = vrot.lane.b32.xlu0 %v1065_v27, %s1203_s29  ;;  %1056 = vrot.lane.b32.xlu1 %v1065_v27, %s1204_s11  ;;  %v1033_v36 = vpop.f32.mrb[7].mxu0 }
 0x107   : > { %1076 = vrot.lane.b32.xlu0 %v1065_v27, %s1205_s12  ;;  %1061 = vrot.lane.b32.xlu1 %v1065_v27, %s1206_s13 }
 0x10b   : > { %1086 = vrot.lane.b32.xlu0 %v1065_v27, %s1207_s14  ;;  %1071 = vrot.lane.b32.xlu1 %v1065_v27, %s1208_s15 }
 0x10f   : > { %473 = vperm.xlu0 %1054, %v469_v29   ;;  %1081 = vrot.lane.b32.xlu1 %v1065_v27, %s1209_s18 }
 0x113   : > { %583 = vperm.xlu0 %1054, %v538_v32   ;;  %1091 = vrot.lane.b32.xlu1 %v1065_v27, %s1210_s21  ;;  %v1186_v32 = vld [vmem:[%s1436_s6 + $0x14] ss:$8 sps:$4 sm:$0xff]  }
 0x114   : > { %986 = vmatprep.mubr.msk.bf16.mxu0 %vm600_vm4, %v1186_v32 }
 0x117   : > { %478 = vperm.xlu1 %1095, %v470_v34  }
 0x11b   : > { %588 = vperm.xlu1 %1095, %v539_v37  }
 0x175   : > { %v1057_v38 = vpop.permute.xlu1 %1056  ;;  %v1067_v42 = vpop.permute.xlu0 %1066 }
 0x176   : > { %v1059_v39 = vunpack.i.h.bf16 %v1057_v38  ;;  %v1058_v40 = vunpack.i.l.bf16 %v1057_v38  ;;  %v1069_v46 = vunpack.i.h.bf16 %v1067_v42  ;;  %v1068_v47 = vunpack.i.l.bf16 %v1067_v42 }
 0x178   : > { %v572_v41 = vpack.c.bf16 %v1059_v39, %v1058_v40  ;;  %v574_v50 = vpack.c.bf16 %v1069_v46, %v1068_v47 }
 0x179   : > { %v1062_v43 = vpop.permute.xlu1 %1061  ;;  %v1077_v54 = vpop.permute.xlu0 %1076 }
 0x17a   : > { %v1064_v44 = vunpack.i.h.bf16 %v1062_v43  ;;  %v1063_v45 = vunpack.i.l.bf16 %v1062_v43  ;;  %605 = vmatpush1.bf16.msra.mxu1 %v572_v41  ;;  %v1079_v55 = vunpack.i.h.bf16 %v1077_v54  ;;  %v1078_v56 = vunpack.i.l.bf16 %v1077_v54 }
 0x17b   : > { %606 = vmatprep.subr.bf16.mxu1 %v1202_v2 }
 0x17c   : > { %v573_v48 = vpack.c.bf16 %v1064_v44, %v1063_v45  ;;  %v577_v58 = vpack.c.bf16 %v1079_v55, %v1078_v56 }
 0x17d   : > { %v1072_v49 = vpop.permute.xlu1 %1071  ;;  %v1087_v61 = vpop.permute.xlu0 %1086 }
 0x17e   : > { %607 = vmatpush1.bf16.msra.mxu1 %v573_v48  ;;  %v1074_v51 = vunpack.i.h.bf16 %v1072_v49  ;;  %v1073_v52 = vunpack.i.l.bf16 %v1072_v49  ;;  %v1089_v62 = vunpack.i.h.bf16 %v1087_v61  ;;  %v1088_v63 = vunpack.i.l.bf16 %v1087_v61 }
 0x17f   : > { %608 = vmatprep.subr.bf16.mxu1 %v1202_v2 }
 0x180   : > { %v575_v53 = vpack.c.bf16 %v1074_v51, %v1073_v52  ;;  %v579_v3 = vpack.c.bf16 %v1089_v62, %v1088_v63 }
 0x181   : > { %v1082_v57 = vpop.permute.xlu1 %1081 }
 0x182   : > { %609 = vmatpush1.bf16.msra.mxu1 %v574_v50  ;;  %v1084_v59 = vunpack.i.h.bf16 %v1082_v57  ;;  %v1083_v60 = vunpack.i.l.bf16 %v1082_v57 }
 0x183   : > { %610 = vmatprep.subr.bf16.mxu1 %v1202_v2 }
 0x184   : > { %v578_v0 = vpack.c.bf16 %v1084_v59, %v1083_v60 }
 0x185   : > { %v1092_v1 = vpop.permute.xlu1 %1091 }
 0x186   : > { %611 = vmatpush1.bf16.msra.mxu1 %v575_v53  ;;  %v1094_v4 = vunpack.i.h.bf16 %v1092_v1  ;;  %v1093_v5 = vunpack.i.l.bf16 %v1092_v1 }
 0x187   : > { %612 = vmatprep.subr.bf16.mxu1 %v1202_v2 }
 0x188   : > { %v580_v6 = vpack.c.bf16 %v1094_v4, %v1093_v5 }
 0x18a   : > { %613 = vmatpush1.bf16.msra.mxu1 %v576_v28 }
 0x18b   : > { %614 = vmatprep.subr.bf16.mxu1 %v1202_v2 }
 0x18e   : > { %615 = vmatpush1.bf16.msra.mxu1 %v577_v58  ;;  %v474_v8 = vpop.permute.xlu0 %473 }
 0x18f   : > { %616 = vmatprep.subr.bf16.mxu1 %v1202_v2  ;;  %v528_v10 = vadd.f32 %v1317_v30, %v474_v8  ;;  %v983_v30 = vld [vmem:[%s1437_s7 + $0x18] sm:$0xff] }
 0x191   : > { %v534_v14 = vmul.f32 %v1300_v23, %v528_v10 }
 0x192   : > { %617 = vmatpush1.bf16.msra.mxu1 %v578_v0  ;;  %v584_v12 = vpop.permute.xlu0 %583 }
 0x193   : > { %618 = vmatprep.subr.bf16.mxu1 %v1202_v2 }
 0x196   : > { %619 = vmatpush1.bf16.msra.mxu1 %v579_v3  ;;  %v479_v9 = vpop.permute.xlu1 %478  ;;  %v1188_v3 = vld [vmem:[%s1436_s6 + $0x10] ss:$8 sps:$4 sm:$0xff]  }
 0x197   : > { %620 = vmatprep.subr.bf16.mxu1 %v1202_v2  ;;  %v531_v11 = vadd.f32 %v530_v35, %v479_v9 }
 0x199   : > { %v535_v19 = vmul.f32 %v1300_v23, %v531_v11 }
 0x19a   : > { %621 = vmatpush1.bf16.msra.mxu1 %v580_v6  ;;  %v589_v17 = vpop.permute.xlu1 %588 }
 0x19b   : > { %834 = vmatprep.subr.bf16.mxu1 %v1202_v2 }
 0x19d   : > { %637 = vmatmul.mubr.bf16.vlgmr.msra.gmra.mrb[0].mxu1 %v1183_v7 }
 0x270   : > { %v638_v13 = vpop.f32.mrb[0].mxu1 }
 0x271   : > { %v639_v15 = vadd.f32 %v638_v13, %v584_v12  ;;  %v640_v16 = vpop.f32.mrb[1].mxu1 }
 0x272   : > { %v641_v18 = vpop.f32.mrb[2].mxu1 }
 0x273   : > { %v645_v20 = vadd.f32 %v639_v15, %v534_v14  ;;  %v642_v21 = vadd.f32 %v641_v18, %v589_v17  ;;  %v643_v22 = vpop.f32.mrb[3].mxu1  ;;  %v990_v18 = vld [vmem:[%s1437_s7 + $0x28] sm:$0xff] }
 0x275   : > { %v647_v24 = vmax.f32 %v645_v20, 0.0  ;;  %v646_v25 = vadd.f32 %v642_v21, %v535_v19  ;;  %v989_v19 = vld [vmem:[%s1437_s7 + $0x20] sm:$0xff] }
 0x276   : > { %v1189_v20 = vld [vmem:[%s1436_s6 + $0x24] ss:$8 sps:$4 sm:$0xff]  }
 0x277   : > { %v648_v26 = vmax.f32 %v646_v25, 0.0  ;;  %v1350_v27 = vmul.f32 %v1300_v23, %v647_v24  ;;  %993 = vmatprep.mubr.msk.bf16.mxu1 %vm600_vm4, %v1189_v20 }
 0x279   : > { %v1353_v28 = vmul.f32 %v1300_v23, %v648_v26 }
 0x27b   : > { %v1101_v29 = vpack.i.bf16 %v1353_v28, %v1350_v27  ;;  %v693_v52 = vpack.c.bf16 %v1353_v28, %v1350_v27 }
 0x27d   : > { %1102 = vrot.lane.b32.xlu1 %v1101_v29, %s1206_s13  ;;  %1097 = vrot.lane.b32.xlu0 %v1101_v29, %s1204_s11 }
 0x281   : > { %1112 = vrot.lane.b32.xlu1 %v1101_v29, %s1208_s15  ;;  %1107 = vrot.lane.b32.xlu0 %v1101_v29, %s1203_s29 }
 0x285   : > { %1122 = vrot.lane.b32.xlu1 %v1101_v29, %s1209_s18  ;;  %1117 = vrot.lane.b32.xlu0 %v1101_v29, %s1205_s12 }
 0x289   : > { %1132 = vrot.lane.b32.xlu1 %v1101_v29, %s1210_s21  ;;  %1127 = vrot.lane.b32.xlu0 %v1101_v29, %s1207_s14 }
 0x28d   : > { %705 = vperm.xlu1 %1095, %v983_v30   ;;  %700 = vperm.xlu0 %1054, %v982_v31  }
 0x2ef   : > { %v1103_v33 = vpop.permute.xlu1 %1102  ;;  %v1098_v34 = vpop.permute.xlu0 %1097 }
 0x2f0   : > { %v1100_v35 = vunpack.i.h.bf16 %v1098_v34  ;;  %v1099_v36 = vunpack.i.l.bf16 %v1098_v34  ;;  %v1105_v37 = vunpack.i.h.bf16 %v1103_v33  ;;  %v1104_v38 = vunpack.i.l.bf16 %v1103_v33 }
 0x2f2   : > { %v689_v39 = vpack.c.bf16 %v1100_v35, %v1099_v36  ;;  %v690_v41 = vpack.c.bf16 %v1105_v37, %v1104_v38 }
 0x2f3   : > { %v1108_v40 = vpop.permute.xlu0 %1107  ;;  %v1113_v44 = vpop.permute.xlu1 %1112 }
 0x2f4   : > { %721 = vmatpush1.bf16.msra.mxu0 %v689_v39  ;;  %v1110_v42 = vunpack.i.h.bf16 %v1108_v40  ;;  %v1109_v43 = vunpack.i.l.bf16 %v1108_v40  ;;  %v1115_v45 = vunpack.i.h.bf16 %v1113_v44  ;;  %v1114_v46 = vunpack.i.l.bf16 %v1113_v44 }
 0x2f5   : > { %722 = vmatprep.subr.bf16.mxu0 %v1202_v2 }
 0x2f6   : > { %v691_v47 = vpack.c.bf16 %v1110_v42, %v1109_v43  ;;  %v692_v48 = vpack.c.bf16 %v1115_v45, %v1114_v46 }
 0x2f7   : > { %v1118_v49 = vpop.permute.xlu0 %1117  ;;  %v1123_v53 = vpop.permute.xlu1 %1122 }
 0x2f8   : > { %723 = vmatpush1.bf16.msra.mxu0 %v690_v41  ;;  %v1120_v50 = vunpack.i.h.bf16 %v1118_v49  ;;  %v1119_v51 = vunpack.i.l.bf16 %v1118_v49  ;;  %v1125_v54 = vunpack.i.h.bf16 %v1123_v53  ;;  %v1124_v55 = vunpack.i.l.bf16 %v1123_v53 }
 0x2f9   : > { %724 = vmatprep.subr.bf16.mxu0 %v1202_v2 }
 0x2fa   : > { %v694_v56 = vpack.c.bf16 %v1120_v50, %v1119_v51  ;;  %v695_v58 = vpack.c.bf16 %v1125_v54, %v1124_v55 }
 0x2fb   : > { %v1128_v57 = vpop.permute.xlu0 %1127  ;;  %v1133_v61 = vpop.permute.xlu1 %1132 }
 0x2fc   : > { %725 = vmatpush1.bf16.msra.mxu0 %v691_v47  ;;  %v1130_v59 = vunpack.i.h.bf16 %v1128_v57  ;;  %v1129_v60 = vunpack.i.l.bf16 %v1128_v57  ;;  %v1135_v62 = vunpack.i.h.bf16 %v1133_v61  ;;  %v1134_v63 = vunpack.i.l.bf16 %v1133_v61 }
 0x2fd   : > { %726 = vmatprep.subr.bf16.mxu0 %v1202_v2 }
 0x2fe   : > { %v696_v0 = vpack.c.bf16 %v1130_v59, %v1129_v60  ;;  %v697_v1 = vpack.c.bf16 %v1135_v62, %v1134_v63 }
 0x300   : > { %727 = vmatpush1.bf16.msra.mxu0 %v692_v48 }
 0x301   : > { %728 = vmatprep.subr.bf16.mxu0 %v1202_v2 }
 0x304   : > { %729 = vmatpush1.bf16.msra.mxu0 %v693_v52 }
 0x305   : > { %730 = vmatprep.subr.bf16.mxu0 %v1202_v2 }
 0x308   : > { %731 = vmatpush1.bf16.msra.mxu0 %v694_v56  ;;  %v1191_v56 = vld [vmem:[%s1436_s6 + $0x20] ss:$8 sps:$4 sm:$0xff]  }
 0x309   : > { %732 = vmatprep.subr.bf16.mxu0 %v1202_v2 }
 0x30c   : > { %733 = vmatpush1.bf16.msra.mxu0 %v695_v58  ;;  %v701_v4 = vpop.permute.xlu0 %700  ;;  %v706_v8 = vpop.permute.xlu1 %705 }
 0x30d   : > { %734 = vmatprep.subr.bf16.mxu0 %v1202_v2 }
 0x310   : > { %735 = vmatpush1.bf16.msra.mxu0 %v696_v0 }
 0x311   : > { %736 = vmatprep.subr.bf16.mxu0 %v1202_v2 }
 0x314   : > { %737 = vmatpush1.bf16.msra.mxu0 %v697_v1 }
 0x317   : > { %753 = vmatmul.mubr.bf16.vlgmr.msra.gmra.mrb[8].mxu0 %v1188_v3 }
 0x3ea   : > { %v754_v5 = vpop.f32.mrb[8].mxu0 }
 0x3eb   : > { %v755_v6 = vadd.f32 %v754_v5, %v701_v4  ;;  %v756_v7 = vpop.f32.mrb[9].mxu0 }
 0x3ec   : > { %v757_v9 = vpop.f32.mrb[10].mxu0 }
 0x3ed   : > { %v761_v10 = vmax.f32 %v755_v6, 0.0  ;;  %v758_v11 = vadd.f32 %v757_v9, %v706_v8  ;;  %v759_v12 = vpop.f32.mrb[11].mxu0 }
 0x3ef   : > { %v762_v13 = vmax.f32 %v758_v11, 0.0  ;;  %v763_v14 = vmul.f32 %v1300_v23, %v761_v10 }
 0x3f1   : > { %v764_v15 = vmul.f32 %v1300_v23, %v762_v13 }
 0x3f3   : > { %v1141_v16 = vpack.i.bf16 %v764_v15, %v763_v14  ;;  %v807_v17 = vpack.c.bf16 %v764_v15, %v763_v14 }
 0x3f5   : > { %1142 = vrot.lane.b32.xlu1 %v1141_v16, %s1206_s13  ;;  %1137 = vrot.lane.b32.xlu0 %v1141_v16, %s1204_s11 }
 0x3f9   : > { %1152 = vrot.lane.b32.xlu1 %v1141_v16, %s1208_s15  ;;  %1147 = vrot.lane.b32.xlu0 %v1141_v16, %s1203_s29  ;;  %s998_s15 = sshll.u32 %s1441_s10, 3 }
 0x3fa   : > { %s349_s17 = scalar_lea.vmem %s1439_s9, %s998_s15 }
 0x3fd   : > { %1162 = vrot.lane.b32.xlu1 %v1141_v16, %s1209_s18  ;;  %1157 = vrot.lane.b32.xlu0 %v1141_v16, %s1205_s12 }
 0x401   : > { %1172 = vrot.lane.b32.xlu1 %v1141_v16, %s1210_s21  ;;  %1167 = vrot.lane.b32.xlu0 %v1141_v16, %s1207_s14 }
 0x405   : > { %819 = vperm.xlu1 %1095, %v990_v18   ;;  %814 = vperm.xlu0 %1054, %v989_v19  }
 0x467   : > { %v1143_v21 = vpop.permute.xlu1 %1142  ;;  %v1138_v22 = vpop.permute.xlu0 %1137 }
 0x468   : > { %v1140_v24 = vunpack.i.h.bf16 %v1138_v22  ;;  %v1139_v25 = vunpack.i.l.bf16 %v1138_v22  ;;  %v1145_v26 = vunpack.i.h.bf16 %v1143_v21  ;;  %v1144_v29 = vunpack.i.l.bf16 %v1143_v21 }
 0x46a   : > { %v803_v30 = vpack.c.bf16 %v1140_v24, %v1139_v25  ;;  %v804_v32 = vpack.c.bf16 %v1145_v26, %v1144_v29 }
 0x46b   : > { %v1148_v31 = vpop.permute.xlu0 %1147  ;;  %v1153_v35 = vpop.permute.xlu1 %1152 }
 0x46c   : > { %835 = vmatpush1.bf16.msra.mxu1 %v803_v30  ;;  %v1150_v33 = vunpack.i.h.bf16 %v1148_v31  ;;  %v1149_v34 = vunpack.i.l.bf16 %v1148_v31  ;;  %v1155_v36 = vunpack.i.h.bf16 %v1153_v35  ;;  %v1154_v37 = vunpack.i.l.bf16 %v1153_v35 }
 0x46d   : > { %836 = vmatprep.subr.bf16.mxu1 %v1202_v2 }
 0x46e   : > { %v805_v38 = vpack.c.bf16 %v1150_v33, %v1149_v34  ;;  %v806_v39 = vpack.c.bf16 %v1155_v36, %v1154_v37 }
 0x46f   : > { %v1158_v40 = vpop.permute.xlu0 %1157  ;;  %v1163_v43 = vpop.permute.xlu1 %1162 }
 0x470   : > { %837 = vmatpush1.bf16.msra.mxu1 %v804_v32  ;;  %v1160_v41 = vunpack.i.h.bf16 %v1158_v40  ;;  %v1159_v42 = vunpack.i.l.bf16 %v1158_v40  ;;  %v1165_v44 = vunpack.i.h.bf16 %v1163_v43  ;;  %v1164_v45 = vunpack.i.l.bf16 %v1163_v43 }
 0x471   : > { %838 = vmatprep.subr.bf16.mxu1 %v1202_v2 }
 0x472   : > { %v808_v46 = vpack.c.bf16 %v1160_v41, %v1159_v42  ;;  %v809_v48 = vpack.c.bf16 %v1165_v44, %v1164_v45 }
 0x473   : > { %v1168_v47 = vpop.permute.xlu0 %1167  ;;  %v1173_v51 = vpop.permute.xlu1 %1172 }
 0x474   : > { %839 = vmatpush1.bf16.msra.mxu1 %v805_v38  ;;  %v1170_v49 = vunpack.i.h.bf16 %v1168_v47  ;;  %v1169_v50 = vunpack.i.l.bf16 %v1168_v47  ;;  %v1175_v52 = vunpack.i.h.bf16 %v1173_v51  ;;  %v1174_v53 = vunpack.i.l.bf16 %v1173_v51 }
 0x475   : > { %840 = vmatprep.subr.bf16.mxu1 %v1202_v2 }
 0x476   : > { %v810_v54 = vpack.c.bf16 %v1170_v49, %v1169_v50  ;;  %v811_v55 = vpack.c.bf16 %v1175_v52, %v1174_v53 }
 0x478   : > { %841 = vmatpush1.bf16.msra.mxu1 %v806_v39 }
 0x479   : > { %842 = vmatprep.subr.bf16.mxu1 %v1202_v2 }
 0x47c   : > { %843 = vmatpush1.bf16.msra.mxu1 %v807_v17 }
 0x47d   : > { %844 = vmatprep.subr.bf16.mxu1 %v1202_v2 }
 0x480   : > { %845 = vmatpush1.bf16.msra.mxu1 %v808_v46 }
 0x481   : > { %846 = vmatprep.subr.bf16.mxu1 %v1202_v2 }
 0x484   : > { %847 = vmatpush1.bf16.msra.mxu1 %v809_v48  ;;  %v815_v57 = vpop.permute.xlu0 %814  ;;  %v820_v61 = vpop.permute.xlu1 %819 }
 0x485   : > { %848 = vmatprep.subr.bf16.mxu1 %v1202_v2 }
 0x488   : > { %849 = vmatpush1.bf16.msra.mxu1 %v810_v54 }
 0x489   : > { %850 = vmatprep.subr.bf16.mxu1 %v1202_v2 }
 0x48c   : > { %851 = vmatpush1.bf16.msra.mxu1 %v811_v55 }
 0x48f   : > { %867 = vmatmul.mubr.bf16.vlgmr.msra.gmra.mrb[4].mxu1 %v1191_v56 }
 0x562   : > { %v868_v58 = vpop.f32.mrb[4].mxu1 }
 0x563   : > { %v869_v59 = vadd.f32 %v868_v58, %v815_v57  ;;  %v870_v60 = vpop.f32.mrb[5].mxu1 }
 0x564   : > { %v871_v62 = vpop.f32.mrb[6].mxu1 }
 0x565   : > { %v875_v63 = vadd.f32 %v869_v59, %v1350_v27  ;;  %v872_v0 = vadd.f32 %v871_v62, %v820_v61  ;;  %v873_v1 = vpop.f32.mrb[7].mxu1 }
 0x567   : > { %v877_v3 = vmax.f32 %v875_v63, 0.0  ;;  %v876_v2 = vadd.f32 %v872_v0, %v1353_v28 }
 0x569   : > { %v878_v4 = vmax.f32 %v876_v2, 0.0  ;;  %v879_v5 = vmul.f32 %v1300_v23, %v877_v3 }
 0x56b   : > { %v880_v6 = vmul.f32 %v1300_v23, %v878_v4 }
 0x56d   : > { %v1004_v7 = vpack.c.bf16 %v880_v6, %v879_v5 }
 0x56f   : > { %1005 = vst [vmem:[%s349_s17] sm:$0xff] %v1004_v7  }
 0x570 PF: > { %s19_s30 = sadd.s32 1, %s1198_s30  }
 0x571   : > { %p16_p4 = scmp.ge.s32.totalorder %s19_s30, 4  }
 0x573   :  { %18 = sbr.rel (!%p16_p4) target bundleno = 1 (0x1), region = 93 }

// kernel: custom_resnet_forward.8
= control target key start
LH: loop header
LB: loop body
LE: loop exit
PB: predicated region body
PF: predicated region fallthrough
CT: control target
= control target key end

     0   :  { %s2117_s30 = smov 0   ;;  %s2399_s0 = inlined_call_operand.vmem [shape: bf16[2,144,128], index: 0, kind: input, shape index: {}]   ;;  %s2400_s1 = inlined_call_operand.vmem [shape: bf16[2,16,128], index: 1, kind: input, shape index: {}]   ;;  %s2401_s2 = inlined_call_operand.vmem [shape: bf16[32,144], index: 2, kind: input, shape index: {}]   ;;  %s2402_s3 = inlined_call_operand.vmem [shape: f32[32,1], index: 3, kind: input, shape index: {}]   ;;  %s2403_s4 = inlined_call_operand.vmem [shape: bf16[32,16], index: 4, kind: input, shape index: {}]   ;;  %s2404_s5 = inlined_call_operand.vmem [shape: f32[32,1], index: 5, kind: input, shape index: {}]   ;;  %s2405_s6 = inlined_call_operand.vmem [shape: bf16[3,32,288], index: 6, kind: input, shape index: {}]   ;;  %s2406_s7 = inlined_call_operand.vmem [shape: f32[3,32,1], index: 7, kind: input, shape index: {}]   ;;  %s2407_s8 = inlined_call_operand.vmem [shape: f32[1,128], index: 8, kind: input, shape index: {}]   ;;  %s2408_s9 = inlined_call_operand.vmem [shape: bf16[2,32,128], index: 9, kind: output, shape index: {}]  }
   0x1 LB: > { %s1516_s10 = sadd.s32 4294967295, %s2056_s30   ;;  %p1520_p0 = scmp.ge.s32.totalorder %s2056_s30, 1  ;;  %s2056_s30 = sphi %s2117_s30, %s19_s30  }
   0x2   : > { %p297_p1 = scmp.lt.s32.totalorder %s2056_s30, 3 }
   0x4   : > { %p298_p2 = pnand %p1520_p0, %p297_p1 }
   0x5   : > { %p338_p3 = scmp.lt.s32.totalorder (!%p298_p2), %s1516_s10, 1  ;;  %v2058_v0 = vmov (!%p298_p2), 0   ;;  %v2018_v1 = vld [vmem:[%s2401_s2 + $0x4] ss:$8 sps:$4 sm:$0xff] (!%p298_p2)   ;;  %vm473_vm0 = vcmask (!%p298_p2), 130048   ;;  %v379_v4 = vld [vmem:[%s2402_s3 + $0x10] sm:$0xff] (!%p298_p2) }
   0x6   : > { %301 = sbr.rel (%p298_p2) target bundleno = 1439 (0x59f), region = 56  ;;  %480 = vmatprep.subr.bf16.mxu0 (!%p298_p2), %v2058_v0  ;;  %1765 = vset.pattern.permute.xlu0 (!%p298_p2), %v2058_v0  ;;  %v377_v2 = vld [vmem:[%s2402_s3] sm:$0xff] (!%p298_p2)  ;;  %v378_v3 = vld [vmem:[%s2402_s3 + $0x8] sm:$0xff] (!%p298_p2)  ;;  %v380_v5 = vld [vmem:[%s2402_s3 + $0x18] sm:$0xff] (!%p298_p2)  ;;  %s2060_s23 = smov (!%p298_p2), 127   ;;  %vm792_vm1 = vcmask (!%p298_p2), 261120  }
   0x7   : > { %1766 = vset.pattern.permute.xlu1 (!%p298_p2), %v2058_v0  ;;  %1539 = vmatprep.mubr.msk.bf16.mxu0 (!%p298_p2), %vm473_vm0, %v2018_v1  ;;  %v2023_v6 = vld [vmem:[%s2403_s4] sm:$0xff] (!%p298_p2)   ;;  %v2024_v12 = vld [vmem:[%s2403_s4 + $0x8] sm:$0xff] (!%p298_p2)   ;;  %v2019_v19 = vld [vmem:[%s2401_s2 + $0x14] ss:$8 sps:$4 sm:$0xff] (!%p298_p2)   ;;  %s2061_s24 = smov (!%p298_p2), 6   ;;  %s2063_s26 = smov (!%p298_p2), 5  }
   0x8   : > { %383 = vperm.xlu0 (!%p298_p2), %1765, %v377_v2   ;;  %393 = vperm.xlu1 (!%p298_p2), %1766, %v379_v4   ;;  %v2016_v18 = vld [vmem:[%s2401_s2] ss:$8 sps:$4 sm:$0xff] (!%p298_p2)   ;;  %v2021_v20 = vld [vmem:[%s2401_s2 + $0x10] ss:$8 sps:$4 sm:$0xff] (!%p298_p2)   ;;  %s2064_s27 = smov (!%p298_p2), 122   ;;  %s2066_s12 = smov (!%p298_p2), 121  }
   0x9   : > { %1719 = vmatprep.mubr.msk.bf16.mxu1 (!%p298_p2), %vm473_vm0, %v2023_v6  ;;  %v2183_v30 = vld [vmem:[%s2407_s8] ss:$0 sm:$0xff] (!%p298_p2)  ;;  %v2027_v50 = vld [vmem:[%s2405_s6 + $0x4] ss:$12 sps:$4 sm:$0xff] (!%p298_p2)   ;;  %v2028_v52 = vld [vmem:[%s2405_s6 + $0x8] ss:$12 sps:$4 sm:$0xff] (!%p298_p2)  }
   0xa   : > { %v549_v53 = vld [vmem:[%s2404_s5] sm:$0xff] (!%p298_p2)  ;;  %v550_v58 = vld [vmem:[%s2404_s5 + $0x8] sm:$0xff] (!%p298_p2)  ;;  %v551_v59 = vld [vmem:[%s2404_s5 + $0x10] sm:$0xff] (!%p298_p2) }
   0xb   : > { %v656_v55 = vld [vmem:[%s2406_s7] sm:$0xff] (!%p298_p2)  ;;  %v657_v60 = vld [vmem:[%s2406_s7 + $0x8] sm:$0xff] (!%p298_p2)  ;;  %v658_v61 = vld [vmem:[%s2406_s7 + $0x10] sm:$0xff] (!%p298_p2) }
   0xc   : > { %388 = vperm.xlu0 (!%p298_p2), %1765, %v378_v3   ;;  %398 = vperm.xlu1 (!%p298_p2), %1766, %v380_v5   ;;  %v552_v62 = vld [vmem:[%s2404_s5 + $0x18] sm:$0xff] (!%p298_p2) }
   0xd   : > { %s2410_s10 = smov (!%p338_p3, %s1516_s10), 1  ;;  %v659_v63 = vld [vmem:[%s2406_s7 + $0x18] sm:$0xff] }
   0xe   : > { %s1747_s21 = smul.u32 72, %s2410_s10  ;;  %s1601_s22 = sshll.u32 %s2410_s10, 3 }
   0xf   : > { %s347_s25 = scalar_lea.vmem %s2400_s1, %s1601_s22  ;;  %s2059_s22 = smov 7  }
  0x10   : > { %s2154_s11 = scalar_lea.vmem %s2399_s0, %s1747_s21  ;;  %v2022_v7 = vld [vmem:[%s347_s25] sm:$0xff]   ;;  %s2062_s25 = smov 123  }
  0x11   : > { %v2007_v8 = vld [vmem:[%s2154_s11] sm:$0xff]   ;;  %1717 = vmatprep.subr.bf16.mxu1 %v2022_v7  ;;  %v2008_v9 = vld [vmem:[%s2154_s11 + $0x8] sm:$0xff]   ;;  %v2009_v10 = vld [vmem:[%s2154_s11 + $0x10] sm:$0xff]   ;;  %s1602_s15 = sshll.u32 %s2410_s10, 4 }
  0x12   : > { %481 = vmatpush1.bf16.msra.mxu0 %v2007_v8  ;;  %1718 = vmatpush3.bf16.msra.mxu1 %v2022_v7  ;;  %v2010_v11 = vld [vmem:[%s2154_s11 + $0x18] sm:$0xff]   ;;  %v2011_v13 = vld [vmem:[%s2154_s11 + $0x20] sm:$0xff]   ;;  %v2012_v14 = vld [vmem:[%s2154_s11 + $0x28] sm:$0xff]   ;;  %s352_s16 = scalar_lea.vmem %s2408_s9, %s1602_s15 }
  0x13   : > { %482 = vmatprep.subr.bf16.mxu0 %v2058_v0  ;;  %v2013_v15 = vld [vmem:[%s2154_s11 + $0x30] sm:$0xff]   ;;  %v2014_v16 = vld [vmem:[%s2154_s11 + $0x38] sm:$0xff]   ;;  %v2015_v17 = vld [vmem:[%s2154_s11 + $0x40] sm:$0xff]   ;;  %s2065_s11 = smov 1  }
  0x15   : > { %1720 = vmatmul.mubr.msk.bf16.vlgmr.msra.gmra.mrb[0].mxu1 %vm473_vm0, %v2024_v12 }
  0x16   : > { %483 = vmatpush1.bf16.msra.mxu0 %v2008_v9  ;;  %831 = vmatprep.mubr.bf16.mxu1 %v2027_v50 }
  0x17   : > { %484 = vmatprep.subr.bf16.mxu0 %v2058_v0 }
  0x1a   : > { %485 = vmatpush1.bf16.msra.mxu0 %v2009_v10 }
  0x1b   : > { %486 = vmatprep.subr.bf16.mxu0 %v2058_v0 }
  0x1e   : > { %487 = vmatpush1.bf16.msra.mxu0 %v2010_v11 }
  0x1f   : > { %488 = vmatprep.subr.bf16.mxu0 %v2058_v0 }
  0x22   : > { %489 = vmatpush1.bf16.msra.mxu0 %v2011_v13 }
  0x23   : > { %490 = vmatprep.subr.bf16.mxu0 %v2058_v0 }
  0x26   : > { %491 = vmatpush1.bf16.msra.mxu0 %v2012_v14 }
  0x27   : > { %492 = vmatprep.subr.bf16.mxu0 %v2058_v0 }
  0x2a   : > { %493 = vmatpush1.bf16.msra.mxu0 %v2013_v15 }
  0x2b   : > { %494 = vmatprep.subr.bf16.mxu0 %v2058_v0 }
  0x2e   : > { %495 = vmatpush1.bf16.msra.mxu0 %v2014_v16 }
  0x2f   : > { %496 = vmatprep.subr.bf16.mxu0 %v2058_v0 }
  0x32   : > { %497 = vmatpush1.bf16.msra.mxu0 %v2015_v17 }
  0x35   : > { %513 = vmatmul.mubr.bf16.vlgmr.msra.gmra.mrb[0].mxu0 %v2016_v18 }
  0x36   : > { %1540 = vmatprep.mubr.msk.bf16.mxu0 %vm473_vm0, %v2019_v19 }
  0x3d   : > { %521 = vmatmul.mubr.bf16.gmra.mrb[4].mxu0 %v2021_v20 }
  0x3e   : > { %1727 = vmatprep.mubr.msk.bf16.mxu0 %vm792_vm1, %v2028_v52 }
  0x87   : > { %v384_v21 = vpop.permute.xlu0 %383  ;;  %v394_v31 = vpop.permute.xlu1 %393 }
  0x8b   : > { %v389_v22 = vpop.permute.xlu0 %388  ;;  %v399_v40 = vpop.permute.xlu1 %398 }
  0xe8   : > { %v2206_v51 = vpop.f32.mrb[0].mxu1 }
  0xe9   : > { %v2214_v54 = vpop.f32.mrb[1].mxu1 }
  0xea   : > { %v2221_v56 = vpop.f32.mrb[2].mxu1 }
  0xeb   : > { %v2224_v57 = vpop.f32.mrb[3].mxu1 }
 0x108   : > { %v514_v23 = vpop.f32.mrb[0].mxu0 }
 0x109   : > { %v515_v24 = vadd.f32 %v514_v23, %v384_v21  ;;  %v516_v25 = vpop.f32.mrb[1].mxu0 }
 0x10a   : > { %v517_v26 = vpop.f32.mrb[2].mxu0 }
 0x10b   : > { %v529_v27 = vmax.f32 %v515_v24, 0.0  ;;  %v518_v28 = vadd.f32 %v517_v26, %v389_v22  ;;  %v519_v29 = vpop.f32.mrb[3].mxu0 }
 0x10d   : > { %v530_v32 = vmax.f32 %v518_v28, 0.0  ;;  %v539_v33 = vmul.f32 %v2183_v30, %v529_v27 }
 0x10f   : > { %v540_v34 = vmul.f32 %v2183_v30, %v530_v32 }
 0x110   : > { %v522_v35 = vpop.f32.mrb[4].mxu0 }
 0x111   : > { %v523_v36 = vadd.f32 %v522_v35, %v394_v31  ;;  %v524_v37 = vpop.f32.mrb[5].mxu0  ;;  %v1767_v38 = vpack.i.bf16 %v540_v34, %v539_v33  ;;  %v732_v39 = vpack.c.bf16 %v540_v34, %v539_v33 }
 0x112   : > { %v525_v41 = vpop.f32.mrb[6].mxu0 }
 0x113   : > { %v531_v42 = vmax.f32 %v523_v36, 0.0  ;;  %v526_v43 = vadd.f32 %v525_v41, %v399_v40  ;;  %v527_v44 = vpop.f32.mrb[7].mxu0  ;;  %1768 = vrot.lane.b32.xlu0 %v1767_v38, %s2059_s22  ;;  %1621 = vmatprep.subr.bf16.mxu1 %v732_v39 }
 0x115   : > { %v532_v45 = vmax.f32 %v526_v43, 0.0  ;;  %v541_v46 = vmul.f32 %v2183_v30, %v531_v42 }
 0x117   : > { %v542_v47 = vmul.f32 %v2183_v30, %v532_v45  ;;  %1773 = vrot.lane.b32.xlu0 %v1767_v38, %s2060_s23 }
 0x119   : > { %v1777_v48 = vpack.i.bf16 %v542_v47, %v541_v46  ;;  %v733_v49 = vpack.c.bf16 %v542_v47, %v541_v46 }
 0x11b   : > { %1778 = vrot.lane.b32.xlu1 %v1777_v48, %s2059_s22  ;;  %1788 = vrot.lane.b32.xlu0 %v1777_v48, %s2060_s23 }
 0x11f   : > { %1783 = vrot.lane.b32.xlu1 %v1767_v38, %s2061_s24  ;;  %1793 = vrot.lane.b32.xlu0 %v1767_v38, %s2062_s25 }
 0x123   : > { %1798 = vrot.lane.b32.xlu1 %v1777_v48, %s2061_s24  ;;  %1808 = vrot.lane.b32.xlu0 %v1777_v48, %s2062_s25 }
 0x127   : > { %1803 = vrot.lane.b32.xlu1 %v1767_v38, %s2063_s26  ;;  %1813 = vrot.lane.b32.xlu0 %v1767_v38, %s2064_s27 }
 0x12b   : > { %1818 = vrot.lane.b32.xlu1 %v1777_v48, %s2063_s26  ;;  %1828 = vrot.lane.b32.xlu0 %v1777_v48, %s2064_s27 }
 0x12f   : > { %1823 = vrot.lane.b32.xlu1 %v1767_v38, %s2065_s11  ;;  %1838 = vrot.lane.b32.xlu0 %v1767_v38, %s2066_s12 }
 0x133   : > { %1833 = vrot.lane.b32.xlu1 %v1777_v48, %s2065_s11  ;;  %555 = vperm.xlu0 %1765, %v549_v53  }
 0x137   : > { %1843 = vrot.lane.b32.xlu1 %v1777_v48, %s2066_s12  ;;  %744 = vperm.xlu0 %1765, %v656_v55  }
 0x13b   : > { %560 = vperm.xlu1 %1766, %v550_v58   ;;  %565 = vperm.xlu0 %1765, %v551_v59  }
 0x13f   : > { %749 = vperm.xlu1 %1766, %v657_v60   ;;  %754 = vperm.xlu0 %1765, %v658_v61  }
 0x143   : > { %570 = vperm.xlu1 %1766, %v552_v62  }
 0x147   : > { %759 = vperm.xlu1 %1766, %v659_v63  }
 0x185   : > { %v1769_v0 = vpop.permute.xlu0 %1768 }
 0x186   : > { %v1771_v1 = vunpack.i.h.bf16 %v1769_v0  ;;  %v1770_v2 = vunpack.i.l.bf16 %v1769_v0 }
 0x188   : > { %v724_v3 = vpack.c.bf16 %v1771_v1, %v1770_v2  ;;  %v2025_v2 = vld [vmem:[%s2405_s6] ss:$12 sps:$4 sm:$0xff]  }
 0x189   : > { %v1774_v4 = vpop.permute.xlu0 %1773 }
 0x18a   : > { %1622 = vmatpush3.bf16.msra.mxu1 %v724_v3  ;;  %v1776_v5 = vunpack.i.h.bf16 %v1774_v4  ;;  %v1775_v6 = vunpack.i.l.bf16 %v1774_v4 }
 0x18b   : > { %1623 = vmatprep.subr.bf16.mxu1 %v733_v49 }
 0x18c   : > { %v734_v12 = vpack.c.bf16 %v1776_v5, %v1775_v6  ;;  %v2030_v5 = vld [vmem:[%s2405_s6 + $0x1c] ss:$12 sps:$4 sm:$0xff]  }
 0x18d   : > { %v1779_v7 = vpop.permute.xlu1 %1778  ;;  %v1789_v8 = vpop.permute.xlu0 %1788 }
 0x18e   : > { %v1781_v9 = vunpack.i.h.bf16 %v1779_v7  ;;  %v1780_v10 = vunpack.i.l.bf16 %v1779_v7  ;;  %v1791_v13 = vunpack.i.h.bf16 %v1789_v8  ;;  %v1790_v14 = vunpack.i.l.bf16 %v1789_v8  ;;  %v2029_v7 = vld [vmem:[%s2405_s6 + $0x20] ss:$12 sps:$4 sm:$0xff]   ;;  %v2032_v8 = vld [vmem:[%s2405_s6 + $0x18] ss:$12 sps:$4 sm:$0xff]  }
 0x190   : > { %v725_v11 = vpack.c.bf16 %v1781_v9, %v1780_v10  ;;  %v735_v20 = vpack.c.bf16 %v1791_v13, %v1790_v14 }
 0x191   : > { %v1784_v15 = vpop.permute.xlu1 %1783  ;;  %v1794_v16 = vpop.permute.xlu0 %1793 }
 0x192   : > { %v1786_v17 = vunpack.i.h.bf16 %v1784_v15  ;;  %v1785_v18 = vunpack.i.l.bf16 %v1784_v15  ;;  %1624 = vmatpush3.bf16.msra.mxu1 %v725_v11  ;;  %v1796_v21 = vunpack.i.h.bf16 %v1794_v16  ;;  %v1795_v22 = vunpack.i.l.bf16 %v1794_v16 }
 0x193   : > { %1625 = vmatprep.subr.bf16.mxu1 %v734_v12 }
 0x194   : > { %v726_v19 = vpack.c.bf16 %v1786_v17, %v1785_v18  ;;  %v736_v28 = vpack.c.bf16 %v1796_v21, %v1795_v22 }
 0x195   : > { %v1799_v23 = vpop.permute.xlu1 %1798  ;;  %v1809_v24 = vpop.permute.xlu0 %1808 }
 0x196   : > { %v1801_v25 = vunpack.i.h.bf16 %v1799_v23  ;;  %v1800_v26 = vunpack.i.l.bf16 %v1799_v23  ;;  %1626 = vmatpush3.bf16.msra.mxu1 %v726_v19  ;;  %v1811_v29 = vunpack.i.h.bf16 %v1809_v24  ;;  %v1810_v31 = vunpack.i.l.bf16 %v1809_v24 }
 0x197   : > { %1627 = vmatprep.subr.bf16.mxu1 %v735_v20 }
 0x198   : > { %v727_v27 = vpack.c.bf16 %v1801_v25, %v1800_v26  ;;  %v737_v37 = vpack.c.bf16 %v1811_v29, %v1810_v31 }
 0x199   : > { %v1804_v32 = vpop.permute.xlu1 %1803  ;;  %v1814_v33 = vpop.permute.xlu0 %1813 }
 0x19a   : > { %v1806_v34 = vunpack.i.h.bf16 %v1804_v32  ;;  %v1805_v35 = vunpack.i.l.bf16 %v1804_v32  ;;  %1628 = vmatpush3.bf16.msra.mxu1 %v727_v27  ;;  %v1816_v38 = vunpack.i.h.bf16 %v1814_v33  ;;  %v1815_v39 = vunpack.i.l.bf16 %v1814_v33 }
 0x19b   : > { %1629 = vmatprep.subr.bf16.mxu1 %v736_v28 }
 0x19c   : > { %v728_v36 = vpack.c.bf16 %v1806_v34, %v1805_v35  ;;  %v738_v45 = vpack.c.bf16 %v1816_v38, %v1815_v39 }
 0x19d   : > { %v1819_v40 = vpop.permute.xlu1 %1818  ;;  %v1829_v41 = vpop.permute.xlu0 %1828 }
 0x19e   : > { %v1821_v42 = vunpack.i.h.bf16 %v1819_v40  ;;  %v1820_v43 = vunpack.i.l.bf16 %v1819_v40  ;;  %1630 = vmatpush3.bf16.msra.mxu1 %v728_v36  ;;  %v1831_v46 = vunpack.i.h.bf16 %v1829_v41  ;;  %v1830_v47 = vunpack.i.l.bf16 %v1829_v41 }
 0x19f   : > { %1631 = vmatprep.subr.bf16.mxu1 %v737_v37 }
 0x1a0   : > { %v729_v44 = vpack.c.bf16 %v1821_v42, %v1820_v43  ;;  %v739_v60 = vpack.c.bf16 %v1831_v46, %v1830_v47 }
 0x1a1   : > { %v1824_v48 = vpop.permute.xlu1 %1823  ;;  %v1839_v49 = vpop.permute.xlu0 %1838 }
 0x1a2   : > { %v1826_v50 = vunpack.i.h.bf16 %v1824_v48  ;;  %v1825_v52 = vunpack.i.l.bf16 %v1824_v48  ;;  %v1841_v53 = vunpack.i.h.bf16 %v1839_v49  ;;  %v1840_v55 = vunpack.i.l.bf16 %v1839_v49  ;;  %1632 = vmatpush3.bf16.msra.mxu1 %v729_v44 }
 0x1a3   : > { %1633 = vmatprep.subr.bf16.mxu1 %v738_v45 }
 0x1a4   : > { %v730_v58 = vpack.c.bf16 %v1826_v50, %v1825_v52  ;;  %v740_v59 = vpack.c.bf16 %v1841_v53, %v1840_v55 }
 0x1a5   : > { %v1834_v61 = vpop.permute.xlu1 %1833 }
 0x1a6   : > { %v1836_v62 = vunpack.i.h.bf16 %v1834_v61  ;;  %v1835_v63 = vunpack.i.l.bf16 %v1834_v61  ;;  %1634 = vmatpush3.bf16.msra.mxu1 %v730_v58  ;;  %1723 = vmatprep.subr.bf16.mxu0 %v740_v59 }
 0x1a7   : > { %1635 = vmatprep.subr.bf16.mxu1 %v739_v60  ;;  %1724 = vmatpush3.bf16.msra.mxu0 %v740_v59 }
 0x1a8   : > { %v731_v0 = vpack.c.bf16 %v1836_v62, %v1835_v63 }
 0x1a9   : > { %v1844_v1 = vpop.permute.xlu1 %1843 }
 0x1aa   : > { %v1846_v3 = vunpack.i.h.bf16 %v1844_v1  ;;  %v1845_v4 = vunpack.i.l.bf16 %v1844_v1  ;;  %1636 = vmatpush3.bf16.msra.mxu1 %v731_v0  ;;  %v2035_v1 = vld [vmem:[%s2405_s6 + $0x34] ss:$12 sps:$4 sm:$0xff]  }
 0x1ac   : > { %v741_v6 = vpack.c.bf16 %v1846_v3, %v1845_v4  ;;  %v1565_v3 = vld [vmem:[%s2406_s7 + $0x30] sm:$0xff]  ;;  %v1564_v4 = vld [vmem:[%s2406_s7 + $0x28] sm:$0xff] }
 0x1ad   : > { %832 = vmatmul.mubr.bf16.vlgmr.msra.gmra.mrb[4].mxu1 %v2025_v2  ;;  %v1563_v2 = vld [vmem:[%s2406_s7 + $0x20] sm:$0xff] }
 0x1ae   : > { %1725 = vmatprep.subr.bf16.mxu0 %v741_v6  ;;  %839 = vmatprep.mubr.bf16.mxu1 %v2030_v5  ;;  %v1566_v5 = vld [vmem:[%s2406_s7 + $0x38] sm:$0xff] }
 0x1af   : > { %1726 = vmatpush3.bf16.msra.mxu0 %v741_v6 }
 0x1b2   : > { %1728 = vmatmul.mubr.msk.bf16.vlgmr.msra.gmra.mrb[8].mxu0 %vm792_vm1, %v2029_v7  ;;  %v556_v9 = vpop.permute.xlu0 %555 }
 0x1b3   : > { %v630_v17 = vadd.f32 %v2214_v54, %v556_v9 }
 0x1b5   : > { %840 = vmatmul.mubr.bf16.gmra.mrb[8].mxu1 %v2032_v8  ;;  %v644_v26 = vmul.f32 %v2183_v30, %v630_v17 }
 0x1b6   : > { %v745_v11 = vpop.permute.xlu0 %744  ;;  %1093 = vmatprep.mubr.bf16.mxu1 %v2035_v1 }
 0x1ba   : > { %v561_v10 = vpop.permute.xlu1 %560  ;;  %v566_v22 = vpop.permute.xlu0 %565 }
 0x1bb   : > { %v633_v21 = vadd.f32 %v2224_v57, %v561_v10  ;;  %v638_v36 = vadd.f32 %v2206_v51, %v566_v22 }
 0x1bd   : > { %v645_v33 = vmul.f32 %v2183_v30, %v633_v21  ;;  %v646_v47 = vmul.f32 %v2183_v30, %v638_v36 }
 0x1be   : > { %v750_v13 = vpop.permute.xlu1 %749  ;;  %v755_v38 = vpop.permute.xlu0 %754 }
 0x1c2   : > { %v571_v27 = vpop.permute.xlu1 %570 }
 0x1c3   : > { %v641_v42 = vadd.f32 %v2221_v56, %v571_v27 }
 0x1c5   : > { %v647_v52 = vmul.f32 %v2183_v30, %v641_v42 }
 0x1c6   : > { %v760_v45 = vpop.permute.xlu1 %759 }
 0x280   : > { %v1637_v12 = vpop.f32.mrb[4].mxu1 }
 0x281   : > { %v1638_v14 = vpop.f32.mrb[5].mxu1 }
 0x282   : > { %v1639_v15 = vadd.f32 %v1638_v14, %v1637_v12  ;;  %v1640_v16 = vpop.f32.mrb[6].mxu1 }
 0x283   : > { %v1641_v18 = vpop.f32.mrb[7].mxu1 }
 0x284   : > { %v1642_v19 = vadd.f32 %v1641_v18, %v1640_v16  ;;  %v834_v20 = vadd.f32 %v1639_v15, %v745_v11 }
 0x285   : > { %v1729_v23 = vpop.f32.mrb[8].mxu0 }
 0x286   : > { %v882_v24 = vpop.f32.mrb[9].mxu0  ;;  %v837_v25 = vadd.f32 %v1642_v19, %v750_v13 }
 0x287   : > { %v883_v28 = vadd.f32 %v882_v24, %v834_v20  ;;  %v1730_v29 = vpop.f32.mrb[10].mxu0 }
 0x288   : > { %v1643_v31 = vpop.f32.mrb[8].mxu1  ;;  %v885_v32 = vpop.f32.mrb[11].mxu0 }
 0x289   : > { %v897_v34 = vadd.f32 %v883_v28, %v644_v26  ;;  %v886_v54 = vadd.f32 %v885_v32, %v837_v25  ;;  %v1644_v35 = vpop.f32.mrb[9].mxu1 }
 0x28a   : > { %v1645_v37 = vadd.f32 %v1644_v35, %v1643_v31  ;;  %v1646_v57 = vpop.f32.mrb[10].mxu1 }
 0x28b   : > { %v901_v39 = vmax.f32 %v897_v34, 0.0  ;;  %v898_v40 = vadd.f32 %v886_v54, %v645_v33  ;;  %v1647_v41 = vpop.f32.mrb[11].mxu1 }
 0x28c   : > { %v842_v43 = vadd.f32 %v1645_v37, %v755_v38  ;;  %v1648_v44 = vadd.f32 %v1647_v41, %v1646_v57 }
 0x28d   : > { %v902_v46 = vmax.f32 %v898_v40, 0.0  ;;  %v2265_v50 = vmul.f32 %v2183_v30, %v901_v39 }
 0x28e   : > { %v891_v48 = vadd.f32 %v1729_v23, %v842_v43  ;;  %v845_v49 = vadd.f32 %v1648_v44, %v760_v45 }
 0x28f   : > { %v2268_v51 = vmul.f32 %v2183_v30, %v902_v46 }
 0x290   : > { %v899_v53 = vadd.f32 %v891_v48, %v646_v47  ;;  %v894_v55 = vadd.f32 %v1730_v29, %v845_v49 }
 0x291   : > { %v1847_v56 = vpack.i.bf16 %v2268_v51, %v2265_v50  ;;  %v995_v58 = vpack.c.bf16 %v2268_v51, %v2265_v50 }
 0x292   : > { %v903_v59 = vmax.f32 %v899_v53, 0.0  ;;  %v900_v60 = vadd.f32 %v894_v55, %v647_v52 }
 0x293   : > { %1848 = vrot.lane.b32.xlu0 %v1847_v56, %s2059_s22  ;;  %1653 = vmatprep.subr.bf16.mxu1 %v995_v58 }
 0x294   : > { %v904_v61 = vmax.f32 %v900_v60, 0.0  ;;  %v2277_v62 = vmul.f32 %v2183_v30, %v903_v59 }
 0x296   : > { %v2280_v63 = vmul.f32 %v2183_v30, %v904_v61 }
 0x297   : > { %1853 = vrot.lane.b32.xlu0 %v1847_v56, %s2060_s23 }
 0x298   : > { %v1857_v0 = vpack.i.bf16 %v2280_v63, %v2277_v62  ;;  %v996_v11 = vpack.c.bf16 %v2280_v63, %v2277_v62 }
 0x29a   : > { %1858 = vrot.lane.b32.xlu1 %v1857_v0, %s2059_s22 }
 0x29b   : > { %1868 = vrot.lane.b32.xlu0 %v1857_v0, %s2060_s23 }
 0x29e   : > { %1863 = vrot.lane.b32.xlu1 %v1847_v56, %s2061_s24 }
 0x29f   : > { %1873 = vrot.lane.b32.xlu0 %v1847_v56, %s2062_s25 }
 0x2a2   : > { %1878 = vrot.lane.b32.xlu1 %v1857_v0, %s2061_s24 }
 0x2a3   : > { %1888 = vrot.lane.b32.xlu0 %v1857_v0, %s2062_s25 }
 0x2a6   : > { %1883 = vrot.lane.b32.xlu1 %v1847_v56, %s2063_s26 }
 0x2a7   : > { %1893 = vrot.lane.b32.xlu0 %v1847_v56, %s2064_s27 }
 0x2aa   : > { %1898 = vrot.lane.b32.xlu1 %v1857_v0, %s2063_s26 }
 0x2ab   : > { %1908 = vrot.lane.b32.xlu0 %v1857_v0, %s2064_s27 }
 0x2ae   : > { %1903 = vrot.lane.b32.xlu1 %v1847_v56, %s2065_s11 }
 0x2af   : > { %1918 = vrot.lane.b32.xlu0 %v1847_v56, %s2066_s12 }
 0x2b2   : > { %1913 = vrot.lane.b32.xlu1 %v1857_v0, %s2065_s11 }
 0x2b3   : > { %1007 = vperm.xlu0 %1765, %v1563_v2  }
 0x2b6   : > { %1923 = vrot.lane.b32.xlu1 %v1857_v0, %s2066_s12 }
 0x2b7   : > { %1017 = vperm.xlu0 %1765, %v1565_v3  }
 0x2ba   : > { %1012 = vperm.xlu1 %1766, %v1564_v4  }
 0x2be   : > { %1022 = vperm.xlu1 %1766, %v1566_v5  }
 0x305   : > { %v1849_v6 = vpop.permute.xlu0 %1848 }
 0x306   : > { %v1851_v7 = vunpack.i.h.bf16 %v1849_v6  ;;  %v1850_v8 = vunpack.i.l.bf16 %v1849_v6 }
 0x308   : > { %v987_v9 = vpack.c.bf16 %v1851_v7, %v1850_v8 }
 0x309   : > { %v1854_v10 = vpop.permute.xlu0 %1853 }
 0x30a   : > { %1654 = vmatpush3.bf16.msra.mxu1 %v987_v9  ;;  %v1856_v12 = vunpack.i.h.bf16 %v1854_v10  ;;  %v1855_v13 = vunpack.i.l.bf16 %v1854_v10  ;;  %v2033_v9 = vld [vmem:[%s2405_s6 + $0x30] ss:$12 sps:$4 sm:$0xff]  }
 0x30b   : > { %1655 = vmatprep.subr.bf16.mxu1 %v996_v11 }
 0x30c   : > { %v1859_v14 = vpop.permute.xlu1 %1858  ;;  %v997_v19 = vpack.c.bf16 %v1856_v12, %v1855_v13  ;;  %v2036_v12 = vld [vmem:[%s2405_s6 + $0x4c] ss:$12 sps:$4 sm:$0xff]  }
 0x30d   : > { %v1861_v15 = vunpack.i.h.bf16 %v1859_v14  ;;  %v1860_v16 = vunpack.i.l.bf16 %v1859_v14  ;;  %v1869_v17 = vpop.permute.xlu0 %1868  ;;  %v2038_v14 = vld [vmem:[%s2405_s6 + $0x48] ss:$12 sps:$4 sm:$0xff]  }
 0x30e   : > { %v1871_v20 = vunpack.i.h.bf16 %v1869_v17  ;;  %v1870_v21 = vunpack.i.l.bf16 %v1869_v17 }
 0x30f   : > { %v988_v18 = vpack.c.bf16 %v1861_v15, %v1860_v16  ;;  %v2039_v15 = vld [vmem:[%s2405_s6 + $0x38] ss:$12 sps:$4 sm:$0xff]   ;;  %v2040_v16 = vld [vmem:[%s2405_s6 + $0x50] ss:$12 sps:$4 sm:$0xff]  }
 0x310   : > { %v1864_v22 = vpop.permute.xlu1 %1863  ;;  %v998_v27 = vpack.c.bf16 %v1871_v20, %v1870_v21 }
 0x311   : > { %v1866_v23 = vunpack.i.h.bf16 %v1864_v22  ;;  %v1865_v24 = vunpack.i.l.bf16 %v1864_v22  ;;  %v1874_v25 = vpop.permute.xlu0 %1873  ;;  %1656 = vmatpush3.bf16.msra.mxu1 %v988_v18 }
 0x312   : > { %1657 = vmatprep.subr.bf16.mxu1 %v997_v19  ;;  %v1876_v28 = vunpack.i.h.bf16 %v1874_v25  ;;  %v1875_v29 = vunpack.i.l.bf16 %v1874_v25 }
 0x313   : > { %v989_v26 = vpack.c.bf16 %v1866_v23, %v1865_v24 }
 0x314   : > { %v1879_v31 = vpop.permute.xlu1 %1878  ;;  %v999_v35 = vpack.c.bf16 %v1876_v28, %v1875_v29 }
 0x315   : > { %v1881_v32 = vunpack.i.h.bf16 %v1879_v31  ;;  %v1880_v33 = vunpack.i.l.bf16 %v1879_v31  ;;  %v1889_v34 = vpop.permute.xlu0 %1888  ;;  %1658 = vmatpush3.bf16.msra.mxu1 %v989_v26 }
 0x316   : > { %1659 = vmatprep.subr.bf16.mxu1 %v998_v27  ;;  %v1891_v36 = vunpack.i.h.bf16 %v1889_v34  ;;  %v1890_v37 = vunpack.i.l.bf16 %v1889_v34 }
 0x317   : > { %v990_v54 = vpack.c.bf16 %v1881_v32, %v1880_v33 }
 0x318   : > { %v1884_v57 = vpop.permute.xlu1 %1883  ;;  %v1000_v42 = vpack.c.bf16 %v1891_v36, %v1890_v37 }
 0x319   : > { %v1886_v38 = vunpack.i.h.bf16 %v1884_v57  ;;  %v1885_v39 = vunpack.i.l.bf16 %v1884_v57  ;;  %v1894_v40 = vpop.permute.xlu0 %1893  ;;  %1660 = vmatpush3.bf16.msra.mxu1 %v990_v54 }
 0x31a   : > { %1661 = vmatprep.subr.bf16.mxu1 %v999_v35  ;;  %v1896_v43 = vunpack.i.h.bf16 %v1894_v40  ;;  %v1895_v44 = vunpack.i.l.bf16 %v1894_v40 }
 0x31b   : > { %v991_v41 = vpack.c.bf16 %v1886_v38, %v1885_v39 }
 0x31c   : > { %v1899_v45 = vpop.permute.xlu1 %1898  ;;  %v1001_v52 = vpack.c.bf16 %v1896_v43, %v1895_v44 }
 0x31d   : > { %v1901_v46 = vunpack.i.h.bf16 %v1899_v45  ;;  %v1900_v47 = vunpack.i.l.bf16 %v1899_v45  ;;  %v1909_v48 = vpop.permute.xlu0 %1908  ;;  %1662 = vmatpush3.bf16.msra.mxu1 %v991_v41 }
 0x31e   : > { %1663 = vmatprep.subr.bf16.mxu1 %v1000_v42  ;;  %v1911_v53 = vunpack.i.h.bf16 %v1909_v48  ;;  %v1910_v55 = vunpack.i.l.bf16 %v1909_v48 }
 0x31f   : > { %v992_v49 = vpack.c.bf16 %v1901_v46, %v1900_v47 }
 0x320   : > { %v1904_v56 = vpop.permute.xlu1 %1903  ;;  %v1002_v0 = vpack.c.bf16 %v1911_v53, %v1910_v55 }
 0x321   : > { %v1906_v58 = vunpack.i.h.bf16 %v1904_v56  ;;  %v1905_v59 = vunpack.i.l.bf16 %v1904_v56  ;;  %v1919_v60 = vpop.permute.xlu0 %1918  ;;  %1664 = vmatpush3.bf16.msra.mxu1 %v992_v49 }
 0x322   : > { %1665 = vmatprep.subr.bf16.mxu1 %v1001_v52  ;;  %v1921_v1 = vunpack.i.h.bf16 %v1919_v60  ;;  %v1920_v2 = vunpack.i.l.bf16 %v1919_v60  ;;  %v2044_v60 = vld [vmem:[%s2405_s6 + $0x68] ss:$12 sps:$4 sm:$0xff]  }
 0x323   : > { %v993_v61 = vpack.c.bf16 %v1906_v58, %v1905_v59 }
 0x324   : > { %v1914_v3 = vpop.permute.xlu1 %1913  ;;  %v1003_v7 = vpack.c.bf16 %v1921_v1, %v1920_v2  ;;  %v1586_v1 = vld [vmem:[%s2406_s7 + $0x58] sm:$0xff]  ;;  %v1585_v2 = vld [vmem:[%s2406_s7 + $0x50] sm:$0xff] }
 0x325   : > { %v1916_v4 = vunpack.i.h.bf16 %v1914_v3  ;;  %v1915_v5 = vunpack.i.l.bf16 %v1914_v3  ;;  %1666 = vmatpush3.bf16.msra.mxu1 %v993_v61  ;;  %v1584_v61 = vld [vmem:[%s2406_s7 + $0x48] sm:$0xff] }
 0x326   : > { %1667 = vmatprep.subr.bf16.mxu1 %v1002_v0  ;;  %v1583_v0 = vld [vmem:[%s2406_s7 + $0x40] sm:$0xff] }
 0x327   : > { %v994_v6 = vpack.c.bf16 %v1916_v4, %v1915_v5 }
 0x328   : > { %v1924_v8 = vpop.permute.xlu1 %1923 }
 0x329   : > { %v1926_v10 = vunpack.i.h.bf16 %v1924_v8  ;;  %v1925_v11 = vunpack.i.l.bf16 %v1924_v8  ;;  %1668 = vmatpush3.bf16.msra.mxu1 %v994_v6 }
 0x32a   : > { %1731 = vmatprep.subr.bf16.mxu1 %v1003_v7 }
 0x32b   : > { %v1004_v13 = vpack.c.bf16 %v1926_v10, %v1925_v11 }
 0x32c   : > { %1094 = vmatmul.mubr.bf16.vlgmr.msra.gmra.mrb[12].mxu1 %v2033_v9 }
 0x32d   : > { %1732 = vmatpush3.bf16.msra.mxu1 %v1003_v7  ;;  %1101 = vmatprep.mubr.bf16.mxu1 %v2036_v12 }
 0x32e   : > { %1733 = vmatprep.subr.bf16.mxu1 %v1004_v13 }
 0x331   : > { %1734 = vmatpush3.bf16.msra.mxu1 %v1004_v13 }
 0x332   : > { %v1008_v23 = vpop.permute.xlu0 %1007 }
 0x334   : > { %1102 = vmatmul.mubr.bf16.gmra.mrb[16].mxu1 %v2038_v14 }
 0x335   : > { %1735 = vmatprep.mubr.msk.bf16.mxu1 %vm792_vm1, %v2039_v15 }
 0x336   : > { %v1018_v32 = vpop.permute.xlu0 %1017 }
 0x339   : > { %v1013_v26 = vpop.permute.xlu1 %1012 }
 0x33c   : > { %1736 = vmatmul.mubr.msk.bf16.vlgmr.msra.gmra.mrb[20].mxu1 %vm792_vm1, %v2040_v16 }
 0x33d   : > { %v1023_v34 = vpop.permute.xlu1 %1022  ;;  %1743 = vmatprep.mubr.msk.bf16.mxu1 %vm792_vm1, %v2044_v60 }
 0x3ff   : > { %v1669_v17 = vpop.f32.mrb[12].mxu1 }
 0x400   : > { %v1670_v18 = vpop.f32.mrb[13].mxu1 }
 0x401   : > { %v1671_v19 = vadd.f32 %v1670_v18, %v1669_v17  ;;  %v1672_v20 = vpop.f32.mrb[14].mxu1 }
 0x402   : > { %v1673_v21 = vpop.f32.mrb[15].mxu1 }
 0x403   : > { %v1674_v22 = vadd.f32 %v1673_v21, %v1672_v20  ;;  %v1096_v35 = vadd.f32 %v1671_v19, %v1008_v23 }
 0x405   : > { %v1099_v40 = vadd.f32 %v1674_v22, %v1013_v26 }
 0x407   : > { %v1675_v24 = vpop.f32.mrb[16].mxu1 }
 0x408   : > { %v1676_v25 = vpop.f32.mrb[17].mxu1 }
 0x409   : > { %v1677_v27 = vadd.f32 %v1676_v25, %v1675_v24  ;;  %v1678_v28 = vpop.f32.mrb[18].mxu1 }
 0x40a   : > { %v1679_v29 = vpop.f32.mrb[19].mxu1 }
 0x40b   : > { %v1680_v31 = vadd.f32 %v1679_v29, %v1678_v28  ;;  %v1104_v33 = vadd.f32 %v1677_v27, %v1018_v32 }
 0x40d   : > { %v1107_v57 = vadd.f32 %v1680_v31, %v1023_v34 }
 0x40f   : > { %v1737_v54 = vpop.f32.mrb[20].mxu1 }
 0x410   : > { %v1153_v36 = vadd.f32 %v1737_v54, %v1104_v33  ;;  %v1144_v37 = vpop.f32.mrb[21].mxu1 }
 0x411   : > { %v1145_v38 = vadd.f32 %v1144_v37, %v1096_v35  ;;  %v1738_v39 = vpop.f32.mrb[22].mxu1 }
 0x412   : > { %v1161_v41 = vmax.f32 %v1153_v36, 0.0  ;;  %v1156_v42 = vadd.f32 %v1738_v39, %v1107_v57  ;;  %v1147_v43 = vpop.f32.mrb[23].mxu1 }
 0x413   : > { %v1159_v44 = vmax.f32 %v1145_v38, 0.0  ;;  %v1148_v45 = vadd.f32 %v1147_v43, %v1099_v40 }
 0x414   : > { %v1162_v46 = vmax.f32 %v1156_v42, 0.0  ;;  %v1165_v48 = vmul.f32 %v2183_v30, %v1161_v41 }
 0x415   : > { %v1160_v47 = vmax.f32 %v1148_v45, 0.0  ;;  %v1163_v52 = vmul.f32 %v2183_v30, %v1159_v44 }
 0x416   : > { %v1166_v49 = vmul.f32 %v2183_v30, %v1162_v46 }
 0x417   : > { %v1164_v53 = vmul.f32 %v2183_v30, %v1160_v47  ;;  %v2043_v30 = vld [vmem:[%s2405_s6 + $0x64] ss:$12 sps:$4 sm:$0xff]  }
 0x418   : > { %v1932_v55 = vpack.i.bf16 %v1166_v49, %v1165_v48  ;;  %v1254_v59 = vpack.c.bf16 %v1166_v49, %v1165_v48  ;;  %1351 = vmatprep.mubr.bf16.mxu0 %v2043_v30 }
 0x419   : > { %v1927_v56 = vpack.i.bf16 %v1164_v53, %v1163_v52  ;;  %v1253_v58 = vpack.c.bf16 %v1164_v53, %v1163_v52 }
 0x41a   : > { %1933 = vrot.lane.b32.xlu1 %v1932_v55, %s2059_s22 }
 0x41b   : > { %1928 = vrot.lane.b32.xlu0 %v1927_v56, %s2059_s22  ;;  %1685 = vmatprep.subr.bf16.mxu0 %v1253_v58 }
 0x41e   : > { %1948 = vrot.lane.b32.xlu1 %v1927_v56, %s2061_s24 }
 0x41f   : > { %1938 = vrot.lane.b32.xlu0 %v1927_v56, %s2060_s23 }
 0x422   : > { %1953 = vrot.lane.b32.xlu1 %v1932_v55, %s2061_s24 }
 0x423   : > { %1943 = vrot.lane.b32.xlu0 %v1932_v55, %s2060_s23 }
 0x426   : > { %1968 = vrot.lane.b32.xlu1 %v1927_v56, %s2063_s26 }
 0x427   : > { %1958 = vrot.lane.b32.xlu0 %v1927_v56, %s2062_s25 }
 0x42a   : > { %1973 = vrot.lane.b32.xlu1 %v1932_v55, %s2063_s26 }
 0x42b   : > { %1963 = vrot.lane.b32.xlu0 %v1932_v55, %s2062_s25 }
 0x42e   : > { %1988 = vrot.lane.b32.xlu1 %v1927_v56, %s2065_s11 }
 0x42f   : > { %1978 = vrot.lane.b32.xlu0 %v1927_v56, %s2064_s27 }
 0x432   : > { %1993 = vrot.lane.b32.xlu1 %v1932_v55, %s2065_s11 }
 0x433   : > { %1983 = vrot.lane.b32.xlu0 %v1932_v55, %s2064_s27 }
 0x436   : > { %2003 = vrot.lane.b32.xlu1 %v1932_v55, %s2066_s12 }
 0x437   : > { %1998 = vrot.lane.b32.xlu0 %v1927_v56, %s2066_s12 }
 0x43a   : > { %1270 = vperm.xlu1 %1766, %v1584_v61  }
 0x43b   : > { %1265 = vperm.xlu0 %1765, %v1583_v0  }
 0x43e   : > { %1280 = vperm.xlu1 %1766, %v1586_v1  }
 0x43f   : > { %1275 = vperm.xlu0 %1765, %v1585_v2  }
 0x48c   : > { %v1934_v3 = vpop.permute.xlu1 %1933 }
 0x48d   : > { %v1929_v4 = vpop.permute.xlu0 %1928  ;;  %v1936_v7 = vunpack.i.h.bf16 %v1934_v3  ;;  %v1935_v8 = vunpack.i.l.bf16 %v1934_v3 }
 0x48e   : > { %v1931_v5 = vunpack.i.h.bf16 %v1929_v4  ;;  %v1930_v6 = vunpack.i.l.bf16 %v1929_v4 }
 0x48f   : > { %v1246_v14 = vpack.c.bf16 %v1936_v7, %v1935_v8  ;;  %v2046_v8 = vld [vmem:[%s2405_s6 + $0x7c] ss:$12 sps:$4 sm:$0xff]  }
 0x490   : > { %v1245_v9 = vpack.c.bf16 %v1931_v5, %v1930_v6  ;;  %v1949_v10 = vpop.permute.xlu1 %1948  ;;  %v2041_v6 = vld [vmem:[%s2405_s6 + $0x60] ss:$12 sps:$4 sm:$0xff]  }
 0x491   : > { %v1939_v11 = vpop.permute.xlu0 %1938  ;;  %v1951_v15 = vunpack.i.h.bf16 %v1949_v10  ;;  %v1950_v16 = vunpack.i.l.bf16 %v1949_v10  ;;  %v2048_v10 = vld [vmem:[%s2405_s6 + $0x78] ss:$12 sps:$4 sm:$0xff]  }
 0x492   : > { %v1941_v12 = vunpack.i.h.bf16 %v1939_v11  ;;  %v1940_v13 = vunpack.i.l.bf16 %v1939_v11  ;;  %1686 = vmatpush3.bf16.msra.mxu0 %v1245_v9  ;;  %v2045_v9 = vld [vmem:[%s2405_s6 + $0x80] ss:$12 sps:$4 sm:$0xff]  }
 0x493   : > { %1687 = vmatprep.subr.bf16.mxu0 %v1254_v59  ;;  %v1247_v22 = vpack.c.bf16 %v1951_v15, %v1950_v16 }
 0x494   : > { %v1255_v17 = vpack.c.bf16 %v1941_v12, %v1940_v13  ;;  %v1954_v18 = vpop.permute.xlu1 %1953 }
 0x495   : > { %v1944_v19 = vpop.permute.xlu0 %1943  ;;  %v1956_v23 = vunpack.i.h.bf16 %v1954_v18  ;;  %v1955_v24 = vunpack.i.l.bf16 %v1954_v18 }
 0x496   : > { %v1946_v20 = vunpack.i.h.bf16 %v1944_v19  ;;  %v1945_v21 = vunpack.i.l.bf16 %v1944_v19  ;;  %1688 = vmatpush3.bf16.msra.mxu0 %v1246_v14 }
 0x497   : > { %1689 = vmatprep.subr.bf16.mxu0 %v1255_v17  ;;  %v1248_v31 = vpack.c.bf16 %v1956_v23, %v1955_v24 }
 0x498   : > { %v1256_v25 = vpack.c.bf16 %v1946_v20, %v1945_v21  ;;  %v1969_v26 = vpop.permute.xlu1 %1968 }
 0x499   : > { %v1959_v27 = vpop.permute.xlu0 %1958  ;;  %v1971_v32 = vunpack.i.h.bf16 %v1969_v26  ;;  %v1970_v33 = vunpack.i.l.bf16 %v1969_v26 }
 0x49a   : > { %v1961_v28 = vunpack.i.h.bf16 %v1959_v27  ;;  %v1960_v29 = vunpack.i.l.bf16 %v1959_v27  ;;  %1690 = vmatpush3.bf16.msra.mxu0 %v1247_v22 }
 0x49b   : > { %1691 = vmatprep.subr.bf16.mxu0 %v1256_v25  ;;  %v1249_v57 = vpack.c.bf16 %v1971_v32, %v1970_v33 }
 0x49c   : > { %v1257_v34 = vpack.c.bf16 %v1961_v28, %v1960_v29  ;;  %v1974_v54 = vpop.permute.xlu1 %1973 }
 0x49d   : > { %v1964_v35 = vpop.permute.xlu0 %1963  ;;  %v1976_v38 = vunpack.i.h.bf16 %v1974_v54  ;;  %v1975_v39 = vunpack.i.l.bf16 %v1974_v54 }
 0x49e   : > { %v1966_v36 = vunpack.i.h.bf16 %v1964_v35  ;;  %v1965_v37 = vunpack.i.l.bf16 %v1964_v35  ;;  %1692 = vmatpush3.bf16.msra.mxu0 %v1248_v31 }
 0x49f   : > { %1693 = vmatprep.subr.bf16.mxu0 %v1257_v34  ;;  %v1250_v45 = vpack.c.bf16 %v1976_v38, %v1975_v39 }
 0x4a0   : > { %v1258_v40 = vpack.c.bf16 %v1966_v36, %v1965_v37  ;;  %v1989_v41 = vpop.permute.xlu1 %1988 }
 0x4a1   : > { %v1979_v42 = vpop.permute.xlu0 %1978  ;;  %v1991_v46 = vunpack.i.h.bf16 %v1989_v41  ;;  %v1990_v47 = vunpack.i.l.bf16 %v1989_v41 }
 0x4a2   : > { %v1981_v43 = vunpack.i.h.bf16 %v1979_v42  ;;  %v1980_v44 = vunpack.i.l.bf16 %v1979_v42  ;;  %1694 = vmatpush3.bf16.msra.mxu0 %v1249_v57 }
 0x4a3   : > { %1695 = vmatprep.subr.bf16.mxu0 %v1258_v40  ;;  %v1251_v56 = vpack.c.bf16 %v1991_v46, %v1990_v47 }
 0x4a4   : > { %v1259_v48 = vpack.c.bf16 %v1981_v43, %v1980_v44  ;;  %v1994_v49 = vpop.permute.xlu1 %1993 }
 0x4a5   : > { %v1984_v52 = vpop.permute.xlu0 %1983  ;;  %v1996_v58 = vunpack.i.h.bf16 %v1994_v49  ;;  %v1995_v59 = vunpack.i.l.bf16 %v1994_v49 }
 0x4a6   : > { %v1986_v53 = vunpack.i.h.bf16 %v1984_v52  ;;  %v1985_v55 = vunpack.i.l.bf16 %v1984_v52  ;;  %1696 = vmatpush3.bf16.msra.mxu0 %v1250_v45 }
 0x4a7   : > { %1697 = vmatprep.subr.bf16.mxu0 %v1259_v48  ;;  %v1252_v4 = vpack.c.bf16 %v1996_v58, %v1995_v59 }
 0x4a8   : > { %v1260_v30 = vpack.c.bf16 %v1986_v53, %v1985_v55  ;;  %v2004_v60 = vpop.permute.xlu1 %2003 }
 0x4a9   : > { %v1999_v61 = vpop.permute.xlu0 %1998  ;;  %v2006_v0 = vunpack.i.h.bf16 %v2004_v60  ;;  %v2005_v1 = vunpack.i.l.bf16 %v2004_v60 }
 0x4aa   : > { %v2001_v2 = vunpack.i.h.bf16 %v1999_v61  ;;  %v2000_v3 = vunpack.i.l.bf16 %v1999_v61  ;;  %1698 = vmatpush3.bf16.msra.mxu0 %v1251_v56 }
 0x4ab   : > { %1699 = vmatprep.subr.bf16.mxu0 %v1260_v30  ;;  %v1262_v7 = vpack.c.bf16 %v2006_v0, %v2005_v1 }
 0x4ac   : > { %v1261_v5 = vpack.c.bf16 %v2001_v2, %v2000_v3 }
 0x4ae   : > { %1700 = vmatpush3.bf16.msra.mxu0 %v1252_v4  ;;  %1739 = vmatprep.subr.bf16.mxu1 %v1261_v5 }
 0x4af   : > { %1740 = vmatpush3.bf16.msra.mxu1 %v1261_v5 }
 0x4b0   : > { %1741 = vmatprep.subr.bf16.mxu1 %v1262_v7 }
 0x4b1   : > { %1352 = vmatmul.mubr.bf16.vlgmr.msra.gmra.mrb[12].mxu0 %v2041_v6 }
 0x4b2   : > { %1359 = vmatprep.mubr.bf16.mxu0 %v2046_v8 }
 0x4b3   : > { %1742 = vmatpush3.bf16.msra.mxu1 %v1262_v7 }
 0x4b6   : > { %1744 = vmatmul.mubr.msk.bf16.vlgmr.msra.gmra.mrb[24].mxu1 %vm792_vm1, %v2045_v9 }
 0x4b9   : > { %1360 = vmatmul.mubr.bf16.gmra.mrb[16].mxu0 %v2048_v10  ;;  %v1271_v19 = vpop.permute.xlu1 %1270 }
 0x4ba   : > { %v1266_v15 = vpop.permute.xlu0 %1265 }
 0x4bd   : > { %v1281_v57 = vpop.permute.xlu1 %1280 }
 0x4be   : > { %v1276_v33 = vpop.permute.xlu0 %1275 }
 0x584   : > { %v1701_v11 = vpop.f32.mrb[12].mxu0 }
 0x585   : > { %v1702_v12 = vpop.f32.mrb[13].mxu0 }
 0x586   : > { %v1703_v13 = vadd.f32 %v1702_v12, %v1701_v11  ;;  %v1704_v14 = vpop.f32.mrb[14].mxu0 }
 0x587   : > { %v1705_v16 = vpop.f32.mrb[15].mxu0 }
 0x588   : > { %v1706_v17 = vadd.f32 %v1705_v16, %v1704_v14  ;;  %v1354_v18 = vadd.f32 %v1703_v13, %v1266_v15 }
 0x589   : > { %v1745_v20 = vpop.f32.mrb[24].mxu1 }
 0x58a   : > { %v1402_v21 = vpop.f32.mrb[25].mxu1  ;;  %v1357_v22 = vadd.f32 %v1706_v17, %v1271_v19 }
 0x58b   : > { %v1403_v23 = vadd.f32 %v1402_v21, %v1354_v18  ;;  %v1746_v24 = vpop.f32.mrb[26].mxu1 }
 0x58c   : > { %v1707_v25 = vpop.f32.mrb[16].mxu0  ;;  %v1405_v26 = vpop.f32.mrb[27].mxu1 }
 0x58d   : > { %v1417_v27 = vadd.f32 %v1403_v23, %v2265_v50  ;;  %v1406_v28 = vadd.f32 %v1405_v26, %v1357_v22  ;;  %v1708_v29 = vpop.f32.mrb[17].mxu0  ;;  %v2049_v50 = vld [vmem:[%s2407_s8] ss:$0 sm:$0xff] }
 0x58e   : > { %v1709_v31 = vadd.f32 %v1708_v29, %v1707_v25  ;;  %v1710_v32 = vpop.f32.mrb[18].mxu0 }
 0x58f   : > { %v1421_v34 = vmax.f32 %v1417_v27, 0.0  ;;  %v1418_v54 = vadd.f32 %v1406_v28, %v2268_v51  ;;  %v1711_v35 = vpop.f32.mrb[19].mxu0 }
 0x590   : > { %v1362_v36 = vadd.f32 %v1709_v31, %v1276_v33  ;;  %v1712_v37 = vadd.f32 %v1711_v35, %v1710_v32 }
 0x591   : > { %v1422_v38 = vmax.f32 %v1418_v54, 0.0  ;;  %v1425_v41 = vmul.f32 %v2049_v50, %v1421_v34 }
 0x592   : > { %v1411_v39 = vadd.f32 %v1745_v20, %v1362_v36  ;;  %v1365_v40 = vadd.f32 %v1712_v37, %v1281_v57 }
 0x593   : > { %v1426_v42 = vmul.f32 %v2049_v50, %v1422_v38 }
 0x594   : > { %v1419_v51 = vadd.f32 %v1411_v39, %v2277_v62  ;;  %v1414_v43 = vadd.f32 %v1746_v24, %v1365_v40 }
 0x595   : > { %v1610_v44 = vpack.c.bf16 %v1426_v42, %v1425_v41 }
 0x596   : > { %v1423_v45 = vmax.f32 %v1419_v51, 0.0  ;;  %v1420_v46 = vadd.f32 %v1414_v43, %v2280_v63 }
 0x597   : > { %1611 = vst [vmem:[%s352_s16] sm:$0xff] %v1610_v44  }
 0x598   : > { %v1424_v47 = vmax.f32 %v1420_v46, 0.0  ;;  %v1427_v48 = vmul.f32 %v2049_v50, %v1423_v45 }
 0x59a   : > { %v1428_v49 = vmul.f32 %v2049_v50, %v1424_v47 }
 0x59c   : > { %v1615_v52 = vpack.c.bf16 %v1428_v49, %v1427_v48 }
 0x59e   : > { %1617 = vst [vmem:[%s352_s16 + $0x8] sm:$0xff] %v1615_v52  }
 0x59f PF: > { %s19_s30 = sadd.s32 1, %s2056_s30  }
 0x5a0   : > { %p16_p4 = scmp.ge.s32.totalorder %s19_s30, 4  }
 0x5a2   :  { %18 = sbr.rel (!%p16_p4) target bundleno = 1 (0x1), region = 93 }

// kernel: custom_resnet_forward.9
= control target key start
LH: loop header
LB: loop body
LE: loop exit
PB: predicated region body
PF: predicated region fallthrough
CT: control target
= control target key end

     0   :  { %s4302_s21 = smov 0   ;;  %s5047_s0 = inlined_call_operand.vmem [shape: bf16[2,288,128], index: 0, kind: input, shape index: {}]   ;;  %s5048_s1 = inlined_call_operand.vmem [shape: bf16[2,32,128], index: 1, kind: input, shape index: {}]   ;;  %s5049_s2 = inlined_call_operand.vmem [shape: bf16[64,288], index: 2, kind: input, shape index: {}]   ;;  %s5050_s3 = inlined_call_operand.vmem [shape: f32[64,1], index: 3, kind: input, shape index: {}]   ;;  %s5051_s4 = inlined_call_operand.vmem [shape: bf16[64,32], index: 4, kind: input, shape index: {}]   ;;  %s5052_s5 = inlined_call_operand.vmem [shape: f32[64,1], index: 5, kind: input, shape index: {}]   ;;  %s5053_s6 = inlined_call_operand.vmem [shape: bf16[3,64,576], index: 6, kind: input, shape index: {}]   ;;  %s5054_s7 = inlined_call_operand.vmem [shape: f32[3,64,1], index: 7, kind: input, shape index: {}]   ;;  %s5055_s8 = inlined_call_operand.vmem [shape: f32[1,128], index: 8, kind: input, shape index: {}]   ;;  %s5056_s9 = inlined_call_operand.vmem [shape: f32[16,64], index: 9, kind: input, shape index: {}]   ;;  %s5057_s10 = inlined_call_operand.vmem [shape: f32[16,1], index: 10, kind: input, shape index: {}]   ;;  %s5058_s11 = inlined_call_operand.vmem [shape: f32[16,1], index: 11, kind: input, shape index: {}]   ;;  %s5059_s12 = inlined_call_operand.vmem [shape: f32[2,16,1], index: 12, kind: output, shape index: {}]  }
   0x1 LB: > { %s2964_s22 = sadd.s32 4294967295, %s4226_s21   ;;  %p2968_p0 = scmp.ge.s32.totalorder %s4226_s21, 1  ;;  %s4226_s21 = sphi %s4302_s21, %s22_s21  }
   0x2   : > { %p372_p1 = scmp.lt.s32.totalorder %s4226_s21, 3 }
   0x4   : > { %p373_p2 = pnand %p2968_p0, %p372_p1 }
   0x5   : > { %p419_p3 = scmp.lt.s32.totalorder (!%p373_p2), %s2964_s22, 1  ;;  %vm704_vm0 = vcmask (!%p373_p2), 261120   ;;  %v4113_v0 = vld [vmem:[%s5049_s2 + $0x4] ss:$12 sps:$4 sm:$0xff] (!%p373_p2)   ;;  %v4115_v1 = vld [vmem:[%s5049_s2 + $0x8] ss:$12 sps:$4 sm:$0xff] (!%p373_p2)  }
   0x6   : > { %376 = sbr.rel (%p373_p2) target bundleno = 1915 (0x77b), region = 68  ;;  %749 = vmatprep.mubr.bf16.mxu0 (!%p373_p2), %v4113_v0  ;;  %3491 = vmatprep.mubr.msk.bf16.mxu1 (!%p373_p2), %vm704_vm0, %v4115_v1  ;;  %v4228_v2 = vmov (!%p373_p2), 0   ;;  %v4116_v18 = vld [vmem:[%s5049_s2 + $0x20] ss:$12 sps:$4 sm:$0xff] (!%p373_p2)   ;;  %v4123_v21 = vld [vmem:[%s5049_s2 + $0x38] ss:$12 sps:$4 sm:$0xff] (!%p373_p2)  }
   0x7   : > { %3612 = vset.pattern.permute.xlu0 (!%p373_p2), %v4228_v2  ;;  %3613 = vset.pattern.permute.xlu1 (!%p373_p2), %v4228_v2  ;;  %v488_v19 = vld [vmem:[%s5050_s3] sm:$0xff] (!%p373_p2)  ;;  %v490_v22 = vld [vmem:[%s5050_s3 + $0x10] sm:$0xff] (!%p373_p2)  ;;  %v489_v24 = vld [vmem:[%s5050_s3 + $0x8] sm:$0xff] (!%p373_p2)  ;;  %s4229_s19 = smov (!%p373_p2), 5   ;;  %s4230_s20 = smov (!%p373_p2), 3   ;;  %vm1382_vm1 = vcmask (!%p373_p2), 523264  }
   0x8   : > { %498 = vperm.xlu0 (!%p373_p2), %3612, %v488_v19   ;;  %508 = vperm.xlu1 (!%p373_p2), %3613, %v490_v22   ;;  %v491_v25 = vld [vmem:[%s5050_s3 + $0x18] sm:$0xff] (!%p373_p2)  ;;  %v492_v27 = vld [vmem:[%s5050_s3 + $0x20] sm:$0xff] (!%p373_p2)  ;;  %v493_v30 = vld [vmem:[%s5050_s3 + $0x28] sm:$0xff] (!%p373_p2)  ;;  %s4231_s23 = smov (!%p373_p2), 125   ;;  %s4232_s24 = smov (!%p373_p2), 1   ;;  %vm2894_vm2 = vcmask (!%p373_p2), 7168  }
   0x9   : > { %v4124_v31 = vld [vmem:[%s5049_s2 + $0x50] ss:$12 sps:$4 sm:$0xff] (!%p373_p2)   ;;  %v4111_v32 = vld [vmem:[%s5049_s2] ss:$12 sps:$4 sm:$0xff] (!%p373_p2)   ;;  %v4119_v36 = vld [vmem:[%s5049_s2 + $0x18] ss:$12 sps:$4 sm:$0xff] (!%p373_p2)  }
   0xa   : > { %v494_v33 = vld [vmem:[%s5050_s3 + $0x30] sm:$0xff] (!%p373_p2)  ;;  %v4117_v34 = vld [vmem:[%s5049_s2 + $0x1c] ss:$12 sps:$4 sm:$0xff] (!%p373_p2)   ;;  %v4125_v39 = vld [vmem:[%s5049_s2 + $0x4c] ss:$12 sps:$4 sm:$0xff] (!%p373_p2)   ;;  %s5063_s28 = smov (!%p373_p2), 124  }
   0xb   : > { %v495_v35 = vld [vmem:[%s5050_s3 + $0x38] sm:$0xff] (!%p373_p2)  ;;  %v4120_v37 = vld [vmem:[%s5049_s2 + $0x34] ss:$12 sps:$4 sm:$0xff] (!%p373_p2)   ;;  %v4131_v42 = vld [vmem:[%s5051_s4 + $0x8] sm:$0xff] (!%p373_p2)   ;;  %s5061_s14 = smov (!%p373_p2), 123   ;;  %s5071_s15 = smov (!%p373_p2), 4  }
   0xc   : > { %503 = vperm.xlu0 (!%p373_p2), %3612, %v489_v24   ;;  %513 = vperm.xlu1 (!%p373_p2), %3613, %v491_v25   ;;  %v4122_v38 = vld [vmem:[%s5049_s2 + $0x30] ss:$12 sps:$4 sm:$0xff] (!%p373_p2)   ;;  %v4127_v40 = vld [vmem:[%s5049_s2 + $0x48] ss:$12 sps:$4 sm:$0xff] (!%p373_p2)   ;;  %v4130_v41 = vld [vmem:[%s5051_s4] sm:$0xff] (!%p373_p2)  }
   0xd   : > { %s5075_s22 = smov (!%p419_p3, %s2964_s22), 1  ;;  %v4132_v43 = vld [vmem:[%s5051_s4 + $0x10] sm:$0xff]   ;;  %v4133_v44 = vld [vmem:[%s5051_s4 + $0x18] sm:$0xff]  }
   0xe   : > { %s3594_s27 = smul.u32 144, %s5075_s22  ;;  %s5060_s17 = sshll.u32 %s5075_s22, 4 }
   0xf   : > { %s428_s26 = scalar_lea.vmem %s5048_s1, %s5060_s17  ;;  %s5069_s17 = smov 124  }
  0x10   : > { %s4323_s30 = scalar_lea.vmem %s5047_s0, %s3594_s27  ;;  %v4128_v26 = vld [vmem:[%s428_s26] sm:$0xff]   ;;  %v4129_v28 = vld [vmem:[%s428_s26 + $0x8] sm:$0xff]   ;;  %518 = vperm.xlu0 %3612, %v492_v27   ;;  %523 = vperm.xlu1 %3613, %v493_v30   ;;  %s5065_s27 = smov 127  }
  0x11   : > { %v4094_v3 = vld [vmem:[%s4323_s30 + $0x40] sm:$0xff]   ;;  %v4096_v5 = vld [vmem:[%s4323_s30 + $0x48] sm:$0xff]   ;;  %v4098_v7 = vld [vmem:[%s4323_s30 + $0x50] sm:$0xff]  }
  0x12   : > { %v4095_v4 = vld [vmem:[%s4323_s30] sm:$0xff]   ;;  %3161 = vmatprep.subr.bf16.mxu0 %v4094_v3  ;;  %v4097_v6 = vld [vmem:[%s4323_s30 + $0x8] sm:$0xff]   ;;  %v4099_v8 = vld [vmem:[%s4323_s30 + $0x10] sm:$0xff]  }
  0x13   : > { %3162 = vmatpush3.bf16.msra.mxu0 %v4095_v4  ;;  %v4100_v9 = vld [vmem:[%s4323_s30 + $0x58] sm:$0xff]   ;;  %v4102_v11 = vld [vmem:[%s4323_s30 + $0x60] sm:$0xff]   ;;  %v4104_v14 = vld [vmem:[%s4323_s30 + $0x68] sm:$0xff]  }
  0x14   : > { %3163 = vmatprep.subr.bf16.mxu0 %v4096_v5  ;;  %v4101_v10 = vld [vmem:[%s4323_s30 + $0x18] sm:$0xff]   ;;  %v4103_v12 = vld [vmem:[%s4323_s30 + $0x20] sm:$0xff]   ;;  %v4114_v15 = vld [vmem:[%s4323_s30 + $0x88] sm:$0xff]   ;;  %528 = vperm.xlu0 %3612, %v494_v33  }
  0x15   : > { %v4109_v13 = vld [vmem:[%s4323_s30 + $0x80] sm:$0xff]   ;;  %v4105_v16 = vld [vmem:[%s4323_s30 + $0x28] sm:$0xff]   ;;  %v4106_v17 = vld [vmem:[%s4323_s30 + $0x70] sm:$0xff]   ;;  %533 = vperm.xlu1 %3613, %v495_v35  }
  0x16   : > { %3487 = vmatprep.subr.bf16.mxu1 %v4109_v13  ;;  %v4107_v20 = vld [vmem:[%s4323_s30 + $0x30] sm:$0xff]   ;;  %v4108_v23 = vld [vmem:[%s4323_s30 + $0x78] sm:$0xff]   ;;  %v4429_v4 = vld [vmem:[%s5055_s8] ss:$0 sm:$0xff] }
  0x17   : > { %3164 = vmatpush3.bf16.msra.mxu0 %v4097_v6  ;;  %3488 = vmatpush3.bf16.msra.mxu1 %v4109_v13  ;;  %v4110_v29 = vld [vmem:[%s4323_s30 + $0x38] sm:$0xff]   ;;  %s5067_s30 = smov 4  }
  0x18   : > { %3165 = vmatprep.subr.bf16.mxu0 %v4098_v7  ;;  %3489 = vmatprep.subr.bf16.mxu1 %v4114_v15 }
  0x1b   : > { %3166 = vmatpush3.bf16.msra.mxu0 %v4099_v8  ;;  %3490 = vmatpush3.bf16.msra.mxu1 %v4114_v15 }
  0x1c   : > { %3167 = vmatprep.subr.bf16.mxu0 %v4100_v9  ;;  %3499 = vmatprep.subr.bf16.mxu1 %v4128_v26 }
  0x1e   : > { %3492 = vmatmul.mubr.msk.bf16.vlgmr.msra.gmra.mrb[0].mxu1 %vm704_vm0, %v4116_v18 }
  0x1f   : > { %3168 = vmatpush3.bf16.msra.mxu0 %v4101_v10  ;;  %3495 = vmatprep.mubr.msk.bf16.mxu1 %vm704_vm0, %v4123_v21 }
  0x20   : > { %3169 = vmatprep.subr.bf16.mxu0 %v4102_v11  ;;  %3500 = vmatpush3.bf16.msra.mxu1 %v4128_v26 }
  0x21   : > { %3501 = vmatprep.subr.bf16.mxu1 %v4129_v28 }
  0x23   : > { %3170 = vmatpush3.bf16.msra.mxu0 %v4103_v12 }
  0x24   : > { %3171 = vmatprep.subr.bf16.mxu0 %v4104_v14  ;;  %3502 = vmatpush3.bf16.msra.mxu1 %v4129_v28 }
  0x26   : > { %3496 = vmatmul.mubr.msk.bf16.gmra.mrb[4].mxu1 %vm704_vm0, %v4124_v31 }
  0x27   : > { %3172 = vmatpush3.bf16.msra.mxu0 %v4105_v16  ;;  %3503 = vmatprep.mubr.msk.bf16.mxu1 %vm704_vm0, %v4130_v41 }
  0x28   : > { %3173 = vmatprep.subr.bf16.mxu0 %v4106_v17 }
  0x2b   : > { %3174 = vmatpush3.bf16.msra.mxu0 %v4107_v20 }
  0x2c   : > { %3175 = vmatprep.subr.bf16.mxu0 %v4108_v23 }
  0x2e   : > { %3504 = vmatmul.mubr.msk.bf16.vlgmr.msra.gmra.mrb[8].mxu1 %vm704_vm0, %v4131_v42 }
  0x2f   : > { %3176 = vmatpush3.bf16.msra.mxu0 %v4110_v29  ;;  %3507 = vmatprep.mubr.msk.bf16.mxu1 %vm704_vm0, %v4132_v43 }
  0x32   : > { %750 = vmatmul.mubr.bf16.vlgmr.msra.gmra.mrb[0].mxu0 %v4111_v32 }
  0x33   : > { %757 = vmatprep.mubr.bf16.mxu0 %v4117_v34 }
  0x36   : > { %3508 = vmatmul.mubr.msk.bf16.gmra.mrb[12].mxu1 %vm704_vm0, %v4133_v44 }
  0x3a   : > { %758 = vmatmul.mubr.bf16.gmra.mrb[4].mxu0 %v4119_v36 }
  0x3b   : > { %765 = vmatprep.mubr.bf16.mxu0 %v4120_v37 }
  0x42   : > { %766 = vmatmul.mubr.bf16.gmra.mrb[8].mxu0 %v4122_v38 }
  0x43   : > { %773 = vmatprep.mubr.bf16.mxu0 %v4125_v39 }
  0x4a   : > { %774 = vmatmul.mubr.bf16.gmra.mrb[12].mxu0 %v4127_v40 }
  0x87   : > { %v499_v49 = vpop.permute.xlu0 %498  ;;  %v509_v0 = vpop.permute.xlu1 %508 }
  0x8b   : > { %v504_v61 = vpop.permute.xlu0 %503  ;;  %v514_v14 = vpop.permute.xlu1 %513 }
  0x8f   : > { %v519_v26 = vpop.permute.xlu0 %518  ;;  %v524_v32 = vpop.permute.xlu1 %523 }
  0x93   : > { %v529_v44 = vpop.permute.xlu0 %528 }
  0xf1   : > { %v3493_v45 = vpop.f32.mrb[0].mxu1 }
  0xf2   : > { %v816_v46 = vpop.f32.mrb[1].mxu1 }
  0xf3   : > { %v3494_v47 = vpop.f32.mrb[2].mxu1 }
  0xf4   : > { %v819_v48 = vpop.f32.mrb[3].mxu1 }
  0xf9   : > { %v4422_v50 = vpop.f32.mrb[4].mxu1 }
  0xfa   : > { %v832_v52 = vpop.f32.mrb[5].mxu1 }
  0xfb   : > { %v4424_v54 = vpop.f32.mrb[6].mxu1 }
  0xfc   : > { %v835_v57 = vpop.f32.mrb[7].mxu1 }
 0x105   : > { %v3177_v51 = vpop.f32.mrb[0].mxu0 }
 0x106   : > { %v3178_v53 = vpop.f32.mrb[1].mxu0 }
 0x107   : > { %v3179_v55 = vadd.f32 %v3178_v53, %v3177_v51  ;;  %v3180_v56 = vpop.f32.mrb[2].mxu0  ;;  %v534_v51 = vpop.permute.xlu1 %533 }
 0x108   : > { %v3181_v58 = vpop.f32.mrb[3].mxu0 }
 0x109   : > { %v3182_v59 = vadd.f32 %v3181_v58, %v3180_v56  ;;  %v752_v60 = vadd.f32 %v3179_v55, %v499_v49 }
 0x10b   : > { %v817_v62 = vadd.f32 %v816_v46, %v752_v60  ;;  %v755_v63 = vadd.f32 %v3182_v59, %v504_v61 }
 0x10d   : > { %v847_v1 = vmax.f32 %v817_v62, 0.0  ;;  %v820_v2 = vadd.f32 %v819_v48, %v755_v63  ;;  %v3183_v3 = vpop.f32.mrb[4].mxu0  ;;  %v4136_v62 = vld [vmem:[%s5053_s6 + $0x4] ss:$20 sps:$4 sm:$0xff]   ;;  %v4142_v63 = vld [vmem:[%s5053_s6 + $0xc] ss:$20 sps:$4 sm:$0xff]  }
 0x10e   : > { %v3184_v5 = vpop.f32.mrb[5].mxu0  ;;  %1427 = vmatprep.mubr.bf16.mxu1 %v4136_v62  ;;  %1492 = vmatprep.mubr.bf16.mxu0 %v4142_v63 }
 0x10f   : > { %v848_v6 = vmax.f32 %v820_v2, 0.0  ;;  %v3185_v7 = vadd.f32 %v3184_v5, %v3183_v3  ;;  %v3186_v8 = vpop.f32.mrb[6].mxu0  ;;  %v4432_v10 = vmul.f32 %v4429_v4, %v847_v1  ;;  %v1070_v1 = vld [vmem:[%s5054_s7] sm:$0xff]  ;;  %v4527_v2 = vpop.f32.mrb[8].mxu1  ;;  %v882_v3 = vld [vmem:[%s5052_s5 + $0x8] sm:$0xff] }
 0x110   : > { %v3187_v9 = vpop.f32.mrb[7].mxu0  ;;  %v881_v5 = vld [vmem:[%s5052_s5] sm:$0xff] }
 0x111   : > { %v4435_v11 = vmul.f32 %v4429_v4, %v848_v6  ;;  %v760_v12 = vadd.f32 %v3185_v7, %v509_v0  ;;  %v3188_v13 = vadd.f32 %v3187_v9, %v3186_v8  ;;  %v1071_v0 = vld [vmem:[%s5054_s7 + $0x8] sm:$0xff]  ;;  %v4535_v6 = vpop.f32.mrb[9].mxu1  ;;  %v1073_v9 = vld [vmem:[%s5054_s7 + $0x18] sm:$0xff] }
 0x112   : > { %v4537_v7 = vpop.f32.mrb[10].mxu1 }
 0x113   : > { %v825_v15 = vadd.f32 %v3493_v45, %v760_v12  ;;  %v763_v16 = vadd.f32 %v3188_v13, %v514_v14  ;;  %v4439_v17 = vpack.i.bf16 %v4435_v11, %v4432_v10  ;;  %v1222_v22 = vpack.c.bf16 %v4435_v11, %v4432_v10  ;;  %v4539_v8 = vpop.f32.mrb[11].mxu1  ;;  %v1072_v12 = vld [vmem:[%s5054_s7 + $0x10] sm:$0xff]  ;;  %v884_v13 = vld [vmem:[%s5052_s5 + $0x18] sm:$0xff] }
 0x114   : > { %v883_v14 = vld [vmem:[%s5052_s5 + $0x10] sm:$0xff] }
 0x115   : > { %v849_v18 = vmax.f32 %v825_v15, 0.0  ;;  %v828_v19 = vadd.f32 %v3494_v47, %v763_v16  ;;  %v3189_v20 = vpop.f32.mrb[8].mxu0  ;;  %3620 = vrot.lane.b32.xlu1 %v4439_v17, %s4229_s19  ;;  %3615 = vrot.lane.b32.xlu0 %v4439_v17, %s4230_s20  ;;  %v1075_v15 = vld [vmem:[%s5054_s7 + $0x28] sm:$0xff]  ;;  %v1074_v16 = vld [vmem:[%s5054_s7 + $0x20] sm:$0xff] }
 0x116   : > { %v3190_v21 = vpop.f32.mrb[9].mxu0 }
 0x117   : > { %v850_v23 = vmax.f32 %v828_v19, 0.0  ;;  %v3191_v24 = vadd.f32 %v3190_v21, %v3189_v20  ;;  %v3192_v25 = vpop.f32.mrb[10].mxu0  ;;  %v4448_v27 = vmul.f32 %v4429_v4, %v849_v18  ;;  %v886_v18 = vld [vmem:[%s5052_s5 + $0x28] sm:$0xff]  ;;  %v885_v19 = vld [vmem:[%s5052_s5 + $0x20] sm:$0xff] }
 0x118   : > { %v3193_v28 = vpop.f32.mrb[11].mxu0 }
 0x119   : > { %v4451_v29 = vmul.f32 %v4429_v4, %v850_v23  ;;  %v3194_v30 = vadd.f32 %v3193_v28, %v3192_v25  ;;  %3630 = vrot.lane.b32.xlu1 %v4439_v17, %s4231_s23  ;;  %3625 = vrot.lane.b32.xlu0 %v4439_v17, %s4232_s24  ;;  %v768_v31 = vadd.f32 %v3191_v24, %v519_v26  ;;  %v1077_v24 = vld [vmem:[%s5054_s7 + $0x38] sm:$0xff]  ;;  %v1076_v25 = vld [vmem:[%s5054_s7 + $0x30] sm:$0xff] }
 0x11a   : > { %v888_v26 = vld [vmem:[%s5052_s5 + $0x38] sm:$0xff]  ;;  %v887_v28 = vld [vmem:[%s5052_s5 + $0x30] sm:$0xff] }
 0x11b   : > { %v833_v33 = vadd.f32 %v832_v52, %v768_v31  ;;  %v771_v34 = vadd.f32 %v3194_v30, %v524_v32  ;;  %v3644_v35 = vpack.i.bf16 %v4451_v29, %v4448_v27  ;;  %v1223_v40 = vpack.c.bf16 %v4451_v29, %v4448_v27 }
 0x11d   : > { %v851_v36 = vmax.f32 %v833_v33, 0.0  ;;  %v836_v37 = vadd.f32 %v835_v57, %v771_v34  ;;  %v3195_v38 = vpop.f32.mrb[12].mxu0  ;;  %3645 = vrot.lane.b32.xlu1 %v3644_v35, %s4229_s19  ;;  %3635 = vrot.lane.b32.xlu0 %v4439_v17, %s5067_s30 }
 0x11e   : > { %v3196_v39 = vpop.f32.mrb[13].mxu0 }
 0x11f   : > { %v852_v41 = vmax.f32 %v836_v37, 0.0  ;;  %v3197_v42 = vadd.f32 %v3196_v39, %v3195_v38  ;;  %v3198_v43 = vpop.f32.mrb[14].mxu0  ;;  %v4465_v45 = vmul.f32 %v4429_v4, %v851_v36 }
 0x120   : > { %v3199_v46 = vpop.f32.mrb[15].mxu0 }
 0x121   : > { %v4468_v47 = vmul.f32 %v4429_v4, %v852_v41  ;;  %v776_v48 = vadd.f32 %v3197_v42, %v529_v44  ;;  %v3200_v49 = vadd.f32 %v3199_v46, %v3198_v43  ;;  %3650 = vrot.lane.b32.xlu1 %v3644_v35, %s4232_s24  ;;  %3640 = vrot.lane.b32.xlu0 %v3644_v35, %s4230_s20 }
 0x123   : > { %v841_v52 = vadd.f32 %v4422_v50, %v776_v48  ;;  %v779_v53 = vadd.f32 %v3200_v49, %v534_v51  ;;  %v3659_v55 = vpack.i.bf16 %v4468_v47, %v4465_v45  ;;  %v1224_v58 = vpack.c.bf16 %v4468_v47, %v4465_v45  ;;  %v4134_v47 = vld [vmem:[%s5053_s6] ss:$20 sps:$4 sm:$0xff]  }
 0x125   : > { %v853_v56 = vmax.f32 %v841_v52, 0.0  ;;  %v844_v57 = vadd.f32 %v4424_v54, %v779_v53  ;;  %3660 = vrot.lane.b32.xlu1 %v3659_v55, %s4229_s19  ;;  %3655 = vrot.lane.b32.xlu0 %v3659_v55, %s4230_s20 }
 0x127   : > { %v854_v59 = vmax.f32 %v844_v57, 0.0  ;;  %v4481_v60 = vmul.f32 %v4429_v4, %v853_v56 }
 0x129   : > { %v4484_v50 = vmul.f32 %v4429_v4, %v854_v59 }
 0x12b   : > { %v3674_v61 = vpack.i.bf16 %v4484_v50, %v4481_v60  ;;  %v1225_v54 = vpack.c.bf16 %v4484_v50, %v4481_v60 }
 0x12d   : > { %3675 = vrot.lane.b32.xlu1 %v3674_v61, %s4229_s19  ;;  %3665 = vrot.lane.b32.xlu0 %v3674_v61, %s4230_s20 }
 0x131   : > { %3680 = vrot.lane.b32.xlu1 %v3644_v35, %s5067_s30  ;;  %3670 = vrot.lane.b32.xlu0 %v3644_v35, %s4231_s23 }
 0x135   : > { %3690 = vrot.lane.b32.xlu1 %v3659_v55, %s4231_s23  ;;  %3685 = vrot.lane.b32.xlu0 %v3659_v55, %s4232_s24 }
 0x139   : > { %3700 = vrot.lane.b32.xlu1 %v3674_v61, %s4232_s24  ;;  %3695 = vrot.lane.b32.xlu0 %v3659_v55, %s5067_s30 }
 0x13d   : > { %3715 = vrot.lane.b32.xlu1 %v3674_v61, %s5067_s30  ;;  %3705 = vrot.lane.b32.xlu0 %v3674_v61, %s4231_s23 }
 0x141   : > { %3720 = vrot.lane.b32.xlu1 %v4439_v17, %s5065_s27  ;;  %3710 = vrot.lane.b32.xlu0 %v4439_v17, %s5063_s28 }
 0x145   : > { %3730 = vrot.lane.b32.xlu1 %v3644_v35, %s5065_s27  ;;  %3725 = vrot.lane.b32.xlu0 %v3644_v35, %s5063_s28 }
 0x149   : > { %3740 = vrot.lane.b32.xlu1 %v3659_v55, %s5065_s27  ;;  %3735 = vrot.lane.b32.xlu0 %v3659_v55, %s5063_s28 }
 0x14d   : > { %3750 = vrot.lane.b32.xlu1 %v3674_v61, %s5065_s27  ;;  %3745 = vrot.lane.b32.xlu0 %v3674_v61, %s5063_s28 }
 0x151   : > { %3760 = vrot.lane.b32.xlu1 %v3644_v35, %s5061_s14  ;;  %3755 = vrot.lane.b32.xlu0 %v4439_v17, %s5061_s14  ;;  %v4559_v17 = vpop.f32.mrb[12].mxu1 }
 0x152   : > { %v4567_v20 = vpop.f32.mrb[13].mxu1 }
 0x153   : > { %v4569_v21 = vpop.f32.mrb[14].mxu1 }
 0x154   : > { %v4571_v23 = vpop.f32.mrb[15].mxu1 }
 0x155   : > { %3770 = vrot.lane.b32.xlu1 %v3674_v61, %s5061_s14  ;;  %3765 = vrot.lane.b32.xlu0 %v3659_v55, %s5061_s14  ;;  %s5070_s14 = smov 123  }
 0x159   : > { %1249 = vperm.xlu1 %3613, %v1071_v0   ;;  %1244 = vperm.xlu0 %3612, %v1070_v1  }
 0x15d   : > { %896 = vperm.xlu1 %3613, %v882_v3   ;;  %891 = vperm.xlu0 %3612, %v881_v5  }
 0x161   : > { %1259 = vperm.xlu1 %3613, %v1073_v9   ;;  %1254 = vperm.xlu0 %3612, %v1072_v12  }
 0x165   : > { %906 = vperm.xlu1 %3613, %v884_v13   ;;  %901 = vperm.xlu0 %3612, %v883_v14  }
 0x169   : > { %1269 = vperm.xlu1 %3613, %v1075_v15   ;;  %1264 = vperm.xlu0 %3612, %v1074_v16  }
 0x16d   : > { %916 = vperm.xlu1 %3613, %v886_v18   ;;  %911 = vperm.xlu0 %3612, %v885_v19  }
 0x171   : > { %1279 = vperm.xlu1 %3613, %v1077_v24   ;;  %1274 = vperm.xlu0 %3612, %v1076_v25  }
 0x175   : > { %926 = vperm.xlu1 %3613, %v888_v26   ;;  %921 = vperm.xlu0 %3612, %v887_v28  }
 0x187   : > { %v3621_v30 = vpop.permute.xlu1 %3620  ;;  %v3616_v31 = vpop.permute.xlu0 %3615 }
 0x188   : > { %v3623_v32 = vunpack.i.h.bf16 %v3621_v30  ;;  %v3622_v33 = vunpack.i.l.bf16 %v3621_v30  ;;  %v3618_v34 = vunpack.i.h.bf16 %v3616_v31  ;;  %v3617_v35 = vunpack.i.l.bf16 %v3616_v31 }
 0x18a   : > { %v1206_v36 = vpack.c.bf16 %v3623_v32, %v3622_v33  ;;  %v1214_v37 = vpack.c.bf16 %v3618_v34, %v3617_v35 }
 0x18b   : > { %v3631_v38 = vpop.permute.xlu1 %3630  ;;  %v3626_v39 = vpop.permute.xlu0 %3625 }
 0x18c   : > { %v3633_v41 = vunpack.i.h.bf16 %v3631_v38  ;;  %v3632_v42 = vunpack.i.l.bf16 %v3631_v38  ;;  %3213 = vmatprep.subr.bf16.mxu1 %v1214_v37  ;;  %v3628_v10 = vunpack.i.h.bf16 %v3626_v39  ;;  %v3627_v11 = vunpack.i.l.bf16 %v3626_v39 }
 0x18d   : > { %3214 = vmatpush3.bf16.msra.mxu1 %v1206_v36 }
 0x18e   : > { %v1230_v43 = vpack.c.bf16 %v3633_v41, %v3632_v42  ;;  %v1218_v33 = vpack.c.bf16 %v3628_v10, %v3627_v11 }
 0x18f   : > { %v3646_v44 = vpop.permute.xlu1 %3645  ;;  %v3636_v46 = vpop.permute.xlu0 %3635 }
 0x190   : > { %3253 = vmatprep.subr.bf16.mxu0 %v1230_v43  ;;  %v3648_v48 = vunpack.i.h.bf16 %v3646_v44  ;;  %v3647_v49 = vunpack.i.l.bf16 %v3646_v44  ;;  %v3638_v19 = vunpack.i.h.bf16 %v3636_v46  ;;  %v3637_v24 = vunpack.i.l.bf16 %v3636_v46 }
 0x191   : > { %3254 = vmatpush3.bf16.msra.mxu0 %v1222_v22 }
 0x192   : > { %v1207_v57 = vpack.c.bf16 %v3648_v48, %v3647_v49  ;;  %v1210_v35 = vpack.c.bf16 %v3638_v19, %v3637_v24 }
 0x193   : > { %v3651_v51 = vpop.permute.xlu1 %3650  ;;  %v3641_v52 = vpop.permute.xlu0 %3640 }
 0x194   : > { %v3643_v53 = vunpack.i.h.bf16 %v3641_v52  ;;  %v3642_v55 = vunpack.i.l.bf16 %v3641_v52  ;;  %v3653_v25 = vunpack.i.h.bf16 %v3651_v51  ;;  %v3652_v26 = vunpack.i.l.bf16 %v3651_v51 }
 0x196   : > { %v1215_v56 = vpack.c.bf16 %v3643_v53, %v3642_v55  ;;  %v1219_v41 = vpack.c.bf16 %v3653_v25, %v3652_v26 }
 0x197   : > { %v3661_v59 = vpop.permute.xlu1 %3660  ;;  %v3656_v61 = vpop.permute.xlu0 %3655 }
 0x198   : > { %v3663_v62 = vunpack.i.h.bf16 %v3661_v59  ;;  %v3662_v63 = vunpack.i.l.bf16 %v3661_v59  ;;  %v3658_v0 = vunpack.i.h.bf16 %v3656_v61  ;;  %v3657_v1 = vunpack.i.l.bf16 %v3656_v61  ;;  %3215 = vmatprep.subr.bf16.mxu1 %v1215_v56 }
 0x199   : > { %3216 = vmatpush3.bf16.msra.mxu1 %v1207_v57 }
 0x19a   : > { %v1208_v3 = vpack.c.bf16 %v3663_v62, %v3662_v63  ;;  %v1216_v5 = vpack.c.bf16 %v3658_v0, %v3657_v1 }
 0x19c   : > { %3217 = vmatprep.subr.bf16.mxu1 %v1216_v5 }
 0x19d   : > { %3218 = vmatpush3.bf16.msra.mxu1 %v1208_v3 }
 0x19f   : > { %v3676_v22 = vpop.permute.xlu1 %3675  ;;  %v3666_v9 = vpop.permute.xlu0 %3665 }
 0x1a0   : > { %v3678_v12 = vunpack.i.h.bf16 %v3676_v22  ;;  %v3677_v13 = vunpack.i.l.bf16 %v3676_v22  ;;  %v3668_v14 = vunpack.i.h.bf16 %v3666_v9  ;;  %v3667_v15 = vunpack.i.l.bf16 %v3666_v9 }
 0x1a2   : > { %v1209_v16 = vpack.c.bf16 %v3678_v12, %v3677_v13  ;;  %v1217_v18 = vpack.c.bf16 %v3668_v14, %v3667_v15 }
 0x1a3   : > { %v3681_v28 = vpop.permute.xlu1 %3680  ;;  %v3671_v30 = vpop.permute.xlu0 %3670 }
 0x1a4   : > { %v3673_v31 = vunpack.i.h.bf16 %v3671_v30  ;;  %v3672_v32 = vunpack.i.l.bf16 %v3671_v30  ;;  %3219 = vmatprep.subr.bf16.mxu1 %v1217_v18  ;;  %v3683_v36 = vunpack.i.h.bf16 %v3681_v28  ;;  %v3682_v37 = vunpack.i.l.bf16 %v3681_v28 }
 0x1a5   : > { %3220 = vmatpush3.bf16.msra.mxu1 %v1209_v16 }
 0x1a6   : > { %3221 = vmatprep.subr.bf16.mxu1 %v1218_v33  ;;  %v1231_v34 = vpack.c.bf16 %v3673_v31, %v3672_v32  ;;  %v1211_v49 = vpack.c.bf16 %v3683_v36, %v3682_v37  ;;  %v4139_v33 = vld [vmem:[%s5053_s6 + $0x28] ss:$20 sps:$4 sm:$0xff]  }
 0x1a7   : > { %v3691_v38 = vpop.permute.xlu1 %3690  ;;  %v3686_v39 = vpop.permute.xlu0 %3685 }
 0x1a8   : > { %v3693_v42 = vunpack.i.h.bf16 %v3691_v38  ;;  %v3692_v43 = vunpack.i.l.bf16 %v3691_v38  ;;  %v3688_v44 = vunpack.i.h.bf16 %v3686_v39  ;;  %v3687_v46 = vunpack.i.l.bf16 %v3686_v39  ;;  %3255 = vmatprep.subr.bf16.mxu0 %v1231_v34  ;;  %v4143_v34 = vld [vmem:[%s5053_s6 + $0x54] ss:$20 sps:$4 sm:$0xff]  }
 0x1a9   : > { %3222 = vmatpush3.bf16.msra.mxu1 %v1210_v35  ;;  %3256 = vmatpush3.bf16.msra.mxu0 %v1223_v40 }
 0x1aa   : > { %3223 = vmatprep.subr.bf16.mxu1 %v1219_v41  ;;  %v1232_v48 = vpack.c.bf16 %v3693_v42, %v3692_v43  ;;  %v1220_v53 = vpack.c.bf16 %v3688_v44, %v3687_v46 }
 0x1ab   : > { %v3701_v51 = vpop.permute.xlu1 %3700  ;;  %v3696_v52 = vpop.permute.xlu0 %3695 }
 0x1ac   : > { %v3703_v55 = vunpack.i.h.bf16 %v3701_v51  ;;  %v3702_v56 = vunpack.i.l.bf16 %v3701_v51  ;;  %v3698_v57 = vunpack.i.h.bf16 %v3696_v52  ;;  %v3697_v59 = vunpack.i.l.bf16 %v3696_v52  ;;  %3257 = vmatprep.subr.bf16.mxu0 %v1232_v48 }
 0x1ad   : > { %3224 = vmatpush3.bf16.msra.mxu1 %v1211_v49  ;;  %3258 = vmatpush3.bf16.msra.mxu0 %v1224_v58  ;;  %v4137_v58 = vld [vmem:[%s5053_s6 + $0x2c] ss:$20 sps:$4 sm:$0xff]  }
 0x1ae   : > { %v1212_v61 = vpack.c.bf16 %v3698_v57, %v3697_v59  ;;  %3225 = vmatprep.subr.bf16.mxu1 %v1220_v53  ;;  %v1221_v40 = vpack.c.bf16 %v3703_v55, %v3702_v56  ;;  %v4140_v53 = vld [vmem:[%s5053_s6 + $0x8] ss:$20 sps:$4 sm:$0xff]   ;;  %v4145_v55 = vld [vmem:[%s5053_s6 + $0x50] ss:$20 sps:$4 sm:$0xff]  }
 0x1af   : > { %v3716_v27 = vpop.permute.xlu1 %3715  ;;  %v3706_v29 = vpop.permute.xlu0 %3705  ;;  %v4146_v59 = vld [vmem:[%s5053_s6 + $0x7c] ss:$20 sps:$4 sm:$0xff]  }
 0x1b0   : > { %v3718_v62 = vunpack.i.h.bf16 %v3716_v27  ;;  %v3717_v63 = vunpack.i.l.bf16 %v3716_v27  ;;  %v3708_v0 = vunpack.i.h.bf16 %v3706_v29  ;;  %v3707_v1 = vunpack.i.l.bf16 %v3706_v29  ;;  %v4148_v27 = vld [vmem:[%s5053_s6 + $0x34] ss:$20 sps:$4 sm:$0xff]  }
 0x1b1   : > { %3226 = vmatpush3.bf16.msra.mxu1 %v1212_v61 }
 0x1b2   : > { %v1213_v3 = vpack.c.bf16 %v3718_v62, %v3717_v63  ;;  %3227 = vmatprep.subr.bf16.mxu1 %v1221_v40  ;;  %v1233_v5 = vpack.c.bf16 %v3708_v0, %v3707_v1  ;;  %v4150_v1 = vld [vmem:[%s5053_s6 + $0x78] ss:$20 sps:$4 sm:$0xff]  }
 0x1b3   : > { %v3721_v10 = vpop.permute.xlu1 %3720  ;;  %v3711_v11 = vpop.permute.xlu0 %3710 }
 0x1b4   : > { %v3723_v22 = vunpack.i.h.bf16 %v3721_v10  ;;  %v3722_v9 = vunpack.i.l.bf16 %v3721_v10  ;;  %v3713_v12 = vunpack.i.h.bf16 %v3711_v11  ;;  %v3712_v45 = vunpack.i.l.bf16 %v3711_v11  ;;  %3259 = vmatprep.subr.bf16.mxu0 %v1233_v5 }
 0x1b5   : > { %3228 = vmatpush3.bf16.msra.mxu1 %v1213_v3  ;;  %3260 = vmatpush3.bf16.msra.mxu0 %v1225_v54  ;;  %v4151_v3 = vld [vmem:[%s5053_s6 + $0x30] ss:$20 sps:$4 sm:$0xff]  }
 0x1b6   : > { %v1226_v13 = vpack.c.bf16 %v3723_v22, %v3722_v9  ;;  %v1234_v14 = vpack.c.bf16 %v3713_v12, %v3712_v45  ;;  %v4152_v22 = vld [vmem:[%s5053_s6 + $0x5c] ss:$20 sps:$4 sm:$0xff]   ;;  %v4155_v45 = vld [vmem:[%s5053_s6 + $0x58] ss:$20 sps:$4 sm:$0xff]  }
 0x1b7   : > { %v3731_v15 = vpop.permute.xlu1 %3730  ;;  %v3726_v16 = vpop.permute.xlu0 %3725  ;;  %v4154_v9 = vld [vmem:[%s5053_s6 + $0x10] ss:$20 sps:$4 sm:$0xff]  }
 0x1b8   : > { %v3733_v18 = vunpack.i.h.bf16 %v3731_v15  ;;  %v3732_v19 = vunpack.i.l.bf16 %v3731_v15  ;;  %v3728_v24 = vunpack.i.h.bf16 %v3726_v16  ;;  %v3727_v25 = vunpack.i.l.bf16 %v3726_v16  ;;  %1428 = vmatmul.mubr.bf16.vlgmr.msra.gmra.mrb[16].mxu1 %v4134_v47  ;;  %3261 = vmatprep.subr.bf16.mxu0 %v1234_v14  ;;  %v4156_v47 = vld [vmem:[%s5053_s6 + $0x38] ss:$20 sps:$4 sm:$0xff]   ;;  %v4160_v14 = vld [vmem:[%s5053_s6 + $0x80] ss:$20 sps:$4 sm:$0xff]   ;;  %v4161_v15 = vld [vmem:[%s5053_s6 + $0x88] ss:$20 sps:$4 sm:$0xff]  }
 0x1b9   : > { %3262 = vmatpush3.bf16.msra.mxu0 %v1226_v13  ;;  %1435 = vmatprep.mubr.bf16.mxu1 %v4137_v58  ;;  %v4157_v58 = vld [vmem:[%s5053_s6 + $0x84] ss:$20 sps:$4 sm:$0xff]   ;;  %v4159_v13 = vld [vmem:[%s5053_s6 + $0x60] ss:$20 sps:$4 sm:$0xff]  }
 0x1ba   : > { %v1227_v26 = vpack.c.bf16 %v3733_v18, %v3732_v19  ;;  %v1235_v28 = vpack.c.bf16 %v3728_v24, %v3727_v25 }
 0x1bb   : > { %v3741_v60 = vpop.permute.xlu1 %3740  ;;  %v3736_v50 = vpop.permute.xlu0 %3735 }
 0x1bc   : > { %v3743_v54 = vunpack.i.h.bf16 %v3741_v60  ;;  %v3742_v30 = vunpack.i.l.bf16 %v3741_v60  ;;  %v3738_v31 = vunpack.i.h.bf16 %v3736_v50  ;;  %v3737_v32 = vunpack.i.l.bf16 %v3736_v50  ;;  %3263 = vmatprep.subr.bf16.mxu0 %v1235_v28 }
 0x1bd   : > { %3264 = vmatpush3.bf16.msra.mxu0 %v1227_v26 }
 0x1be   : > { %v1228_v35 = vpack.c.bf16 %v3743_v54, %v3742_v30  ;;  %v1236_v36 = vpack.c.bf16 %v3738_v31, %v3737_v32 }
 0x1bf   : > { %v3751_v37 = vpop.permute.xlu1 %3750  ;;  %v3746_v38 = vpop.permute.xlu0 %3745 }
 0x1c0   : > { %v3753_v39 = vunpack.i.h.bf16 %v3751_v37  ;;  %v3752_v41 = vunpack.i.l.bf16 %v3751_v37  ;;  %v3748_v42 = vunpack.i.h.bf16 %v3746_v38  ;;  %v3747_v43 = vunpack.i.l.bf16 %v3746_v38  ;;  %1436 = vmatmul.mubr.bf16.gmra.mrb[20].mxu1 %v4139_v33  ;;  %3265 = vmatprep.subr.bf16.mxu0 %v1236_v36 }
 0x1c1   : > { %3266 = vmatpush3.bf16.msra.mxu0 %v1228_v35  ;;  %1443 = vmatprep.mubr.bf16.mxu1 %v4143_v34 }
 0x1c2   : > { %v1229_v44 = vpack.c.bf16 %v3753_v39, %v3752_v41  ;;  %v1237_v46 = vpack.c.bf16 %v3748_v42, %v3747_v43 }
 0x1c3   : > { %v3761_v48 = vpop.permute.xlu1 %3760  ;;  %v3756_v49 = vpop.permute.xlu0 %3755 }
 0x1c4   : > { %v3758_v51 = vunpack.i.h.bf16 %v3756_v49  ;;  %v3757_v52 = vunpack.i.l.bf16 %v3756_v49  ;;  %3267 = vmatprep.subr.bf16.mxu0 %v1237_v46  ;;  %v3763_v56 = vunpack.i.h.bf16 %v3761_v48  ;;  %v3762_v57 = vunpack.i.l.bf16 %v3761_v48 }
 0x1c5   : > { %3268 = vmatpush3.bf16.msra.mxu0 %v1229_v44 }
 0x1c6   : > { %v1238_v61 = vpack.c.bf16 %v3758_v51, %v3757_v52  ;;  %v1239_v63 = vpack.c.bf16 %v3763_v56, %v3762_v57 }
 0x1c7   : > { %v3766_v29 = vpop.permute.xlu0 %3765  ;;  %v3771_v0 = vpop.permute.xlu1 %3770 }
 0x1c8   : > { %1444 = vmatmul.mubr.bf16.gmra.mrb[24].mxu1 %v4145_v55  ;;  %1493 = vmatmul.mubr.bf16.vlgmr.msra.gmra.mrb[16].mxu0 %v4140_v53  ;;  %v3768_v40 = vunpack.i.h.bf16 %v3766_v29  ;;  %v3767_v62 = vunpack.i.l.bf16 %v3766_v29  ;;  %v3773_v5 = vunpack.i.h.bf16 %v3771_v0  ;;  %v3772_v10 = vunpack.i.l.bf16 %v3771_v0 }
 0x1c9   : > { %3511 = vmatprep.subr.bf16.mxu1 %v1238_v61  ;;  %1451 = vmatprep.mubr.bf16.mxu1 %v4146_v59 }
 0x1ca   : > { %3512 = vmatpush3.bf16.msra.mxu1 %v1238_v61  ;;  %1500 = vmatprep.mubr.bf16.mxu0 %v4148_v27  ;;  %v1240_v11 = vpack.c.bf16 %v3768_v40, %v3767_v62  ;;  %v1241_v12 = vpack.c.bf16 %v3773_v5, %v3772_v10 }
 0x1cb   : > { %3513 = vmatprep.subr.bf16.mxu1 %v1239_v63 }
 0x1ce   : > { %3514 = vmatpush3.bf16.msra.mxu1 %v1239_v63 }
 0x1cf   : > { %3515 = vmatprep.subr.bf16.mxu1 %v1240_v11 }
 0x1d0   : > { %1452 = vmatmul.mubr.bf16.gmra.mrb[28].mxu1 %v4150_v1  ;;  %1501 = vmatmul.mubr.bf16.gmra.mrb[20].mxu0 %v4151_v3 }
 0x1d1   : > { %1508 = vmatprep.mubr.bf16.mxu0 %v4152_v22  ;;  %3519 = vmatprep.mubr.msk.bf16.mxu1 %vm1382_vm1, %v4154_v9 }
 0x1d2   : > { %3516 = vmatpush3.bf16.msra.mxu1 %v1240_v11 }
 0x1d3   : > { %3517 = vmatprep.subr.bf16.mxu1 %v1241_v12 }
 0x1d6   : > { %3518 = vmatpush3.bf16.msra.mxu1 %v1241_v12 }
 0x1d8   : > { %1509 = vmatmul.mubr.bf16.gmra.mrb[24].mxu0 %v4155_v45  ;;  %v1250_v16 = vpop.permute.xlu1 %1249  ;;  %v1245_v18 = vpop.permute.xlu0 %1244 }
 0x1d9   : > { %3520 = vmatmul.mubr.msk.bf16.vlgmr.msra.gmra.mrb[32].mxu1 %vm1382_vm1, %v4156_v47  ;;  %1516 = vmatprep.mubr.bf16.mxu0 %v4157_v58 }
 0x1da   : > { %3523 = vmatprep.mubr.msk.bf16.mxu1 %vm1382_vm1, %v4159_v13 }
 0x1dc   : > { %v897_v19 = vpop.permute.xlu1 %896  ;;  %v892_v24 = vpop.permute.xlu0 %891 }
 0x1e0   : > { %1517 = vmatmul.mubr.bf16.gmra.mrb[28].mxu0 %v4160_v14  ;;  %v1260_v28 = vpop.permute.xlu1 %1259  ;;  %v1255_v54 = vpop.permute.xlu0 %1254 }
 0x1e1   : > { %3524 = vmatmul.mubr.msk.bf16.gmra.mrb[36].mxu1 %vm1382_vm1, %v4161_v15 }
 0x1e4   : > { %v907_v32 = vpop.permute.xlu1 %906  ;;  %v902_v34 = vpop.permute.xlu0 %901 }
 0x1e8   : > { %v1270_v41 = vpop.permute.xlu1 %1269  ;;  %v1265_v42 = vpop.permute.xlu0 %1264 }
 0x1ec   : > { %v917_v62 = vpop.permute.xlu1 %916  ;;  %v912_v63 = vpop.permute.xlu0 %911 }
 0x28b   : > { %v3229_v25 = vpop.f32.mrb[16].mxu1 }
 0x28c   : > { %v3230_v26 = vpop.f32.mrb[17].mxu1 }
 0x28d   : > { %v3231_v60 = vadd.f32 %v3230_v26, %v3229_v25  ;;  %v3232_v50 = vpop.f32.mrb[18].mxu1  ;;  %v1008_v25 = vadd.f32 %v4535_v6, %v892_v24  ;;  %v1019_v26 = vadd.f32 %v4537_v7, %v907_v32 }
 0x28e   : > { %v3233_v30 = vpop.f32.mrb[19].mxu1 }
 0x28f   : > { %v3234_v31 = vadd.f32 %v3233_v30, %v3232_v50  ;;  %v1430_v49 = vadd.f32 %v3231_v60, %v1245_v18  ;;  %v1280_v60 = vpop.permute.xlu1 %1279  ;;  %v1275_v50 = vpop.permute.xlu0 %1274  ;;  %v1011_v30 = vadd.f32 %v4539_v8, %v897_v19  ;;  %v1041_v6 = vmul.f32 %v4429_v4, %v1019_v26 }
 0x291   : > { %v1433_v59 = vadd.f32 %v3234_v31, %v1250_v16  ;;  %v1016_v16 = vadd.f32 %v4527_v2, %v902_v34  ;;  %v1038_v2 = vmul.f32 %v4429_v4, %v1008_v25 }
 0x293   : > { %v3235_v33 = vpop.f32.mrb[20].mxu1 }
 0x294   : > { %v3236_v35 = vpop.f32.mrb[21].mxu1 }
 0x295   : > { %v3237_v36 = vadd.f32 %v3236_v35, %v3235_v33  ;;  %v3238_v37 = vpop.f32.mrb[22].mxu1  ;;  %v1040_v35 = vmul.f32 %v4429_v4, %v1016_v16 }
 0x296   : > { %v3239_v38 = vpop.f32.mrb[23].mxu1 }
 0x297   : > { %v3240_v39 = vadd.f32 %v3239_v38, %v3238_v37  ;;  %v1438_v10 = vadd.f32 %v3237_v36, %v1255_v54 }
 0x299   : > { %v1441_v58 = vadd.f32 %v3240_v39, %v1260_v28 }
 0x29b   : > { %v3241_v43 = vpop.f32.mrb[24].mxu1  ;;  %v3269_v44 = vpop.f32.mrb[16].mxu0 }
 0x29c   : > { %v3242_v46 = vpop.f32.mrb[25].mxu1  ;;  %v3270_v48 = vpop.f32.mrb[17].mxu0 }
 0x29d   : > { %v3243_v51 = vadd.f32 %v3242_v46, %v3241_v43  ;;  %v3271_v52 = vadd.f32 %v3270_v48, %v3269_v44  ;;  %v3244_v53 = vpop.f32.mrb[26].mxu1  ;;  %v3272_v55 = vpop.f32.mrb[18].mxu0  ;;  %v1039_v48 = vmul.f32 %v4429_v4, %v1011_v30 }
 0x29e   : > { %v3245_v56 = vpop.f32.mrb[27].mxu1  ;;  %v3273_v57 = vpop.f32.mrb[19].mxu0 }
 0x29f   : > { %v3246_v61 = vadd.f32 %v3245_v56, %v3244_v53  ;;  %v3274_v27 = vadd.f32 %v3273_v57, %v3272_v55  ;;  %v1495_v29 = vadd.f32 %v3271_v52, %v1430_v49  ;;  %v1446_v28 = vadd.f32 %v3243_v51, %v1265_v42  ;;  %v922_v52 = vpop.permute.xlu0 %921 }
 0x2a0   : > { %v1024_v42 = vadd.f32 %v4567_v20, %v912_v63 }
 0x2a1   : > { %v1498_v40 = vadd.f32 %v3274_v27, %v1433_v59  ;;  %v1449_v24 = vadd.f32 %v3246_v61, %v1270_v41  ;;  %v1027_v41 = vadd.f32 %v4571_v23, %v917_v62  ;;  %v927_v59 = vpop.permute.xlu1 %926 }
 0x2a3   : > { %v3247_v0 = vpop.f32.mrb[28].mxu1  ;;  %v3275_v1 = vpop.f32.mrb[20].mxu0 }
 0x2a4   : > { %v3248_v3 = vpop.f32.mrb[29].mxu1  ;;  %v3276_v5 = vpop.f32.mrb[21].mxu0 }
 0x2a5   : > { %v3249_v11 = vadd.f32 %v3248_v3, %v3247_v0  ;;  %v3277_v22 = vadd.f32 %v3276_v5, %v3275_v1  ;;  %v3250_v9 = vpop.f32.mrb[30].mxu1  ;;  %v3278_v12 = vpop.f32.mrb[22].mxu0  ;;  %v1032_v0 = vadd.f32 %v4559_v17, %v922_v52  ;;  %v3073_v52 = vld [vmem:[%s5054_s7 + $0x70] sm:$0xff] }
 0x2a6   : > { %v3251_v45 = vpop.f32.mrb[31].mxu1  ;;  %v3279_v47 = vpop.f32.mrb[23].mxu0 }
 0x2a7   : > { %v3252_v13 = vadd.f32 %v3251_v45, %v3250_v9  ;;  %v3280_v14 = vadd.f32 %v3279_v47, %v3278_v12  ;;  %v1503_v15 = vadd.f32 %v3277_v22, %v1438_v10  ;;  %v1454_v1 = vadd.f32 %v3249_v11, %v1275_v50 }
 0x2a8   : > { %v1035_v9 = vadd.f32 %v4569_v21, %v927_v59  ;;  %v1044_v25 = vmul.f32 %v4429_v4, %v1032_v0 }
 0x2a9   : > { %v1506_v18 = vadd.f32 %v3280_v14, %v1441_v58  ;;  %v1457_v12 = vadd.f32 %v3252_v13, %v1280_v60 }
 0x2ab   : > { %v3281_v54 = vpop.f32.mrb[24].mxu0 }
 0x2ac   : > { %v3521_v31 = vpop.f32.mrb[32].mxu1  ;;  %v3282_v33 = vpop.f32.mrb[25].mxu0 }
 0x2ad   : > { %v1568_v36 = vadd.f32 %v3521_v31, %v1503_v15  ;;  %v3283_v37 = vadd.f32 %v3282_v33, %v3281_v54  ;;  %v1559_v38 = vpop.f32.mrb[33].mxu1  ;;  %v3284_v39 = vpop.f32.mrb[26].mxu0  ;;  %v1045_v54 = vmul.f32 %v4429_v4, %v1035_v9 }
 0x2ae   : > { %v1560_v7 = vadd.f32 %v1559_v38, %v1495_v29  ;;  %v3522_v32 = vpop.f32.mrb[34].mxu1  ;;  %v3285_v34 = vpop.f32.mrb[27].mxu0  ;;  %v1042_v29 = vmul.f32 %v4429_v4, %v1024_v42  ;;  %v3072_v42 = vld [vmem:[%s5054_s7 + $0x68] sm:$0xff] }
 0x2af   : > { %v1592_v43 = vadd.f32 %v1568_v36, %v1040_v35  ;;  %v1571_v44 = vadd.f32 %v3522_v32, %v1506_v18  ;;  %v3286_v8 = vadd.f32 %v3285_v34, %v3284_v39  ;;  %v1562_v19 = vpop.f32.mrb[35].mxu1  ;;  %v1511_v46 = vadd.f32 %v3283_v37, %v1446_v28  ;;  %v4694_v39 = vld [vmem:[%s5055_s8] ss:$0 sm:$0xff] }
 0x2b0   : > { %v1590_v49 = vadd.f32 %v1560_v7, %v1038_v2  ;;  %v1563_v51 = vadd.f32 %v1562_v19, %v1498_v40  ;;  %v1043_v18 = vmul.f32 %v4429_v4, %v1027_v41  ;;  %v3067_v19 = vld [vmem:[%s5054_s7 + $0x40] sm:$0xff] }
 0x2b1   : > { %v1600_v53 = vmax.f32 %v1592_v43, 0.0  ;;  %v1593_v55 = vadd.f32 %v1571_v44, %v1041_v6  ;;  %v1514_v56 = vadd.f32 %v3286_v8, %v1449_v24  ;;  %v4164_v43 = vld [vmem:[%s5053_s6 + $0xa4] ss:$20 sps:$4 sm:$0xff]   ;;  %v4170_v44 = vld [vmem:[%s5053_s6 + $0xac] ss:$20 sps:$4 sm:$0xff]  }
 0x2b2   : > { %v1591_v57 = vadd.f32 %v1563_v51, %v1039_v48  ;;  %v1598_v63 = vmax.f32 %v1590_v49, 0.0  ;;  %1996 = vmatprep.mubr.bf16.mxu0 %v4164_v43  ;;  %2061 = vmatprep.mubr.bf16.mxu1 %v4170_v44  ;;  %v3068_v8 = vld [vmem:[%s5054_s7 + $0x48] sm:$0xff]  ;;  %v3069_v48 = vld [vmem:[%s5054_s7 + $0x50] sm:$0xff]  ;;  %v3071_v49 = vld [vmem:[%s5054_s7 + $0x60] sm:$0xff] }
 0x2b3   : > { %v1601_v61 = vmax.f32 %v1593_v55, 0.0  ;;  %v3287_v27 = vpop.f32.mrb[28].mxu0  ;;  %v4668_v40 = vmul.f32 %v4429_v4, %v1600_v53  ;;  %v3074_v51 = vld [vmem:[%s5054_s7 + $0x78] sm:$0xff] }
 0x2b4   : > { %v1599_v3 = vmax.f32 %v1591_v57, 0.0  ;;  %v3525_v5 = vpop.f32.mrb[36].mxu1  ;;  %v3288_v20 = vpop.f32.mrb[29].mxu0  ;;  %v4682_v21 = vmul.f32 %v4429_v4, %v1598_v63 }
 0x2b5   : > { %v4671_v10 = vmul.f32 %v4429_v4, %v1601_v61  ;;  %v3289_v22 = vadd.f32 %v3288_v20, %v3287_v27  ;;  %v1575_v23 = vpop.f32.mrb[37].mxu1  ;;  %v3290_v62 = vpop.f32.mrb[30].mxu0 }
 0x2b6   : > { %v4675_v45 = vmul.f32 %v4429_v4, %v1599_v3  ;;  %v1576_v17 = vadd.f32 %v1575_v23, %v1511_v46  ;;  %v3526_v11 = vpop.f32.mrb[38].mxu1  ;;  %v3291_v47 = vpop.f32.mrb[31].mxu0  ;;  %v3070_v46 = vld [vmem:[%s5054_s7 + $0x58] sm:$0xff] }
 0x2b7   : > { %v1519_v58 = vadd.f32 %v3289_v22, %v1454_v1  ;;  %v3292_v14 = vadd.f32 %v3291_v47, %v3290_v62  ;;  %v1578_v15 = vpop.f32.mrb[39].mxu1  ;;  %v3779_v16 = vpack.i.bf16 %v4671_v10, %v4668_v40 }
 0x2b8   : > { %v1594_v26 = vadd.f32 %v1576_v17, %v1042_v29  ;;  %v1579_v50 = vadd.f32 %v1578_v15, %v1514_v56  ;;  %v3789_v35 = vpack.i.bf16 %v4675_v45, %v4682_v21 }
 0x2b9   : > { %v1584_v13 = vadd.f32 %v3525_v5, %v1519_v58  ;;  %v1522_v60 = vadd.f32 %v3292_v14, %v1457_v12  ;;  %3780 = vrot.lane.b32.xlu1 %v3779_v16, %s4229_s19  ;;  %3775 = vrot.lane.b32.xlu0 %v3779_v16, %s4230_s20  ;;  %v1792_v58 = vpack.c.bf16 %v4675_v45, %v4682_v21 }
 0x2ba   : > { %v1595_v30 = vadd.f32 %v1579_v50, %v1043_v18  ;;  %v1602_v2 = vmax.f32 %v1594_v26, 0.0 }
 0x2bb   : > { %v1596_v31 = vadd.f32 %v1584_v13, %v1044_v25  ;;  %v1587_v33 = vadd.f32 %v3526_v11, %v1522_v60 }
 0x2bc   : > { %v1603_v38 = vmax.f32 %v1595_v30, 0.0  ;;  %v4710_v32 = vmul.f32 %v4694_v39, %v1602_v2 }
 0x2bd   : > { %v1604_v28 = vmax.f32 %v1596_v31, 0.0  ;;  %v1597_v36 = vadd.f32 %v1587_v33, %v1045_v54  ;;  %3790 = vrot.lane.b32.xlu1 %v3789_v35, %s4229_s19  ;;  %3785 = vrot.lane.b32.xlu0 %v3789_v35, %s4230_s20 }
 0x2be   : > { %v4705_v24 = vmul.f32 %v4694_v39, %v1603_v38 }
 0x2bf   : > { %v1605_v37 = vmax.f32 %v1597_v36, 0.0  ;;  %v4697_v4 = vmul.f32 %v4694_v39, %v1604_v28 }
 0x2c0   : > { %v3824_v34 = vpack.i.bf16 %v4705_v24, %v4710_v32 }
 0x2c1   : > { %v4700_v6 = vmul.f32 %v4694_v39, %v1605_v37  ;;  %3800 = vrot.lane.b32.xlu1 %v3789_v35, %s4231_s23  ;;  %3795 = vrot.lane.b32.xlu0 %v3789_v35, %s4232_s24 }
 0x2c3   : > { %v3809_v7 = vpack.i.bf16 %v4700_v6, %v4697_v4 }
 0x2c5   : > { %3810 = vrot.lane.b32.xlu1 %v3809_v7, %s4229_s19  ;;  %3805 = vrot.lane.b32.xlu0 %v3809_v7, %s4230_s20 }
 0x2c9   : > { %3825 = vrot.lane.b32.xlu1 %v3824_v34, %s4229_s19  ;;  %3815 = vrot.lane.b32.xlu0 %v3824_v34, %s4230_s20 }
 0x2cd   : > { %3830 = vrot.lane.b32.xlu1 %v3779_v16, %s4232_s24  ;;  %3820 = vrot.lane.b32.xlu0 %v3789_v35, %s5067_s30 }
 0x2d1   : > { %3840 = vrot.lane.b32.xlu1 %v3779_v16, %s5067_s30  ;;  %3835 = vrot.lane.b32.xlu0 %v3779_v16, %s4231_s23 }
 0x2d5   : > { %3850 = vrot.lane.b32.xlu1 %v3824_v34, %s4231_s23  ;;  %3845 = vrot.lane.b32.xlu0 %v3824_v34, %s4232_s24 }
 0x2d9   : > { %3855 = vrot.lane.b32.xlu1 %v3809_v7, %s4232_s24  ;;  %3860 = vrot.lane.b32.xlu0 %v3824_v34, %s5067_s30 }
 0x2dd   : > { %3870 = vrot.lane.b32.xlu1 %v3809_v7, %s5067_s30  ;;  %3865 = vrot.lane.b32.xlu0 %v3809_v7, %s4231_s23  ;;  %s5073_s30 = sshll.u32 %s5075_s22, 4 }
 0x2e1   : > { %3880 = vrot.lane.b32.xlu1 %v3789_v35, %s5065_s27  ;;  %3875 = vrot.lane.b32.xlu0 %v3789_v35, %s5069_s17 }
 0x2e5   : > { %3890 = vrot.lane.b32.xlu1 %v3779_v16, %s5065_s27  ;;  %3885 = vrot.lane.b32.xlu0 %v3779_v16, %s5069_s17 }
 0x2e9   : > { %3905 = vrot.lane.b32.xlu1 %v3824_v34, %s5065_s27  ;;  %3895 = vrot.lane.b32.xlu0 %v3824_v34, %s5069_s17 }
 0x2ed   : > { %3910 = vrot.lane.b32.xlu1 %v3809_v7, %s5065_s27  ;;  %3900 = vrot.lane.b32.xlu0 %v3809_v7, %s5069_s17 }
 0x2f1   : > { %3920 = vrot.lane.b32.xlu1 %v3779_v16, %s5070_s14  ;;  %3915 = vrot.lane.b32.xlu0 %v3789_v35, %s5070_s14 }
 0x2f5   : > { %3930 = vrot.lane.b32.xlu1 %v3809_v7, %s5070_s14  ;;  %3925 = vrot.lane.b32.xlu0 %v3824_v34, %s5070_s14 }
 0x2f9   : > { %1819 = vperm.xlu1 %3613, %v3068_v8   ;;  %1814 = vperm.xlu0 %3612, %v3067_v19  }
 0x2fd   : > { %1829 = vperm.xlu1 %3613, %v3070_v46   ;;  %1824 = vperm.xlu0 %3612, %v3069_v48  }
 0x301   : > { %1839 = vperm.xlu1 %3613, %v3072_v42   ;;  %1834 = vperm.xlu0 %3612, %v3071_v49   ;;  %v1793_v49 = vpack.c.bf16 %v4671_v10, %v4668_v40 }
 0x305   : > { %1849 = vperm.xlu1 %3613, %v3074_v51   ;;  %1844 = vperm.xlu0 %3612, %v3073_v52  }
 0x32b   : > { %v3781_v53 = vpop.permute.xlu1 %3780  ;;  %v3776_v55 = vpop.permute.xlu0 %3775 }
 0x32c   : > { %v3778_v56 = vunpack.i.h.bf16 %v3776_v55  ;;  %v3777_v57 = vunpack.i.l.bf16 %v3776_v55  ;;  %v3783_v5 = vunpack.i.h.bf16 %v3781_v53  ;;  %v3782_v20 = vunpack.i.l.bf16 %v3781_v53 }
 0x32e   : > { %v1785_v23 = vpack.c.bf16 %v3778_v56, %v3777_v57  ;;  %v1777_v17 = vpack.c.bf16 %v3783_v5, %v3782_v20  ;;  %v1794_v20 = vpack.c.bf16 %v4705_v24, %v4710_v32 }
 0x32f   : > { %v3791_v41 = vpop.permute.xlu1 %3790  ;;  %v3786_v59 = vpop.permute.xlu0 %3785 }
 0x330   : > { %v3793_v61 = vunpack.i.h.bf16 %v3791_v41  ;;  %v3792_v27 = vunpack.i.l.bf16 %v3791_v41  ;;  %v3788_v29 = vunpack.i.h.bf16 %v3786_v59  ;;  %v3787_v0 = vunpack.i.l.bf16 %v3786_v59 }
 0x332   : > { %v1776_v1 = vpack.c.bf16 %v3793_v61, %v3792_v27  ;;  %v1784_v3 = vpack.c.bf16 %v3788_v29, %v3787_v0 }
 0x333   : > { %v3801_v63 = vpop.permute.xlu1 %3800  ;;  %v3796_v22 = vpop.permute.xlu0 %3795 }
 0x334   : > { %v3803_v62 = vunpack.i.h.bf16 %v3801_v63  ;;  %v3802_v9 = vunpack.i.l.bf16 %v3801_v63  ;;  %3301 = vmatprep.subr.bf16.mxu0 %v1784_v3  ;;  %v3798_v28 = vunpack.i.h.bf16 %v3796_v22  ;;  %v3797_v36 = vunpack.i.l.bf16 %v3796_v22 }
 0x335   : > { %3302 = vmatpush3.bf16.msra.mxu0 %v1776_v1 }
 0x336   : > { %v1800_v12 = vpack.c.bf16 %v3803_v62, %v3802_v9  ;;  %3303 = vmatprep.subr.bf16.mxu0 %v1785_v23  ;;  %v1788_v19 = vpack.c.bf16 %v3798_v28, %v3797_v36 }
 0x337   : > { %v3811_v11 = vpop.permute.xlu1 %3810  ;;  %v3806_v47 = vpop.permute.xlu0 %3805 }
 0x338   : > { %3341 = vmatprep.subr.bf16.mxu1 %v1800_v12  ;;  %v3808_v14 = vunpack.i.h.bf16 %v3806_v47  ;;  %v3807_v15 = vunpack.i.l.bf16 %v3806_v47  ;;  %v3813_v60 = vunpack.i.h.bf16 %v3811_v11  ;;  %v3812_v54 = vunpack.i.l.bf16 %v3811_v11 }
 0x339   : > { %3304 = vmatpush3.bf16.msra.mxu0 %v1777_v17  ;;  %3342 = vmatpush3.bf16.msra.mxu1 %v1792_v58 }
 0x33a   : > { %v1787_v37 = vpack.c.bf16 %v3808_v14, %v3807_v15  ;;  %v1779_v38 = vpack.c.bf16 %v3813_v60, %v3812_v54 }
 0x33b   : > { %v3826_v16 = vpop.permute.xlu1 %3825  ;;  %v3816_v18 = vpop.permute.xlu0 %3815 }
 0x33c   : > { %v3828_v25 = vunpack.i.h.bf16 %v3826_v16  ;;  %v3827_v26 = vunpack.i.l.bf16 %v3826_v16  ;;  %v3818_v50 = vunpack.i.h.bf16 %v3816_v18  ;;  %v3817_v13 = vunpack.i.l.bf16 %v3816_v18 }
 0x33e   : > { %v1778_v30 = vpack.c.bf16 %v3828_v25, %v3827_v26  ;;  %v1786_v31 = vpack.c.bf16 %v3818_v50, %v3817_v13  ;;  %v1795_v50 = vpack.c.bf16 %v4700_v6, %v4697_v4 }
 0x33f   : > { %v3831_v33 = vpop.permute.xlu1 %3830  ;;  %v3821_v35 = vpop.permute.xlu0 %3820 }
 0x340   : > { %3305 = vmatprep.subr.bf16.mxu0 %v1786_v31  ;;  %v3833_v2 = vunpack.i.h.bf16 %v3831_v33  ;;  %v3832_v7 = vunpack.i.l.bf16 %v3831_v33  ;;  %v3823_v34 = vunpack.i.h.bf16 %v3821_v35  ;;  %v3822_v43 = vunpack.i.l.bf16 %v3821_v35  ;;  %v4162_v31 = vld [vmem:[%s5053_s6 + $0xa0] ss:$20 sps:$4 sm:$0xff]  }
 0x341   : > { %3306 = vmatpush3.bf16.msra.mxu0 %v1778_v30  ;;  %v4165_v33 = vld [vmem:[%s5053_s6 + $0xcc] ss:$20 sps:$4 sm:$0xff]  }
 0x342   : > { %3307 = vmatprep.subr.bf16.mxu0 %v1787_v37  ;;  %v1789_v51 = vpack.c.bf16 %v3833_v2, %v3832_v7  ;;  %v1780_v52 = vpack.c.bf16 %v3823_v34, %v3822_v43 }
 0x343   : > { %v3841_v44 = vpop.permute.xlu1 %3840  ;;  %v3836_v8 = vpop.permute.xlu0 %3835 }
 0x344   : > { %v3838_v46 = vunpack.i.h.bf16 %v3836_v8  ;;  %v3837_v48 = vunpack.i.l.bf16 %v3836_v8  ;;  %v3843_v53 = vunpack.i.h.bf16 %v3841_v44  ;;  %v3842_v55 = vunpack.i.l.bf16 %v3841_v44 }
 0x345   : > { %3308 = vmatpush3.bf16.msra.mxu0 %v1779_v38 }
 0x346   : > { %v1801_v42 = vpack.c.bf16 %v3838_v46, %v3837_v48  ;;  %3309 = vmatprep.subr.bf16.mxu0 %v1788_v19  ;;  %v1781_v0 = vpack.c.bf16 %v3843_v53, %v3842_v55 }
 0x347   : > { %v3851_v56 = vpop.permute.xlu1 %3850  ;;  %v3846_v57 = vpop.permute.xlu0 %3845 }
 0x348   : > { %v3853_v41 = vunpack.i.h.bf16 %v3851_v56  ;;  %v3852_v59 = vunpack.i.l.bf16 %v3851_v56  ;;  %v3848_v61 = vunpack.i.h.bf16 %v3846_v57  ;;  %v3847_v27 = vunpack.i.l.bf16 %v3846_v57  ;;  %3343 = vmatprep.subr.bf16.mxu1 %v1801_v42 }
 0x349   : > { %3310 = vmatpush3.bf16.msra.mxu0 %v1780_v52  ;;  %3344 = vmatpush3.bf16.msra.mxu1 %v1793_v49  ;;  %v4171_v52 = vld [vmem:[%s5053_s6 + $0xf4] ss:$20 sps:$4 sm:$0xff]  }
 0x34a   : > { %v1802_v29 = vpack.c.bf16 %v3853_v41, %v3852_v59  ;;  %3311 = vmatprep.subr.bf16.mxu0 %v1789_v51  ;;  %v1790_v1 = vpack.c.bf16 %v3848_v61, %v3847_v27  ;;  %v4167_v51 = vld [vmem:[%s5053_s6 + $0xc8] ss:$20 sps:$4 sm:$0xff]  }
 0x34b   : > { %v3856_v3 = vpop.permute.xlu1 %3855  ;;  %v3861_v5 = vpop.permute.xlu0 %3860 }
 0x34c   : > { %v3858_v63 = vunpack.i.h.bf16 %v3856_v3  ;;  %v3857_v22 = vunpack.i.l.bf16 %v3856_v3  ;;  %v3863_v23 = vunpack.i.h.bf16 %v3861_v5  ;;  %v3862_v62 = vunpack.i.l.bf16 %v3861_v5  ;;  %3345 = vmatprep.subr.bf16.mxu1 %v1802_v29 }
 0x34d   : > { %3312 = vmatpush3.bf16.msra.mxu0 %v1781_v0  ;;  %3346 = vmatpush3.bf16.msra.mxu1 %v1794_v20 }
 0x34e   : > { %v1782_v9 = vpack.c.bf16 %v3863_v23, %v3862_v62  ;;  %3313 = vmatprep.subr.bf16.mxu0 %v1790_v1  ;;  %v1791_v12 = vpack.c.bf16 %v3858_v63, %v3857_v22  ;;  %v4168_v63 = vld [vmem:[%s5053_s6 + $0xa8] ss:$20 sps:$4 sm:$0xff]   ;;  %v4173_v22 = vld [vmem:[%s5053_s6 + $0xf0] ss:$20 sps:$4 sm:$0xff]  }
 0x34f   : > { %v3871_v17 = vpop.permute.xlu1 %3870  ;;  %v3866_v11 = vpop.permute.xlu0 %3865 }
 0x350   : > { %v3873_v47 = vunpack.i.h.bf16 %v3871_v17  ;;  %v3872_v58 = vunpack.i.l.bf16 %v3871_v17  ;;  %v3868_v14 = vunpack.i.h.bf16 %v3866_v11  ;;  %v3867_v15 = vunpack.i.l.bf16 %v3866_v11  ;;  %v4176_v17 = vld [vmem:[%s5053_s6 + $0xd4] ss:$20 sps:$4 sm:$0xff]  }
 0x351   : > { %3314 = vmatpush3.bf16.msra.mxu0 %v1782_v9  ;;  %v4174_v9 = vld [vmem:[%s5053_s6 + $0x11c] ss:$20 sps:$4 sm:$0xff]  }
 0x352   : > { %v1783_v16 = vpack.c.bf16 %v3873_v47, %v3872_v58  ;;  %v1803_v18 = vpack.c.bf16 %v3868_v14, %v3867_v15  ;;  %3315 = vmatprep.subr.bf16.mxu0 %v1791_v12 }
 0x353   : > { %v3881_v25 = vpop.permute.xlu1 %3880  ;;  %v3876_v26 = vpop.permute.xlu0 %3875 }
 0x354   : > { %v3883_v13 = vunpack.i.h.bf16 %v3881_v25  ;;  %v3882_v60 = vunpack.i.l.bf16 %v3881_v25  ;;  %v3878_v54 = vunpack.i.h.bf16 %v3876_v26  ;;  %v3877_v30 = vunpack.i.l.bf16 %v3876_v26  ;;  %3347 = vmatprep.subr.bf16.mxu1 %v1803_v18  ;;  %v4179_v18 = vld [vmem:[%s5053_s6 + $0xd0] ss:$20 sps:$4 sm:$0xff]  }
 0x355   : > { %3316 = vmatpush3.bf16.msra.mxu0 %v1783_v16  ;;  %3348 = vmatpush3.bf16.msra.mxu1 %v1795_v50  ;;  %v4178_v16 = vld [vmem:[%s5053_s6 + $0x118] ss:$20 sps:$4 sm:$0xff]  }
 0x356   : > { %v1796_v35 = vpack.c.bf16 %v3883_v13, %v3882_v60  ;;  %v1804_v28 = vpack.c.bf16 %v3878_v54, %v3877_v30  ;;  %v4180_v13 = vld [vmem:[%s5053_s6 + $0xfc] ss:$20 sps:$4 sm:$0xff]   ;;  %v4183_v30 = vld [vmem:[%s5053_s6 + $0xf8] ss:$20 sps:$4 sm:$0xff]  }
 0x357   : > { %v3891_v36 = vpop.permute.xlu1 %3890  ;;  %v3886_v37 = vpop.permute.xlu0 %3885  ;;  %v4182_v60 = vld [vmem:[%s5053_s6 + $0xb0] ss:$20 sps:$4 sm:$0xff]  }
 0x358   : > { %v3893_v38 = vunpack.i.h.bf16 %v3891_v36  ;;  %v3892_v2 = vunpack.i.l.bf16 %v3891_v36  ;;  %v3888_v7 = vunpack.i.h.bf16 %v3886_v37  ;;  %v3887_v34 = vunpack.i.l.bf16 %v3886_v37  ;;  %1997 = vmatmul.mubr.bf16.vlgmr.msra.gmra.mrb[32].mxu0 %v4162_v31  ;;  %3349 = vmatprep.subr.bf16.mxu1 %v1804_v28  ;;  %v4184_v31 = vld [vmem:[%s5053_s6 + $0xd8] ss:$20 sps:$4 sm:$0xff]   ;;  %v4188_v28 = vld [vmem:[%s5053_s6 + $0x120] ss:$20 sps:$4 sm:$0xff]   ;;  %v4189_v36 = vld [vmem:[%s5053_s6 + $0x128] ss:$20 sps:$4 sm:$0xff]  }
 0x359   : > { %3350 = vmatpush3.bf16.msra.mxu1 %v1796_v35  ;;  %2004 = vmatprep.mubr.bf16.mxu0 %v4165_v33  ;;  %v4185_v33 = vld [vmem:[%s5053_s6 + $0x124] ss:$20 sps:$4 sm:$0xff]   ;;  %v4187_v35 = vld [vmem:[%s5053_s6 + $0x100] ss:$20 sps:$4 sm:$0xff]  }
 0x35a   : > { %v1797_v43 = vpack.c.bf16 %v3893_v38, %v3892_v2  ;;  %v1805_v44 = vpack.c.bf16 %v3888_v7, %v3887_v34 }
 0x35b   : > { %v3906_v8 = vpop.permute.xlu1 %3905  ;;  %v3896_v19 = vpop.permute.xlu0 %3895 }
 0x35c   : > { %v3908_v46 = vunpack.i.h.bf16 %v3906_v8  ;;  %v3907_v48 = vunpack.i.l.bf16 %v3906_v8  ;;  %v3898_v42 = vunpack.i.h.bf16 %v3896_v19  ;;  %v3897_v49 = vunpack.i.l.bf16 %v3896_v19  ;;  %3351 = vmatprep.subr.bf16.mxu1 %v1805_v44 }
 0x35d   : > { %3352 = vmatpush3.bf16.msra.mxu1 %v1797_v43 }
 0x35e   : > { %v1798_v53 = vpack.c.bf16 %v3908_v46, %v3907_v48  ;;  %v1806_v55 = vpack.c.bf16 %v3898_v42, %v3897_v49 }
 0x35f   : > { %v3911_v56 = vpop.permute.xlu1 %3910  ;;  %v3901_v57 = vpop.permute.xlu0 %3900 }
 0x360   : > { %v3913_v41 = vunpack.i.h.bf16 %v3911_v56  ;;  %v3912_v59 = vunpack.i.l.bf16 %v3911_v56  ;;  %v3903_v61 = vunpack.i.h.bf16 %v3901_v57  ;;  %v3902_v27 = vunpack.i.l.bf16 %v3901_v57  ;;  %2005 = vmatmul.mubr.bf16.gmra.mrb[36].mxu0 %v4167_v51  ;;  %3353 = vmatprep.subr.bf16.mxu1 %v1806_v55 }
 0x361   : > { %3354 = vmatpush3.bf16.msra.mxu1 %v1798_v53  ;;  %2012 = vmatprep.mubr.bf16.mxu0 %v4171_v52 }
 0x362   : > { %v1799_v29 = vpack.c.bf16 %v3913_v41, %v3912_v59  ;;  %v1807_v0 = vpack.c.bf16 %v3903_v61, %v3902_v27 }
 0x363   : > { %v3921_v1 = vpop.permute.xlu1 %3920  ;;  %v3916_v3 = vpop.permute.xlu0 %3915 }
 0x364   : > { %v3918_v5 = vunpack.i.h.bf16 %v3916_v3  ;;  %v3917_v20 = vunpack.i.l.bf16 %v3916_v3  ;;  %3355 = vmatprep.subr.bf16.mxu1 %v1807_v0  ;;  %v3923_v23 = vunpack.i.h.bf16 %v3921_v1  ;;  %v3922_v62 = vunpack.i.l.bf16 %v3921_v1 }
 0x365   : > { %3356 = vmatpush3.bf16.msra.mxu1 %v1799_v29 }
 0x366   : > { %v1808_v12 = vpack.c.bf16 %v3918_v5, %v3917_v20  ;;  %v1809_v47 = vpack.c.bf16 %v3923_v23, %v3922_v62 }
 0x367   : > { %v3926_v11 = vpop.permute.xlu0 %3925  ;;  %v3931_v15 = vpop.permute.xlu1 %3930 }
 0x368   : > { %2013 = vmatmul.mubr.bf16.gmra.mrb[40].mxu0 %v4173_v22  ;;  %2062 = vmatmul.mubr.bf16.vlgmr.msra.gmra.mrb[40].mxu1 %v4168_v63  ;;  %v3928_v58 = vunpack.i.h.bf16 %v3926_v11  ;;  %v3927_v14 = vunpack.i.l.bf16 %v3926_v11  ;;  %v3933_v25 = vunpack.i.h.bf16 %v3931_v15  ;;  %v3932_v26 = vunpack.i.l.bf16 %v3931_v15 }
 0x369   : > { %3527 = vmatprep.subr.bf16.mxu0 %v1808_v12  ;;  %2020 = vmatprep.mubr.bf16.mxu0 %v4174_v9 }
 0x36a   : > { %3528 = vmatpush3.bf16.msra.mxu0 %v1808_v12  ;;  %2069 = vmatprep.mubr.bf16.mxu1 %v4176_v17  ;;  %v1810_v50 = vpack.c.bf16 %v3928_v58, %v3927_v14  ;;  %v1811_v54 = vpack.c.bf16 %v3933_v25, %v3932_v26 }
 0x36b   : > { %3529 = vmatprep.subr.bf16.mxu0 %v1809_v47 }
 0x36e   : > { %3530 = vmatpush3.bf16.msra.mxu0 %v1809_v47 }
 0x36f   : > { %3531 = vmatprep.subr.bf16.mxu0 %v1810_v50 }
 0x370   : > { %2021 = vmatmul.mubr.bf16.gmra.mrb[44].mxu0 %v4178_v16  ;;  %2070 = vmatmul.mubr.bf16.gmra.mrb[44].mxu1 %v4179_v18 }
 0x371   : > { %2077 = vmatprep.mubr.bf16.mxu1 %v4180_v13  ;;  %3535 = vmatprep.mubr.msk.bf16.mxu0 %vm1382_vm1, %v4182_v60 }
 0x372   : > { %3532 = vmatpush3.bf16.msra.mxu0 %v1810_v50 }
 0x373   : > { %3533 = vmatprep.subr.bf16.mxu0 %v1811_v54 }
 0x376   : > { %3534 = vmatpush3.bf16.msra.mxu0 %v1811_v54 }
 0x378   : > { %2078 = vmatmul.mubr.bf16.gmra.mrb[48].mxu1 %v4183_v30  ;;  %v1820_v49 = vpop.permute.xlu1 %1819  ;;  %v1815_v51 = vpop.permute.xlu0 %1814 }
 0x379   : > { %3536 = vmatmul.mubr.msk.bf16.vlgmr.msra.gmra.mrb[48].mxu0 %vm1382_vm1, %v4184_v31  ;;  %2085 = vmatprep.mubr.bf16.mxu1 %v4185_v33 }
 0x37a   : > { %3539 = vmatprep.mubr.msk.bf16.mxu0 %vm1382_vm1, %v4187_v35 }
 0x37c   : > { %v1830_v22 = vpop.permute.xlu1 %1829  ;;  %v1825_v23 = vpop.permute.xlu0 %1824 }
 0x380   : > { %2086 = vmatmul.mubr.bf16.gmra.mrb[52].mxu1 %v4188_v28  ;;  %v1840_v54 = vpop.permute.xlu1 %1839  ;;  %v1835_v30 = vpop.permute.xlu0 %1834 }
 0x381   : > { %3540 = vmatmul.mubr.msk.bf16.gmra.mrb[52].mxu0 %vm1382_vm1, %v4189_v36 }
 0x42b   : > { %v3317_v37 = vpop.f32.mrb[32].mxu0 }
 0x42c   : > { %v3318_v38 = vpop.f32.mrb[33].mxu0 }
 0x42d   : > { %v3319_v2 = vadd.f32 %v3318_v38, %v3317_v37  ;;  %v3320_v7 = vpop.f32.mrb[34].mxu0 }
 0x42e   : > { %v3321_v34 = vpop.f32.mrb[35].mxu0 }
 0x42f   : > { %v3322_v43 = vadd.f32 %v3321_v34, %v3320_v7  ;;  %v1999_v57 = vadd.f32 %v3319_v2, %v1815_v51 }
 0x431   : > { %v2002_v1 = vadd.f32 %v3322_v43, %v1820_v49 }
 0x433   : > { %v3323_v44 = vpop.f32.mrb[36].mxu0 }
 0x434   : > { %v3324_v8 = vpop.f32.mrb[37].mxu0 }
 0x435   : > { %v3325_v19 = vadd.f32 %v3324_v8, %v3323_v44  ;;  %v3326_v46 = vpop.f32.mrb[38].mxu0 }
 0x436   : > { %v3327_v48 = vpop.f32.mrb[39].mxu0 }
 0x437   : > { %v3328_v42 = vadd.f32 %v3327_v48, %v3326_v46  ;;  %v2007_v11 = vadd.f32 %v3325_v19, %v1825_v23 }
 0x439   : > { %v2010_v25 = vadd.f32 %v3328_v42, %v1830_v22 }
 0x43b   : > { %v3329_v52 = vpop.f32.mrb[40].mxu0  ;;  %v3357_v53 = vpop.f32.mrb[40].mxu1 }
 0x43c   : > { %v3330_v55 = vpop.f32.mrb[41].mxu0  ;;  %v3358_v56 = vpop.f32.mrb[41].mxu1 }
 0x43d   : > { %v3331_v41 = vadd.f32 %v3330_v55, %v3329_v52  ;;  %v3359_v59 = vadd.f32 %v3358_v56, %v3357_v53  ;;  %v3332_v61 = vpop.f32.mrb[42].mxu0  ;;  %v3360_v27 = vpop.f32.mrb[42].mxu1 }
 0x43e   : > { %v3333_v29 = vpop.f32.mrb[43].mxu0  ;;  %v3361_v0 = vpop.f32.mrb[43].mxu1 }
 0x43f   : > { %v3334_v3 = vadd.f32 %v3333_v29, %v3332_v61  ;;  %v3362_v5 = vadd.f32 %v3361_v0, %v3360_v27  ;;  %v2064_v20 = vadd.f32 %v3359_v59, %v1999_v57  ;;  %v2015_v28 = vadd.f32 %v3331_v41, %v1835_v30  ;;  %v1850_v55 = vpop.permute.xlu1 %1849  ;;  %v1845_v57 = vpop.permute.xlu0 %1844 }
 0x441   : > { %v2067_v63 = vadd.f32 %v3362_v5, %v2002_v1  ;;  %v2018_v7 = vadd.f32 %v3334_v3, %v1840_v54 }
 0x443   : > { %v3335_v62 = vpop.f32.mrb[44].mxu0  ;;  %v3363_v9 = vpop.f32.mrb[44].mxu1 }
 0x444   : > { %v3336_v12 = vpop.f32.mrb[45].mxu0  ;;  %v3364_v17 = vpop.f32.mrb[45].mxu1 }
 0x445   : > { %v3337_v47 = vadd.f32 %v3336_v12, %v3335_v62  ;;  %v3365_v58 = vadd.f32 %v3364_v17, %v3363_v9  ;;  %v3338_v14 = vpop.f32.mrb[46].mxu0  ;;  %v3366_v15 = vpop.f32.mrb[46].mxu1 }
 0x446   : > { %v3339_v16 = vpop.f32.mrb[47].mxu0  ;;  %v3367_v18 = vpop.f32.mrb[47].mxu1 }
 0x447   : > { %v3340_v26 = vadd.f32 %v3339_v16, %v3338_v14  ;;  %v3368_v50 = vadd.f32 %v3367_v18, %v3366_v15  ;;  %v2072_v13 = vadd.f32 %v3365_v58, %v2007_v11  ;;  %v2023_v27 = vadd.f32 %v3337_v47, %v1845_v57 }
 0x449   : > { %v2075_v60 = vadd.f32 %v3368_v50, %v2010_v25  ;;  %v2026_v29 = vadd.f32 %v3340_v26, %v1850_v55 }
 0x44b   : > { %v3369_v31 = vpop.f32.mrb[48].mxu1 }
 0x44c   : > { %v3537_v33 = vpop.f32.mrb[48].mxu0  ;;  %v3370_v35 = vpop.f32.mrb[49].mxu1 }
 0x44d   : > { %v2137_v36 = vadd.f32 %v3537_v33, %v2072_v13  ;;  %v3371_v37 = vadd.f32 %v3370_v35, %v3369_v31  ;;  %v2128_v38 = vpop.f32.mrb[49].mxu0  ;;  %v3372_v2 = vpop.f32.mrb[50].mxu1 }
 0x44e   : > { %v2129_v34 = vadd.f32 %v2128_v38, %v2064_v20  ;;  %v3538_v43 = vpop.f32.mrb[50].mxu0  ;;  %v3373_v44 = vpop.f32.mrb[51].mxu1 }
 0x44f   : > { %v2161_v8 = vmax.f32 %v2137_v36, 0.0  ;;  %v2140_v19 = vadd.f32 %v3538_v43, %v2075_v60  ;;  %v3374_v46 = vadd.f32 %v3373_v44, %v3372_v2  ;;  %v2131_v48 = vpop.f32.mrb[51].mxu0  ;;  %v2080_v42 = vadd.f32 %v3371_v37, %v2015_v28  ;;  %v4198_v2 = vld [vmem:[%s5053_s6 + $0x14c] ss:$20 sps:$4 sm:$0xff]   ;;  %v3126_v43 = vld [vmem:[%s5054_s7 + $0x98] sm:$0xff]  ;;  %v3125_v44 = vld [vmem:[%s5054_s7 + $0x90] sm:$0xff] }
 0x450   : > { %v2159_v49 = vmax.f32 %v2129_v34, 0.0  ;;  %v2132_v51 = vadd.f32 %v2131_v48, %v2067_v63  ;;  %2622 = vmatprep.mubr.bf16.mxu0 %v4198_v2  ;;  %v3123_v34 = vld [vmem:[%s5054_s7 + $0x80] sm:$0xff]  ;;  %v3129_v48 = vld [vmem:[%s5054_s7 + $0xb0] sm:$0xff] }
 0x451   : > { %v2162_v52 = vmax.f32 %v2140_v19, 0.0  ;;  %v2083_v53 = vadd.f32 %v3374_v46, %v2018_v7  ;;  %v4837_v41 = vmul.f32 %v4694_v39, %v2161_v8  ;;  %v3124_v7 = vld [vmem:[%s5054_s7 + $0x88] sm:$0xff]  ;;  %v3127_v19 = vld [vmem:[%s5054_s7 + $0xa0] sm:$0xff]  ;;  %v3130_v46 = vld [vmem:[%s5054_s7 + $0xb8] sm:$0xff] }
 0x452   : > { %v2160_v56 = vmax.f32 %v2132_v51, 0.0  ;;  %v4843_v0 = vmul.f32 %v4694_v39, %v2159_v49  ;;  %v3128_v8 = vld [vmem:[%s5054_s7 + $0xa8] sm:$0xff] }
 0x453   : > { %v4840_v59 = vmul.f32 %v4694_v39, %v2162_v52  ;;  %v3375_v61 = vpop.f32.mrb[52].mxu1 }
 0x454   : > { %v4846_v1 = vmul.f32 %v4694_v39, %v2160_v56  ;;  %v3541_v3 = vpop.f32.mrb[52].mxu0  ;;  %v3376_v5 = vpop.f32.mrb[53].mxu1 }
 0x455   : > { %v3377_v20 = vadd.f32 %v3376_v5, %v3375_v61  ;;  %v2144_v63 = vpop.f32.mrb[53].mxu0  ;;  %v3378_v22 = vpop.f32.mrb[54].mxu1  ;;  %v3939_v23 = vpack.i.bf16 %v4840_v59, %v4837_v41  ;;  %v2354_v30 = vpack.c.bf16 %v4840_v59, %v4837_v41 }
 0x456   : > { %v2145_v62 = vadd.f32 %v2144_v63, %v2080_v42  ;;  %v3542_v9 = vpop.f32.mrb[54].mxu0  ;;  %v3379_v12 = vpop.f32.mrb[55].mxu1  ;;  %v3949_v17 = vpack.i.bf16 %v4846_v1, %v4843_v0  ;;  %v2353_v54 = vpack.c.bf16 %v4846_v1, %v4843_v0 }
 0x457   : > { %v2088_v11 = vadd.f32 %v3377_v20, %v2023_v27  ;;  %v3380_v47 = vadd.f32 %v3379_v12, %v3378_v22  ;;  %v2147_v58 = vpop.f32.mrb[55].mxu0  ;;  %3940 = vrot.lane.b32.xlu1 %v3939_v23, %s4229_s19  ;;  %3935 = vrot.lane.b32.xlu0 %v3939_v23, %s4230_s20 }
 0x458   : > { %v2163_v14 = vmax.f32 %v2145_v62, 0.0  ;;  %v2148_v15 = vadd.f32 %v2147_v58, %v2083_v53 }
 0x459   : > { %v2153_v16 = vadd.f32 %v3541_v3, %v2088_v11  ;;  %v2091_v18 = vadd.f32 %v3380_v47, %v2026_v29 }
 0x45a   : > { %v4855_v25 = vmul.f32 %v4694_v39, %v2163_v14  ;;  %v2164_v26 = vmax.f32 %v2148_v15, 0.0 }
 0x45b   : > { %v2165_v50 = vmax.f32 %v2153_v16, 0.0  ;;  %v2156_v13 = vadd.f32 %v3542_v9, %v2091_v18  ;;  %3950 = vrot.lane.b32.xlu1 %v3949_v17, %s4229_s19  ;;  %3945 = vrot.lane.b32.xlu0 %v3949_v17, %s4230_s20 }
 0x45c   : > { %v4860_v60 = vmul.f32 %v4694_v39, %v2164_v26 }
 0x45d   : > { %v4867_v31 = vmul.f32 %v4694_v39, %v2165_v50  ;;  %v2166_v33 = vmax.f32 %v2156_v13, 0.0 }
 0x45e   : > { %v3984_v35 = vpack.i.bf16 %v4860_v60, %v4855_v25  ;;  %v2355_v36 = vpack.c.bf16 %v4860_v60, %v4855_v25  ;;  %v4190_v60 = vld [vmem:[%s5053_s6 + $0x140] ss:$20 sps:$4 sm:$0xff]  }
 0x45f   : > { %v4872_v28 = vmul.f32 %v4694_v39, %v2166_v33  ;;  %3960 = vrot.lane.b32.xlu1 %v3949_v17, %s4231_s23  ;;  %3955 = vrot.lane.b32.xlu0 %v3949_v17, %s4232_s24  ;;  %v4192_v39 = vld [vmem:[%s5053_s6 + $0x144] ss:$20 sps:$4 sm:$0xff]  }
 0x460   : > { %2557 = vmatprep.mubr.bf16.mxu1 %v4192_v39 }
 0x461   : > { %v3969_v37 = vpack.i.bf16 %v4872_v28, %v4867_v31  ;;  %v2356_v38 = vpack.c.bf16 %v4872_v28, %v4867_v31 }
 0x463   : > { %3970 = vrot.lane.b32.xlu1 %v3969_v37, %s4229_s19  ;;  %3965 = vrot.lane.b32.xlu0 %v3969_v37, %s4230_s20 }
 0x467   : > { %3985 = vrot.lane.b32.xlu1 %v3984_v35, %s4229_s19  ;;  %3975 = vrot.lane.b32.xlu0 %v3984_v35, %s4230_s20  ;;  %s5072_s19 = smov 127  }
 0x46b   : > { %3990 = vrot.lane.b32.xlu1 %v3939_v23, %s4232_s24  ;;  %3980 = vrot.lane.b32.xlu0 %v3949_v17, %s5071_s15 }
 0x46f   : > { %4000 = vrot.lane.b32.xlu1 %v3939_v23, %s5071_s15  ;;  %3995 = vrot.lane.b32.xlu0 %v3939_v23, %s4231_s23 }
 0x473   : > { %4010 = vrot.lane.b32.xlu1 %v3984_v35, %s4231_s23  ;;  %4005 = vrot.lane.b32.xlu0 %v3984_v35, %s4232_s24 }
 0x477   : > { %4015 = vrot.lane.b32.xlu1 %v3969_v37, %s4232_s24  ;;  %4020 = vrot.lane.b32.xlu0 %v3984_v35, %s5071_s15 }
 0x47b   : > { %4030 = vrot.lane.b32.xlu1 %v3969_v37, %s5071_s15  ;;  %4025 = vrot.lane.b32.xlu0 %v3969_v37, %s4231_s23 }
 0x47f   : > { %4040 = vrot.lane.b32.xlu1 %v3949_v17, %s5072_s19  ;;  %4035 = vrot.lane.b32.xlu0 %v3949_v17, %s5069_s17 }
 0x483   : > { %4050 = vrot.lane.b32.xlu1 %v3939_v23, %s5072_s19  ;;  %4045 = vrot.lane.b32.xlu0 %v3939_v23, %s5069_s17 }
 0x487   : > { %4065 = vrot.lane.b32.xlu1 %v3984_v35, %s5072_s19  ;;  %4055 = vrot.lane.b32.xlu0 %v3984_v35, %s5069_s17 }
 0x48b   : > { %4070 = vrot.lane.b32.xlu1 %v3969_v37, %s5072_s19  ;;  %4060 = vrot.lane.b32.xlu0 %v3969_v37, %s5069_s17  ;;  %s433_s17 = scalar_lea.vmem %s5059_s12, %s5073_s30 }
 0x48f   : > { %4080 = vrot.lane.b32.xlu1 %v3939_v23, %s5070_s14  ;;  %4075 = vrot.lane.b32.xlu0 %v3949_v17, %s5070_s14 }
 0x493   : > { %4090 = vrot.lane.b32.xlu1 %v3969_v37, %s5070_s14  ;;  %4085 = vrot.lane.b32.xlu0 %v3984_v35, %s5070_s14 }
 0x497   : > { %2380 = vperm.xlu1 %3613, %v3124_v7   ;;  %2375 = vperm.xlu0 %3612, %v3123_v34  }
 0x49b   : > { %2390 = vperm.xlu1 %3613, %v3126_v43   ;;  %2385 = vperm.xlu0 %3612, %v3125_v44  }
 0x49f   : > { %2400 = vperm.xlu1 %3613, %v3128_v8   ;;  %2395 = vperm.xlu0 %3612, %v3127_v19  }
 0x4a3   : > { %2410 = vperm.xlu1 %3613, %v3130_v46   ;;  %2405 = vperm.xlu0 %3612, %v3129_v48  }
 0x4c9   : > { %v3941_v42 = vpop.permute.xlu1 %3940  ;;  %v3936_v49 = vpop.permute.xlu0 %3935 }
 0x4ca   : > { %v3938_v51 = vunpack.i.h.bf16 %v3936_v49  ;;  %v3937_v52 = vunpack.i.l.bf16 %v3936_v49  ;;  %v3943_v5 = vunpack.i.h.bf16 %v3941_v42  ;;  %v3942_v20 = vunpack.i.l.bf16 %v3941_v42 }
 0x4cc   : > { %v2346_v23 = vpack.c.bf16 %v3938_v51, %v3937_v52  ;;  %v2338_v17 = vpack.c.bf16 %v3943_v5, %v3942_v20 }
 0x4cd   : > { %v3951_v53 = vpop.permute.xlu1 %3950  ;;  %v3946_v55 = vpop.permute.xlu0 %3945 }
 0x4ce   : > { %v3953_v56 = vunpack.i.h.bf16 %v3951_v53  ;;  %v3952_v57 = vunpack.i.l.bf16 %v3951_v53  ;;  %v3948_v61 = vunpack.i.h.bf16 %v3946_v55  ;;  %v3947_v27 = vunpack.i.l.bf16 %v3946_v55 }
 0x4d0   : > { %v2337_v29 = vpack.c.bf16 %v3953_v56, %v3952_v57  ;;  %v2345_v3 = vpack.c.bf16 %v3948_v61, %v3947_v27 }
 0x4d1   : > { %v3961_v63 = vpop.permute.xlu1 %3960  ;;  %v3956_v22 = vpop.permute.xlu0 %3955 }
 0x4d2   : > { %v3963_v62 = vunpack.i.h.bf16 %v3961_v63  ;;  %v3962_v9 = vunpack.i.l.bf16 %v3961_v63  ;;  %3389 = vmatprep.subr.bf16.mxu1 %v2345_v3  ;;  %v3958_v34 = vunpack.i.h.bf16 %v3956_v22  ;;  %v3957_v43 = vunpack.i.l.bf16 %v3956_v22 }
 0x4d3   : > { %3390 = vmatpush3.bf16.msra.mxu1 %v2337_v29 }
 0x4d4   : > { %v2361_v12 = vpack.c.bf16 %v3963_v62, %v3962_v9  ;;  %3391 = vmatprep.subr.bf16.mxu1 %v2346_v23  ;;  %v2349_v42 = vpack.c.bf16 %v3958_v34, %v3957_v43 }
 0x4d5   : > { %v3971_v11 = vpop.permute.xlu1 %3970  ;;  %v3966_v47 = vpop.permute.xlu0 %3965 }
 0x4d6   : > { %3429 = vmatprep.subr.bf16.mxu0 %v2361_v12  ;;  %v3968_v58 = vunpack.i.h.bf16 %v3966_v47  ;;  %v3967_v14 = vunpack.i.l.bf16 %v3966_v47  ;;  %v3973_v33 = vunpack.i.h.bf16 %v3971_v11  ;;  %v3972_v35 = vunpack.i.l.bf16 %v3971_v11 }
 0x4d7   : > { %3392 = vmatpush3.bf16.msra.mxu1 %v2338_v17  ;;  %3430 = vmatpush3.bf16.msra.mxu0 %v2353_v54 }
 0x4d8   : > { %v2348_v44 = vpack.c.bf16 %v3968_v58, %v3967_v14  ;;  %v2340_v0 = vpack.c.bf16 %v3973_v33, %v3972_v35 }
 0x4d9   : > { %v3986_v15 = vpop.permute.xlu1 %3985  ;;  %v3976_v16 = vpop.permute.xlu0 %3975 }
 0x4da   : > { %v3988_v18 = vunpack.i.h.bf16 %v3986_v15  ;;  %v3987_v26 = vunpack.i.l.bf16 %v3986_v15  ;;  %v3978_v50 = vunpack.i.h.bf16 %v3976_v16  ;;  %v3977_v13 = vunpack.i.l.bf16 %v3976_v16 }
 0x4dc   : > { %v2339_v37 = vpack.c.bf16 %v3988_v18, %v3987_v26  ;;  %v2347_v39 = vpack.c.bf16 %v3978_v50, %v3977_v13 }
 0x4dd   : > { %v3991_v2 = vpop.permute.xlu1 %3990  ;;  %v3981_v7 = vpop.permute.xlu0 %3980 }
 0x4de   : > { %3393 = vmatprep.subr.bf16.mxu1 %v2347_v39  ;;  %v3993_v1 = vunpack.i.h.bf16 %v3991_v2  ;;  %v3992_v54 = vunpack.i.l.bf16 %v3991_v2  ;;  %v3983_v8 = vunpack.i.h.bf16 %v3981_v7  ;;  %v3982_v19 = vunpack.i.l.bf16 %v3981_v7 }
 0x4df   : > { %3394 = vmatpush3.bf16.msra.mxu1 %v2339_v37 }
 0x4e0   : > { %3395 = vmatprep.subr.bf16.mxu1 %v2348_v44  ;;  %v2350_v53 = vpack.c.bf16 %v3993_v1, %v3992_v54  ;;  %v2341_v55 = vpack.c.bf16 %v3983_v8, %v3982_v19 }
 0x4e1   : > { %v4001_v46 = vpop.permute.xlu1 %4000  ;;  %v3996_v48 = vpop.permute.xlu0 %3995 }
 0x4e2   : > { %v3998_v49 = vunpack.i.h.bf16 %v3996_v48  ;;  %v3997_v51 = vunpack.i.l.bf16 %v3996_v48  ;;  %v4003_v56 = vunpack.i.h.bf16 %v4001_v46  ;;  %v4002_v57 = vunpack.i.l.bf16 %v4001_v46 }
 0x4e3   : > { %3396 = vmatpush3.bf16.msra.mxu1 %v2340_v0 }
 0x4e4   : > { %v2362_v52 = vpack.c.bf16 %v3998_v49, %v3997_v51  ;;  %3397 = vmatprep.subr.bf16.mxu1 %v2349_v42  ;;  %v2342_v22 = vpack.c.bf16 %v4003_v56, %v4002_v57  ;;  %v4195_v49 = vld [vmem:[%s5053_s6 + $0x168] ss:$20 sps:$4 sm:$0xff]  }
 0x4e5   : > { %v4011_v61 = vpop.permute.xlu1 %4010  ;;  %v4006_v27 = vpop.permute.xlu0 %4005  ;;  %v4199_v51 = vld [vmem:[%s5053_s6 + $0x194] ss:$20 sps:$4 sm:$0xff]  }
 0x4e6   : > { %v4013_v29 = vunpack.i.h.bf16 %v4011_v61  ;;  %v4012_v3 = vunpack.i.l.bf16 %v4011_v61  ;;  %v4008_v5 = vunpack.i.h.bf16 %v4006_v27  ;;  %v4007_v20 = vunpack.i.l.bf16 %v4006_v27  ;;  %3431 = vmatprep.subr.bf16.mxu0 %v2362_v52 }
 0x4e7   : > { %3398 = vmatpush3.bf16.msra.mxu1 %v2341_v55  ;;  %3432 = vmatpush3.bf16.msra.mxu0 %v2354_v30 }
 0x4e8   : > { %v2363_v63 = vpack.c.bf16 %v4013_v29, %v4012_v3  ;;  %3399 = vmatprep.subr.bf16.mxu1 %v2350_v53  ;;  %v2351_v23 = vpack.c.bf16 %v4008_v5, %v4007_v20 }
 0x4e9   : > { %v4016_v62 = vpop.permute.xlu1 %4015  ;;  %v4021_v9 = vpop.permute.xlu0 %4020 }
 0x4ea   : > { %v4018_v12 = vunpack.i.h.bf16 %v4016_v62  ;;  %v4017_v17 = vunpack.i.l.bf16 %v4016_v62  ;;  %v4023_v11 = vunpack.i.h.bf16 %v4021_v9  ;;  %v4022_v47 = vunpack.i.l.bf16 %v4021_v9  ;;  %3433 = vmatprep.subr.bf16.mxu0 %v2363_v63  ;;  %v4196_v62 = vld [vmem:[%s5053_s6 + $0x148] ss:$20 sps:$4 sm:$0xff]   ;;  %v4201_v9 = vld [vmem:[%s5053_s6 + $0x190] ss:$20 sps:$4 sm:$0xff]  }
 0x4eb   : > { %3400 = vmatpush3.bf16.msra.mxu1 %v2342_v22  ;;  %3434 = vmatpush3.bf16.msra.mxu0 %v2355_v36  ;;  %v4193_v36 = vld [vmem:[%s5053_s6 + $0x16c] ss:$20 sps:$4 sm:$0xff]  }
 0x4ec   : > { %v2343_v58 = vpack.c.bf16 %v4023_v11, %v4022_v47  ;;  %3401 = vmatprep.subr.bf16.mxu1 %v2351_v23  ;;  %v2352_v41 = vpack.c.bf16 %v4018_v12, %v4017_v17  ;;  %v4202_v11 = vld [vmem:[%s5053_s6 + $0x1bc] ss:$20 sps:$4 sm:$0xff]  }
 0x4ed   : > { %v4031_v59 = vpop.permute.xlu1 %4030  ;;  %v4026_v30 = vpop.permute.xlu0 %4025 }
 0x4ee   : > { %v4033_v14 = vunpack.i.h.bf16 %v4031_v59  ;;  %v4032_v15 = vunpack.i.l.bf16 %v4031_v59  ;;  %v4028_v16 = vunpack.i.h.bf16 %v4026_v30  ;;  %v4027_v18 = vunpack.i.l.bf16 %v4026_v30 }
 0x4ef   : > { %3402 = vmatpush3.bf16.msra.mxu1 %v2343_v58  ;;  %v4204_v58 = vld [vmem:[%s5053_s6 + $0x174] ss:$20 sps:$4 sm:$0xff]  }
 0x4f0   : > { %v2344_v26 = vpack.c.bf16 %v4033_v14, %v4032_v15  ;;  %v2364_v50 = vpack.c.bf16 %v4028_v16, %v4027_v18  ;;  %3403 = vmatprep.subr.bf16.mxu1 %v2352_v41  ;;  %v4206_v16 = vld [vmem:[%s5053_s6 + $0x1b8] ss:$20 sps:$4 sm:$0xff]   ;;  %v4207_v18 = vld [vmem:[%s5053_s6 + $0x170] ss:$20 sps:$4 sm:$0xff]  }
 0x4f1   : > { %v4041_v13 = vpop.permute.xlu1 %4040  ;;  %v4036_v33 = vpop.permute.xlu0 %4035 }
 0x4f2   : > { %v4043_v35 = vunpack.i.h.bf16 %v4041_v13  ;;  %v4042_v37 = vunpack.i.l.bf16 %v4041_v13  ;;  %v4038_v39 = vunpack.i.h.bf16 %v4036_v33  ;;  %v4037_v25 = vunpack.i.l.bf16 %v4036_v33  ;;  %3435 = vmatprep.subr.bf16.mxu0 %v2364_v50  ;;  %v4208_v33 = vld [vmem:[%s5053_s6 + $0x19c] ss:$20 sps:$4 sm:$0xff]  }
 0x4f3   : > { %3404 = vmatpush3.bf16.msra.mxu1 %v2344_v26  ;;  %3436 = vmatpush3.bf16.msra.mxu0 %v2356_v38 }
 0x4f4   : > { %v2357_v2 = vpack.c.bf16 %v4043_v35, %v4042_v37  ;;  %v2365_v7 = vpack.c.bf16 %v4038_v39, %v4037_v25  ;;  %v4210_v35 = vld [vmem:[%s5053_s6 + $0x150] ss:$20 sps:$4 sm:$0xff]   ;;  %v4211_v39 = vld [vmem:[%s5053_s6 + $0x198] ss:$20 sps:$4 sm:$0xff]  }
 0x4f5   : > { %v4051_v34 = vpop.permute.xlu1 %4050  ;;  %v4046_v43 = vpop.permute.xlu0 %4045  ;;  %v4212_v25 = vld [vmem:[%s5053_s6 + $0x178] ss:$20 sps:$4 sm:$0xff]  }
 0x4f6   : > { %v4053_v44 = vunpack.i.h.bf16 %v4051_v34  ;;  %v4052_v0 = vunpack.i.l.bf16 %v4051_v34  ;;  %v4048_v1 = vunpack.i.h.bf16 %v4046_v43  ;;  %v4047_v54 = vunpack.i.l.bf16 %v4046_v43  ;;  %2558 = vmatmul.mubr.bf16.vlgmr.msra.gmra.mrb[56].mxu1 %v4190_v60  ;;  %3437 = vmatprep.subr.bf16.mxu0 %v2365_v7  ;;  %v4213_v60 = vld [vmem:[%s5053_s6 + $0x1c4] ss:$20 sps:$4 sm:$0xff]   ;;  %v4217_v7 = vld [vmem:[%s5053_s6 + $0x1c8] ss:$20 sps:$4 sm:$0xff]  }
 0x4f7   : > { %3438 = vmatpush3.bf16.msra.mxu0 %v2357_v2  ;;  %2565 = vmatprep.mubr.bf16.mxu1 %v4193_v36  ;;  %v4215_v36 = vld [vmem:[%s5053_s6 + $0x1a0] ss:$20 sps:$4 sm:$0xff]  }
 0x4f8   : > { %v2358_v8 = vpack.c.bf16 %v4053_v44, %v4052_v0  ;;  %v2366_v19 = vpack.c.bf16 %v4048_v1, %v4047_v54  ;;  %v4216_v2 = vld [vmem:[%s5053_s6 + $0x1c0] ss:$20 sps:$4 sm:$0xff]  }
 0x4f9   : > { %v4066_v31 = vpop.permute.xlu1 %4065  ;;  %v4056_v28 = vpop.permute.xlu0 %4055  ;;  %v2789_v34 = vld [vmem:[%s5056_s9] sm:$0xff] }
 0x4fa   : > { %v4068_v38 = vunpack.i.h.bf16 %v4066_v31  ;;  %v4067_v46 = vunpack.i.l.bf16 %v4066_v31  ;;  %v4058_v48 = vunpack.i.h.bf16 %v4056_v28  ;;  %v4057_v42 = vunpack.i.l.bf16 %v4056_v28  ;;  %3439 = vmatprep.subr.bf16.mxu0 %v2366_v19 }
 0x4fb   : > { %3440 = vmatpush3.bf16.msra.mxu0 %v2358_v8 }
 0x4fc   : > { %v2359_v52 = vpack.c.bf16 %v4068_v38, %v4067_v46  ;;  %v2367_v53 = vpack.c.bf16 %v4058_v48, %v4057_v42 }
 0x4fd   : > { %v4071_v55 = vpop.permute.xlu1 %4070  ;;  %v4061_v56 = vpop.permute.xlu0 %4060 }
 0x4fe   : > { %v4073_v57 = vunpack.i.h.bf16 %v4071_v55  ;;  %v4072_v61 = vunpack.i.l.bf16 %v4071_v55  ;;  %v4063_v27 = vunpack.i.h.bf16 %v4061_v56  ;;  %v4062_v29 = vunpack.i.l.bf16 %v4061_v56  ;;  %2566 = vmatmul.mubr.bf16.gmra.mrb[60].mxu1 %v4195_v49  ;;  %3441 = vmatprep.subr.bf16.mxu0 %v2367_v53 }
 0x4ff   : > { %3442 = vmatpush3.bf16.msra.mxu0 %v2359_v52  ;;  %2573 = vmatprep.mubr.bf16.mxu1 %v4199_v51 }
 0x500   : > { %v2360_v3 = vpack.c.bf16 %v4073_v57, %v4072_v61  ;;  %v2368_v5 = vpack.c.bf16 %v4063_v27, %v4062_v29 }
 0x501   : > { %v4081_v20 = vpop.permute.xlu1 %4080  ;;  %v4076_v63 = vpop.permute.xlu0 %4075 }
 0x502   : > { %v4078_v22 = vunpack.i.h.bf16 %v4076_v63  ;;  %v4077_v23 = vunpack.i.l.bf16 %v4076_v63  ;;  %3443 = vmatprep.subr.bf16.mxu0 %v2368_v5  ;;  %v4083_v12 = vunpack.i.h.bf16 %v4081_v20  ;;  %v4082_v17 = vunpack.i.l.bf16 %v4081_v20 }
 0x503   : > { %3444 = vmatpush3.bf16.msra.mxu0 %v2360_v3 }
 0x504   : > { %v2369_v47 = vpack.c.bf16 %v4078_v22, %v4077_v23  ;;  %v2370_v59 = vpack.c.bf16 %v4083_v12, %v4082_v17 }
 0x505   : > { %v4086_v41 = vpop.permute.xlu0 %4085  ;;  %v4091_v15 = vpop.permute.xlu1 %4090 }
 0x506   : > { %2574 = vmatmul.mubr.bf16.gmra.mrb[64].mxu1 %v4201_v9  ;;  %2623 = vmatmul.mubr.bf16.vlgmr.msra.gmra.mrb[56].mxu0 %v4196_v62  ;;  %v4088_v30 = vunpack.i.h.bf16 %v4086_v41  ;;  %v4087_v14 = vunpack.i.l.bf16 %v4086_v41  ;;  %v4093_v26 = vunpack.i.h.bf16 %v4091_v15  ;;  %v4092_v50 = vunpack.i.l.bf16 %v4091_v15 }
 0x507   : > { %3543 = vmatprep.subr.bf16.mxu1 %v2369_v47  ;;  %2581 = vmatprep.mubr.bf16.mxu1 %v4202_v11 }
 0x508   : > { %3544 = vmatpush3.bf16.msra.mxu1 %v2369_v47  ;;  %2630 = vmatprep.mubr.bf16.mxu0 %v4204_v58  ;;  %v2371_v13 = vpack.c.bf16 %v4088_v30, %v4087_v14  ;;  %v2372_v37 = vpack.c.bf16 %v4093_v26, %v4092_v50 }
 0x509   : > { %3545 = vmatprep.subr.bf16.mxu1 %v2370_v59 }
 0x50c   : > { %3546 = vmatpush3.bf16.msra.mxu1 %v2370_v59 }
 0x50d   : > { %3547 = vmatprep.subr.bf16.mxu1 %v2371_v13 }
 0x50e   : > { %2582 = vmatmul.mubr.bf16.gmra.mrb[68].mxu1 %v4206_v16  ;;  %2631 = vmatmul.mubr.bf16.gmra.mrb[60].mxu0 %v4207_v18 }
 0x50f   : > { %2638 = vmatprep.mubr.bf16.mxu0 %v4208_v33  ;;  %3551 = vmatprep.mubr.msk.bf16.mxu1 %vm1382_vm1, %v4210_v35 }
 0x510   : > { %3548 = vmatpush3.bf16.msra.mxu1 %v2371_v13 }
 0x511   : > { %3549 = vmatprep.subr.bf16.mxu1 %v2372_v37 }
 0x514   : > { %3550 = vmatpush3.bf16.msra.mxu1 %v2372_v37 }
 0x516   : > { %2639 = vmatmul.mubr.bf16.gmra.mrb[64].mxu0 %v4211_v39  ;;  %v2381_v42 = vpop.permute.xlu1 %2380  ;;  %v2376_v49 = vpop.permute.xlu0 %2375 }
 0x517   : > { %3552 = vmatmul.mubr.msk.bf16.vlgmr.msra.gmra.mrb[72].mxu1 %vm1382_vm1, %v4212_v25  ;;  %2646 = vmatprep.mubr.bf16.mxu0 %v4213_v60 }
 0x518   : > { %3555 = vmatprep.mubr.msk.bf16.mxu1 %vm1382_vm1, %v4215_v36 }
 0x51a   : > { %v2391_v9 = vpop.permute.xlu1 %2390  ;;  %v2386_v12 = vpop.permute.xlu0 %2385 }
 0x51e   : > { %2647 = vmatmul.mubr.bf16.gmra.mrb[68].mxu0 %v4216_v2  ;;  %v2401_v37 = vpop.permute.xlu1 %2400  ;;  %v2396_v39 = vpop.permute.xlu0 %2395 }
 0x51f   : > { %3556 = vmatmul.mubr.msk.bf16.gmra.mrb[76].mxu1 %vm1382_vm1, %v4217_v7  ;;  %3575 = vmatprep.mubr.msk.f32.mxu0 %vm1382_vm1, %v2789_v34 }
 0x5c9   : > { %v3405_v43 = vpop.f32.mrb[56].mxu1 }
 0x5ca   : > { %v3406_v44 = vpop.f32.mrb[57].mxu1 }
 0x5cb   : > { %v3407_v0 = vadd.f32 %v3406_v44, %v3405_v43  ;;  %v3408_v1 = vpop.f32.mrb[58].mxu1 }
 0x5cc   : > { %v3409_v54 = vpop.f32.mrb[59].mxu1 }
 0x5cd   : > { %v3410_v8 = vadd.f32 %v3409_v54, %v3408_v1  ;;  %v2560_v56 = vadd.f32 %v3407_v0, %v2376_v49 }
 0x5cf   : > { %v2563_v20 = vadd.f32 %v3410_v8, %v2381_v42 }
 0x5d1   : > { %v3411_v19 = vpop.f32.mrb[60].mxu1 }
 0x5d2   : > { %v3412_v31 = vpop.f32.mrb[61].mxu1 }
 0x5d3   : > { %v3413_v28 = vadd.f32 %v3412_v31, %v3411_v19  ;;  %v3414_v38 = vpop.f32.mrb[62].mxu1 }
 0x5d4   : > { %v3415_v46 = vpop.f32.mrb[63].mxu1 }
 0x5d5   : > { %v3416_v48 = vadd.f32 %v3415_v46, %v3414_v38  ;;  %v2568_v41 = vadd.f32 %v3413_v28, %v2386_v12 }
 0x5d7   : > { %v2571_v26 = vadd.f32 %v3416_v48, %v2391_v9 }
 0x5d9   : > { %v3417_v51 = vpop.f32.mrb[64].mxu1  ;;  %v3445_v52 = vpop.f32.mrb[56].mxu0 }
 0x5da   : > { %v3418_v53 = vpop.f32.mrb[65].mxu1  ;;  %v3446_v55 = vpop.f32.mrb[57].mxu0 }
 0x5db   : > { %v3419_v57 = vadd.f32 %v3418_v53, %v3417_v51  ;;  %v3447_v61 = vadd.f32 %v3446_v55, %v3445_v52  ;;  %v3420_v27 = vpop.f32.mrb[66].mxu1  ;;  %v3448_v29 = vpop.f32.mrb[58].mxu0 }
 0x5dc   : > { %v3421_v3 = vpop.f32.mrb[67].mxu1  ;;  %v3449_v5 = vpop.f32.mrb[59].mxu0 }
 0x5dd   : > { %v3422_v63 = vadd.f32 %v3421_v3, %v3420_v27  ;;  %v3450_v22 = vadd.f32 %v3449_v5, %v3448_v29  ;;  %v2625_v23 = vadd.f32 %v3447_v61, %v2560_v56  ;;  %v2576_v2 = vadd.f32 %v3419_v57, %v2396_v39  ;;  %v2411_v53 = vpop.permute.xlu1 %2410  ;;  %v2406_v57 = vpop.permute.xlu0 %2405  ;;  %v4219_v5 = vld [vmem:[%s5055_s8] ss:$0 sm:$0xff] }
 0x5df   : > { %v2628_v62 = vadd.f32 %v3450_v22, %v2563_v20  ;;  %v2579_v0 = vadd.f32 %v3422_v63, %v2401_v37 }
 0x5e1   : > { %v3423_v17 = vpop.f32.mrb[68].mxu1  ;;  %v3451_v11 = vpop.f32.mrb[60].mxu0 }
 0x5e2   : > { %v3424_v47 = vpop.f32.mrb[69].mxu1  ;;  %v3452_v58 = vpop.f32.mrb[61].mxu0 }
 0x5e3   : > { %v3425_v59 = vadd.f32 %v3424_v47, %v3423_v17  ;;  %v3453_v30 = vadd.f32 %v3452_v58, %v3451_v11  ;;  %v3426_v14 = vpop.f32.mrb[70].mxu1  ;;  %v3454_v15 = vpop.f32.mrb[62].mxu0 }
 0x5e4   : > { %v3427_v16 = vpop.f32.mrb[71].mxu1  ;;  %v3455_v18 = vpop.f32.mrb[63].mxu0 }
 0x5e5   : > { %v3428_v50 = vadd.f32 %v3427_v16, %v3426_v14  ;;  %v3456_v13 = vadd.f32 %v3455_v18, %v3454_v15  ;;  %v2633_v33 = vadd.f32 %v3453_v30, %v2568_v41  ;;  %v2584_v20 = vadd.f32 %v3425_v59, %v2406_v57 }
 0x5e7   : > { %v2636_v35 = vadd.f32 %v3456_v13, %v2571_v26  ;;  %v2587_v11 = vadd.f32 %v3428_v50, %v2411_v53 }
 0x5e9   : > { %v3457_v25 = vpop.f32.mrb[64].mxu0 }
 0x5ea   : > { %v3553_v60 = vpop.f32.mrb[72].mxu1  ;;  %v3458_v36 = vpop.f32.mrb[65].mxu0 }
 0x5eb   : > { %v2698_v7 = vadd.f32 %v3553_v60, %v2633_v33  ;;  %v3459_v34 = vadd.f32 %v3458_v36, %v3457_v25  ;;  %v2689_v43 = vpop.f32.mrb[73].mxu1  ;;  %v3460_v44 = vpop.f32.mrb[66].mxu0 }
 0x5ec   : > { %v2690_v1 = vadd.f32 %v2689_v43, %v2625_v23  ;;  %v3554_v54 = vpop.f32.mrb[74].mxu1  ;;  %v3461_v8 = vpop.f32.mrb[67].mxu0 }
 0x5ed   : > { %v2722_v19 = vadd.f32 %v2698_v7, %v4668_v40  ;;  %v2701_v31 = vadd.f32 %v3554_v54, %v2636_v35  ;;  %v3462_v28 = vadd.f32 %v3461_v8, %v3460_v44  ;;  %v2692_v38 = vpop.f32.mrb[75].mxu1  ;;  %v2641_v46 = vadd.f32 %v3459_v34, %v2576_v2 }
 0x5ee   : > { %v2720_v48 = vadd.f32 %v2690_v1, %v4682_v21  ;;  %v2693_v42 = vadd.f32 %v2692_v38, %v2628_v62 }
 0x5ef   : > { %v2730_v49 = vmax.f32 %v2722_v19, 0.0  ;;  %v2723_v51 = vadd.f32 %v2701_v31, %v4671_v10  ;;  %v2644_v52 = vadd.f32 %v3462_v28, %v2579_v0 }
 0x5f0   : > { %v2728_v55 = vmax.f32 %v2720_v48, 0.0  ;;  %v2721_v56 = vadd.f32 %v2693_v42, %v4675_v45 }
 0x5f1   : > { %v2731_v61 = vmax.f32 %v2723_v51, 0.0  ;;  %v3463_v27 = vpop.f32.mrb[68].mxu0  ;;  %v2738_v62 = vmul.f32 %v4219_v5, %v2730_v49 }
 0x5f2   : > { %v2729_v29 = vmax.f32 %v2721_v56, 0.0  ;;  %v3557_v40 = vpop.f32.mrb[76].mxu1  ;;  %v3464_v3 = vpop.f32.mrb[69].mxu0  ;;  %v2736_v21 = vmul.f32 %v4219_v5, %v2728_v55 }
 0x5f3   : > { %v2739_v63 = vmul.f32 %v4219_v5, %v2731_v61  ;;  %v3465_v22 = vadd.f32 %v3464_v3, %v3463_v27  ;;  %v2705_v10 = vpop.f32.mrb[77].mxu1  ;;  %v3466_v23 = vpop.f32.mrb[70].mxu0 }
 0x5f4   : > { %v2706_v9 = vadd.f32 %v2705_v10, %v2641_v46  ;;  %v3558_v12 = vpop.f32.mrb[78].mxu1  ;;  %2744 = vadd.xlane.f32.xlu0 %v2736_v21  ;;  %v3467_v45 = vpop.f32.mrb[71].mxu0  ;;  %v2737_v17 = vmul.f32 %v4219_v5, %v2729_v29 }
 0x5f5   : > { %v2649_v47 = vadd.f32 %v3465_v22, %v2584_v20  ;;  %v3468_v58 = vadd.f32 %v3467_v45, %v3466_v23  ;;  %v2708_v41 = vpop.f32.mrb[79].mxu1  ;;  %v3582_v30 = vpack.c.bf16 %v2739_v63, %v2738_v62 }
 0x5f6   : > { %v2724_v14 = vadd.f32 %v2706_v9, %v4710_v32  ;;  %v2709_v15 = vadd.f32 %v2708_v41, %v2644_v52  ;;  %2746 = vadd.xlane.f32.xlu1 %v2737_v17  ;;  %v3578_v59 = vpack.c.bf16 %v2737_v17, %v2736_v21 }
 0x5f7   : > { %v2714_v16 = vadd.f32 %v3557_v40, %v2649_v47  ;;  %v2652_v18 = vadd.f32 %v3468_v58, %v2587_v11 }
 0x5f8   : > { %v2732_v26 = vmax.f32 %v2724_v14, 0.0  ;;  %v2725_v13 = vadd.f32 %v2709_v15, %v4705_v24  ;;  %2748 = vadd.xlane.f32.xlu0 %v2738_v62  ;;  %3579 = vmatprep.subr.bf16.mxu0 %v3578_v59  ;;  %v2883_v14 = vld [vmem:[%s5057_s10 + $0x8] sm:$0xff] }
 0x5f9   : > { %v2717_v33 = vadd.f32 %v3558_v12, %v2652_v18  ;;  %3581 = vmatpush3.bf16.msra.mxu0 %v3578_v59  ;;  %v2726_v50 = vadd.f32 %v2714_v16, %v4697_v4  ;;  %v2790_v4 = vld [vmem:[%s5056_s9 + $0x8] sm:$0xff]  ;;  %v2882_v16 = vld [vmem:[%s5057_s10] sm:$0xff] }
 0x5fa   : > { %v2733_v35 = vmax.f32 %v2725_v13, 0.0  ;;  %3583 = vmatprep.subr.bf16.mxu0 %v3582_v30  ;;  %v2740_v37 = vmul.f32 %v4219_v5, %v2732_v26  ;;  %v2887_v18 = vld [vmem:[%s5058_s11 + $0x8] sm:$0xff] }
 0x5fb   : > { %v2734_v39 = vmax.f32 %v2726_v50, 0.0  ;;  %v2727_v32 = vadd.f32 %v2717_v33, %v4700_v6  ;;  %v2886_v33 = vld [vmem:[%s5058_s11] sm:$0xff] }
 0x5fc   : > { %2752 = vadd.xlane.f32.xlu1 %v2740_v37  ;;  %2750 = vadd.xlane.f32.xlu0 %v2739_v63  ;;  %v2741_v25 = vmul.f32 %v4219_v5, %v2733_v35 }
 0x5fd   : > { %3585 = vmatpush3.bf16.msra.mxu0 %v3582_v30  ;;  %v2742_v60 = vmul.f32 %v4219_v5, %v2734_v39  ;;  %v2735_v36 = vmax.f32 %v2727_v32, 0.0 }
 0x5fe   : > { %v3586_v2 = vpack.c.bf16 %v2741_v25, %v2740_v37 }
 0x5ff   : > { %v2743_v24 = vmul.f32 %v4219_v5, %v2735_v36 }
 0x600   : > { %2756 = vadd.xlane.f32.xlu1 %v2742_v60  ;;  %2754 = vadd.xlane.f32.xlu0 %v2741_v25 }
 0x601   : > { %3587 = vmatprep.subr.bf16.mxu0 %v3586_v2  ;;  %v3590_v7 = vpack.c.bf16 %v2743_v24, %v2742_v60 }
 0x602   : > { %3589 = vmatpush3.bf16.msra.mxu0 %v3586_v2 }
 0x603   : > { %3591 = vmatprep.subr.bf16.mxu0 %v3590_v7 }
 0x604   : > { %2758 = vadd.xlane.f32.xlu0 %v2743_v24 }
 0x606   : > { %3593 = vmatpush3.bf16.msra.mxu0 %v3590_v7 }
 0x609   : > { %3576 = vmatmul.mubr.msk.f32.vlgmr.msra.gmra.mrb[72].mxu0 %vm1382_vm1, %v2790_v4 }
 0x681   : > { %v2745_v43 = vpop.xlane.xlu0 %2744 }
 0x682   : > { %v2760_v54 = vmul.f32 0.25, %v2745_v43 }
 0x683   : > { %v2747_v44 = vpop.xlane.xlu1 %2746 }
 0x684   : > { %v2761_v1 = vmul.f32 0.25, %v2747_v44  ;;  %v2768_v28 = vmul.f32 %v2760_v54, %v2760_v54 }
 0x685   : > { %v2749_v0 = vpop.xlane.xlu0 %2748 }
 0x686   : > { %v2769_v19 = vmul.f32 %v2761_v1, %v2761_v1  ;;  %v2762_v31 = vmul.f32 0.25, %v2749_v0 }
 0x688   : > { %v2776_v46 = vadd.f32 %v2769_v19, %v2768_v28  ;;  %v2770_v48 = vmul.f32 %v2762_v31, %v2762_v31 }
 0x689   : > { %v2751_v8 = vpop.xlane.xlu0 %2750  ;;  %v2753_v42 = vpop.xlane.xlu1 %2752 }
 0x68a   : > { %v2763_v38 = vmul.f32 0.25, %v2751_v8  ;;  %v2777_v52 = vadd.f32 %v2776_v46, %v2770_v48  ;;  %v2764_v53 = vmul.f32 0.25, %v2753_v42 }
 0x68c   : > { %v2771_v49 = vmul.f32 %v2763_v38, %v2763_v38  ;;  %v2772_v57 = vmul.f32 %v2764_v53, %v2764_v53 }
 0x68d   : > { %v2755_v51 = vpop.xlane.xlu0 %2754  ;;  %v2757_v61 = vpop.xlane.xlu1 %2756 }
 0x68e   : > { %v2778_v55 = vadd.f32 %v2777_v52, %v2771_v49  ;;  %v2765_v56 = vmul.f32 0.25, %v2755_v51  ;;  %v2766_v3 = vmul.f32 0.25, %v2757_v61 }
 0x690   : > { %v2779_v27 = vadd.f32 %v2778_v55, %v2772_v57  ;;  %v2773_v29 = vmul.f32 %v2765_v56, %v2765_v56  ;;  %v2774_v20 = vmul.f32 %v2766_v3, %v2766_v3 }
 0x691   : > { %v2759_v40 = vpop.xlane.xlu0 %2758 }
 0x692   : > { %v2780_v5 = vadd.f32 %v2779_v27, %v2773_v29  ;;  %v2767_v21 = vmul.f32 0.25, %v2759_v40 }
 0x694   : > { %v2781_v63 = vadd.f32 %v2780_v5, %v2774_v20  ;;  %v2775_v22 = vmul.f32 %v2767_v21, %v2767_v21 }
 0x696   : > { %v2782_v10 = vadd.f32 %v2781_v63, %v2775_v22 }
 0x698   : > { %v2783_v23 = vrot.slane %v2782_v10, 4 }
 0x69a   : > { %v2784_v62 = vadd.f32 %v2783_v23, %v2782_v10 }
 0x69c   : > { %v2785_v9 = vrot.slane %v2784_v62, 2 }
 0x69e   : > { %v2786_v12 = vadd.f32 %v2785_v9, %v2784_v62 }
 0x6a0   : > { %v2787_v45 = vrot.slane %v2786_v12, 1 }
 0x6a2   : > { %v2788_v41 = vadd.f32 %v2787_v45, %v2786_v12 }
 0x6dc   : > { %v3577_v6 = vpop.f32.mrb[72].mxu0 }
 0x6dd   : > { %2874 = vadd.xlane.f32.xlu0 %v3577_v6  ;;  %v2863_v34 = vpop.f32.mrb[73].mxu0 }
 0x6de   : > { %2872 = vadd.xlane.f32.xlu1 %v2863_v34 }
 0x76a   : > { %v2875_v17 = vpop.xlane.xlu0 %2874 }
 0x76b   : > { %v2877_v11 = vmul.f32 0.25, %v2875_v17  ;;  %v2873_v47 = vpop.xlane.xlu1 %2872 }
 0x76c   : > { %v2876_v58 = vmul.f32 0.25, %v2873_v47 }
 0x76d   : > { %v2879_v30 = vmul.f32 2.0, %v2877_v11 }
 0x76e   : > { %v2878_v15 = vmul.f32 2.0, %v2876_v58 }
 0x76f   : > { %v2881_v59 = vsub.f32 %v2788_v41, %v2879_v30 }
 0x770   : > { %v2880_v26 = vsub.f32 %v2788_v41, %v2878_v15 }
 0x771   : > { %v2885_v13 = vadd.f32 %v2883_v14, %v2881_v59 }
 0x772   : > { %v2884_v50 = vadd.f32 %v2882_v16, %v2880_v26 }
 0x773   : > { %v2889_v35 = vsub.f32 %v2885_v13, %v2887_v18 }
 0x774   : > { %v2888_v37 = vsub.f32 %v2884_v50, %v2886_v33 }
 0x775   : > { %v2891_v39 = vsub.f32 0.0, %v2889_v35 }
 0x776   : > { %v2890_v32 = vsub.f32 0.0, %v2888_v37 }
 0x777   : > { %v2893_v25 = vmul.f32 0.5, %v2891_v39 }
 0x778   : > { %v2892_v60 = vmul.f32 0.5, %v2890_v32 }
 0x779   : > { %2896 = vst.msk [vmem:[%s433_s17 + $0x8] sm:$0xff] %vm2894_vm2, %v2893_v25 }
 0x77a   : > { %2895 = vst.msk [vmem:[%s433_s17] sm:$0xff] %vm2894_vm2, %v2892_v60 }
 0x77b PF: > { %s22_s21 = sadd.s32 1, %s4226_s21  }
 0x77c   : > { %p19_p4 = scmp.ge.s32.totalorder %s22_s21, 4  }
 0x77e   :  { %21 = sbr.rel (!%p19_p4) target bundleno = 1 (0x1), region = 105 }

</bundles_post_ra>
